<compile_context>
chip_gen: v7x
topology: tpu7x:2x2x1
jax: 0.10.0
libtpu: 0.0.40
codegen_flags: <defaults>
</compile_context>

<pallas_src>
import functools
import math

import jax
import jax.numpy as jnp
from jax import lax
from jax.experimental import pallas as pl
from jax.experimental.pallas import tpu as pltpu

BN_EPS = 1e-5


# ----------------------------------------------------------------------------------------
# Kernels
# ----------------------------------------------------------------------------------------

def _im2col_3x3(xp, h, w):
    """xp: zero-padded activation (h+2, w+2, C).  Returns the (h*w, 9*C) patch matrix;
    K ordering is (dh, dw, c), matching the (3,3,C_in,C_out)->(9*C_in,C_out) weight."""
    cols = [xp[dh:dh + h, dw:dw + w, :] for dh in range(3) for dw in range(3)]
    return jnp.concatenate(cols, axis=-1).reshape(h * w, -1)


def _relu_conv3x3_s1_kernel(x_ref, w_ref, y_ref, sum_ref, ssq_ref, pad_ref,
                            *, h, w, cdtype):
    """ReLU -> zero-pad (VMEM scratch) -> 3x3 stride-1 conv as ONE K=9*C_in MXU matmul
    -> pre-BN output tile + per-channel sum / sum-of-squares, accumulated over the inner
    ("arbitrary") batch axis; one accumulator row per outer ("parallel") grid slice."""
    b = pl.program_id(1)

    @pl.when(b == 0)
    def _init():
        sum_ref[...] = jnp.zeros_like(sum_ref)
        ssq_ref[...] = jnp.zeros_like(ssq_ref)
        pad_ref[...] = jnp.zeros_like(pad_ref)          # border stays zero for every image

    pad_ref[1:h + 1, 1:w + 1, :] = jnp.maximum(x_ref[0], 0.0).astype(cdtype)
    patch = _im2col_3x3(pad_ref[...], h, w)                           # (h*w, 9*C_in)
    acc = jnp.dot(patch, w_ref[...], preferred_element_type=jnp.float32)

    y_ref[...] = acc.astype(y_ref.dtype)
    sum_ref[...] += jnp.sum(acc, axis=0, keepdims=True)[None]
    ssq_ref[...] += jnp.sum(acc * acc, axis=0, keepdims=True)[None]


def _relu_conv3x3_s2_down_kernel(xq_ref, wa_ref, wd_ref,
                                 ya_ref, yd_ref, sa_ref, qa_ref, sd_ref, qd_ref,
                                 pad_ref, *, ho, wo, cdtype):
    """Stride-2 conv_a with the 1x1-stride-2 downsample conv fused in.

    xq_ref holds the image's four 2x2 parity sub-images (q = r*2+c  ->  x[r::2, c::2]).
    They are scattered into the four zero-padded conv phases in a VMEM scratch so every
    3x3 tap is a contiguous slice; the 9 taps are concatenated into one K=9*C_in matmul.
    Parity (0,0) is exactly x[::2, ::2] and feeds the (un-ReLU'd) downsample matmul."""
    b = pl.program_id(1)

    @pl.when(b == 0)
    def _init():
        sa_ref[...] = jnp.zeros_like(sa_ref)
        qa_ref[...] = jnp.zeros_like(qa_ref)
        sd_ref[...] = jnp.zeros_like(sd_ref)
        qd_ref[...] = jnp.zeros_like(qd_ref)
        pad_ref[...] = jnp.zeros_like(pad_ref)

    xq = xq_ref[...]                                                  # (4, ho, wo, C_in)
    xr = jnp.maximum(xq, 0.0).astype(cdtype)                          # fused ReLU (main path)

    # Phase p=(ph,pw): phase[a,b] = padded_x[2a+ph, 2b+pw]; its interior data is the
    # parity (1-ph, 1-pw) sub-image placed at offset (1-ph, 1-pw); borders stay zero.
    for p in range(4):
        ph, pw = p // 2, p % 2
        pad_ref[p, 1 - ph:1 - ph + ho, 1 - pw:1 - pw + wo, :] = xr[3 - p]

    xp = pad_ref[...]                                                 # (4, ho+1, wo+1, C_in)
    cols = []
    for dh in range(3):
        for dw in range(3):
            p = (dh % 2) * 2 + (dw % 2)
            cols.append(xp[p, dh // 2:dh // 2 + ho, dw // 2:dw // 2 + wo, :])
    patch = jnp.concatenate(cols, axis=-1).reshape(ho * wo, -1)       # (ho*wo, 9*C_in)
    acc = jnp.dot(patch, wa_ref[...], preferred_element_type=jnp.float32)
    ya_ref[...] = acc.astype(ya_ref.dtype)
    sa_ref[...] += jnp.sum(acc, axis=0, keepdims=True)[None]
    qa_ref[...] += jnp.sum(acc * acc, axis=0, keepdims=True)[None]

    # Fused downsample branch: 1x1 conv, stride 2, no ReLU.
    xd = xq[0].astype(cdtype).reshape(ho * wo, -1)
    accd = jnp.dot(xd, wd_ref[...], preferred_element_type=jnp.float32)
    yd_ref[...] = accd.astype(yd_ref.dtype)
    sd_ref[...] += jnp.sum(accd, axis=0, keepdims=True)[None]
    qd_ref[...] += jnp.sum(accd * accd, axis=0, keepdims=True)[None]


def _bnrelu_conv3x3_kernel(ya_ref, sc_ref, sh_ref, w_ref,
                           yb_ref, sum_ref, ssq_ref, pad_ref, *, h, w, cdtype):
    """Fused: previous-stage BN (folded per-channel scale/shift) -> ReLU -> zero-pad
    (VMEM scratch) -> 3x3 stride-1 conv as one K=9*C matmul -> pre-BN output + BN stats."""
    b = pl.program_id(1)

    @pl.when(b == 0)
    def _init():
        sum_ref[...] = jnp.zeros_like(sum_ref)
        ssq_ref[...] = jnp.zeros_like(ssq_ref)
        pad_ref[...] = jnp.zeros_like(pad_ref)

    a = ya_ref[...].astype(jnp.float32) * sc_ref[...] + sh_ref[...]
    a = jnp.maximum(a, 0.0).astype(cdtype)
    pad_ref[1:h + 1, 1:w + 1, :] = a.reshape(h, w, -1)

    patch = _im2col_3x3(pad_ref[...], h, w)
    acc = jnp.dot(patch, w_ref[...], preferred_element_type=jnp.float32)

    yb_ref[...] = acc.astype(yb_ref.dtype)
    sum_ref[...] += jnp.sum(acc, axis=0, keepdims=True)[None]
    ssq_ref[...] += jnp.sum(acc * acc, axis=0, keepdims=True)[None]


def _bn_apply_add_kernel(yb_ref, sb_ref, tb_ref, r_ref, sr_ref, tr_ref, o_ref):
    """out = (y_b * scale_b + shift_b) + (residual * scale_r + shift_r), lane-dense."""
    yb = yb_ref[...].astype(jnp.float32) * sb_ref[...] + tb_ref[...]
    rr = r_ref[...].astype(jnp.float32) * sr_ref[...] + tr_ref[...]
    o_ref[...] = (yb + rr).astype(o_ref.dtype)


# ----------------------------------------------------------------------------------------
# pallas_call wrappers
# ----------------------------------------------------------------------------------------

def _split_batch(n):
    """(G, n_per_group): G=2 'parallel' slices when possible (v7x megacore), else 1."""
    return (2, n // 2) if n % 2 == 0 else (1, n)


def _fold_weight_3x3(w_oihw, cdtype):
    """(C_out, C_in, 3, 3) -> (9*C_in, C_out) with K ordering (dh, dw, c_in)."""
    c_out, c_in = w_oihw.shape[0], w_oihw.shape[1]
    return jnp.transpose(w_oihw, (2, 3, 1, 0)).reshape(9 * c_in, c_out).astype(cdtype)


def _relu_conv3x3_s1(x_nhwc, w_oihw, cdtype):
    N, H, W, C_in = x_nhwc.shape
    C_out = w_oihw.shape[0]
    G, npg = _split_batch(N)
    w_k = _fold_weight_3x3(w_oihw, cdtype)
    kernel = functools.partial(_relu_conv3x3_s1_kernel, h=H, w=W, cdtype=cdtype)
    y, ssum, ssq = pl.pallas_call(
        kernel,
        grid=(G, npg),
        in_specs=[
            pl.BlockSpec((1, H, W, C_in), lambda g, b: (g * npg + b, 0, 0, 0)),
            pl.BlockSpec((9 * C_in, C_out), lambda g, b: (0, 0)),
        ],
        out_specs=[
            pl.BlockSpec((H * W, C_out), lambda g, b: (g * npg + b, 0)),
            pl.BlockSpec((1, 8, C_out), lambda g, b: (g, 0, 0)),     # per-slice accumulators
            pl.BlockSpec((1, 8, C_out), lambda g, b: (g, 0, 0)),
        ],
        out_shape=[
            jax.ShapeDtypeStruct((N * H * W, C_out), jnp.float32),
            jax.ShapeDtypeStruct((G, 8, C_out), jnp.float32),
            jax.ShapeDtypeStruct((G, 8, C_out), jnp.float32),
        ],
        scratch_shapes=[pltpu.VMEM((H + 2, W + 2, C_in), cdtype)],
        compiler_params=pltpu.CompilerParams(
            dimension_semantics=("parallel", "arbitrary")),
    )(x_nhwc, w_k)
    return y, ssum, ssq


def _relu_conv3x3_s2_down(x_nhwc, w_oihw, wd_oihw, cdtype):
    N, H, W, C_in = x_nhwc.shape
    assert H % 2 == 0 and W % 2 == 0, "stride-2 path assumes even spatial dims"
    Ho, Wo = H // 2, W // 2
    C_out = w_oihw.shape[0]
    G, npg = _split_batch(N)

    # Unpadded 2x2 parity split (one layout copy, no jnp.pad HBM copy); padding happens
    # in-kernel in the VMEM phase scratch.  xq[n*4 + r*2 + c] = x[n, r::2, c::2, :]
    xq = x_nhwc.reshape(N, Ho, 2, Wo, 2, C_in).transpose(0, 2, 4, 1, 3, 5)
    xq = xq.reshape(N * 4, Ho, Wo, C_in)

    w_k = _fold_weight_3x3(w_oihw, cdtype)
    w_d = jnp.transpose(wd_oihw.reshape(C_out, C_in), (1, 0)).astype(cdtype)
    kernel = functools.partial(_relu_conv3x3_s2_down_kernel, ho=Ho, wo=Wo, cdtype=cdtype)
    ya, yd, sa, qa, sd, qd = pl.pallas_call(
        kernel,
        grid=(G, npg),
        in_specs=[
            pl.BlockSpec((4, Ho, Wo, C_in), lambda g, b: (g * npg + b, 0, 0, 0)),
            pl.BlockSpec((9 * C_in, C_out), lambda g, b: (0, 0)),
            pl.BlockSpec((C_in, C_out), lambda g, b: (0, 0)),
        ],
        out_specs=[
            pl.BlockSpec((Ho * Wo, C_out), lambda g, b: (g * npg + b, 0)),
            pl.BlockSpec((Ho * Wo, C_out), lambda g, b: (g * npg + b, 0)),
            pl.BlockSpec((1, 8, C_out), lambda g, b: (g, 0, 0)),
            pl.BlockSpec((1, 8, C_out), lambda g, b: (g, 0, 0)),
            pl.BlockSpec((1, 8, C_out), lambda g, b: (g, 0, 0)),
            pl.BlockSpec((1, 8, C_out), lambda g, b: (g, 0, 0)),
        ],
        out_shape=[
            jax.ShapeDtypeStruct((N * Ho * Wo, C_out), jnp.float32),
            jax.ShapeDtypeStruct((N * Ho * Wo, C_out), jnp.float32),
            jax.ShapeDtypeStruct((G, 8, C_out), jnp.float32),
            jax.ShapeDtypeStruct((G, 8, C_out), jnp.float32),
            jax.ShapeDtypeStruct((G, 8, C_out), jnp.float32),
            jax.ShapeDtypeStruct((G, 8, C_out), jnp.float32),
        ],
        scratch_shapes=[pltpu.VMEM((4, Ho + 1, Wo + 1, C_in), cdtype)],
        compiler_params=pltpu.CompilerParams(
            dimension_semantics=("parallel", "arbitrary")),
    )(xq, w_k, w_d)
    return ya, yd, sa, qa, sd, qd, Ho, Wo


def _bnrelu_conv3x3(ya, scale_a, shift_a, w_oihw, N, H, W, cdtype):
    C_in, C_out = w_oihw.shape[1], w_oihw.shape[0]
    G, npg = _split_batch(N)
    w_k = _fold_weight_3x3(w_oihw, cdtype)
    kernel = functools.partial(_bnrelu_conv3x3_kernel, h=H, w=W, cdtype=cdtype)
    yb, ssum, ssq = pl.pallas_call(
        kernel,
        grid=(G, npg),
        in_specs=[
            pl.BlockSpec((H * W, C_in), lambda g, b: (g * npg + b, 0)),
            pl.BlockSpec((1, C_in), lambda g, b: (0, 0)),
            pl.BlockSpec((1, C_in), lambda g, b: (0, 0)),
            pl.BlockSpec((9 * C_in, C_out), lambda g, b: (0, 0)),
        ],
        out_specs=[
            pl.BlockSpec((H * W, C_out), lambda g, b: (g * npg + b, 0)),
            pl.BlockSpec((1, 8, C_out), lambda g, b: (g, 0, 0)),
            pl.BlockSpec((1, 8, C_out), lambda g, b: (g, 0, 0)),
        ],
        out_shape=[
            jax.ShapeDtypeStruct((N * H * W, C_out), jnp.float32),
            jax.ShapeDtypeStruct((G, 8, C_out), jnp.float32),
            jax.ShapeDtypeStruct((G, 8, C_out), jnp.float32),
        ],
        scratch_shapes=[pltpu.VMEM((H + 2, W + 2, C_in), cdtype)],
        compiler_params=pltpu.CompilerParams(
            dimension_semantics=("parallel", "arbitrary")),
    )(ya, scale_a, shift_a, w_k)
    return yb, ssum, ssq


def _lane_layout(M, C):
    """Pick a lane-dense 2-D layout (L, R) for an (M, C) row-major tensor."""
    if C % 128 == 0:
        return C, M
    if 128 % C == 0 and (M * C) % 128 == 0:
        return 128, (M * C) // 128
    return C, M                                     # fallback (masked stores)


def _expand_cvec(v, C, L):
    """Tile a per-channel (C,) vector to lane width L (channel pattern repeats)."""
    v = v.reshape(-1).astype(jnp.float32)
    if L == C:
        return v.reshape(1, C)
    return jnp.tile(v, L // C).reshape(1, L)


def _pick_row_tile(R):
    t = math.gcd(R, 512)
    return t if t >= 8 else R


def _bn_apply_add(yb, sb, tb, resid, sr, tr, out_dtype):
    """Lane-dense fused BN-apply + residual add: (M, C) viewed as (M*C/128, 128)."""
    M, C = yb.shape
    L, R = _lane_layout(M, C)
    yb2, r2 = yb.reshape(R, L), resid.reshape(R, L)           # row-major reshape: free
    sb2, tb2 = _expand_cvec(sb, C, L), _expand_cvec(tb, C, L)
    sr2, tr2 = _expand_cvec(sr, C, L), _expand_cvec(tr, C, L)
    tile_r = _pick_row_tile(R)
    out = pl.pallas_call(
        _bn_apply_add_kernel,
        grid=(R // tile_r,),
        in_specs=[
            pl.BlockSpec((tile_r, L), lambda i: (i, 0)),
            pl.BlockSpec((1, L), lambda i: (0, 0)),
            pl.BlockSpec((1, L), lambda i: (0, 0)),
            pl.BlockSpec((tile_r, L), lambda i: (i, 0)),
            pl.BlockSpec((1, L), lambda i: (0, 0)),
            pl.BlockSpec((1, L), lambda i: (0, 0)),
        ],
        out_specs=pl.BlockSpec((tile_r, L), lambda i: (i, 0)),
        out_shape=jax.ShapeDtypeStruct((R, L), out_dtype),
        compiler_params=pltpu.CompilerParams(dimension_semantics=("parallel",)),
    )(yb2, sb2, tb2, r2, sr2, tr2)
    return out.reshape(M, C)


def _bn_fold(stat_sum, stat_ssq, count, gamma, beta):
    """Training-mode BatchNorm folded into per-channel scale/shift (biased variance).
    stat_* are (G, 8, C) per-parallel-slice partials (row 0 of each slice is the total)."""
    ssum = jnp.sum(stat_sum[:, 0, :], axis=0)
    ssq = jnp.sum(stat_ssq[:, 0, :], axis=0)
    mean = ssum / count
    var = jnp.maximum(ssq / count - mean * mean, 0.0)
    inv = lax.rsqrt(var + BN_EPS)
    scale = gamma.astype(jnp.float32) * inv
    shift = beta.astype(jnp.float32) - mean * scale
    return scale.reshape(1, -1), shift.reshape(1, -1)


def resnet_basicblock_forward(x_nchw, params, stride, compute_dtype=jnp.bfloat16):
    """ResNetBasicblock forward (training-mode BN), NCHW in / NCHW out like PyTorch.
    `compute_dtype` is the MXU operand dtype (bf16 recommended on v6e/v7x); accumulation,
    BN statistics and inter-stage activations are kept in float32."""
    assert stride in (1, 2), f"invalid stride {stride}"
    N, C_in, H, W = x_nchw.shape
    C_out = params["conv_a_w"].shape[0]
    x_nhwc = jnp.transpose(x_nchw, (0, 2, 3, 1))              # layout glue (fused by XLA)

    # conv_a: ReLU -> 3x3/s conv -> BN stats  (stride 2 also fuses the 1x1 downsample)
    if stride == 1:
        ya, sa, qa = _relu_conv3x3_s1(x_nhwc, params["conv_a_w"], compute_dtype)
        Ho, Wo = H, W
        yd = sd = qd = None
    else:
        ya, yd, sa, qa, sd, qd, Ho, Wo = _relu_conv3x3_s2_down(
            x_nhwc, params["conv_a_w"], params["down_w"], compute_dtype)

    M = N * Ho * Wo
    scale_a, shift_a = _bn_fold(sa, qa, M, params["bn_a_g"], params["bn_a_b"])

    # conv_b: (fold BN_a) -> ReLU -> 3x3 conv -> BN stats, one fused kernel
    yb, sb, qb = _bnrelu_conv3x3(ya, scale_a, shift_a, params["conv_b_w"],
                                 N, Ho, Wo, compute_dtype)
    scale_b, shift_b = _bn_fold(sb, qb, M, params["bn_b_g"], params["bn_b_b"])

    # residual branch
    if stride == 2:
        scale_r, shift_r = _bn_fold(sd, qd, M, params["bn_d_g"], params["bn_d_b"])
        resid = yd
    else:
        assert C_in == C_out, "identity residual needs C_in == C_out"
        resid = x_nhwc.reshape(M, C_in)
        scale_r = jnp.ones((1, C_out), jnp.float32)
        shift_r = jnp.zeros((1, C_out), jnp.float32)

    out = _bn_apply_add(yb, scale_b, shift_b, resid, scale_r, shift_r, x_nchw.dtype)
    return jnp.transpose(out.reshape(N, Ho, Wo, C_out), (0, 3, 1, 2))


# ----------------------------------------------------------------------------------------
# Pure-JAX reference (PyTorch-equivalent forward; conv operand dtype selectable)
# ----------------------------------------------------------------------------------------

def _bn_train_ref(y, gamma, beta):
    mean = jnp.mean(y, axis=(0, 2, 3), keepdims=True)
    var = jnp.mean((y - mean) ** 2, axis=(0, 2, 3), keepdims=True)
    yh = (y - mean) * lax.rsqrt(var + BN_EPS)
    return yh * gamma.reshape(1, -1, 1, 1) + beta.reshape(1, -1, 1, 1)


def _conv_ref(x, w, stride, padding, cdtype):
    return lax.conv_general_dilated(
        x.astype(cdtype), w.astype(cdtype), (stride, stride),
        [(padding, padding), (padding, padding)],
        dimension_numbers=("NCHW", "OIHW", "NCHW"),
        preferred_element_type=jnp.float32)


def resnet_basicblock_reference(x, params, stride, cdtype=jnp.float32):
    a = jnp.maximum(x, 0.0)
    y = _bn_train_ref(_conv_ref(a, params["conv_a_w"], stride, 1, cdtype),
                      params["bn_a_g"], params["bn_a_b"])
    a = jnp.maximum(y, 0.0)
    y = _bn_train_ref(_conv_ref(a, params["conv_b_w"], 1, 1, cdtype),
                      params["bn_b_g"], params["bn_b_b"])
    if stride == 2:
        r = _bn_train_ref(_conv_ref(x, params["down_w"], 2, 0, cdtype),
                          params["bn_d_g"], params["bn_d_b"])
    else:
        r = x
    return r + y


# ----------------------------------------------------------------------------------------
# Demo / self-check
# ----------------------------------------------------------------------------------------

def _make_params(key, c_in, c_out, stride):
    ks = jax.random.split(key, 9)
    p = {
        "conv_a_w": 0.1 * jax.random.normal(ks[0], (c_out, c_in, 3, 3), jnp.float32),
        "bn_a_g": 1.0 + 0.1 * jax.random.normal(ks[1], (c_out,), jnp.float32),
        "bn_a_b": 0.1 * jax.random.normal(ks[2], (c_out,), jnp.float32),
        "conv_b_w": 0.1 * jax.random.normal(ks[3], (c_out, c_out, 3, 3), jnp.float32),
        "bn_b_g": 1.0 + 0.1 * jax.random.normal(ks[4], (c_out,), jnp.float32),
        "bn_b_b": 0.1 * jax.random.normal(ks[5], (c_out,), jnp.float32),
    }
    if stride == 2:
        p["down_w"] = 0.1 * jax.random.normal(ks[6], (c_out, c_in, 1, 1), jnp.float32)
        p["bn_d_g"] = 1.0 + 0.1 * jax.random.normal(ks[7], (c_out,), jnp.float32)
        p["bn_d_b"] = 0.1 * jax.random.normal(ks[8], (c_out,), jnp.float32)
    return p


if __name__ == "__main__":
    key = jax.random.PRNGKey(0)
    k1, k2, k3, k4 = jax.random.split(key, 4)
    fwd = jax.jit(resnet_basicblock_forward, static_argnums=(2, 3))

    # --- stride 1 (identity residual), C_in == C_out ---
    N, C, H, W = 2, 4, 16, 16
    x1 = jax.random.normal(k1, (N, C, H, W), jnp.float32)
    p1 = _make_params(k2, C, C, 1)

    # f32 MXU operands: matches the exact PyTorch-semantics reference.
    out1_f32 = jax.block_until_ready(fwd(x1, p1, 1, jnp.float32))
    assert out1_f32.shape == (N, C, H, W)
    ref1_f32 = resnet_basicblock_reference(x1, p1, 1, jnp.float32)
    assert jnp.allclose(out1_f32, ref1_f32, atol=1e-3, rtol=1e-3), "stride-1 f32 mismatch"

    # bf16 MXU operands (default fast path): compared against a bf16-operand reference.
    out1_bf = jax.block_until_ready(fwd(x1, p1, 1, jnp.bfloat16))
    ref1_bf = resnet_basicblock_reference(x1, p1, 1, jnp.bfloat16)
    assert jnp.allclose(out1_bf, ref1_bf, atol=1e-2, rtol=1e-2), "stride-1 bf16 mismatch"

    # --- stride 2 (fused 1x1-conv + BN downsample residual), C_in != C_out ---
    C_in2, C_out2 = 4, 8
    x2 = jax.random.normal(k3, (N, C_in2, H, W), jnp.float32)
    p2 = _make_params(k4, C_in2, C_out2, 2)

    out2_f32 = jax.block_until_ready(fwd(x2, p2, 2, jnp.float32))
    assert out2_f32.shape == (N, C_out2, H // 2, W // 2)
    ref2_f32 = resnet_basicblock_reference(x2, p2, 2, jnp.float32)
    assert jnp.allclose(out2_f32, ref2_f32, atol=1e-3, rtol=1e-3), "stride-2 f32 mismatch"

    out2_bf = jax.block_until_ready(fwd(x2, p2, 2, jnp.bfloat16))
    ref2_bf = resnet_basicblock_reference(x2, p2, 2, jnp.bfloat16)
    assert jnp.allclose(out2_bf, ref2_bf, atol=1e-2, rtol=1e-2), "stride-2 bf16 mismatch"

    print("KERNEL_OK")
</pallas_src>

<mosaic_0001>
module attributes {stable_mosaic.version = 11 : i64} {
  func.func @_bnrelu_conv3x3_kernel(%arg0: i32, %arg1: i32, %arg2: memref<256x4xf32, #tpu.memory_space<vmem>>, %arg3: memref<1x4xf32, #tpu.memory_space<vmem>>, %arg4: memref<1x4xf32, #tpu.memory_space<vmem>>, %arg5: memref<36x4xf32, #tpu.memory_space<vmem>>, %arg6: memref<256x4xf32, #tpu.memory_space<vmem>>, %arg7: memref<1x8x4xf32, #tpu.memory_space<vmem>>, %arg8: memref<1x8x4xf32, #tpu.memory_space<vmem>>, %arg9: memref<18x18x4xf32, #tpu.memory_space<vmem>>) attributes {dimension_semantics = [#tpu.dimension_semantics<parallel>, #tpu.dimension_semantics<arbitrary>], iteration_bounds = array<i64: 2, 1>, scalar_prefetch = 0 : i64, scratch_operands = 1 : i64, tpu.core_type = #tpu.core_type<tc>, window_params = [{transform_indices = @transform_0, window_bounds = array<i64: 256, 4>}, {pipeline_mode = #tpu.pipeline_mode<synchronous>, transform_indices = @transform_1, window_bounds = array<i64: 1, 4>}, {pipeline_mode = #tpu.pipeline_mode<synchronous>, transform_indices = @transform_2, window_bounds = array<i64: 1, 4>}, {pipeline_mode = #tpu.pipeline_mode<synchronous>, transform_indices = @transform_3, window_bounds = array<i64: 36, 4>}, {transform_indices = @transform_4, window_bounds = array<i64: 256, 4>}, {transform_indices = @transform_5, window_bounds = array<i64: 1, 8, 4>}, {transform_indices = @transform_6, window_bounds = array<i64: 1, 8, 4>}]} {
    %c0_i32 = arith.constant 0 : i32
    %0 = arith.cmpi eq, %arg1, %c0_i32 : i32
    %1 = arith.extui %0 : i1 to i32
    %c0_i32_0 = arith.constant 0 : i32
    %2 = arith.cmpi ne, %1, %c0_i32_0 : i32
    scf.if %2 {
      %cst_30 = arith.constant 0.000000e+00 : f32
      %44 = vector.broadcast %cst_30 : f32 to vector<1x8x4xf32>
      %c0_31 = arith.constant 0 : index
      %c0_32 = arith.constant 0 : index
      %c0_33 = arith.constant 0 : index
      %45 = vector.load %arg7[%c0_31, %c0_32, %c0_33] : memref<1x8x4xf32, #tpu.memory_space<vmem>>, vector<1x8x4xf32>
      tpu.vector_store %arg7[%c0_31, %c0_32, %c0_33], %44 {strides = array<i32>} : memref<1x8x4xf32, #tpu.memory_space<vmem>>, vector<1x8x4xf32>,
      %cst_34 = arith.constant 0.000000e+00 : f32
      %46 = vector.broadcast %cst_34 : f32 to vector<1x8x4xf32>
      %c0_35 = arith.constant 0 : index
      %c0_36 = arith.constant 0 : index
      %c0_37 = arith.constant 0 : index
      %47 = vector.load %arg8[%c0_35, %c0_36, %c0_37] : memref<1x8x4xf32, #tpu.memory_space<vmem>>, vector<1x8x4xf32>
      tpu.vector_store %arg8[%c0_35, %c0_36, %c0_37], %46 {strides = array<i32>} : memref<1x8x4xf32, #tpu.memory_space<vmem>>, vector<1x8x4xf32>,
      %cst_38 = arith.constant 0.000000e+00 : f32
      %48 = vector.broadcast %cst_38 : f32 to vector<18x18x4xf32>
      %c0_39 = arith.constant 0 : index
      %c0_40 = arith.constant 0 : index
      %c0_41 = arith.constant 0 : index
      %49 = vector.load %arg9[%c0_39, %c0_40, %c0_41] : memref<18x18x4xf32, #tpu.memory_space<vmem>>, vector<18x18x4xf32>
      tpu.vector_store %arg9[%c0_39, %c0_40, %c0_41], %48 {strides = array<i32>} : memref<18x18x4xf32, #tpu.memory_space<vmem>>, vector<18x18x4xf32>,
    } else {
    }
    %c0 = arith.constant 0 : index
    %c0_1 = arith.constant 0 : index
    %3 = vector.load %arg2[%c0, %c0_1] : memref<256x4xf32, #tpu.memory_space<vmem>>, vector<256x4xf32>
    %c0_2 = arith.constant 0 : index
    %c0_3 = arith.constant 0 : index
    %4 = vector.load %arg3[%c0_2, %c0_3] : memref<1x4xf32, #tpu.memory_space<vmem>>, vector<1x4xf32>
    %5 = vector.broadcast %4 : vector<1x4xf32> to vector<256x4xf32>
    %6 = arith.mulf %3, %5 : vector<256x4xf32>
    %c0_4 = arith.constant 0 : index
    %c0_5 = arith.constant 0 : index
    %7 = vector.load %arg4[%c0_4, %c0_5] : memref<1x4xf32, #tpu.memory_space<vmem>>, vector<1x4xf32>
    %8 = vector.broadcast %7 : vector<1x4xf32> to vector<256x4xf32>
    %9 = arith.addf %6, %8 : vector<256x4xf32>
    %cst = arith.constant 0.000000e+00 : f32
    %10 = vector.broadcast %cst : f32 to vector<256x4xf32>
    %11 = arith.maximumf %9, %10 : vector<256x4xf32>
    %12 = vector.shape_cast %11 : vector<256x4xf32> to vector<16x16x4xf32>
    %c1 = arith.constant 1 : index
    %c1_6 = arith.constant 1 : index
    %c0_7 = arith.constant 0 : index
    %13 = vector.load %arg9[%c1, %c1_6, %c0_7] : memref<18x18x4xf32, #tpu.memory_space<vmem>>, vector<16x16x4xf32>
    tpu.vector_store %arg9[%c1, %c1_6, %c0_7], %12 {strides = array<i32>} : memref<18x18x4xf32, #tpu.memory_space<vmem>>, vector<16x16x4xf32>,
    %c0_8 = arith.constant 0 : index
    %c0_9 = arith.constant 0 : index
    %c0_10 = arith.constant 0 : index
    %14 = vector.load %arg9[%c0_8, %c0_9, %c0_10] : memref<18x18x4xf32, #tpu.memory_space<vmem>>, vector<18x18x4xf32>
    %15 = vector.extract_strided_slice %14 {offsets = [0, 0, 0], sizes = [16, 16, 4], strides = [1, 1, 1]} : vector<18x18x4xf32> to vector<16x16x4xf32>
    %16 = vector.extract_strided_slice %14 {offsets = [0, 1, 0], sizes = [16, 16, 4], strides = [1, 1, 1]} : vector<18x18x4xf32> to vector<16x16x4xf32>
    %17 = vector.extract_strided_slice %14 {offsets = [0, 2, 0], sizes = [16, 16, 4], strides = [1, 1, 1]} : vector<18x18x4xf32> to vector<16x16x4xf32>
    %18 = vector.extract_strided_slice %14 {offsets = [1, 0, 0], sizes = [16, 16, 4], strides = [1, 1, 1]} : vector<18x18x4xf32> to vector<16x16x4xf32>
    %19 = vector.extract_strided_slice %14 {offsets = [1, 1, 0], sizes = [16, 16, 4], strides = [1, 1, 1]} : vector<18x18x4xf32> to vector<16x16x4xf32>
    %20 = vector.extract_strided_slice %14 {offsets = [1, 2, 0], sizes = [16, 16, 4], strides = [1, 1, 1]} : vector<18x18x4xf32> to vector<16x16x4xf32>
    %21 = vector.extract_strided_slice %14 {offsets = [2, 0, 0], sizes = [16, 16, 4], strides = [1, 1, 1]} : vector<18x18x4xf32> to vector<16x16x4xf32>
    %22 = vector.extract_strided_slice %14 {offsets = [2, 1, 0], sizes = [16, 16, 4], strides = [1, 1, 1]} : vector<18x18x4xf32> to vector<16x16x4xf32>
    %23 = vector.extract_strided_slice %14 {offsets = [2, 2, 0], sizes = [16, 16, 4], strides = [1, 1, 1]} : vector<18x18x4xf32> to vector<16x16x4xf32>
    %24 = tpu.concatenate %15, %16, %17, %18, %19, %20, %21, %22, %23 in 2 : vector<16x16x4xf32>, vector<16x16x4xf32>, vector<16x16x4xf32>, vector<16x16x4xf32>, vector<16x16x4xf32>, vector<16x16x4xf32>, vector<16x16x4xf32>, vector<16x16x4xf32>, vector<16x16x4xf32> -> vector<16x16x36xf32>
    %25 = vector.shape_cast %24 : vector<16x16x36xf32> to vector<256x36xf32>
    %c0_11 = arith.constant 0 : index
    %c0_12 = arith.constant 0 : index
    %26 = vector.load %arg5[%c0_11, %c0_12] : memref<36x4xf32, #tpu.memory_space<vmem>>, vector<36x4xf32>
    %cst_13 = arith.constant dense<0.000000e+00> : vector<256x4xf32>
    %27 = tpu.matmul %25, %26, %cst_13 {dimension_numbers = #tpu.dot_dimension_numbers<[1], [0], [0], [1], [0, 0, 1, 1], [], []>} : vector<256x36xf32>, vector<36x4xf32>, vector<256x4xf32> -> vector<256x4xf32>
    %c0_14 = arith.constant 0 : index
    %c0_15 = arith.constant 0 : index
    %28 = vector.load %arg6[%c0_14, %c0_15] : memref<256x4xf32, #tpu.memory_space<vmem>>, vector<256x4xf32>
    tpu.vector_store %arg6[%c0_14, %c0_15], %27 {strides = array<i32>} : memref<256x4xf32, #tpu.memory_space<vmem>>, vector<256x4xf32>,
    %c0_16 = arith.constant 0 : index
    %c0_17 = arith.constant 0 : index
    %c0_18 = arith.constant 0 : index
    %29 = vector.load %arg7[%c0_16, %c0_17, %c0_18] : memref<1x8x4xf32, #tpu.memory_space<vmem>>, vector<1x8x4xf32>
    %cst_19 = arith.constant dense<0.000000e+00> : vector<4xf32>
    %30 = vector.multi_reduction <add>, %27, %cst_19 [0] : vector<256x4xf32> to vector<4xf32>
    %31 = vector.shape_cast %30 : vector<4xf32> to vector<1x4xf32>
    %32 = vector.shape_cast %31 : vector<1x4xf32> to vector<1x1x4xf32>
    %33 = vector.broadcast %32 : vector<1x1x4xf32> to vector<1x8x4xf32>
    %34 = arith.addf %29, %33 : vector<1x8x4xf32>
    %c0_20 = arith.constant 0 : index
    %c0_21 = arith.constant 0 : index
    %c0_22 = arith.constant 0 : index
    %35 = vector.load %arg7[%c0_20, %c0_21, %c0_22] : memref<1x8x4xf32, #tpu.memory_space<vmem>>, vector<1x8x4xf32>
    tpu.vector_store %arg7[%c0_20, %c0_21, %c0_22], %34 {strides = array<i32>} : memref<1x8x4xf32, #tpu.memory_space<vmem>>, vector<1x8x4xf32>,
    %c0_23 = arith.constant 0 : index
    %c0_24 = arith.constant 0 : index
    %c0_25 = arith.constant 0 : index
    %36 = vector.load %arg8[%c0_23, %c0_24, %c0_25] : memref<1x8x4xf32, #tpu.memory_space<vmem>>, vector<1x8x4xf32>
    %37 = arith.mulf %27, %27 : vector<256x4xf32>
    %cst_26 = arith.constant dense<0.000000e+00> : vector<4xf32>
    %38 = vector.multi_reduction <add>, %37, %cst_26 [0] : vector<256x4xf32> to vector<4xf32>
    %39 = vector.shape_cast %38 : vector<4xf32> to vector<1x4xf32>
    %40 = vector.shape_cast %39 : vector<1x4xf32> to vector<1x1x4xf32>
    %41 = vector.broadcast %40 : vector<1x1x4xf32> to vector<1x8x4xf32>
    %42 = arith.addf %36, %41 : vector<1x8x4xf32>
    %c0_27 = arith.constant 0 : index
    %c0_28 = arith.constant 0 : index
    %c0_29 = arith.constant 0 : index
    %43 = vector.load %arg8[%c0_27, %c0_28, %c0_29] : memref<1x8x4xf32, #tpu.memory_space<vmem>>, vector<1x8x4xf32>
    tpu.vector_store %arg8[%c0_27, %c0_28, %c0_29], %42 {strides = array<i32>} : memref<1x8x4xf32, #tpu.memory_space<vmem>>, vector<1x8x4xf32>,
    return
  }
  func.func @transform_0(%arg0: i32, %arg1: i32) -> (i32, i32) {
    %c1_i32 = arith.constant 1 : i32
    %0 = arith.muli %arg0, %c1_i32 : i32
    %1 = arith.addi %0, %arg1 : i32
    %c0_i32 = arith.constant 0 : i32
    %c0_i32_0 = arith.constant 0 : i32
    return %1, %c0_i32 : i32, i32
  }
  func.func @transform_1(%arg0: i32, %arg1: i32) -> (i32, i32) {
    %c0_i32 = arith.constant 0 : i32
    %c0_i32_0 = arith.constant 0 : i32
    %c0_i32_1 = arith.constant 0 : i32
    return %c0_i32, %c0_i32_0 : i32, i32
  }
  func.func @transform_2(%arg0: i32, %arg1: i32) -> (i32, i32) {
    %c0_i32 = arith.constant 0 : i32
    %c0_i32_0 = arith.constant 0 : i32
    %c0_i32_1 = arith.constant 0 : i32
    return %c0_i32, %c0_i32_0 : i32, i32
  }
  func.func @transform_3(%arg0: i32, %arg1: i32) -> (i32, i32) {
    %c0_i32 = arith.constant 0 : i32
    %c0_i32_0 = arith.constant 0 : i32
    %c0_i32_1 = arith.constant 0 : i32
    return %c0_i32, %c0_i32_0 : i32, i32
  }
  func.func @transform_4(%arg0: i32, %arg1: i32) -> (i32, i32) {
    %c1_i32 = arith.constant 1 : i32
    %0 = arith.muli %arg0, %c1_i32 : i32
    %1 = arith.addi %0, %arg1 : i32
    %c0_i32 = arith.constant 0 : i32
    %c0_i32_0 = arith.constant 0 : i32
    return %1, %c0_i32 : i32, i32
  }
  func.func @transform_5(%arg0: i32, %arg1: i32) -> (i32, i32, i32) {
    %c0_i32 = arith.constant 0 : i32
    %c0_i32_0 = arith.constant 0 : i32
    %c0_i32_1 = arith.constant 0 : i32
    return %arg0, %c0_i32, %c0_i32_0 : i32, i32, i32
  }
  func.func @transform_6(%arg0: i32, %arg1: i32) -> (i32, i32, i32) {
    %c0_i32 = arith.constant 0 : i32
    %c0_i32_0 = arith.constant 0 : i32
    %c0_i32_1 = arith.constant 0 : i32
    return %arg0, %c0_i32, %c0_i32_0 : i32, i32, i32
  }
}

module attributes {stable_mosaic.version = 11 : i64} {
  func.func @_relu_conv3x3_s1_kernel(%arg0: i32, %arg1: i32, %arg2: memref<1x16x16x4xf32, #tpu.memory_space<vmem>>, %arg3: memref<36x4xf32, #tpu.memory_space<vmem>>, %arg4: memref<256x4xf32, #tpu.memory_space<vmem>>, %arg5: memref<1x8x4xf32, #tpu.memory_space<vmem>>, %arg6: memref<1x8x4xf32, #tpu.memory_space<vmem>>, %arg7: memref<18x18x4xf32, #tpu.memory_space<vmem>>) attributes {dimension_semantics = [#tpu.dimension_semantics<parallel>, #tpu.dimension_semantics<arbitrary>], iteration_bounds = array<i64: 2, 1>, scalar_prefetch = 0 : i64, scratch_operands = 1 : i64, tpu.core_type = #tpu.core_type<tc>, window_params = [{transform_indices = @transform_0, window_bounds = array<i64: 1, 16, 16, 4>}, {pipeline_mode = #tpu.pipeline_mode<synchronous>, transform_indices = @transform_1, window_bounds = array<i64: 36, 4>}, {transform_indices = @transform_2, window_bounds = array<i64: 256, 4>}, {transform_indices = @transform_3, window_bounds = array<i64: 1, 8, 4>}, {transform_indices = @transform_4, window_bounds = array<i64: 1, 8, 4>}]} {
    %c0_i32 = arith.constant 0 : i32
    %0 = arith.cmpi eq, %arg1, %c0_i32 : i32
    %1 = arith.extui %0 : i1 to i32
    %c0_i32_0 = arith.constant 0 : i32
    %2 = arith.cmpi ne, %1, %c0_i32_0 : i32
    scf.if %2 {
      %cst_28 = arith.constant 0.000000e+00 : f32
      %38 = vector.broadcast %cst_28 : f32 to vector<1x8x4xf32>
      %c0_29 = arith.constant 0 : index
      %c0_30 = arith.constant 0 : index
      %c0_31 = arith.constant 0 : index
      %39 = vector.load %arg5[%c0_29, %c0_30, %c0_31] : memref<1x8x4xf32, #tpu.memory_space<vmem>>, vector<1x8x4xf32>
      tpu.vector_store %arg5[%c0_29, %c0_30, %c0_31], %38 {strides = array<i32>} : memref<1x8x4xf32, #tpu.memory_space<vmem>>, vector<1x8x4xf32>,
      %cst_32 = arith.constant 0.000000e+00 : f32
      %40 = vector.broadcast %cst_32 : f32 to vector<1x8x4xf32>
      %c0_33 = arith.constant 0 : index
      %c0_34 = arith.constant 0 : index
      %c0_35 = arith.constant 0 : index
      %41 = vector.load %arg6[%c0_33, %c0_34, %c0_35] : memref<1x8x4xf32, #tpu.memory_space<vmem>>, vector<1x8x4xf32>
      tpu.vector_store %arg6[%c0_33, %c0_34, %c0_35], %40 {strides = array<i32>} : memref<1x8x4xf32, #tpu.memory_space<vmem>>, vector<1x8x4xf32>,
      %cst_36 = arith.constant 0.000000e+00 : f32
      %42 = vector.broadcast %cst_36 : f32 to vector<18x18x4xf32>
      %c0_37 = arith.constant 0 : index
      %c0_38 = arith.constant 0 : index
      %c0_39 = arith.constant 0 : index
      %43 = vector.load %arg7[%c0_37, %c0_38, %c0_39] : memref<18x18x4xf32, #tpu.memory_space<vmem>>, vector<18x18x4xf32>
      tpu.vector_store %arg7[%c0_37, %c0_38, %c0_39], %42 {strides = array<i32>} : memref<18x18x4xf32, #tpu.memory_space<vmem>>, vector<18x18x4xf32>,
    } else {
    }
    %c0 = arith.constant 0 : index
    %c0_1 = arith.constant 0 : index
    %c0_2 = arith.constant 0 : index
    %c0_3 = arith.constant 0 : index
    %3 = vector.load %arg2[%c0, %c0_1, %c0_2, %c0_3] : memref<1x16x16x4xf32, #tpu.memory_space<vmem>>, vector<1x16x16x4xf32>
    %4 = vector.shape_cast %3 : vector<1x16x16x4xf32> to vector<16x16x4xf32>
    %cst = arith.constant 0.000000e+00 : f32
    %5 = vector.broadcast %cst : f32 to vector<16x16x4xf32>
    %6 = arith.maximumf %4, %5 : vector<16x16x4xf32>
    %c1 = arith.constant 1 : index
    %c1_4 = arith.constant 1 : index
    %c0_5 = arith.constant 0 : index
    %7 = vector.load %arg7[%c1, %c1_4, %c0_5] : memref<18x18x4xf32, #tpu.memory_space<vmem>>, vector<16x16x4xf32>
    tpu.vector_store %arg7[%c1, %c1_4, %c0_5], %6 {strides = array<i32>} : memref<18x18x4xf32, #tpu.memory_space<vmem>>, vector<16x16x4xf32>,
    %c0_6 = arith.constant 0 : index
    %c0_7 = arith.constant 0 : index
    %c0_8 = arith.constant 0 : index
    %8 = vector.load %arg7[%c0_6, %c0_7, %c0_8] : memref<18x18x4xf32, #tpu.memory_space<vmem>>, vector<18x18x4xf32>
    %9 = vector.extract_strided_slice %8 {offsets = [0, 0, 0], sizes = [16, 16, 4], strides = [1, 1, 1]} : vector<18x18x4xf32> to vector<16x16x4xf32>
    %10 = vector.extract_strided_slice %8 {offsets = [0, 1, 0], sizes = [16, 16, 4], strides = [1, 1, 1]} : vector<18x18x4xf32> to vector<16x16x4xf32>
    %11 = vector.extract_strided_slice %8 {offsets = [0, 2, 0], sizes = [16, 16, 4], strides = [1, 1, 1]} : vector<18x18x4xf32> to vector<16x16x4xf32>
    %12 = vector.extract_strided_slice %8 {offsets = [1, 0, 0], sizes = [16, 16, 4], strides = [1, 1, 1]} : vector<18x18x4xf32> to vector<16x16x4xf32>
    %13 = vector.extract_strided_slice %8 {offsets = [1, 1, 0], sizes = [16, 16, 4], strides = [1, 1, 1]} : vector<18x18x4xf32> to vector<16x16x4xf32>
    %14 = vector.extract_strided_slice %8 {offsets = [1, 2, 0], sizes = [16, 16, 4], strides = [1, 1, 1]} : vector<18x18x4xf32> to vector<16x16x4xf32>
    %15 = vector.extract_strided_slice %8 {offsets = [2, 0, 0], sizes = [16, 16, 4], strides = [1, 1, 1]} : vector<18x18x4xf32> to vector<16x16x4xf32>
    %16 = vector.extract_strided_slice %8 {offsets = [2, 1, 0], sizes = [16, 16, 4], strides = [1, 1, 1]} : vector<18x18x4xf32> to vector<16x16x4xf32>
    %17 = vector.extract_strided_slice %8 {offsets = [2, 2, 0], sizes = [16, 16, 4], strides = [1, 1, 1]} : vector<18x18x4xf32> to vector<16x16x4xf32>
    %18 = tpu.concatenate %9, %10, %11, %12, %13, %14, %15, %16, %17 in 2 : vector<16x16x4xf32>, vector<16x16x4xf32>, vector<16x16x4xf32>, vector<16x16x4xf32>, vector<16x16x4xf32>, vector<16x16x4xf32>, vector<16x16x4xf32>, vector<16x16x4xf32>, vector<16x16x4xf32> -> vector<16x16x36xf32>
    %19 = vector.shape_cast %18 : vector<16x16x36xf32> to vector<256x36xf32>
    %c0_9 = arith.constant 0 : index
    %c0_10 = arith.constant 0 : index
    %20 = vector.load %arg3[%c0_9, %c0_10] : memref<36x4xf32, #tpu.memory_space<vmem>>, vector<36x4xf32>
    %cst_11 = arith.constant dense<0.000000e+00> : vector<256x4xf32>
    %21 = tpu.matmul %19, %20, %cst_11 {dimension_numbers = #tpu.dot_dimension_numbers<[1], [0], [0], [1], [0, 0, 1, 1], [], []>} : vector<256x36xf32>, vector<36x4xf32>, vector<256x4xf32> -> vector<256x4xf32>
    %c0_12 = arith.constant 0 : index
    %c0_13 = arith.constant 0 : index
    %22 = vector.load %arg4[%c0_12, %c0_13] : memref<256x4xf32, #tpu.memory_space<vmem>>, vector<256x4xf32>
    tpu.vector_store %arg4[%c0_12, %c0_13], %21 {strides = array<i32>} : memref<256x4xf32, #tpu.memory_space<vmem>>, vector<256x4xf32>,
    %c0_14 = arith.constant 0 : index
    %c0_15 = arith.constant 0 : index
    %c0_16 = arith.constant 0 : index
    %23 = vector.load %arg5[%c0_14, %c0_15, %c0_16] : memref<1x8x4xf32, #tpu.memory_space<vmem>>, vector<1x8x4xf32>
    %cst_17 = arith.constant dense<0.000000e+00> : vector<4xf32>
    %24 = vector.multi_reduction <add>, %21, %cst_17 [0] : vector<256x4xf32> to vector<4xf32>
    %25 = vector.shape_cast %24 : vector<4xf32> to vector<1x4xf32>
    %26 = vector.shape_cast %25 : vector<1x4xf32> to vector<1x1x4xf32>
    %27 = vector.broadcast %26 : vector<1x1x4xf32> to vector<1x8x4xf32>
    %28 = arith.addf %23, %27 : vector<1x8x4xf32>
    %c0_18 = arith.constant 0 : index
    %c0_19 = arith.constant 0 : index
    %c0_20 = arith.constant 0 : index
    %29 = vector.load %arg5[%c0_18, %c0_19, %c0_20] : memref<1x8x4xf32, #tpu.memory_space<vmem>>, vector<1x8x4xf32>
    tpu.vector_store %arg5[%c0_18, %c0_19, %c0_20], %28 {strides = array<i32>} : memref<1x8x4xf32, #tpu.memory_space<vmem>>, vector<1x8x4xf32>,
    %c0_21 = arith.constant 0 : index
    %c0_22 = arith.constant 0 : index
    %c0_23 = arith.constant 0 : index
    %30 = vector.load %arg6[%c0_21, %c0_22, %c0_23] : memref<1x8x4xf32, #tpu.memory_space<vmem>>, vector<1x8x4xf32>
    %31 = arith.mulf %21, %21 : vector<256x4xf32>
    %cst_24 = arith.constant dense<0.000000e+00> : vector<4xf32>
    %32 = vector.multi_reduction <add>, %31, %cst_24 [0] : vector<256x4xf32> to vector<4xf32>
    %33 = vector.shape_cast %32 : vector<4xf32> to vector<1x4xf32>
    %34 = vector.shape_cast %33 : vector<1x4xf32> to vector<1x1x4xf32>
    %35 = vector.broadcast %34 : vector<1x1x4xf32> to vector<1x8x4xf32>
    %36 = arith.addf %30, %35 : vector<1x8x4xf32>
    %c0_25 = arith.constant 0 : index
    %c0_26 = arith.constant 0 : index
    %c0_27 = arith.constant 0 : index
    %37 = vector.load %arg6[%c0_25, %c0_26, %c0_27] : memref<1x8x4xf32, #tpu.memory_space<vmem>>, vector<1x8x4xf32>
    tpu.vector_store %arg6[%c0_25, %c0_26, %c0_27], %36 {strides = array<i32>} : memref<1x8x4xf32, #tpu.memory_space<vmem>>, vector<1x8x4xf32>,
    return
  }
  func.func @transform_0(%arg0: i32, %arg1: i32) -> (i32, i32, i32, i32) {
    %c1_i32 = arith.constant 1 : i32
    %0 = arith.muli %arg0, %c1_i32 : i32
    %1 = arith.addi %0, %arg1 : i32
    %c0_i32 = arith.constant 0 : i32
    %c0_i32_0 = arith.constant 0 : i32
    %c0_i32_1 = arith.constant 0 : i32
    %c0_i32_2 = arith.constant 0 : i32
    return %1, %c0_i32, %c0_i32_0, %c0_i32_1 : i32, i32, i32, i32
  }
  func.func @transform_1(%arg0: i32, %arg1: i32) -> (i32, i32) {
    %c0_i32 = arith.constant 0 : i32
    %c0_i32_0 = arith.constant 0 : i32
    %c0_i32_1 = arith.constant 0 : i32
    return %c0_i32, %c0_i32_0 : i32, i32
  }
  func.func @transform_2(%arg0: i32, %arg1: i32) -> (i32, i32) {
    %c1_i32 = arith.constant 1 : i32
    %0 = arith.muli %arg0, %c1_i32 : i32
    %1 = arith.addi %0, %arg1 : i32
    %c0_i32 = arith.constant 0 : i32
    %c0_i32_0 = arith.constant 0 : i32
    return %1, %c0_i32 : i32, i32
  }
  func.func @transform_3(%arg0: i32, %arg1: i32) -> (i32, i32, i32) {
    %c0_i32 = arith.constant 0 : i32
    %c0_i32_0 = arith.constant 0 : i32
    %c0_i32_1 = arith.constant 0 : i32
    return %arg0, %c0_i32, %c0_i32_0 : i32, i32, i32
  }
  func.func @transform_4(%arg0: i32, %arg1: i32) -> (i32, i32, i32) {
    %c0_i32 = arith.constant 0 : i32
    %c0_i32_0 = arith.constant 0 : i32
    %c0_i32_1 = arith.constant 0 : i32
    return %arg0, %c0_i32, %c0_i32_0 : i32, i32, i32
  }
}

module attributes {stable_mosaic.version = 11 : i64} {
  func.func @_bn_apply_add_kernel(%arg0: i32, %arg1: memref<16x128xf32, #tpu.memory_space<vmem>>, %arg2: memref<1x128xf32, #tpu.memory_space<vmem>>, %arg3: memref<1x128xf32, #tpu.memory_space<vmem>>, %arg4: memref<16x128xf32, #tpu.memory_space<vmem>>, %arg5: memref<1x128xf32, #tpu.memory_space<vmem>>, %arg6: memref<1x128xf32, #tpu.memory_space<vmem>>, %arg7: memref<16x128xf32, #tpu.memory_space<vmem>>) attributes {dimension_semantics = [#tpu.dimension_semantics<parallel>], iteration_bounds = array<i64: 1>, scalar_prefetch = 0 : i64, scratch_operands = 0 : i64, tpu.core_type = #tpu.core_type<tc>, window_params = [{transform_indices = @transform_0, window_bounds = array<i64: 16, 128>}, {pipeline_mode = #tpu.pipeline_mode<synchronous>, transform_indices = @transform_1, window_bounds = array<i64: 1, 128>}, {pipeline_mode = #tpu.pipeline_mode<synchronous>, transform_indices = @transform_2, window_bounds = array<i64: 1, 128>}, {transform_indices = @transform_3, window_bounds = array<i64: 16, 128>}, {pipeline_mode = #tpu.pipeline_mode<synchronous>, transform_indices = @transform_4, window_bounds = array<i64: 1, 128>}, {pipeline_mode = #tpu.pipeline_mode<synchronous>, transform_indices = @transform_5, window_bounds = array<i64: 1, 128>}, {transform_indices = @transform_6, window_bounds = array<i64: 16, 128>}]} {
    %c0 = arith.constant 0 : index
    %c0_0 = arith.constant 0 : index
    %0 = vector.load %arg1[%c0, %c0_0] : memref<16x128xf32, #tpu.memory_space<vmem>>, vector<16x128xf32>
    %c0_1 = arith.constant 0 : index
    %c0_2 = arith.constant 0 : index
    %1 = vector.load %arg2[%c0_1, %c0_2] : memref<1x128xf32, #tpu.memory_space<vmem>>, vector<1x128xf32>
    %2 = vector.broadcast %1 : vector<1x128xf32> to vector<16x128xf32>
    %3 = arith.mulf %0, %2 : vector<16x128xf32>
    %c0_3 = arith.constant 0 : index
    %c0_4 = arith.constant 0 : index
    %4 = vector.load %arg3[%c0_3, %c0_4] : memref<1x128xf32, #tpu.memory_space<vmem>>, vector<1x128xf32>
    %5 = vector.broadcast %4 : vector<1x128xf32> to vector<16x128xf32>
    %6 = arith.addf %3, %5 : vector<16x128xf32>
    %c0_5 = arith.constant 0 : index
    %c0_6 = arith.constant 0 : index
    %7 = vector.load %arg4[%c0_5, %c0_6] : memref<16x128xf32, #tpu.memory_space<vmem>>, vector<16x128xf32>
    %c0_7 = arith.constant 0 : index
    %c0_8 = arith.constant 0 : index
    %8 = vector.load %arg5[%c0_7, %c0_8] : memref<1x128xf32, #tpu.memory_space<vmem>>, vector<1x128xf32>
    %9 = vector.broadcast %8 : vector<1x128xf32> to vector<16x128xf32>
    %10 = arith.mulf %7, %9 : vector<16x128xf32>
    %c0_9 = arith.constant 0 : index
    %c0_10 = arith.constant 0 : index
    %11 = vector.load %arg6[%c0_9, %c0_10] : memref<1x128xf32, #tpu.memory_space<vmem>>, vector<1x128xf32>
    %12 = vector.broadcast %11 : vector<1x128xf32> to vector<16x128xf32>
    %13 = arith.addf %10, %12 : vector<16x128xf32>
    %14 = arith.addf %6, %13 : vector<16x128xf32>
    %c0_11 = arith.constant 0 : index
    %c0_12 = arith.constant 0 : index
    %15 = vector.load %arg7[%c0_11, %c0_12] : memref<16x128xf32, #tpu.memory_space<vmem>>, vector<16x128xf32>
    tpu.vector_store %arg7[%c0_11, %c0_12], %14 {strides = array<i32>} : memref<16x128xf32, #tpu.memory_space<vmem>>, vector<16x128xf32>,
    return
  }
  func.func @transform_0(%arg0: i32) -> (i32, i32) {
    %c0_i32 = arith.constant 0 : i32
    %c0_i32_0 = arith.constant 0 : i32
    return %arg0, %c0_i32 : i32, i32
  }
  func.func @transform_1(%arg0: i32) -> (i32, i32) {
    %c0_i32 = arith.constant 0 : i32
    %c0_i32_0 = arith.constant 0 : i32
    %c0_i32_1 = arith.constant 0 : i32
    return %c0_i32, %c0_i32_0 : i32, i32
  }
  func.func @transform_2(%arg0: i32) -> (i32, i32) {
    %c0_i32 = arith.constant 0 : i32
    %c0_i32_0 = arith.constant 0 : i32
    %c0_i32_1 = arith.constant 0 : i32
    return %c0_i32, %c0_i32_0 : i32, i32
  }
  func.func @transform_3(%arg0: i32) -> (i32, i32) {
    %c0_i32 = arith.constant 0 : i32
    %c0_i32_0 = arith.constant 0 : i32
    return %arg0, %c0_i32 : i32, i32
  }
  func.func @transform_4(%arg0: i32) -> (i32, i32) {
    %c0_i32 = arith.constant 0 : i32
    %c0_i32_0 = arith.constant 0 : i32
    %c0_i32_1 = arith.constant 0 : i32
    return %c0_i32, %c0_i32_0 : i32, i32
  }
  func.func @transform_5(%arg0: i32) -> (i32, i32) {
    %c0_i32 = arith.constant 0 : i32
    %c0_i32_0 = arith.constant 0 : i32
    %c0_i32_1 = arith.constant 0 : i32
    return %c0_i32, %c0_i32_0 : i32, i32
  }
  func.func @transform_6(%arg0: i32) -> (i32, i32) {
    %c0_i32 = arith.constant 0 : i32
    %c0_i32_0 = arith.constant 0 : i32
    return %arg0, %c0_i32 : i32, i32
  }
}

</mosaic_0001>

<bundles_post_ra>
// kernel: tile.18
= control target key start
LH: loop header
LB: loop body
LE: loop exit
PB: predicated region body
PF: predicated region fallthrough
CT: control target
= control target key end

     0   :  { %s40_s0 = inlined_call_operand.vmem [shape: f32[4], index: 0, kind: input, shape index: {}]   ;;  %s41_s1 = inlined_call_operand.vmem [shape: f32[32,4], index: 1, kind: output, shape index: {}]  }
   0x1   :  { %v4_v0 = vld [vmem:[%s40_s0] ss:$0 sm:$0xff] }
   0x2   :  { %5 = vst [vmem:[%s41_s1] sm:$0xff] %v4_v0  ;;  %12 = vst [vmem:[%s41_s1 + $0x8] sm:$0xff] %v4_v0 }
   0x3   :  { %13 = vst [vmem:[%s41_s1 + $0x10] sm:$0xff] %v4_v0  ;;  %14 = vst [vmem:[%s41_s1 + $0x18] sm:$0xff] %v4_v0 }

// kernel: tile.19
= control target key start
LH: loop header
LB: loop body
LE: loop exit
PB: predicated region body
PF: predicated region fallthrough
CT: control target
= control target key end

     0   :  { %s259_s10 = smov 124   ;;  %s260_s11 = smov 116   ;;  %vm3_vm0 = vcmask 31744   ;;  %vm9_vm1 = vcmask 1048544   ;;  %vm15_vm2 = vcmask 1015744   ;;  %vm21_vm3 = vcmask 982944   ;;  %s399_s0 = inlined_call_operand.vmem [shape: f32[32,4], index: 0, kind: input, shape index: {}]   ;;  %s400_s1 = inlined_call_operand.vmem [shape: f32[1,128], index: 1, kind: output, shape index: {}]  }
   0x1   :  { %v197_v0 = vld [vmem:[%s399_s0 + $0x1f] sm:$0x1]   ;;  %v199_v1 = vld [vmem:[%s399_s0 + $0x1d] sm:$0x1]   ;;  %v198_v2 = vld [vmem:[%s399_s0 + $0x1e] sm:$0x1]  }
   0x2   :  { %7 = vrot.lane.b32.xlu0 %v197_v0, %s259_s10  ;;  %19 = vrot.lane.b32.xlu1 %v199_v1, %s260_s11  ;;  %v200_v3 = vld [vmem:[%s399_s0 + $0x1c] sm:$0x1]   ;;  %s261_s16 = smov 120   ;;  %s262_s17 = smov 112   ;;  %v201_v4 = vld [vmem:[%s399_s0 + $0x1b] sm:$0x1]  }
   0x3   :  { %v202_v5 = vld [vmem:[%s399_s0 + $0x1a] sm:$0x1]   ;;  %s263_s22 = smov 108   ;;  %s264_s23 = smov 104   ;;  %v203_v6 = vld [vmem:[%s399_s0 + $0x19] sm:$0x1]  }
   0x4   :  { %v204_v7 = vld [vmem:[%s399_s0 + $0x18] sm:$0x1]   ;;  %s265_s28 = smov 100   ;;  %s266_s29 = smov 96   ;;  %v205_v8 = vld [vmem:[%s399_s0 + $0x17] sm:$0x1]  }
   0x5   :  { %v206_v9 = vld [vmem:[%s399_s0 + $0x16] sm:$0x1]   ;;  %v2_v10 = vld [vmem:[%s399_s0] sm:$0x1]   ;;  %s267_s7 = smov 92   ;;  %s268_s8 = smov 88  }
   0x6   :  { %13 = vrot.lane.b32.xlu0 %v198_v2, %s261_s16  ;;  %25 = vrot.lane.b32.xlu1 %v200_v3, %s262_s17  ;;  %4 = vst.msk [vmem:[#allocation0] sm:$0x1] %vm3_vm0, %v2_v10   ;;  %v207_v11 = vld [vmem:[%s399_s0 + $0x15] sm:$0x1]   ;;  %v208_v12 = vld [vmem:[%s399_s0 + $0x14] sm:$0x1]  }
   0x7   :  { %s269_s13 = smov 84   ;;  %s270_s14 = smov 80   ;;  %v209_v13 = vld [vmem:[%s399_s0 + $0x13] sm:$0x1]   ;;  %v210_v14 = vld [vmem:[%s399_s0 + $0x12] sm:$0x1]  }
   0x8   :  { %s271_s19 = smov 76   ;;  %s272_s20 = smov 72   ;;  %v211_v15 = vld [vmem:[%s399_s0 + $0x11] sm:$0x1]   ;;  %v212_v16 = vld [vmem:[%s399_s0 + $0x10] sm:$0x1]  }
   0x9   :  { %s273_s25 = smov 68   ;;  %s274_s26 = smov 64   ;;  %v213_v17 = vld [vmem:[%s399_s0 + $0xf] sm:$0x1]   ;;  %v214_v18 = vld [vmem:[%s399_s0 + $0xe] sm:$0x1]  }
   0xa   :  { %31 = vrot.lane.b32.xlu0 %v201_v4, %s263_s22  ;;  %37 = vrot.lane.b32.xlu1 %v202_v5, %s264_s23  ;;  %s275_s2 = smov 60   ;;  %s276_s3 = smov 56   ;;  %v215_v19 = vld [vmem:[%s399_s0 + $0xd] sm:$0x1]   ;;  %v216_v20 = vld [vmem:[%s399_s0 + $0xc] sm:$0x1]  }
   0xb   :  { %s278_s9 = smov 48   ;;  %v217_v21 = vld [vmem:[%s399_s0 + $0xb] sm:$0x1]   ;;  %v218_v22 = vld [vmem:[%s399_s0 + $0xa] sm:$0x1]   ;;  %s280_s15 = smov 40  }
   0xc   :  { %v219_v23 = vld [vmem:[%s399_s0 + $0x9] sm:$0x1]   ;;  %v220_v24 = vld [vmem:[%s399_s0 + $0x8] sm:$0x1]   ;;  %s282_s21 = smov 32   ;;  %s284_s27 = smov 24  }
   0xd   :  { %v221_v25 = vld [vmem:[%s399_s0 + $0x7] sm:$0x1]   ;;  %v222_v26 = vld [vmem:[%s399_s0 + $0x6] sm:$0x1]   ;;  %v223_v27 = vld [vmem:[%s399_s0 + $0x5] sm:$0x1]  }
   0xe   :  { %43 = vrot.lane.b32.xlu0 %v203_v6, %s265_s28  ;;  %49 = vrot.lane.b32.xlu1 %v204_v7, %s266_s29  ;;  %v224_v28 = vld [vmem:[%s399_s0 + $0x4] sm:$0x1]   ;;  %s286_s4 = smov 16   ;;  %v225_v29 = vld [vmem:[%s399_s0 + $0x3] sm:$0x1]   ;;  %s288_s10 = smov 8  }
   0xf   :  { %v226_v30 = vld [vmem:[%s399_s0 + $0x2] sm:$0x1]   ;;  %v227_v31 = vld [vmem:[%s399_s0 + $0x1] sm:$0x1]   ;;  %s289_s0 = smov 4   ;;  %vm27_vm4 = vcmask 950144  }
  0x10   :  { %vm33_vm5 = vcmask 917344   ;;  %vm39_vm6 = vcmask 884544   ;;  %vm45_vm7 = vcmask 851744   ;;  %vm51_vm8 = vcmask 818944  }
  0x11   :  { %vm57_vm9 = vcmask 786144   ;;  %vm63_vm10 = vcmask 753344   ;;  %vm69_vm11 = vcmask 720544   ;;  %vm75_vm12 = vcmask 687744  }
  0x12   :  { %55 = vrot.lane.b32.xlu0 %v205_v8, %s267_s7  ;;  %61 = vrot.lane.b32.xlu1 %v206_v9, %s268_s8  ;;  %s277_s8 = smov 52   ;;  %vm81_vm13 = vcmask 654944   ;;  %vm87_vm14 = vcmask 622144   ;;  %vm93_vm15 = vcmask 589344   ;;  %vm99_vm0 = vcmask 556544  }
  0x16   :  { %67 = vrot.lane.b32.xlu0 %v207_v11, %s269_s13  ;;  %73 = vrot.lane.b32.xlu1 %v208_v12, %s270_s14  ;;  %s279_s14 = smov 44  }
  0x1a   :  { %79 = vrot.lane.b32.xlu0 %v209_v13, %s271_s19  ;;  %85 = vrot.lane.b32.xlu1 %v210_v14, %s272_s20  ;;  %s281_s20 = smov 36  }
  0x1e   :  { %91 = vrot.lane.b32.xlu0 %v211_v15, %s273_s25  ;;  %97 = vrot.lane.b32.xlu1 %v212_v16, %s274_s26  ;;  %s283_s26 = smov 28  }
  0x22   :  { %103 = vrot.lane.b32.xlu0 %v213_v17, %s275_s2  ;;  %109 = vrot.lane.b32.xlu1 %v214_v18, %s276_s3  ;;  %s285_s3 = smov 20  }
  0x26   :  { %115 = vrot.lane.b32.xlu0 %v215_v19, %s277_s8  ;;  %121 = vrot.lane.b32.xlu1 %v216_v20, %s278_s9  ;;  %s287_s9 = smov 12  }
  0x2a   :  { %127 = vrot.lane.b32.xlu0 %v217_v21, %s279_s14  ;;  %133 = vrot.lane.b32.xlu1 %v218_v22, %s280_s15 }
  0x2e   :  { %139 = vrot.lane.b32.xlu0 %v219_v23, %s281_s20  ;;  %145 = vrot.lane.b32.xlu1 %v220_v24, %s282_s21 }
  0x32   :  { %151 = vrot.lane.b32.xlu0 %v221_v25, %s283_s26  ;;  %157 = vrot.lane.b32.xlu1 %v222_v26, %s284_s27 }
  0x36   :  { %163 = vrot.lane.b32.xlu0 %v223_v27, %s285_s3  ;;  %169 = vrot.lane.b32.xlu1 %v224_v28, %s286_s4 }
  0x3a   :  { %175 = vrot.lane.b32.xlu0 %v225_v29, %s287_s9  ;;  %181 = vrot.lane.b32.xlu1 %v226_v30, %s288_s10 }
  0x3e   :  { %187 = vrot.lane.b32.xlu0 %v227_v31, %s289_s0 }
  0x74   :  { %v8_v32 = vpop.permute.xlu0 %7   ;;  %v20_v33 = vpop.permute.xlu1 %19  }
  0x75   :  { %10 = vst.msk [vmem:[#allocation0] sm:$0x1] %vm9_vm1, %v8_v32   ;;  %vm105_vm1 = vcmask 523744  }
  0x78   :  { %v14_v34 = vpop.permute.xlu0 %13   ;;  %v26_v35 = vpop.permute.xlu1 %25  }
  0x79   :  { %16 = vst.msk [vmem:[#allocation0] sm:$0x1] %vm15_vm2, %v14_v34   ;;  %vm111_vm2 = vcmask 490944  }
  0x7a   :  { %22 = vst.msk [vmem:[#allocation0] sm:$0x1] %vm21_vm3, %v20_v33   ;;  %vm117_vm3 = vcmask 458144  }
  0x7b   :  { %28 = vst.msk [vmem:[#allocation0] sm:$0x1] %vm27_vm4, %v26_v35   ;;  %vm123_vm4 = vcmask 425344  }
  0x7c   :  { %v32_v36 = vpop.permute.xlu0 %31   ;;  %v38_v37 = vpop.permute.xlu1 %37  }
  0x7d   :  { %34 = vst.msk [vmem:[#allocation0] sm:$0x1] %vm33_vm5, %v32_v36   ;;  %vm129_vm5 = vcmask 392544  }
  0x7e   :  { %40 = vst.msk [vmem:[#allocation0] sm:$0x1] %vm39_vm6, %v38_v37   ;;  %vm135_vm6 = vcmask 359744  }
  0x80   :  { %v44_v38 = vpop.permute.xlu0 %43   ;;  %v50_v39 = vpop.permute.xlu1 %49  }
  0x81   :  { %46 = vst.msk [vmem:[#allocation0] sm:$0x1] %vm45_vm7, %v44_v38   ;;  %vm141_vm7 = vcmask 326944  }
  0x82   :  { %52 = vst.msk [vmem:[#allocation0] sm:$0x1] %vm51_vm8, %v50_v39   ;;  %vm147_vm8 = vcmask 294144  }
  0x84   :  { %v56_v40 = vpop.permute.xlu0 %55   ;;  %v62_v41 = vpop.permute.xlu1 %61  }
  0x85   :  { %58 = vst.msk [vmem:[#allocation0] sm:$0x1] %vm57_vm9, %v56_v40   ;;  %vm153_vm9 = vcmask 261344  }
  0x86   :  { %64 = vst.msk [vmem:[#allocation0] sm:$0x1] %vm63_vm10, %v62_v41   ;;  %vm159_vm10 = vcmask 228544  }
  0x88   :  { %v68_v42 = vpop.permute.xlu0 %67   ;;  %v74_v43 = vpop.permute.xlu1 %73  }
  0x89   :  { %70 = vst.msk [vmem:[#allocation0] sm:$0x1] %vm69_vm11, %v68_v42   ;;  %vm165_vm11 = vcmask 195744  }
  0x8a   :  { %76 = vst.msk [vmem:[#allocation0] sm:$0x1] %vm75_vm12, %v74_v43   ;;  %vm171_vm12 = vcmask 162944  }
  0x8c   :  { %v80_v44 = vpop.permute.xlu0 %79   ;;  %v86_v45 = vpop.permute.xlu1 %85  }
  0x8d   :  { %82 = vst.msk [vmem:[#allocation0] sm:$0x1] %vm81_vm13, %v80_v44   ;;  %vm177_vm13 = vcmask 130144  }
  0x8e   :  { %88 = vst.msk [vmem:[#allocation0] sm:$0x1] %vm87_vm14, %v86_v45   ;;  %vm183_vm14 = vcmask 97344  }
  0x90   :  { %v92_v46 = vpop.permute.xlu0 %91   ;;  %v98_v47 = vpop.permute.xlu1 %97  }
  0x91   :  { %94 = vst.msk [vmem:[#allocation0] sm:$0x1] %vm93_vm15, %v92_v46   ;;  %vm189_vm15 = vcmask 64544  }
  0x92   :  { %100 = vst.msk [vmem:[#allocation0] sm:$0x1] %vm99_vm0, %v98_v47  }
  0x94   :  { %v104_v48 = vpop.permute.xlu0 %103   ;;  %v110_v49 = vpop.permute.xlu1 %109  }
  0x95   :  { %106 = vst.msk [vmem:[#allocation0] sm:$0x1] %vm105_vm1, %v104_v48  }
  0x96   :  { %112 = vst.msk [vmem:[#allocation0] sm:$0x1] %vm111_vm2, %v110_v49  }
  0x98   :  { %v116_v50 = vpop.permute.xlu0 %115   ;;  %v122_v51 = vpop.permute.xlu1 %121  }
  0x99   :  { %118 = vst.msk [vmem:[#allocation0] sm:$0x1] %vm117_vm3, %v116_v50  }
  0x9a   :  { %124 = vst.msk [vmem:[#allocation0] sm:$0x1] %vm123_vm4, %v122_v51  }
  0x9c   :  { %v128_v52 = vpop.permute.xlu0 %127   ;;  %v134_v53 = vpop.permute.xlu1 %133  }
  0x9d   :  { %130 = vst.msk [vmem:[#allocation0] sm:$0x1] %vm129_vm5, %v128_v52  }
  0x9e   :  { %136 = vst.msk [vmem:[#allocation0] sm:$0x1] %vm135_vm6, %v134_v53  }
  0xa0   :  { %v140_v54 = vpop.permute.xlu0 %139   ;;  %v146_v55 = vpop.permute.xlu1 %145  }
  0xa1   :  { %142 = vst.msk [vmem:[#allocation0] sm:$0x1] %vm141_vm7, %v140_v54  }
  0xa2   :  { %148 = vst.msk [vmem:[#allocation0] sm:$0x1] %vm147_vm8, %v146_v55  }
  0xa4   :  { %v152_v56 = vpop.permute.xlu0 %151   ;;  %v158_v57 = vpop.permute.xlu1 %157  }
  0xa5   :  { %154 = vst.msk [vmem:[#allocation0] sm:$0x1] %vm153_vm9, %v152_v56  }
  0xa6   :  { %160 = vst.msk [vmem:[#allocation0] sm:$0x1] %vm159_vm10, %v158_v57  }
  0xa8   :  { %v164_v58 = vpop.permute.xlu0 %163   ;;  %v170_v59 = vpop.permute.xlu1 %169  }
  0xa9   :  { %166 = vst.msk [vmem:[#allocation0] sm:$0x1] %vm165_vm11, %v164_v58  }
  0xaa   :  { %172 = vst.msk [vmem:[#allocation0] sm:$0x1] %vm171_vm12, %v170_v59  }
  0xac   :  { %v176_v60 = vpop.permute.xlu0 %175   ;;  %v182_v61 = vpop.permute.xlu1 %181  }
  0xad   :  { %178 = vst.msk [vmem:[#allocation0] sm:$0x1] %vm177_vm13, %v176_v60  }
  0xae   :  { %184 = vst.msk [vmem:[#allocation0] sm:$0x1] %vm183_vm14, %v182_v61  }
  0xb0   :  { %v188_v62 = vpop.permute.xlu0 %187  }
  0xb1   :  { %190 = vst.msk [vmem:[#allocation0] sm:$0x1] %vm189_vm15, %v188_v62  }
  0xb8   :  { %v194_v63 = vld [vmem:[#allocation0] sm:$0x1] }
  0xb9   :  { %196 = vst [vmem:[%s400_s1] sm:$0x1] %v194_v63 }

// kernel: tile.10
= control target key start
LH: loop header
LB: loop body
LE: loop exit
PB: predicated region body
PF: predicated region fallthrough
CT: control target
= control target key end

     0   :  { %s20_s0 = inlined_call_operand.<no memory space> [shape: f32[], index: 0, kind: input, shape index: {}]   ;;  %s21_s1 = inlined_call_operand.vmem [shape: f32[1,128], index: 1, kind: output, shape index: {}]  }
   0x1   :  { %v2_v0 = vstv %s20_s0 }
   0x2   :  { %3 = vst [vmem:[%s21_s1] sm:$0x1] %v2_v0 }

// kernel: resnet_basicblock_forward.5
= control target key start
LH: loop header
LB: loop body
LE: loop exit
PB: predicated region body
PF: predicated region fallthrough
CT: control target
= control target key end

     0   :  { %s140_s0 = inlined_call_operand.vmem [shape: f32[16,128], index: 0, kind: input, shape index: {}]   ;;  %s141_s1 = inlined_call_operand.vmem [shape: f32[1,128], index: 1, kind: input, shape index: {}]   ;;  %s142_s2 = inlined_call_operand.vmem [shape: f32[1,128], index: 2, kind: input, shape index: {}]   ;;  %s143_s3 = inlined_call_operand.vmem [shape: f32[16,128], index: 3, kind: input, shape index: {}]   ;;  %s144_s4 = inlined_call_operand.vmem [shape: f32[1,128], index: 4, kind: input, shape index: {}]   ;;  %s145_s5 = inlined_call_operand.vmem [shape: f32[1,128], index: 5, kind: input, shape index: {}]   ;;  %s146_s6 = inlined_call_operand.vmem [shape: f32[16,128], index: 6, kind: output, shape index: {}]  }
   0x1   :  { %v23_v0 = vld [vmem:[%s140_s0] sm:$0xff]  ;;  %v24_v8 = vld [vmem:[%s140_s0 + $0x8] sm:$0xff] }
   0x2   :  { %v71_v1 = vld [vmem:[%s141_s1] ss:$0 sm:$0xff]  ;;  %v44_v9 = vld [vmem:[%s143_s3 + $0x8] sm:$0xff] }
   0x3   :  { %v72_v2 = vld [vmem:[%s142_s2] ss:$0 sm:$0xff]  ;;  %v32_v3 = vmul.f32 %v71_v1, %v23_v0  ;;  %v33_v11 = vmul.f32 %v71_v1, %v24_v8 }
   0x4   :  { %v43_v4 = vld [vmem:[%s143_s3] sm:$0xff] }
   0x5   :  { %v73_v5 = vld [vmem:[%s144_s4] ss:$0 sm:$0xff]  ;;  %v41_v10 = vadd.f32 %v72_v2, %v32_v3  ;;  %v42_v14 = vadd.f32 %v72_v2, %v33_v11 }
   0x6   :  { %v74_v6 = vld [vmem:[%s145_s5] ss:$0 sm:$0xff]  ;;  %v52_v7 = vmul.f32 %v73_v5, %v43_v4  ;;  %v53_v12 = vmul.f32 %v73_v5, %v44_v9 }
   0x8   :  { %v61_v13 = vadd.f32 %v74_v6, %v52_v7  ;;  %v62_v15 = vadd.f32 %v74_v6, %v53_v12 }
   0xa   :  { %v63_v16 = vadd.f32 %v61_v13, %v41_v10  ;;  %v64_v17 = vadd.f32 %v62_v15, %v42_v14 }
   0xc   :  { %65 = vst [vmem:[%s146_s6] sm:$0xff] %v63_v16  ;;  %66 = vst [vmem:[%s146_s6 + $0x8] sm:$0xff] %v64_v17 }

// kernel: resnet_basicblock_forward.3
= control target key start
LH: loop header
LB: loop body
LE: loop exit
PB: predicated region body
PF: predicated region fallthrough
CT: control target
= control target key end

     0   :  { %s2673_s15 = smov 0   ;;  %s2675_s16 = smov 0   ;;  %s4505_s0 = inlined_call_operand.vmem [shape: f32[2,16,16,4], index: 0, kind: input, shape index: {}]   ;;  %s4506_s1 = inlined_call_operand.vmem [shape: f32[36,4], index: 1, kind: input, shape index: {}]   ;;  %s4507_s2 = inlined_call_operand.vmem [shape: f32[512,4], index: 2, kind: output, shape index: {0}]   ;;  %s4508_s3 = inlined_call_operand.vmem [shape: f32[2,8,4], index: 3, kind: output, shape index: {1}]   ;;  %s4509_s4 = inlined_call_operand.vmem [shape: f32[2,8,4], index: 4, kind: output, shape index: {2}]  }
   0x1   :  { %s2677_s17 = smov 0  }
   0x2 LB: > { %s27_s18 = sadd.s32 1, %s2633_s16  ;;  %p2398_p0 = scmp.ge.s32.totalorder %s2637_s17, 1  ;;  %s2637_s17 = sphi %s2677_s17, %s15_s17   ;;  %s2633_s16 = sphi %s2675_s16, %s4742_s16   ;;  %s2629_s15 = sphi %s2673_s15, %s4741_s15  }
   0x3   : > { %p29_p1 = scmp.ge.s32.totalorder %s27_s18, 2  ;;  %p185_p2 = scmp.lt.s32.totalorder %s2637_s17, 3 }
   0x5   : > { %s4744_s18 = smov (%p29_p1, %s27_s18), 0  ;;  %p186_p3 = pnand %p2398_p0, %p185_p2 }
   0x7   : > { %189 = sbr.rel (%p186_p3) target bundleno = 913 (0x391), region = 28 }
   0xe   : > { %vm248_vm0 = vcmask 31744   ;;  %vm253_vm1 = vcmask 25600   ;;  %p222_p4 = scmp.lt.s32.totalorder %s2629_s15, 1  ;;  %v4510_v0 = vmov 0.0   ;;  %vm506_vm2 = vcmask 1046528   ;;  %s2640_s24 = smov 4  }
   0xf   : > { %251 = vst.msk [vmem:[#allocation2] sm:$0xff] %vm248_vm0, %v4510_v0  ;;  %252 = vst.msk [vmem:[#allocation2 + $0x8] sm:$0xff] %vm248_vm0, %v4510_v0  ;;  %vm683_vm3 = vcmask 1045504   ;;  %s2641_s25 = smov 8   ;;  %s2642_s26 = smov 12   ;;  %vm1827_vm4 = vcmask 1043456  }
  0x10   : > { %255 = vst.msk [vmem:[#allocation2 + $0x18] sm:$0xff] %vm248_vm0, %v4510_v0  ;;  %256 = vst.msk [vmem:[#allocation2 + $0x20] sm:$0xff] %vm248_vm0, %v4510_v0  ;;  %s2805_s19 = scalar_select %p222_p4, %s2629_s15, 1  ;;  %vm1494_vm5 = vcmask 64512   ;;  %vm1527_vm6 = vcmask 97280   ;;  %vm1560_vm7 = vcmask 130048  }
  0x11   : > { %258 = vst.msk [vmem:[#allocation2 + $0x30] sm:$0xff] %vm248_vm0, %v4510_v0  ;;  %259 = vst.msk [vmem:[#allocation2 + $0x38] sm:$0xff] %vm248_vm0, %v4510_v0  ;;  %s2643_s27 = smov 16   ;;  %s2644_s28 = smov 20   ;;  %vm1593_vm8 = vcmask 162816   ;;  %vm1659_vm9 = vcmask 228352  }
  0x12   : > { %261 = vst.msk [vmem:[#allocation2 + $0x48] sm:$0xff] %vm248_vm0, %v4510_v0  ;;  %262 = vst.msk [vmem:[#allocation2 + $0x50] sm:$0xff] %vm248_vm0, %v4510_v0  ;;  %s2440_s20 = sshll.u32 %s2805_s19, 8  ;;  %s2645_s7 = smov 24   ;;  %vm1626_vm10 = vcmask 195584   ;;  %vm1692_vm11 = vcmask 261120  }
  0x13   : > { %264 = vst.msk [vmem:[#allocation2 + $0x60] sm:$0xff] %vm248_vm0, %v4510_v0  ;;  %265 = vst.msk [vmem:[#allocation2 + $0x68] sm:$0xff] %vm248_vm0, %v4510_v0  ;;  %s2811_s23 = scalar_lea.vmem %s4505_s0, %s2440_s20  ;;  %s2646_s14 = smov 32   ;;  %vm1730_vm12 = vcmask 293888  }
  0x14   : > { %267 = vst.msk [vmem:[#allocation2 + $0x78] sm:$0xff] %vm248_vm0, %v4510_v0  ;;  %268 = vst.msk [vmem:[#allocation2 + $0x80] sm:$0xff] %vm248_vm0, %v4510_v0  ;;  %v308_v1 = vld [vmem:[%s2811_s23 + $0x10] sm:$0xff]  ;;  %v309_v2 = vld [vmem:[%s2811_s23 + $0x18] sm:$0xff]  ;;  %s2647_s20 = smov 28   ;;  %s2401_s21 = sshll.u32 %s2629_s15, 5 }
  0x15   : > { %270 = vst.msk [vmem:[#allocation2 + $0x90] sm:$0xff] %vm248_vm0, %v4510_v0  ;;  %271 = vst.msk [vmem:[#allocation2 + $0x98] sm:$0xff] %vm248_vm0, %v4510_v0  ;;  %v306_v3 = vld [vmem:[%s2811_s23] sm:$0xff]  ;;  %v340_v4 = vmax.f32 %v308_v1, 0.0  ;;  %v341_v5 = vmax.f32 %v309_v2, 0.0  ;;  %v307_v6 = vld [vmem:[%s2811_s23 + $0x8] sm:$0xff] }
  0x16   : > { %273 = vst.msk [vmem:[#allocation2 + $0xa8] sm:$0xff] %vm248_vm0, %v4510_v0  ;;  %274 = vst.msk [vmem:[#allocation2 + $0xb0] sm:$0xff] %vm248_vm0, %v4510_v0  ;;  %v338_v7 = vmax.f32 %v306_v3, 0.0  ;;  %v310_v8 = vld [vmem:[%s2811_s23 + $0x20] sm:$0xff]  ;;  %v311_v9 = vld [vmem:[%s2811_s23 + $0x28] sm:$0xff]  ;;  %v339_v13 = vmax.f32 %v307_v6, 0.0 }
  0x17   : > { %276 = vst.msk [vmem:[#allocation2 + $0xc0] sm:$0xff] %vm248_vm0, %v4510_v0  ;;  %277 = vst.msk [vmem:[#allocation2 + $0xc8] sm:$0xff] %vm248_vm0, %v4510_v0  ;;  %v2819_v10 = vld [vmem:[#allocation2] sm:$0xff]  ;;  %v2821_v11 = vld [vmem:[#allocation2 + $0x8] sm:$0xff]  ;;  %v342_v14 = vmax.f32 %v310_v8, 0.0  ;;  %v343_v18 = vmax.f32 %v311_v9, 0.0 }
  0x18   : > { %279 = vst.msk [vmem:[#allocation2 + $0xd8] sm:$0xff] %vm248_vm0, %v4510_v0  ;;  %280 = vst.msk [vmem:[#allocation2 + $0xe0] sm:$0xff] %vm248_vm0, %v4510_v0  ;;  %v507_v15 = vrot.slane %v2819_v10, 1  ;;  %v508_v16 = vrot.slane %v2821_v11, 1  ;;  %v312_v19 = vld [vmem:[%s2811_s23 + $0x30] sm:$0xff]  ;;  %v313_v20 = vld [vmem:[%s2811_s23 + $0x38] sm:$0xff] }
  0x19   : > { %282 = vst.msk [vmem:[#allocation2 + $0xf0] sm:$0xff] %vm248_vm0, %v4510_v0  ;;  %283 = vst.msk [vmem:[#allocation2 + $0xf8] sm:$0xff] %vm248_vm0, %v4510_v0  ;;  %v344_v21 = vmax.f32 %v312_v19, 0.0  ;;  %v345_v22 = vmax.f32 %v313_v20, 0.0  ;;  %v314_v23 = vld [vmem:[%s2811_s23 + $0x40] sm:$0xff]  ;;  %v315_v24 = vld [vmem:[%s2811_s23 + $0x48] sm:$0xff] }
  0x1a   : > { %285 = vst.msk [vmem:[#allocation2 + $0x108] sm:$0xff] %vm248_vm0, %v4510_v0  ;;  %286 = vst.msk [vmem:[#allocation2 + $0x110] sm:$0xff] %vm248_vm0, %v4510_v0  ;;  %v316_v25 = vld [vmem:[%s2811_s23 + $0x50] sm:$0xff]  ;;  %v509_v26 = vsel %vm506_vm2, %v507_v15, %v508_v16  ;;  %v346_v27 = vmax.f32 %v314_v23, 0.0  ;;  %v347_v28 = vmax.f32 %v315_v24, 0.0  ;;  %v317_v29 = vld [vmem:[%s2811_s23 + $0x58] sm:$0xff] }
  0x1b   : > { %288 = vst.msk [vmem:[#allocation2 + $0x120] sm:$0xff] %vm248_vm0, %v4510_v0  ;;  %289 = vst.msk [vmem:[#allocation2 + $0x128] sm:$0xff] %vm248_vm0, %v4510_v0  ;;  %v318_v30 = vld [vmem:[%s2811_s23 + $0x60] sm:$0xff]  ;;  %v319_v31 = vld [vmem:[%s2811_s23 + $0x68] sm:$0xff]  ;;  %587 = vrot.lane.b32.xlu0 %v509_v26, %s2640_s24  ;;  %v348_v32 = vmax.f32 %v316_v25, 0.0  ;;  %v349_v33 = vmax.f32 %v317_v29, 0.0 }
  0x1c   : > { %291 = vst.msk [vmem:[#allocation2 + $0x138] sm:$0xff] %vm248_vm0, %v4510_v0  ;;  %292 = vst.msk [vmem:[#allocation2 + $0x140] sm:$0xff] %vm248_vm0, %v4510_v0  ;;  %v350_v34 = vmax.f32 %v318_v30, 0.0  ;;  %v351_v35 = vmax.f32 %v319_v31, 0.0  ;;  %v320_v36 = vld [vmem:[%s2811_s23 + $0x70] sm:$0xff]  ;;  %v321_v37 = vld [vmem:[%s2811_s23 + $0x78] sm:$0xff] }
  0x1d   : > { %294 = vst.msk [vmem:[#allocation2 + $0x150] sm:$0xff] %vm248_vm0, %v4510_v0  ;;  %295 = vst.msk [vmem:[#allocation2 + $0x158] sm:$0xff] %vm248_vm0, %v4510_v0  ;;  %v352_v39 = vmax.f32 %v320_v36, 0.0  ;;  %v353_v40 = vmax.f32 %v321_v37, 0.0  ;;  %v322_v41 = vld [vmem:[%s2811_s23 + $0x80] sm:$0xff]  ;;  %v323_v42 = vld [vmem:[%s2811_s23 + $0x88] sm:$0xff] }
  0x1e   : > { %297 = vst.msk [vmem:[#allocation2 + $0x168] sm:$0xff] %vm248_vm0, %v4510_v0  ;;  %298 = vst.msk [vmem:[#allocation2 + $0x170] sm:$0xff] %vm248_vm0, %v4510_v0  ;;  %v324_v43 = vld [vmem:[%s2811_s23 + $0x90] sm:$0xff]  ;;  %v354_v44 = vmax.f32 %v322_v41, 0.0  ;;  %v355_v45 = vmax.f32 %v323_v42, 0.0  ;;  %v325_v46 = vld [vmem:[%s2811_s23 + $0x98] sm:$0xff] }
  0x1f   : > { %300 = vst.msk [vmem:[#allocation2 + $0x180] sm:$0xff] %vm248_vm0, %v4510_v0  ;;  %301 = vst.msk [vmem:[#allocation2 + $0x188] sm:$0xff] %vm248_vm0, %v4510_v0  ;;  %v356_v47 = vmax.f32 %v324_v43, 0.0  ;;  %v326_v48 = vld [vmem:[%s2811_s23 + $0xa0] sm:$0xff]  ;;  %v327_v49 = vld [vmem:[%s2811_s23 + $0xa8] sm:$0xff]  ;;  %v357_v50 = vmax.f32 %v325_v46, 0.0 }
  0x20   : > { %303 = vst.msk [vmem:[#allocation2 + $0x198] sm:$0xff] %vm248_vm0, %v4510_v0  ;;  %304 = vst.msk [vmem:[#allocation2 + $0x1a0] sm:$0xff] %vm248_vm0, %v4510_v0  ;;  %v358_v51 = vmax.f32 %v326_v48, 0.0  ;;  %v359_v52 = vmax.f32 %v327_v49, 0.0  ;;  %v328_v53 = vld [vmem:[%s2811_s23 + $0xb0] sm:$0xff]  ;;  %v329_v54 = vld [vmem:[%s2811_s23 + $0xb8] sm:$0xff] }
  0x21   : > { %254 = vst.msk [vmem:[#allocation2 + $0x10] sm:$0x3] %vm253_vm1, %v4510_v0  ;;  %257 = vst.msk [vmem:[#allocation2 + $0x28] sm:$0x3] %vm253_vm1, %v4510_v0  ;;  %v330_v55 = vld [vmem:[%s2811_s23 + $0xc0] sm:$0xff]  ;;  %v360_v59 = vmax.f32 %v328_v53, 0.0 }
  0x22   : > { %260 = vst.msk [vmem:[#allocation2 + $0x40] sm:$0x3] %vm253_vm1, %v4510_v0  ;;  %263 = vst.msk [vmem:[#allocation2 + $0x58] sm:$0x3] %vm253_vm1, %v4510_v0  ;;  %v361_v60 = vmax.f32 %v329_v54, 0.0  ;;  %v362_v61 = vmax.f32 %v330_v55, 0.0 }
  0x23   : > { %266 = vst.msk [vmem:[#allocation2 + $0x70] sm:$0x3] %vm253_vm1, %v4510_v0  ;;  %269 = vst.msk [vmem:[#allocation2 + $0x88] sm:$0x3] %vm253_vm1, %v4510_v0  ;;  %p230_p5 = scmp.lt.s32.totalorder %s2401_s21, 63 }
  0x24   : > { %272 = vst.msk [vmem:[#allocation2 + $0xa0] sm:$0x3] %vm253_vm1, %v4510_v0  ;;  %275 = vst.msk [vmem:[#allocation2 + $0xb8] sm:$0x3] %vm253_vm1, %v4510_v0 }
  0x25   : > { %278 = vst.msk [vmem:[#allocation2 + $0xd0] sm:$0x3] %vm253_vm1, %v4510_v0  ;;  %281 = vst.msk [vmem:[#allocation2 + $0xe8] sm:$0x3] %vm253_vm1, %v4510_v0  ;;  %s4746_s21 = smov (!%p230_p5, %s2401_s21), 63 }
  0x26   : > { %284 = vst.msk [vmem:[#allocation2 + $0x100] sm:$0x3] %vm253_vm1, %v4510_v0  ;;  %287 = vst.msk [vmem:[#allocation2 + $0x118] sm:$0x3] %vm253_vm1, %v4510_v0  ;;  %s2402_s15 = sshll.u32 %s4746_s21, 3 }
  0x27   : > { %290 = vst.msk [vmem:[#allocation2 + $0x130] sm:$0x3] %vm253_vm1, %v4510_v0  ;;  %293 = vst.msk [vmem:[#allocation2 + $0x148] sm:$0x3] %vm253_vm1, %v4510_v0 }
  0x28   : > { %296 = vst.msk [vmem:[#allocation2 + $0x160] sm:$0x3] %vm253_vm1, %v4510_v0  ;;  %299 = vst.msk [vmem:[#allocation2 + $0x178] sm:$0x3] %vm253_vm1, %v4510_v0  ;;  %v2823_v12 = vld [vmem:[#allocation2 + $0x10] sm:$0x3] }
  0x29   : > { %302 = vst.msk [vmem:[#allocation2 + $0x190] sm:$0x3] %vm253_vm1, %v4510_v0  ;;  %305 = vst.msk [vmem:[#allocation2 + $0x1a8] sm:$0x3] %vm253_vm1, %v4510_v0  ;;  %v510_v17 = vrot.slane %v2823_v12, 1 }
  0x2a   : > { %374 = vst.msk [vmem:[#allocation2 + $0x31] sm:$0xff] %vm248_vm0, %v340_v4  ;;  %375 = vst.msk [vmem:[#allocation2 + $0x39] sm:$0xff] %vm248_vm0, %v341_v5  ;;  %v331_v4 = vld [vmem:[%s2811_s23 + $0xc8] sm:$0xff] }
  0x2b   : > { %372 = vst.msk [vmem:[#allocation2 + $0x19] sm:$0xff] %vm248_vm0, %v338_v7  ;;  %373 = vst.msk [vmem:[#allocation2 + $0x21] sm:$0xff] %vm248_vm0, %v339_v13  ;;  %v511_v38 = vsel %vm506_vm2, %v508_v16, %v510_v17  ;;  %v363_v9 = vmax.f32 %v331_v4, 0.0 }
  0x2c   : > { %376 = vst.msk [vmem:[#allocation2 + $0x49] sm:$0xff] %vm248_vm0, %v342_v14  ;;  %377 = vst.msk [vmem:[#allocation2 + $0x51] sm:$0xff] %vm248_vm0, %v343_v18  ;;  %589 = vrot.lane.b32.xlu0 %v511_v38, %s2640_s24 }
  0x2d   : > { %378 = vst.msk [vmem:[#allocation2 + $0x61] sm:$0xff] %vm248_vm0, %v344_v21  ;;  %379 = vst.msk [vmem:[#allocation2 + $0x69] sm:$0xff] %vm248_vm0, %v345_v22 }
  0x2e   : > { %380 = vst.msk [vmem:[#allocation2 + $0x79] sm:$0xff] %vm248_vm0, %v346_v27  ;;  %381 = vst.msk [vmem:[#allocation2 + $0x81] sm:$0xff] %vm248_vm0, %v347_v28 }
  0x2f   : > { %382 = vst.msk [vmem:[#allocation2 + $0x91] sm:$0xff] %vm248_vm0, %v348_v32  ;;  %383 = vst.msk [vmem:[#allocation2 + $0x99] sm:$0xff] %vm248_vm0, %v349_v33 }
  0x30   : > { %384 = vst.msk [vmem:[#allocation2 + $0xa9] sm:$0xff] %vm248_vm0, %v350_v34  ;;  %385 = vst.msk [vmem:[#allocation2 + $0xb1] sm:$0xff] %vm248_vm0, %v351_v35 }
  0x31   : > { %386 = vst.msk [vmem:[#allocation2 + $0xc1] sm:$0xff] %vm248_vm0, %v352_v39  ;;  %387 = vst.msk [vmem:[#allocation2 + $0xc9] sm:$0xff] %vm248_vm0, %v353_v40  ;;  %v2867_v56 = vld [vmem:[#allocation2 + $0x30] sm:$0xff]  ;;  %v2869_v57 = vld [vmem:[#allocation2 + $0x38] sm:$0xff] }
  0x32   : > { %v2871_v58 = vld [vmem:[#allocation2 + $0x18] sm:$0xff]  ;;  %388 = vst.msk [vmem:[#allocation2 + $0xd9] sm:$0xff] %vm248_vm0, %v354_v44  ;;  %389 = vst.msk [vmem:[#allocation2 + $0xe1] sm:$0xff] %vm248_vm0, %v355_v45  ;;  %v517_v62 = vrot.slane %v2867_v56, 1  ;;  %v518_v63 = vrot.slane %v2869_v57, 1  ;;  %v2878_v1 = vld [vmem:[#allocation2 + $0x20] sm:$0xff] }
  0x33   : > { %390 = vst.msk [vmem:[#allocation2 + $0xf1] sm:$0xff] %vm248_vm0, %v356_v47  ;;  %v512_v2 = vrot.slane %v2871_v58, 1  ;;  %v2881_v3 = vld [vmem:[#allocation2 + $0x48] sm:$0xff]  ;;  %391 = vst.msk [vmem:[#allocation2 + $0xf9] sm:$0xff] %vm248_vm0, %v357_v50  ;;  %v513_v5 = vrot.slane %v2878_v1, 1  ;;  %v2888_v6 = vld [vmem:[#allocation2 + $0x50] sm:$0xff] }
  0x34   : > { %392 = vst.msk [vmem:[#allocation2 + $0x109] sm:$0xff] %vm248_vm0, %v358_v51  ;;  %393 = vst.msk [vmem:[#allocation2 + $0x111] sm:$0xff] %vm248_vm0, %v359_v52  ;;  %v522_v7 = vrot.slane %v2881_v3, 1  ;;  %v2891_v8 = vld [vmem:[#allocation2 + $0x28] sm:$0x3]  ;;  %v2897_v13 = vsel %vm506_vm2, %v517_v62, %v518_v63  ;;  %v523_v14 = vrot.slane %v2888_v6, 1 }
  0x35   : > { %394 = vst.msk [vmem:[#allocation2 + $0x121] sm:$0xff] %vm248_vm0, %v360_v59  ;;  %395 = vst.msk [vmem:[#allocation2 + $0x129] sm:$0xff] %vm248_vm0, %v361_v60  ;;  %v515_v15 = vrot.slane %v2891_v8, 1  ;;  %v2901_v16 = vld [vmem:[#allocation2 + $0x60] sm:$0xff]  ;;  %v2903_v17 = vld [vmem:[#allocation2 + $0x68] sm:$0xff]  ;;  %595 = vrot.lane.b32.xlu0 %v2897_v13, %s2640_s24  ;;  %v2910_v19 = vsel %vm506_vm2, %v512_v2, %v513_v5 }
  0x36   : > { %396 = vst.msk [vmem:[#allocation2 + $0x139] sm:$0xff] %vm248_vm0, %v362_v61  ;;  %v2905_v18 = vld [vmem:[#allocation2 + $0x40] sm:$0x3]  ;;  %397 = vst.msk [vmem:[#allocation2 + $0x141] sm:$0xff] %vm248_vm0, %v363_v9  ;;  %591 = vrot.lane.b32.xlu1 %v2910_v19, %s2640_s24  ;;  %v2916_v20 = vsel %vm506_vm2, %v522_v7, %v523_v14  ;;  %v527_v21 = vrot.slane %v2901_v16, 1  ;;  %v528_v22 = vrot.slane %v2903_v17, 1 }
  0x37   : > { %4586 = vst [vmem:[#allocation3_spill] sm:$0xff] %v2916_v20  ;;  %v2921_v23 = vsel %vm506_vm2, %v513_v5, %v515_v15  ;;  %v520_v24 = vrot.slane %v2905_v18, 1  ;;  %v2924_v25 = vld [vmem:[#allocation2 + $0x78] sm:$0xff]  ;;  %v2926_v26 = vld [vmem:[#allocation2 + $0x80] sm:$0xff]  ;;  %v2943_v33 = vld [vmem:[#allocation2 + $0x90] sm:$0xff] }
  0x38   : > { %v2928_v27 = vld [vmem:[#allocation2 + $0x58] sm:$0x3]  ;;  %v2935_v28 = vsel %vm506_vm2, %v527_v21, %v528_v22  ;;  %v532_v29 = vrot.slane %v2924_v25, 1  ;;  %v533_v30 = vrot.slane %v2926_v26, 1  ;;  %v2947_v35 = vld [vmem:[#allocation2 + $0x70] sm:$0x3] }
  0x39   : > { %599 = vrot.lane.b32.xlu0 %v2916_v20, %s2640_s24  ;;  %4587 = vst [vmem:[#allocation4_spill] sm:$0xff] %v2935_v28  ;;  %v2940_v31 = vsel %vm506_vm2, %v518_v63, %v520_v24  ;;  %v525_v32 = vrot.slane %v2928_v27, 1  ;;  %v2945_v34 = vld [vmem:[#allocation2 + $0x98] sm:$0xff]  ;;  %v537_v37 = vrot.slane %v2943_v33, 1  ;;  %v2958_v39 = vld [vmem:[#allocation2 + $0xa8] sm:$0xff]  ;;  %v332_v40 = vld [vmem:[%s2811_s23 + $0xd0] sm:$0xff] }
  0x3a   : > { %593 = vrot.lane.b32.xlu1 %v2921_v23, %s2640_s24  ;;  %v2954_v36 = vsel %vm506_vm2, %v532_v29, %v533_v30  ;;  %v538_v38 = vrot.slane %v2945_v34, 1  ;;  %v530_v42 = vrot.slane %v2947_v35, 1  ;;  %v2965_v43 = vld [vmem:[#allocation2 + $0xb0] sm:$0xff]  ;;  %v333_v44 = vld [vmem:[%s2811_s23 + $0xd8] sm:$0xff]  ;;  %v334_v45 = vld [vmem:[%s2811_s23 + $0xe0] sm:$0xff]  ;;  %v542_v48 = vrot.slane %v2958_v39, 1 }
  0x3b   : > { %4588 = vst [vmem:[#allocation5_spill] sm:$0xff] %v2954_v36  ;;  %v2962_v41 = vsel %vm506_vm2, %v523_v14, %v525_v32  ;;  %4590 = vst [vmem:[#allocation7_spill] sm:$0xff] %v2965_v43  ;;  %v2969_v46 = vld [vmem:[#allocation2 + $0x88] sm:$0x3]  ;;  %v364_v49 = vmax.f32 %v332_v40, 0.0  ;;  %v543_v51 = vrot.slane %v2965_v43, 1 }
  0x3c   : > { %4589 = vst [vmem:[#allocation6_spill] sm:$0xff] %v2962_v41  ;;  %v335_v47 = vld [vmem:[%s2811_s23 + $0xe8] sm:$0xff]  ;;  %v2978_v50 = vsel %vm506_vm2, %v537_v37, %v538_v38  ;;  %v365_v52 = vmax.f32 %v333_v44, 0.0  ;;  %v366_v53 = vmax.f32 %v334_v45, 0.0  ;;  %v2982_v54 = vsel %vm506_vm2, %v528_v22, %v530_v42  ;;  %v2985_v59 = vld [vmem:[#allocation2 + $0xc0] sm:$0xff]  ;;  %v3008_v9 = vld [vmem:[#allocation2 + $0xd8] sm:$0xff] }
  0x3d   : > { %603 = vrot.lane.b32.xlu0 %v2935_v28, %s2640_s24  ;;  %4591 = vst [vmem:[#allocation8_spill] sm:$0xff] %v2978_v50  ;;  %4592 = vst [vmem:[#allocation9_spill] sm:$0xff] %v2982_v54  ;;  %v535_v55 = vrot.slane %v2969_v46, 1  ;;  %v2987_v60 = vld [vmem:[#allocation2 + $0xc8] sm:$0xff]  ;;  %v367_v61 = vmax.f32 %v335_v47, 0.0  ;;  %v3000_v63 = vsel %vm506_vm2, %v542_v48, %v543_v51  ;;  %v547_v2 = vrot.slane %v2985_v59, 1 }
  0x3e   : > { %597 = vrot.lane.b32.xlu1 %v2940_v31, %s2640_s24  ;;  %4593 = vst [vmem:[#allocation10_spill] sm:$0xff] %v2987_v60  ;;  %398 = vst.msk [vmem:[#allocation2 + $0x151] sm:$0xff] %vm248_vm0, %v364_v49  ;;  %v2990_v62 = vld [vmem:[#allocation2 + $0xa0] sm:$0x3]  ;;  %v548_v4 = vrot.slane %v2987_v60, 1  ;;  %v552_v22 = vrot.slane %v3008_v9, 1 }
  0x3f   : > { %399 = vst.msk [vmem:[#allocation2 + $0x159] sm:$0xff] %vm248_vm0, %v365_v52  ;;  %400 = vst.msk [vmem:[#allocation2 + $0x169] sm:$0xff] %vm248_vm0, %v366_v53  ;;  %v3005_v5 = vsel %vm506_vm2, %v533_v30, %v535_v55  ;;  %v540_v7 = vrot.slane %v2990_v62, 1  ;;  %v3010_v14 = vld [vmem:[#allocation2 + $0xe0] sm:$0xff]  ;;  %v3012_v15 = vld [vmem:[#allocation2 + $0xb8] sm:$0x3] }
  0x40   : > { %401 = vst.msk [vmem:[#allocation2 + $0x171] sm:$0xff] %vm248_vm0, %v367_v61  ;;  %4594 = vst [vmem:[#allocation11_spill] sm:$0xff] %v3000_v63  ;;  %v3019_v21 = vsel %vm506_vm2, %v547_v2, %v548_v4  ;;  %v553_v24 = vrot.slane %v3010_v14, 1  ;;  %v545_v30 = vrot.slane %v3012_v15, 1  ;;  %v3027_v32 = vld [vmem:[#allocation2 + $0xf0] sm:$0xff]  ;;  %v3029_v37 = vld [vmem:[#allocation2 + $0xf8] sm:$0xff] }
  0x41   : > { %607 = vrot.lane.b32.xlu0 %v2954_v36, %s2640_s24  ;;  %4595 = vst [vmem:[#allocation12_spill] sm:$0xff] %v3005_v5  ;;  %4596 = vst [vmem:[#allocation13_spill] sm:$0xff] %v3010_v14  ;;  %v3024_v29 = vsel %vm506_vm2, %v538_v38, %v540_v7  ;;  %v3031_v40 = vld [vmem:[#allocation2 + $0xd0] sm:$0x3]  ;;  %v557_v38 = vrot.slane %v3027_v32, 1  ;;  %v558_v44 = vrot.slane %v3029_v37, 1 }
  0x42   : > { %601 = vrot.lane.b32.xlu1 %v2962_v41, %s2640_s24  ;;  %4597 = vst [vmem:[#allocation14_spill] sm:$0xff] %v3019_v21  ;;  %4598 = vst [vmem:[#allocation15_spill] sm:$0xff] %v3024_v29  ;;  %v3038_v42 = vsel %vm506_vm2, %v552_v22, %v553_v24  ;;  %v3043_v45 = vsel %vm506_vm2, %v543_v51, %v545_v30  ;;  %v550_v47 = vrot.slane %v3031_v40, 1  ;;  %v3046_v48 = vld [vmem:[#allocation2 + $0x108] sm:$0xff]  ;;  %v3048_v49 = vld [vmem:[#allocation2 + $0x110] sm:$0xff] }
  0x43   : > { %4599 = vst [vmem:[#allocation16_spill] sm:$0xff] %v3029_v37  ;;  %4600 = vst [vmem:[#allocation17_spill] sm:$0xff] %v3038_v42  ;;  %v3050_v52 = vld [vmem:[#allocation2 + $0xe8] sm:$0x3]  ;;  %v3057_v53 = vsel %vm506_vm2, %v557_v38, %v558_v44  ;;  %v562_v51 = vrot.slane %v3046_v48, 1  ;;  %v563_v55 = vrot.slane %v3048_v49, 1 }
  0x44   : > { %4601 = vst [vmem:[#allocation18_spill] sm:$0xff] %v3043_v45  ;;  %4602 = vst [vmem:[#allocation19_spill] sm:$0xff] %v3057_v53  ;;  %v3062_v61 = vsel %vm506_vm2, %v548_v4, %v550_v47  ;;  %v555_v2 = vrot.slane %v3050_v52, 1  ;;  %v3065_v7 = vld [vmem:[#allocation2 + $0x120] sm:$0xff]  ;;  %v3067_v22 = vld [vmem:[#allocation2 + $0x128] sm:$0xff] }
  0x45   : > { %611 = vrot.lane.b32.xlu0 %v2978_v50, %s2640_s24  ;;  %4603 = vst [vmem:[#allocation20_spill] sm:$0xff] %v3062_v61  ;;  %v3069_v30 = vld [vmem:[#allocation2 + $0x100] sm:$0x3]  ;;  %v3076_v38 = vsel %vm506_vm2, %v562_v51, %v563_v55  ;;  %v567_v4 = vrot.slane %v3065_v7, 1  ;;  %v568_v47 = vrot.slane %v3067_v22, 1 }
  0x46   : > { %605 = vrot.lane.b32.xlu1 %v2982_v54, %s2640_s24  ;;  %4604 = vst [vmem:[#allocation21_spill] sm:$0xff] %v3076_v38  ;;  %v3081_v0 = vsel %vm506_vm2, %v553_v24, %v555_v2  ;;  %v3105_v50 = vld [vmem:[#allocation2 + $0x158] sm:$0xff]  ;;  %v3122_v36 = vld [vmem:[#allocation2 + $0x168] sm:$0xff]  ;;  %v3141_v41 = vld [vmem:[#allocation2 + $0x160] sm:$0x3] }
  0x47   : > { %4605 = vst [vmem:[#allocation22_spill] sm:$0xff] %v3081_v0  ;;  %v3095_v51 = vsel %vm506_vm2, %v567_v4, %v568_v47  ;;  %v3124_v54 = vld [vmem:[#allocation2 + $0x170] sm:$0xff]  ;;  %v3156_v20 = vld [vmem:[#allocation2 + $0x178] sm:$0x3] }
  0x48   : > { %4606 = vst [vmem:[#allocation23_spill] sm:$0xff] %v3095_v51 }
  0x49   : > { %615 = vrot.lane.b32.xlu0 %v3000_v63, %s2640_s24  ;;  %v3086_v63 = vld [vmem:[#allocation2 + $0x140] sm:$0xff] }
  0x4a   : > { %609 = vrot.lane.b32.xlu1 %v3005_v5, %s2640_s24  ;;  %v573_v2 = vrot.slane %v3086_v63, 1 }
  0x4d   : > { %619 = vrot.lane.b32.xlu0 %v3019_v21, %s2640_s24  ;;  %v3084_v21 = vld [vmem:[#allocation2 + $0x138] sm:$0xff] }
  0x4e   : > { %613 = vrot.lane.b32.xlu1 %v3024_v29, %s2640_s24  ;;  %v572_v24 = vrot.slane %v3084_v21, 1  ;;  %v3103_v29 = vld [vmem:[#allocation2 + $0x150] sm:$0xff] }
  0x50   : > { %v3114_v4 = vsel %vm506_vm2, %v572_v24, %v573_v2 }
  0x51   : > { %623 = vrot.lane.b32.xlu0 %v3038_v42, %s2640_s24  ;;  %v560_v42 = vrot.slane %v3069_v30, 1  ;;  %4608 = vst [vmem:[#allocation25_spill] sm:$0xff] %v3114_v4 }
  0x52   : > { %617 = vrot.lane.b32.xlu1 %v3043_v45, %s2640_s24 }
  0x55   : > { %627 = vrot.lane.b32.xlu0 %v3057_v53, %s2640_s24  ;;  %v3088_v53 = vld [vmem:[#allocation2 + $0x118] sm:$0x3] }
  0x56   : > { %621 = vrot.lane.b32.xlu1 %v3062_v61, %s2640_s24  ;;  %v3100_v61 = vsel %vm506_vm2, %v558_v44, %v560_v42  ;;  %v565_v45 = vrot.slane %v3088_v53, 1  ;;  %v577_v42 = vrot.slane %v3103_v29, 1  ;;  %v578_v44 = vrot.slane %v3105_v50, 1 }
  0x57   : > { %4607 = vst [vmem:[#allocation24_spill] sm:$0xff] %v3100_v61 }
  0x58   : > { %v3133_v24 = vsel %vm506_vm2, %v577_v42, %v578_v44 }
  0x59   : > { %631 = vrot.lane.b32.xlu0 %v3076_v38, %s2640_s24  ;;  %v3107_v38 = vld [vmem:[#allocation2 + $0x130] sm:$0x3]  ;;  %4610 = vst [vmem:[#allocation27_spill] sm:$0xff] %v3133_v24 }
  0x5a   : > { %625 = vrot.lane.b32.xlu1 %v3081_v0, %s2640_s24  ;;  %v3119_v0 = vsel %vm506_vm2, %v563_v55, %v565_v45  ;;  %v570_v5 = vrot.slane %v3107_v38, 1  ;;  %v582_v45 = vrot.slane %v3122_v36, 1  ;;  %v583_v55 = vrot.slane %v3124_v54, 1 }
  0x5b   : > { %4609 = vst [vmem:[#allocation26_spill] sm:$0xff] %v3119_v0 }
  0x5c   : > { %v3148_v42 = vsel %vm506_vm2, %v582_v45, %v583_v55 }
  0x5d   : > { %635 = vrot.lane.b32.xlu0 %v3095_v51, %s2640_s24  ;;  %v3126_v51 = vld [vmem:[#allocation2 + $0x148] sm:$0x3]  ;;  %4612 = vst [vmem:[#allocation29_spill] sm:$0xff] %v3148_v42 }
  0x5e   : > { %629 = vrot.lane.b32.xlu1 %v3100_v61, %s2640_s24  ;;  %v3138_v61 = vsel %vm506_vm2, %v568_v47, %v570_v5  ;;  %v575_v28 = vrot.slane %v3126_v51, 1  ;;  %v580_v47 = vrot.slane %v3141_v41, 1 }
  0x5f   : > { %4611 = vst [vmem:[#allocation28_spill] sm:$0xff] %v3138_v61 }
  0x60   : > { %v3153_v5 = vsel %vm506_vm2, %v573_v2, %v575_v28  ;;  %v3166_v28 = vsel %vm506_vm2, %v578_v44, %v580_v47  ;;  %v585_v2 = vrot.slane %v3156_v20, 1  ;;  %v687_v44 = vrot.slane %v2823_v12, 2 }
  0x61   : > { %639 = vrot.lane.b32.xlu0 %v3114_v4, %s2640_s24  ;;  %v684_v4 = vrot.slane %v2819_v10, 2  ;;  %4613 = vst [vmem:[#allocation30_spill] sm:$0xff] %v3153_v5  ;;  %v689_v10 = vrot.slane %v2871_v58, 2  ;;  %4614 = vst [vmem:[#allocation31_spill] sm:$0xff] %v3166_v28 }
  0x62   : > { %633 = vrot.lane.b32.xlu1 %v3119_v0, %s2640_s24  ;;  %v685_v0 = vrot.slane %v2821_v11, 2  ;;  %v690_v11 = vrot.slane %v2878_v1, 2 }
  0x64   : > { %v686_v45 = vsel %vm683_vm3, %v684_v4, %v685_v0  ;;  %v694_v4 = vrot.slane %v2867_v56, 2 }
  0x65   : > { %643 = vrot.lane.b32.xlu0 %v3133_v24, %s2640_s24  ;;  %v695_v24 = vrot.slane %v2869_v57, 2 }
  0x66   : > { %637 = vrot.lane.b32.xlu1 %v3138_v61, %s2640_s24  ;;  %v697_v61 = vrot.slane %v2905_v18, 2 }
  0x67   : > { %v3186_v47 = vsel %vm683_vm3, %v694_v4, %v695_v24  ;;  %v705_v4 = vrot.slane %v2903_v17, 2 }
  0x69   : > { %647 = vrot.lane.b32.xlu0 %v3148_v42, %s2640_s24  ;;  %v3173_v42 = vsel %vm683_vm3, %v689_v10, %v690_v11  ;;  %v700_v10 = vrot.slane %v2888_v6, 2 }
  0x6a   : > { %641 = vrot.lane.b32.xlu1 %v3153_v5, %s2640_s24  ;;  %v3178_v5 = vsel %vm506_vm2, %v583_v55, %v585_v2  ;;  %v692_v55 = vrot.slane %v2891_v8, 2  ;;  %v704_v2 = vrot.slane %v2901_v16, 2  ;;  %v709_v8 = vrot.slane %v2924_v25, 2 }
  0x6b   : > { %4615 = vst [vmem:[#allocation32_spill] sm:$0xff] %v3178_v5 }
  0x6d   : > { %764 = vrot.lane.b32.xlu0 %v686_v45, %s2641_s25  ;;  %v699_v45 = vrot.slane %v2881_v3, 2 }
  0x6e   : > { %645 = vrot.lane.b32.xlu1 %v3166_v28, %s2640_s24  ;;  %v688_v28 = vsel %vm683_vm3, %v685_v0, %v687_v44  ;;  %v3209_v0 = vsel %vm683_vm3, %v704_v2, %v705_v4  ;;  %v3214_v44 = vsel %vm683_vm3, %v695_v24, %v697_v61  ;;  %v707_v61 = vrot.slane %v2947_v35, 2 }
  0x6f   : > { %v3196_v12 = vsel %vm683_vm3, %v699_v45, %v700_v10  ;;  %4616 = vst [vmem:[#allocation33_spill] sm:$0xff] %v3209_v0  ;;  %v714_v45 = vrot.slane %v2943_v33, 2  ;;  %v719_v24 = vrot.slane %v2958_v39, 2 }
  0x71   : > { %768 = vrot.lane.b32.xlu0 %v3173_v42, %s2641_s25 }
  0x72   : > { %649 = vrot.lane.b32.xlu1 %v3178_v5, %s2640_s24  ;;  %v3201_v5 = vsel %vm683_vm3, %v690_v11, %v692_v55  ;;  %v702_v11 = vrot.slane %v2928_v27, 2  ;;  %v715_v55 = vrot.slane %v2945_v34, 2  ;;  %s4199_s24 = scalar_lea.vmem %s4507_s2, %s2402_s15 }
  0x74   : > { %v3227_v2 = vsel %vm683_vm3, %v700_v10, %v702_v11  ;;  %v3235_v27 = vsel %vm683_vm3, %v714_v45, %v715_v55  ;;  %v712_v10 = vrot.slane %v2969_v46, 2  ;;  %v724_v11 = vrot.slane %v2985_v59, 2 }
  0x75   : > { %772 = vrot.lane.b32.xlu0 %v3186_v47, %s2641_s25  ;;  %v725_v45 = vrot.slane %v2987_v60, 2 }
  0x76   : > { %766 = vrot.lane.b32.xlu1 %v688_v28, %s2641_s25  ;;  %v710_v28 = vrot.slane %v2926_v26, 2 }
  0x77   : > { %v3261_v46 = vsel %vm683_vm3, %v724_v11, %v725_v45  ;;  %v735_v11 = vrot.slane %v3029_v37, 2 }
  0x78   : > { %v3222_v18 = vsel %vm683_vm3, %v709_v8, %v710_v28  ;;  %v720_v8 = vrot.slane %v2965_v43, 2  ;;  %v3253_v43 = vsel %vm683_vm3, %v710_v28, %v712_v10  ;;  %v722_v28 = vrot.slane %v3012_v15, 2 }
  0x79   : > { %776 = vrot.lane.b32.xlu0 %v3196_v12, %s2641_s25  ;;  %v734_v10 = vrot.slane %v3027_v32, 2 }
  0x7a   : > { %770 = vrot.lane.b32.xlu1 %v3201_v5, %s2641_s25  ;;  %v3248_v35 = vsel %vm683_vm3, %v719_v24, %v720_v8  ;;  %v730_v24 = vrot.slane %v3010_v14, 2  ;;  %v3279_v14 = vsel %vm683_vm3, %v720_v8, %v722_v28  ;;  %v732_v8 = vrot.slane %v3050_v52, 2 }
  0x7b   : > { %v3287_v15 = vsel %vm683_vm3, %v734_v10, %v735_v11  ;;  %v744_v28 = vrot.slane %v3065_v7, 2  ;;  %v749_v10 = vrot.slane %v3084_v21, 2  ;;  %v750_v7 = vrot.slane %v3086_v63, 2 }
  0x7c   : > { %v755_v21 = vrot.slane %v3105_v50, 2  ;;  %v760_v50 = vrot.slane %v3124_v54, 2  ;;  %v757_v54 = vrot.slane %v3141_v41, 2 }
  0x7d   : > { %780 = vrot.lane.b32.xlu0 %v3209_v0, %s2641_s25  ;;  %v3240_v0 = vsel %vm683_vm3, %v705_v4, %v707_v61  ;;  %v717_v4 = vrot.slane %v2990_v62, 2  ;;  %v729_v61 = vrot.slane %v3008_v9, 2 }
  0x7e   : > { %774 = vrot.lane.b32.xlu1 %v3214_v44, %s2641_s25 }
  0x7f   : > { %v3266_v60 = vsel %vm683_vm3, %v715_v55, %v717_v4  ;;  %v3274_v62 = vsel %vm683_vm3, %v729_v61, %v730_v24  ;;  %v727_v55 = vrot.slane %v3031_v40, 2  ;;  %v739_v4 = vrot.slane %v3046_v48, 2 }
  0x80   : > { %v740_v61 = vrot.slane %v3048_v49, 2  ;;  %v745_v48 = vrot.slane %v3067_v22, 2  ;;  %v3305_v49 = vsel %vm683_vm3, %v730_v24, %v732_v8  ;;  %v742_v24 = vrot.slane %v3088_v53, 2 }
  0x81   : > { %784 = vrot.lane.b32.xlu0 %v3222_v18, %s2641_s25  ;;  %v3292_v37 = vsel %vm683_vm3, %v725_v45, %v727_v55  ;;  %v737_v45 = vrot.slane %v3069_v30, 2  ;;  %v3326_v30 = vsel %vm683_vm3, %v749_v10, %v750_v7  ;;  %v754_v55 = vrot.slane %v3103_v29, 2 }
  0x82   : > { %778 = vrot.lane.b32.xlu1 %v3227_v2, %s2641_s25  ;;  %v3300_v40 = vsel %vm683_vm3, %v739_v4, %v740_v61  ;;  %v3313_v52 = vsel %vm683_vm3, %v744_v28, %v745_v48  ;;  %4617 = vst [vmem:[#allocation34_spill] sm:$0xff] %v3326_v30  ;;  %v3333_v63 = vsel %vm683_vm3, %v740_v61, %v742_v24  ;;  %v747_v53 = vrot.slane %v3107_v38, 2 }
  0x83   : > { %v3318_v22 = vsel %vm683_vm3, %v735_v11, %v737_v45  ;;  %v3341_v11 = vsel %vm683_vm3, %v754_v55, %v755_v21  ;;  %v759_v29 = vrot.slane %v3122_v36, 2  ;;  %v752_v38 = vrot.slane %v3126_v51, 2 }
  0x84   : > { %4618 = vst [vmem:[#allocation35_spill] sm:$0xff] %v3341_v11  ;;  %v3348_v61 = vsel %vm683_vm3, %v745_v48, %v747_v53  ;;  %v3373_v10 = vsel %vm683_vm3, %v755_v21, %v757_v54  ;;  %v762_v24 = vrot.slane %v3156_v20, 2 }
  0x85   : > { %788 = vrot.lane.b32.xlu0 %v3235_v27, %s2641_s25  ;;  %v3356_v28 = vsel %vm683_vm3, %v759_v29, %v760_v50  ;;  %v3361_v36 = vsel %vm683_vm3, %v750_v7, %v752_v38  ;;  %4621 = vst [vmem:[#allocation38_spill] sm:$0xff] %v3373_v10 }
  0x86   : > { %782 = vrot.lane.b32.xlu1 %v3240_v0, %s2641_s25  ;;  %4619 = vst [vmem:[#allocation36_spill] sm:$0xff] %v3356_v28  ;;  %4620 = vst [vmem:[#allocation37_spill] sm:$0xff] %v3361_v36  ;;  %v3385_v7 = vsel %vm683_vm3, %v760_v50, %v762_v24 }
  0x87   : > { %4622 = vst [vmem:[#allocation39_spill] sm:$0xff] %v3385_v7 }
  0x89   : > { %792 = vrot.lane.b32.xlu0 %v3248_v35, %s2641_s25 }
  0x8a   : > { %786 = vrot.lane.b32.xlu1 %v3253_v43, %s2641_s25 }
  0x8d   : > { %796 = vrot.lane.b32.xlu0 %v3261_v46, %s2641_s25  ;;  %v3330_v4 = vpop.permute.xlu0 %587 }
  0x8e   : > { %790 = vrot.lane.b32.xlu1 %v3266_v60, %s2641_s25 }
  0x91   : > { %800 = vrot.lane.b32.xlu0 %v3274_v62, %s2641_s25 }
  0x92   : > { %794 = vrot.lane.b32.xlu1 %v3279_v14, %s2641_s25 }
  0x95   : > { %804 = vrot.lane.b32.xlu0 %v3287_v15, %s2641_s25 }
  0x96   : > { %798 = vrot.lane.b32.xlu1 %v3292_v37, %s2641_s25 }
  0x99   : > { %808 = vrot.lane.b32.xlu0 %v3300_v40, %s2641_s25 }
  0x9a   : > { %802 = vrot.lane.b32.xlu1 %v3305_v49, %s2641_s25 }
  0x9d   : > { %812 = vrot.lane.b32.xlu0 %v3313_v52, %s2641_s25 }
  0x9e   : > { %806 = vrot.lane.b32.xlu1 %v3318_v22, %s2641_s25  ;;  %v3345_v8 = vpop.permute.xlu0 %589 }
  0xa1   : > { %816 = vrot.lane.b32.xlu0 %v3326_v30, %s2641_s25 }
  0xa2   : > { %810 = vrot.lane.b32.xlu1 %v3333_v63, %s2641_s25 }
  0xa5   : > { %820 = vrot.lane.b32.xlu0 %v3341_v11, %s2641_s25 }
  0xa6   : > { %814 = vrot.lane.b32.xlu1 %v3348_v61, %s2641_s25 }
  0xa7   : > { %v3358_v45 = vpop.permute.xlu0 %595 }
  0xa8   : > { %v3364_v48 = vpop.permute.xlu1 %591 }
  0xa9   : > { %824 = vrot.lane.b32.xlu0 %v3356_v28, %s2641_s25 }
  0xaa   : > { %818 = vrot.lane.b32.xlu1 %v3361_v36, %s2641_s25 }
  0xab   : > { %v3370_v51 = vpop.permute.xlu0 %599 }
  0xac   : > { %v3376_v55 = vpop.permute.xlu1 %593 }
  0xad   : > { %862 = vrot.lane.b32.xlu0 %v2871_v58, %s2642_s26 }
  0xae   : > { %822 = vrot.lane.b32.xlu1 %v3373_v10, %s2641_s25 }
  0xaf   : > { %v3382_v41 = vpop.permute.xlu0 %603 }
  0xb0   : > { %v3387_v53 = vpop.permute.xlu1 %597 }
  0xb1   : > { %866 = vrot.lane.b32.xlu0 %v2867_v56, %s2642_s26 }
  0xb2   : > { %826 = vrot.lane.b32.xlu1 %v3385_v7, %s2641_s25  ;;  %s2403_s25 = sshll.u32 %s2805_s19, 3 }
  0xb3   : > { %v3393_v20 = vpop.permute.xlu0 %607  ;;  %s4434_s5 = scalar_lea.vmem %s4509_s4, %s2403_s25 }
  0xb4   : > { %v3395_v21 = vpop.permute.xlu1 %601 }
  0xb5   : > { %870 = vrot.lane.b32.xlu0 %v2881_v3, %s2642_s26 }
  0xb6   : > { %864 = vrot.lane.b32.xlu1 %v2878_v1, %s2642_s26 }
  0xb7   : > { %v3401_v58 = vpop.permute.xlu0 %611 }
  0xb8   : > { %4623 = vst [vmem:[#allocation40_spill] sm:$0xff] %v3401_v58  ;;  %v3403_v29 = vpop.permute.xlu1 %605 }
  0xb9   : > { %874 = vrot.lane.b32.xlu0 %v2901_v16, %s2642_s26 }
  0xba   : > { %868 = vrot.lane.b32.xlu1 %v2869_v57, %s2642_s26 }
  0xbb   : > { %v3409_v50 = vpop.permute.xlu0 %615 }
  0xbc   : > { %4624 = vst [vmem:[#allocation41_spill] sm:$0xff] %v3409_v50  ;;  %v3411_v38 = vpop.permute.xlu1 %609  ;;  %v4673_v50 = vld [vmem:[#allocation18_spill] sm:$0xff] }
  0xbd   : > { %878 = vrot.lane.b32.xlu0 %v2924_v25, %s2642_s26 }
  0xbe   : > { %872 = vrot.lane.b32.xlu1 %v2888_v6, %s2642_s26 }
  0xbf   : > { %v3417_v1 = vpop.permute.xlu0 %619 }
  0xc0   : > { %4625 = vst [vmem:[#allocation42_spill] sm:$0xff] %v3417_v1  ;;  %v3419_v54 = vpop.permute.xlu1 %613 }
  0xc1   : > { %882 = vrot.lane.b32.xlu0 %v2943_v33, %s2642_s26 }
  0xc2   : > { %876 = vrot.lane.b32.xlu1 %v2903_v17, %s2642_s26 }
  0xc3   : > { %v3425_v24 = vpop.permute.xlu0 %623 }
  0xc4   : > { %4626 = vst [vmem:[#allocation43_spill] sm:$0xff] %v3425_v24  ;;  %v3427_v28 = vpop.permute.xlu1 %617 }
  0xc5   : > { %4627 = vst [vmem:[#allocation44_spill] sm:$0xff] %v3427_v28  ;;  %886 = vrot.lane.b32.xlu0 %v2958_v39, %s2642_s26  ;;  %v4674_v28 = vld [vmem:[#allocation11_spill] sm:$0xff] }
  0xc6   : > { %880 = vrot.lane.b32.xlu1 %v2926_v26, %s2642_s26 }
  0xc7   : > { %v3433_v7 = vpop.permute.xlu0 %627 }
  0xc8   : > { %4628 = vst [vmem:[#allocation45_spill] sm:$0xff] %v3433_v7  ;;  %v3435_v1 = vpop.permute.xlu1 %621  ;;  %v1725_v7 = vld [vmem:[%s4506_s1] sm:$0xff] }
  0xc9   : > { %4629 = vst [vmem:[#allocation46_spill] sm:$0xff] %v3435_v1  ;;  %966 = vrot.lane.b32.xlu0 %v2921_v23, %s2643_s27  ;;  %v1726_v1 = vld [vmem:[%s4506_s1 + $0x8] sm:$0xff] }
  0xca   : > { %884 = vrot.lane.b32.xlu1 %v2945_v34, %s2642_s26  ;;  %v2536_v23 = vpack.c.bf16 %v1726_v1, %v1725_v7 }
  0xcb   : > { %v3441_v24 = vpop.permute.xlu0 %631 }
  0xcc   : > { %4630 = vst [vmem:[#allocation47_spill] sm:$0xff] %v3441_v24  ;;  %v3443_v11 = vpop.permute.xlu1 %625  ;;  %2537 = vmatprep.subr.bf16.mxu0 %v2536_v23  ;;  %2544 = vmatprep.subr.bf16.mxu1 %v2536_v23 }
  0xcd   : > { %4631 = vst [vmem:[#allocation48_spill] sm:$0xff] %v3443_v11  ;;  %1067 = vrot.lane.b32.xlu0 %v3201_v5, %s2644_s28  ;;  %2539 = vmatpush3.bf16.msra.mxu0 %v2536_v23  ;;  %v1727_v5 = vld [vmem:[%s4506_s1 + $0x10] sm:$0xff]  ;;  %v4649_v11 = vld [vmem:[#allocation33_spill] sm:$0xff] }
  0xce   : > { %964 = vrot.lane.b32.xlu1 %v2910_v19, %s2643_s27  ;;  %v1728_v19 = vld [vmem:[%s4506_s1 + $0x18] sm:$0xff]  ;;  %2547 = vmatpush3.bf16.msra.mxu1 %v2536_v23 }
  0xcf   : > { %v3455_v10 = vpop.permute.xlu0 %635  ;;  %v2540_v7 = vpack.c.bf16 %v1728_v19, %v1727_v5 }
  0xd0   : > { %4632 = vst [vmem:[#allocation49_spill] sm:$0xff] %v3455_v10  ;;  %v3457_v24 = vpop.permute.xlu1 %629 }
  0xd1   : > { %4633 = vst [vmem:[#allocation50_spill] sm:$0xff] %v3457_v24  ;;  %1165 = vrot.lane.b32.xlu0 %v2869_v57, %s2645_s7  ;;  %2541 = vmatprep.subr.bf16.mxu0 %v2540_v7  ;;  %v1729_v57 = vld [vmem:[%s4506_s1 + $0x20] sm:$0xf] }
  0xd2   : > { %1065 = vrot.lane.b32.xlu1 %v3173_v42, %s2644_s28  ;;  %2545 = vmatprep.subr.bf16.mxu1 %v2540_v7 }
  0xd3   : > { %v3469_v1 = vpop.permute.xlu0 %639  ;;  %2543 = vmatpush3.bf16.msra.mxu0 %v2540_v7  ;;  %2548 = vmatpush3.bf16.msra.mxu1 %v2540_v7 }
  0xd4   : > { %4634 = vst [vmem:[#allocation51_spill] sm:$0xff] %v3469_v1  ;;  %v3471_v10 = vpop.permute.xlu1 %633  ;;  %2486 = vmatprep.subr.msk.mxu0 %vm1827_vm4, %v1729_v57  ;;  %2546 = vmatprep.subr.msk.mxu1 %vm1827_vm4, %v1729_v57 }
  0xd5   : > { %4635 = vst [vmem:[#allocation52_spill] sm:$0xff] %v3471_v10  ;;  %968 = vrot.lane.b32.xlu0 %v2897_v13, %s2643_s27  ;;  %v4646_v10 = vld [vmem:[#allocation4_spill] sm:$0xff] }
  0xd6   : > { %1163 = vrot.lane.b32.xlu1 %v2867_v56, %s2645_s7 }
  0xd7   : > { %v3480_v42 = vpop.permute.xlu0 %643  ;;  %2487 = vmatpush3.msk.msra.mxu0 %vm1827_vm4, %v1729_v57  ;;  %2549 = vmatpush3.msk.msra.mxu1 %vm1827_vm4, %v1729_v57 }
  0xd8   : > { %4636 = vst [vmem:[#allocation53_spill] sm:$0xff] %v3480_v42  ;;  %v3482_v23 = vpop.permute.xlu1 %637 }
  0xd9   : > { %4637 = vst [vmem:[#allocation54_spill] sm:$0xff] %v3482_v23  ;;  %1366 = vrot.lane.b32.xlu0 %v3186_v47, %s2646_s14 }
  0xda   : > { %1265 = vrot.lane.b32.xlu1 %v2897_v13, %s2647_s20 }
  0xdb   : > { %v3488_v56 = vpop.permute.xlu0 %647 }
  0xdc   : > { %4638 = vst [vmem:[#allocation55_spill] sm:$0xff] %v3488_v56  ;;  %v3490_v5 = vpop.permute.xlu1 %641 }
  0xdd   : > { %4639 = vst [vmem:[#allocation56_spill] sm:$0xff] %v3490_v5  ;;  %1069 = vrot.lane.b32.xlu0 %v3186_v47, %s2644_s28 }
  0xde   : > { %1267 = vrot.lane.b32.xlu1 %v2940_v31, %s2647_s20 }
  0xdf   : > { %v3496_v19 = vpop.permute.xlu0 %764 }
  0xe0   : > { %v3498_v7 = vpop.permute.xlu1 %645 }
  0xe1   : > { %4640 = vst [vmem:[#allocation57_spill] sm:$0xff] %v3498_v7  ;;  %1071 = vrot.lane.b32.xlu0 %v3214_v44, %s2644_s28  ;;  %v4642_v7 = vld [vmem:[#allocation3_spill] sm:$0xff] }
  0xe2   : > { %970 = vrot.lane.b32.xlu1 %v2940_v31, %s2643_s27 }
  0xe3   : > { %v3504_v13 = vpop.permute.xlu0 %768 }
  0xe4   : > { %v3506_v57 = vpop.permute.xlu1 %649 }
  0xe5   : > { %4641 = vst [vmem:[#allocation58_spill] sm:$0xff] %v3506_v57  ;;  %1169 = vrot.lane.b32.xlu0 %v2888_v6, %s2645_s7  ;;  %v4643_v57 = vld [vmem:[#allocation6_spill] sm:$0xff] }
  0xe6   : > { %1368 = vrot.lane.b32.xlu1 %v3214_v44, %s2646_s14 }
  0xe7   : > { %v3512_v47 = vpop.permute.xlu0 %772 }
  0xe8   : > { %v3514_v56 = vpop.permute.xlu1 %766 }
  0xe9   : > { %972 = vrot.lane.b32.xlu0 %v4642_v7, %s2643_s27 }
  0xea   : > { %1167 = vrot.lane.b32.xlu1 %v2881_v3, %s2645_s7 }
  0xeb   : > { %v3520_v31 = vpop.permute.xlu0 %776 }
  0xec   : > { %v3522_v42 = vpop.permute.xlu1 %770 }
  0xed   : > { %1370 = vrot.lane.b32.xlu0 %v3196_v12, %s2646_s14 }
  0xee   : > { %1269 = vrot.lane.b32.xlu1 %v4642_v7, %s2647_s20 }
  0xef   : > { %v3528_v6 = vpop.permute.xlu0 %780 }
  0xf0   : > { %v3530_v44 = vpop.permute.xlu1 %774 }
  0xf1   : > { %1073 = vrot.lane.b32.xlu0 %v3196_v12, %s2644_s28 }
  0xf2   : > { %1271 = vrot.lane.b32.xlu1 %v4643_v57, %s2647_s20 }
  0xf3   : > { %v3536_v3 = vpop.permute.xlu0 %784 }
  0xf4   : > { %v3538_v1 = vpop.permute.xlu1 %778 }
  0xf5   : > { %1075 = vrot.lane.b32.xlu0 %v3227_v2, %s2644_s28 }
  0xf6   : > { %974 = vrot.lane.b32.xlu1 %v4643_v57, %s2643_s27 }
  0xf7   : > { %v3544_v7 = vpop.permute.xlu0 %788 }
  0xf8   : > { %4644 = vst [vmem:[#allocation3_spill] sm:$0xff] %v3544_v7  ;;  %v3546_v5 = vpop.permute.xlu1 %782 }
  0xf9   : > { %1173 = vrot.lane.b32.xlu0 %v2903_v17, %s2645_s7 }
  0xfa   : > { %1372 = vrot.lane.b32.xlu1 %v3227_v2, %s2646_s14 }
  0xfb   : > { %v3552_v12 = vpop.permute.xlu0 %792 }
  0xfc   : > { %4645 = vst [vmem:[#allocation6_spill] sm:$0xff] %v3552_v12  ;;  %v3554_v23 = vpop.permute.xlu1 %786  ;;  %v4652_v12 = vld [vmem:[#allocation9_spill] sm:$0xff] }
  0xfd   : > { %976 = vrot.lane.b32.xlu0 %v4646_v10, %s2643_s27 }
  0xfe   : > { %1171 = vrot.lane.b32.xlu1 %v2901_v16, %s2645_s7 }
  0xff   : > { %v3560_v57 = vpop.permute.xlu0 %796 }
 0x100   : > { %4647 = vst [vmem:[#allocation4_spill] sm:$0xff] %v3560_v57  ;;  %v3562_v24 = vpop.permute.xlu1 %790 }
 0x101   : > { %4648 = vst [vmem:[#allocation59_spill] sm:$0xff] %v3562_v24  ;;  %1374 = vrot.lane.b32.xlu0 %v4649_v11, %s2646_s14 }
 0x102   : > { %1273 = vrot.lane.b32.xlu1 %v4646_v10, %s2647_s20 }
 0x103   : > { %v3568_v17 = vpop.permute.xlu0 %800 }
 0x104   : > { %4650 = vst [vmem:[#allocation33_spill] sm:$0xff] %v3568_v17  ;;  %v3570_v2 = vpop.permute.xlu1 %794 }
 0x105   : > { %4651 = vst [vmem:[#allocation60_spill] sm:$0xff] %v3570_v2  ;;  %1077 = vrot.lane.b32.xlu0 %v4649_v11, %s2644_s28 }
 0x106   : > { %1275 = vrot.lane.b32.xlu1 %v4652_v12, %s2647_s20 }
 0x107   : > { %v3576_v16 = vpop.permute.xlu0 %804 }
 0x108   : > { %4653 = vst [vmem:[#allocation9_spill] sm:$0xff] %v3576_v16  ;;  %v3578_v57 = vpop.permute.xlu1 %798 }
 0x109   : > { %4654 = vst [vmem:[#allocation61_spill] sm:$0xff] %v3578_v57  ;;  %1079 = vrot.lane.b32.xlu0 %v3240_v0, %s2644_s28  ;;  %v4659_v57 = vld [vmem:[#allocation5_spill] sm:$0xff] }
 0x10a   : > { %978 = vrot.lane.b32.xlu1 %v4652_v12, %s2643_s27 }
 0x10b   : > { %v3584_v10 = vpop.permute.xlu0 %808 }
 0x10c   : > { %4655 = vst [vmem:[#allocation62_spill] sm:$0xff] %v3584_v10  ;;  %v3586_v17 = vpop.permute.xlu1 %802 }
 0x10d   : > { %4656 = vst [vmem:[#allocation63_spill] sm:$0xff] %v3586_v17  ;;  %1177 = vrot.lane.b32.xlu0 %v2926_v26, %s2645_s7 }
 0x10e   : > { %1376 = vrot.lane.b32.xlu1 %v3240_v0, %s2646_s14 }
 0x10f   : > { %v3592_v11 = vpop.permute.xlu0 %812 }
 0x110   : > { %4657 = vst [vmem:[#allocation64_spill] sm:$0xff] %v3592_v11  ;;  %v3594_v16 = vpop.permute.xlu1 %806  ;;  %v4664_v11 = vld [vmem:[#allocation12_spill] sm:$0xff] }
 0x111   : > { %4658 = vst [vmem:[#allocation65_spill] sm:$0xff] %v3594_v16  ;;  %980 = vrot.lane.b32.xlu0 %v4659_v57, %s2643_s27  ;;  %v4671_v16 = vld [vmem:[#allocation7_spill] sm:$0xff] }
 0x112   : > { %1175 = vrot.lane.b32.xlu1 %v2924_v25, %s2645_s7 }
 0x113   : > { %v3600_v12 = vpop.permute.xlu0 %816 }
 0x114   : > { %4660 = vst [vmem:[#allocation5_spill] sm:$0xff] %v3600_v12  ;;  %v3602_v10 = vpop.permute.xlu1 %810 }
 0x115   : > { %4661 = vst [vmem:[#allocation66_spill] sm:$0xff] %v3602_v10  ;;  %1378 = vrot.lane.b32.xlu0 %v3222_v18, %s2646_s14 }
 0x116   : > { %1277 = vrot.lane.b32.xlu1 %v4659_v57, %s2647_s20 }
 0x117   : > { %v3608_v26 = vpop.permute.xlu0 %820 }
 0x118   : > { %4662 = vst [vmem:[#allocation67_spill] sm:$0xff] %v3608_v26  ;;  %v3610_v0 = vpop.permute.xlu1 %814 }
 0x119   : > { %4663 = vst [vmem:[#allocation68_spill] sm:$0xff] %v3610_v0  ;;  %1081 = vrot.lane.b32.xlu0 %v3222_v18, %s2644_s28 }
 0x11a   : > { %1279 = vrot.lane.b32.xlu1 %v4664_v11, %s2647_s20 }
 0x11b   : > { %v3616_v25 = vpop.permute.xlu0 %824 }
 0x11c   : > { %4665 = vst [vmem:[#allocation12_spill] sm:$0xff] %v3616_v25  ;;  %v3618_v12 = vpop.permute.xlu1 %818 }
 0x11d   : > { %4666 = vst [vmem:[#allocation69_spill] sm:$0xff] %v3618_v12  ;;  %1083 = vrot.lane.b32.xlu0 %v3253_v43, %s2644_s28  ;;  %v4669_v12 = vld [vmem:[#allocation8_spill] sm:$0xff] }
 0x11e   : > { %982 = vrot.lane.b32.xlu1 %v4664_v11, %s2643_s27 }
 0x11f   : > { %v863_v57 = vpop.permute.xlu0 %862 }
 0x120   : > { %v3624_v26 = vpop.permute.xlu1 %822 }
 0x121   : > { %4667 = vst [vmem:[#allocation70_spill] sm:$0xff] %v3624_v26  ;;  %1181 = vrot.lane.b32.xlu0 %v2945_v34, %s2645_s7 }
 0x122   : > { %1380 = vrot.lane.b32.xlu1 %v3253_v43, %s2646_s14 }
 0x123   : > { %v3630_v18 = vpop.permute.xlu0 %866 }
 0x124   : > { %v3632_v25 = vpop.permute.xlu1 %826 }
 0x125   : > { %4668 = vst [vmem:[#allocation71_spill] sm:$0xff] %v3632_v25  ;;  %984 = vrot.lane.b32.xlu0 %v4669_v12, %s2643_s27  ;;  %v4670_v25 = vld [vmem:[#allocation15_spill] sm:$0xff] }
 0x126   : > { %1179 = vrot.lane.b32.xlu1 %v2943_v33, %s2645_s7 }
 0x127   : > { %v3638_v11 = vpop.permute.xlu0 %870 }
 0x128   : > { %v3640_v0 = vpop.permute.xlu1 %864 }
 0x129   : > { %1382 = vrot.lane.b32.xlu0 %v3235_v27, %s2646_s14 }
 0x12a   : > { %1281 = vrot.lane.b32.xlu1 %v4669_v12, %s2647_s20 }
 0x12b   : > { %v3646_v34 = vpop.permute.xlu0 %874 }
 0x12c   : > { %v3648_v43 = vpop.permute.xlu1 %868 }
 0x12d   : > { %1085 = vrot.lane.b32.xlu0 %v3235_v27, %s2644_s28 }
 0x12e   : > { %1283 = vrot.lane.b32.xlu1 %v4670_v25, %s2647_s20 }
 0x12f   : > { %v3654_v33 = vpop.permute.xlu0 %878 }
 0x130   : > { %v3656_v26 = vpop.permute.xlu1 %872 }
 0x131   : > { %1087 = vrot.lane.b32.xlu0 %v3266_v60, %s2644_s28 }
 0x132   : > { %986 = vrot.lane.b32.xlu1 %v4670_v25, %s2643_s27 }
 0x133   : > { %v3662_v12 = vpop.permute.xlu0 %882 }
 0x134   : > { %v3664_v10 = vpop.permute.xlu1 %876 }
 0x135   : > { %1185 = vrot.lane.b32.xlu0 %v4671_v16, %s2645_s7 }
 0x136   : > { %1384 = vrot.lane.b32.xlu1 %v3266_v60, %s2646_s14 }
 0x137   : > { %v3670_v27 = vpop.permute.xlu0 %886 }
 0x138   : > { %4672 = vst [vmem:[#allocation8_spill] sm:$0xff] %v3670_v27  ;;  %v3672_v17 = vpop.permute.xlu1 %880 }
 0x139   : > { %888 = vrot.lane.b32.xlu0 %v4671_v16, %s2642_s26 }
 0x13a   : > { %1183 = vrot.lane.b32.xlu1 %v2958_v39, %s2645_s7  ;;  %v2583_v39 = vld [vmem:[#allocation2] sm:$0xff] }
 0x13b   : > { %v967_v25 = vpop.permute.xlu0 %966  ;;  %v1462_v27 = vsel %vm248_vm0, %v2583_v39, %v3330_v4 }
 0x13c   : > { %v3678_v2 = vpop.permute.xlu1 %884 }
 0x13d   : > { %1287 = vrot.lane.b32.xlu0 %v4673_v50, %s2647_s20 }
 0x13e   : > { %1285 = vrot.lane.b32.xlu1 %v4674_v28, %s2647_s20 }
 0x13f   : > { %v1068_v60 = vpop.permute.xlu0 %1067 }
 0x140   : > { %v965_v30 = vpop.permute.xlu1 %964 }
 0x141   : > { %990 = vrot.lane.b32.xlu0 %v4673_v50, %s2643_s27  ;;  %v1495_v50 = vsel %vm1494_vm5, %v1462_v27, %v3496_v19 }
 0x142   : > { %988 = vrot.lane.b32.xlu1 %v4674_v28, %s2643_s27  ;;  %v1528_v28 = vsel %vm1527_vm6, %v1495_v50, %v863_v57  ;;  %v4675_v50 = vld [vmem:[#allocation10_spill] sm:$0xff] }
 0x143   : > { %v1166_v16 = vpop.permute.xlu0 %1165  ;;  %v1561_v58 = vsel %vm1560_vm7, %v1528_v28, %v965_v30 }
 0x144   : > { %v1066_v36 = vpop.permute.xlu1 %1065 }
 0x145   : > { %1388 = vrot.lane.b32.xlu0 %v3279_v14, %s2646_s14  ;;  %v1594_v4 = vsel %vm1593_vm8, %v1561_v58, %v1066_v36  ;;  %v2584_v58 = vld [vmem:[#allocation2 + $0x8] sm:$0xff] }
 0x146   : > { %1386 = vrot.lane.b32.xlu1 %v3248_v35, %s2646_s14 }
 0x147   : > { %v969_v7 = vpop.permute.xlu0 %968 }
 0x148   : > { %v1164_v24 = vpop.permute.xlu1 %1163 }
 0x149   : > { %1187 = vrot.lane.b32.xlu0 %v2985_v59, %s2645_s7  ;;  %v1627_v19 = vsel %vm1626_vm10, %v1594_v4, %v1164_v24  ;;  %v1463_v24 = vsel %vm248_vm0, %v2584_v58, %v3345_v8  ;;  %v4677_v8 = vld [vmem:[#allocation14_spill] sm:$0xff] }
 0x14a   : > { %1089 = vrot.lane.b32.xlu1 %v3248_v35, %s2644_s28  ;;  %v1496_v28 = vsel %vm1494_vm5, %v1463_v24, %v3514_v56 }
 0x14b   : > { %v1367_v39 = vpop.permute.xlu0 %1366  ;;  %v1529_v4 = vsel %vm1527_vm6, %v1496_v28, %v3640_v0  ;;  %v2585_v0 = vld [vmem:[#allocation2 + $0x18] sm:$0xff] }
 0x14c   : > { %v1266_v27 = vpop.permute.xlu1 %1265 }
 0x14d   : > { %v1660_v57 = vsel %vm1659_vm9, %v1627_v19, %v1266_v27  ;;  %1189 = vrot.lane.b32.xlu0 %v4675_v50, %s2645_s7  ;;  %v1562_v19 = vsel %vm1560_vm7, %v1529_v4, %v967_v25  ;;  %v4676_v27 = vld [vmem:[#allocation20_spill] sm:$0xff]  ;;  %v1464_v25 = vsel %vm248_vm0, %v2585_v0, %v3364_v48 }
 0x14e   : > { %1091 = vrot.lane.b32.xlu1 %v3279_v14, %s2644_s28  ;;  %v1693_v35 = vsel %vm1692_vm11, %v1660_v57, %v1367_v39  ;;  %v1595_v57 = vsel %vm1593_vm8, %v1562_v19, %v1068_v60 }
 0x14f   : > { %2488 = vmatprep.mubr.msk.f32.mxu0 %vm1730_vm12, %v1693_v35  ;;  %v1070_v30 = vpop.permute.xlu0 %1069 }
 0x150   : > { %v1268_v36 = vpop.permute.xlu1 %1267 }
 0x151   : > { %892 = vrot.lane.b32.xlu0 %v4675_v50, %s2642_s26 }
 0x152   : > { %890 = vrot.lane.b32.xlu1 %v2985_v59, %s2642_s26  ;;  %v1628_v59 = vsel %vm1626_vm10, %v1595_v57, %v1166_v16  ;;  %v1497_v16 = vsel %vm1494_vm5, %v1464_v25, %v3504_v13  ;;  %v2586_v57 = vld [vmem:[#allocation2 + $0x20] sm:$0xff] }
 0x153   : > { %v1072_v14 = vpop.permute.xlu0 %1071  ;;  %v1661_v56 = vsel %vm1659_vm9, %v1628_v59, %v1268_v36  ;;  %v1530_v24 = vsel %vm1527_vm6, %v1497_v16, %v3630_v18 }
 0x154   : > { %v971_v39 = vpop.permute.xlu1 %970  ;;  %v1563_v28 = vsel %vm1560_vm7, %v1530_v24, %v969_v7 }
 0x155   : > { %1291 = vrot.lane.b32.xlu0 %v4676_v27, %s2647_s20  ;;  %v1596_v4 = vsel %vm1593_vm8, %v1563_v28, %v1070_v30  ;;  %v1465_v30 = vsel %vm248_vm0, %v2586_v57, %v3376_v55 }
 0x156   : > { %1289 = vrot.lane.b32.xlu1 %v4677_v8, %s2647_s20  ;;  %v1498_v59 = vsel %vm1494_vm5, %v1465_v30, %v3522_v42 }
 0x157   : > { %v1170_v50 = vpop.permute.xlu0 %1169 }
 0x158   : > { %v1369_v35 = vpop.permute.xlu1 %1368 }
 0x159   : > { %v1694_v58 = vsel %vm1692_vm11, %v1661_v56, %v1369_v35  ;;  %994 = vrot.lane.b32.xlu0 %v4676_v27, %s2643_s27  ;;  %v4678_v56 = vld [vmem:[#allocation13_spill] sm:$0xff]  ;;  %v1531_v35 = vsel %vm1527_vm6, %v1498_v59, %v3648_v43 }
 0x15a   : > { %992 = vrot.lane.b32.xlu1 %v4677_v8, %s2643_s27  ;;  %2489 = vmatmul.mubr.msk.f32.vlgmr.msra.gmra.mrb[0].mxu0 %vm1730_vm12, %v1694_v58 }
 0x15b   : > { %v973_v60 = vpop.permute.xlu0 %972 }
 0x15c   : > { %v1168_v36 = vpop.permute.xlu1 %1167 }
 0x15d   : > { %1392 = vrot.lane.b32.xlu0 %v3292_v37, %s2646_s14  ;;  %v1629_v48 = vsel %vm1626_vm10, %v1596_v4, %v1168_v36  ;;  %v4680_v36 = vld [vmem:[#allocation17_spill] sm:$0xff] }
 0x15e   : > { %1390 = vrot.lane.b32.xlu1 %v3261_v46, %s2646_s14 }
 0x15f   : > { %v1371_v19 = vpop.permute.xlu0 %1370 }
 0x160   : > { %v1270_v27 = vpop.permute.xlu1 %1269 }
 0x161   : > { %v1662_v13 = vsel %vm1659_vm9, %v1629_v48, %v1270_v27  ;;  %1191 = vrot.lane.b32.xlu0 %v3008_v9, %s2645_s7 }
 0x162   : > { %1093 = vrot.lane.b32.xlu1 %v3261_v46, %s2644_s28  ;;  %v1695_v18 = vsel %vm1692_vm11, %v1662_v13, %v1371_v19  ;;  %v1564_v46 = vsel %vm1560_vm7, %v1531_v35, %v971_v39  ;;  %v4679_v39 = vld [vmem:[#allocation22_spill] sm:$0xff] }
 0x163   : > { %2491 = vmatprep.mubr.msk.f32.mxu0 %vm1730_vm12, %v1695_v18  ;;  %v1074_v7 = vpop.permute.xlu0 %1073  ;;  %v1597_v55 = vsel %vm1593_vm8, %v1564_v46, %v1072_v14  ;;  %v2587_v14 = vld [vmem:[#allocation2 + $0x30] sm:$0xff]  ;;  %v2588_v18 = vld [vmem:[#allocation2 + $0x38] sm:$0xff] }
 0x164   : > { %v1272_v8 = vpop.permute.xlu1 %1271  ;;  %v1630_v42 = vsel %vm1626_vm10, %v1597_v55, %v1170_v50  ;;  %v4681_v46 = vld [vmem:[#allocation16_spill] sm:$0xff] }
 0x165   : > { %1193 = vrot.lane.b32.xlu0 %v4678_v56, %s2645_s7  ;;  %v1663_v43 = vsel %vm1659_vm9, %v1630_v42, %v1272_v8 }
 0x166   : > { %1095 = vrot.lane.b32.xlu1 %v3292_v37, %s2644_s28 }
 0x167   : > { %v1076_v58 = vpop.permute.xlu0 %1075 }
 0x168   : > { %v975_v0 = vpop.permute.xlu1 %974 }
 0x169   : > { %896 = vrot.lane.b32.xlu0 %v4678_v56, %s2642_s26 }
 0x16a   : > { %894 = vrot.lane.b32.xlu1 %v3008_v9, %s2642_s26  ;;  %v1466_v9 = vsel %vm248_vm0, %v2587_v14, %v3358_v45 }
 0x16b   : > { %v1174_v25 = vpop.permute.xlu0 %1173  ;;  %v1499_v50 = vsel %vm1494_vm5, %v1466_v9, %v3512_v47 }
 0x16c   : > { %v1373_v16 = vpop.permute.xlu1 %1372  ;;  %v1532_v4 = vsel %vm1527_vm6, %v1499_v50, %v3638_v11  ;;  %v4683_v50 = vld [vmem:[#allocation19_spill] sm:$0xff] }
 0x16d   : > { %v1696_v37 = vsel %vm1692_vm11, %v1663_v43, %v1373_v16  ;;  %1295 = vrot.lane.b32.xlu0 %v4679_v39, %s2647_s20  ;;  %v1565_v19 = vsel %vm1560_vm7, %v1532_v4, %v973_v60  ;;  %v337_v16 = vld [vmem:[%s2811_s23 + $0xf8] sm:$0xff] }
 0x16e   : > { %1293 = vrot.lane.b32.xlu1 %v4680_v36, %s2647_s20  ;;  %2492 = vmatmul.mubr.msk.f32.gmra.mrb[2].mxu0 %vm1730_vm12, %v1696_v37  ;;  %v1598_v48 = vsel %vm1593_vm8, %v1565_v19, %v1074_v7  ;;  %v1467_v7 = vsel %vm248_vm0, %v2588_v18, %v3387_v53 }
 0x16f   : > { %v977_v24 = vpop.permute.xlu0 %976  ;;  %v1500_v30 = vsel %vm1494_vm5, %v1467_v7, %v3530_v44  ;;  %v3858_v7 = vld [vmem:[#allocation2 + $0x108] sm:$0xff] }
 0x170   : > { %v1172_v28 = vpop.permute.xlu1 %1171  ;;  %v1533_v8 = vsel %vm1527_vm6, %v1500_v30, %v3656_v26  ;;  %v336_v26 = vld [vmem:[%s2811_s23 + $0xf0] sm:$0xff] }
 0x171   : > { %998 = vrot.lane.b32.xlu0 %v4679_v39, %s2643_s27  ;;  %v1631_v45 = vsel %vm1626_vm10, %v1598_v48, %v1172_v28  ;;  %v1566_v59 = vsel %vm1560_vm7, %v1533_v8, %v975_v0  ;;  %v368_v43 = vmax.f32 %v336_v26, 0.0  ;;  %v2590_v48 = vld [vmem:[#allocation2 + $0x50] sm:$0xff] }
 0x172   : > { %996 = vrot.lane.b32.xlu1 %v4680_v36, %s2643_s27  ;;  %v1599_v53 = vsel %vm1593_vm8, %v1566_v59, %v1076_v58  ;;  %v369_v36 = vmax.f32 %v337_v16, 0.0  ;;  %v3868_v59 = vld [vmem:[#allocation2 + $0x110] sm:$0xff] }
 0x173   : > { %v1375_v27 = vpop.permute.xlu0 %1374  ;;  %v1632_v44 = vsel %vm1626_vm10, %v1599_v53, %v1174_v25  ;;  %402 = vst.msk [vmem:[#allocation2 + $0x181] sm:$0xff] %vm248_vm0, %v368_v43 }
 0x174   : > { %v1274_v13 = vpop.permute.xlu1 %1273  ;;  %403 = vst.msk [vmem:[#allocation2 + $0x189] sm:$0xff] %vm248_vm0, %v369_v36 }
 0x175   : > { %v1664_v47 = vsel %vm1659_vm9, %v1631_v45, %v1274_v13  ;;  %1396 = vrot.lane.b32.xlu0 %v3305_v49, %s2646_s14 }
 0x176   : > { %1394 = vrot.lane.b32.xlu1 %v3274_v62, %s2646_s14  ;;  %v1697_v11 = vsel %vm1692_vm11, %v1664_v47, %v1375_v27  ;;  %v1469_v27 = vsel %vm248_vm0, %v2590_v48, %v3395_v21 }
 0x177   : > { %2494 = vmatprep.mubr.msk.f32.mxu0 %vm1730_vm12, %v1697_v11  ;;  %v1078_v60 = vpop.permute.xlu0 %1077  ;;  %v1502_v13 = vsel %vm1494_vm5, %v1469_v27, %v3538_v1 }
 0x178   : > { %v1276_v57 = vpop.permute.xlu1 %1275  ;;  %v1535_v47 = vsel %vm1527_vm6, %v1502_v13, %v3664_v10 }
 0x179   : > { %1195 = vrot.lane.b32.xlu0 %v3027_v32, %s2645_s7  ;;  %v1665_v42 = vsel %vm1659_vm9, %v1632_v44, %v1276_v57 }
 0x17a   : > { %1097 = vrot.lane.b32.xlu1 %v3274_v62, %s2644_s28 }
 0x17b   : > { %v1080_v56 = vpop.permute.xlu0 %1079 }
 0x17c   : > { %v979_v35 = vpop.permute.xlu1 %978 }
 0x17d   : > { %1197 = vrot.lane.b32.xlu0 %v4681_v46, %s2645_s7  ;;  %v1568_v11 = vsel %vm1560_vm7, %v1535_v47, %v979_v35 }
 0x17e   : > { %1099 = vrot.lane.b32.xlu1 %v3305_v49, %s2644_s28  ;;  %v2589_v49 = vld [vmem:[#allocation2 + $0x48] sm:$0xff]  ;;  %v1601_v21 = vsel %vm1593_vm8, %v1568_v11, %v1080_v56  ;;  %v2593_v56 = vld [vmem:[#allocation2 + $0x60] sm:$0xff] }
 0x17f   : > { %v1178_v55 = vpop.permute.xlu0 %1177  ;;  %v1468_v58 = vsel %vm248_vm0, %v2589_v49, %v3370_v51  ;;  %v2594_v49 = vld [vmem:[#allocation2 + $0x68] sm:$0xff] }
 0x180   : > { %v1377_v62 = vpop.permute.xlu1 %1376  ;;  %v1501_v37 = vsel %vm1494_vm5, %v1468_v58, %v3520_v31  ;;  %v1634_v1 = vsel %vm1626_vm10, %v1601_v21, %v1178_v55  ;;  %v1471_v58 = vsel %vm248_vm0, %v2594_v49, %v3403_v29 }
 0x181   : > { %v1698_v0 = vsel %vm1692_vm11, %v1665_v42, %v1377_v62  ;;  %900 = vrot.lane.b32.xlu0 %v4681_v46, %s2642_s26  ;;  %v1534_v14 = vsel %vm1527_vm6, %v1501_v37, %v3646_v34  ;;  %v4684_v62 = vld [vmem:[#allocation26_spill] sm:$0xff]  ;;  %v1504_v16 = vsel %vm1494_vm5, %v1471_v58, %v3546_v5  ;;  %v4690_v58 = vld [vmem:[#allocation3_spill] sm:$0xff] }
 0x182   : > { %898 = vrot.lane.b32.xlu1 %v3027_v32, %s2642_s26  ;;  %2495 = vmatmul.mubr.msk.f32.gmra.mrb[4].mxu0 %vm1730_vm12, %v1698_v0  ;;  %v4682_v32 = vld [vmem:[#allocation24_spill] sm:$0xff]  ;;  %v1567_v9 = vsel %vm1560_vm7, %v1534_v14, %v977_v24  ;;  %v1537_v37 = vsel %vm1527_vm6, %v1504_v16, %v3672_v17 }
 0x183   : > { %v981_v25 = vpop.permute.xlu0 %980  ;;  %v1600_v51 = vsel %vm1593_vm8, %v1567_v9, %v1078_v60 }
 0x184   : > { %v1176_v39 = vpop.permute.xlu1 %1175 }
 0x185   : > { %1299 = vrot.lane.b32.xlu0 %v4682_v32, %s2647_s20  ;;  %v1633_v31 = vsel %vm1626_vm10, %v1600_v51, %v1176_v39  ;;  %v3914_v51 = vld [vmem:[#allocation2 + $0x120] sm:$0xff] }
 0x186   : > { %1297 = vrot.lane.b32.xlu1 %v4683_v50, %s2647_s20 }
 0x187   : > { %v1379_v28 = vpop.permute.xlu0 %1378 }
 0x188   : > { %v1278_v4 = vpop.permute.xlu1 %1277 }
 0x189   : > { %v1666_v19 = vsel %vm1659_vm9, %v1633_v31, %v1278_v4  ;;  %1002 = vrot.lane.b32.xlu0 %v4682_v32, %s2643_s27  ;;  %v3921_v4 = vld [vmem:[#allocation2 + $0x128] sm:$0xff] }
 0x18a   : > { %1000 = vrot.lane.b32.xlu1 %v4683_v50, %s2643_s27  ;;  %v1699_v34 = vsel %vm1692_vm11, %v1666_v19, %v1379_v28  ;;  %v2597_v19 = vld [vmem:[#allocation2 + $0x80] sm:$0xff] }
 0x18b   : > { %2497 = vmatprep.mubr.msk.f32.mxu0 %vm1730_vm12, %v1699_v34  ;;  %v1082_v24 = vpop.permute.xlu0 %1081  ;;  %v1473_v34 = vsel %vm248_vm0, %v2597_v19, %v3411_v38 }
 0x18c   : > { %v1280_v45 = vpop.permute.xlu1 %1279 }
 0x18d   : > { %1400 = vrot.lane.b32.xlu0 %v3318_v22, %s2646_s14  ;;  %v1667_v57 = vsel %vm1659_vm9, %v1634_v1, %v1280_v45  ;;  %v2598_v45 = vld [vmem:[#allocation2 + $0x78] sm:$0xff]  ;;  %v4687_v1 = vld [vmem:[#allocation23_spill] sm:$0xff] }
 0x18e   : > { %1398 = vrot.lane.b32.xlu1 %v3287_v15, %s2646_s14  ;;  %v1472_v13 = vsel %vm248_vm0, %v2598_v45, %v3393_v20  ;;  %v4694_v45 = vld [vmem:[#allocation37_spill] sm:$0xff] }
 0x18f   : > { %v1084_v60 = vpop.permute.xlu0 %1083  ;;  %v1505_v38 = vsel %vm1494_vm5, %v1472_v13, %v3536_v3  ;;  %v4695_v13 = vld [vmem:[#allocation34_spill] sm:$0xff] }
 0x190   : > { %v983_v18 = vpop.permute.xlu1 %982  ;;  %v1538_v47 = vsel %vm1527_vm6, %v1505_v38, %v3662_v12 }
 0x191   : > { %1199 = vrot.lane.b32.xlu0 %v3858_v7, %s2645_s7  ;;  %v1570_v39 = vsel %vm1560_vm7, %v1537_v37, %v983_v18  ;;  %v4686_v18 = vld [vmem:[#allocation28_spill] sm:$0xff] }
 0x192   : > { %1101 = vrot.lane.b32.xlu1 %v3287_v15, %s2644_s28  ;;  %v1470_v15 = vsel %vm248_vm0, %v2593_v56, %v3382_v41  ;;  %v1603_v29 = vsel %vm1593_vm8, %v1570_v39, %v1084_v60 }
 0x193   : > { %v1182_v10 = vpop.permute.xlu0 %1181  ;;  %v1503_v46 = vsel %vm1494_vm5, %v1470_v15, %v3528_v6 }
 0x194   : > { %v1381_v30 = vpop.permute.xlu1 %1380  ;;  %v1536_v44 = vsel %vm1527_vm6, %v1503_v46, %v3654_v33  ;;  %v4685_v33 = vld [vmem:[#allocation21_spill] sm:$0xff]  ;;  %v1636_v5 = vsel %vm1626_vm10, %v1603_v29, %v1182_v10 }
 0x195   : > { %v1700_v8 = vsel %vm1692_vm11, %v1667_v57, %v1381_v30  ;;  %1201 = vrot.lane.b32.xlu0 %v3868_v59, %s2645_s7  ;;  %v1569_v55 = vsel %vm1560_vm7, %v1536_v44, %v981_v25  ;;  %v3967_v44 = vld [vmem:[#allocation2 + $0x138] sm:$0xff] }
 0x196   : > { %1103 = vrot.lane.b32.xlu1 %v3318_v22, %s2644_s28  ;;  %2498 = vmatmul.mubr.msk.f32.gmra.mrb[6].mxu0 %vm1730_vm12, %v1700_v8  ;;  %v1602_v22 = vsel %vm1593_vm8, %v1569_v55, %v1082_v24 }
 0x197   : > { %v985_v35 = vpop.permute.xlu0 %984 }
 0x198   : > { %v1180_v53 = vpop.permute.xlu1 %1179  ;;  %v1571_v11 = vsel %vm1560_vm7, %v1538_v47, %v985_v35 }
 0x199   : > { %904 = vrot.lane.b32.xlu0 %v3868_v59, %s2642_s26  ;;  %v1635_v41 = vsel %vm1626_vm10, %v1602_v22, %v1180_v53 }
 0x19a   : > { %902 = vrot.lane.b32.xlu1 %v3858_v7, %s2642_s26 }
 0x19b   : > { %v1383_v26 = vpop.permute.xlu0 %1382 }
 0x19c   : > { %v1282_v42 = vpop.permute.xlu1 %1281 }
 0x19d   : > { %v1668_v6 = vsel %vm1659_vm9, %v1635_v41, %v1282_v42  ;;  %1303 = vrot.lane.b32.xlu0 %v4684_v62, %s2647_s20  ;;  %v2601_v41 = vld [vmem:[#allocation2 + $0x98] sm:$0xff] }
 0x19e   : > { %1301 = vrot.lane.b32.xlu1 %v4685_v33, %s2647_s20  ;;  %v1701_v43 = vsel %vm1692_vm11, %v1668_v6, %v1383_v26  ;;  %v3973_v26 = vld [vmem:[#allocation2 + $0x140] sm:$0xff]  ;;  %v1475_v42 = vsel %vm248_vm0, %v2601_v41, %v3419_v54 }
 0x19f   : > { %2500 = vmatprep.mubr.msk.f32.mxu0 %vm1730_vm12, %v1701_v43  ;;  %v1086_v0 = vpop.permute.xlu0 %1085 }
 0x1a0   : > { %v1284_v25 = vpop.permute.xlu1 %1283  ;;  %v1604_v20 = vsel %vm1593_vm8, %v1571_v11, %v1086_v0  ;;  %v4024_v11 = vld [vmem:[#allocation2 + $0x158] sm:$0xff] }
 0x1a1   : > { %1006 = vrot.lane.b32.xlu0 %v4684_v62, %s2643_s27  ;;  %v1669_v17 = vsel %vm1659_vm9, %v1636_v5, %v1284_v25  ;;  %v2602_v62 = vld [vmem:[#allocation2 + $0x90] sm:$0xff] }
 0x1a2   : > { %1004 = vrot.lane.b32.xlu1 %v4685_v33, %s2643_s27  ;;  %v4688_v33 = vld [vmem:[#allocation40_spill] sm:$0xff] }
 0x1a3   : > { %v1088_v36 = vpop.permute.xlu0 %1087  ;;  %v1474_v43 = vsel %vm248_vm0, %v2602_v62, %v4688_v33 }
 0x1a4   : > { %v987_v14 = vpop.permute.xlu1 %986  ;;  %v1507_v25 = vsel %vm1494_vm5, %v1474_v43, %v4690_v58 }
 0x1a5   : > { %1404 = vrot.lane.b32.xlu0 %v3333_v63, %s2646_s14 }
 0x1a6   : > { %1402 = vrot.lane.b32.xlu1 %v3300_v40, %s2646_s14 }
 0x1a7   : > { %v1186_v32 = vpop.permute.xlu0 %1185 }
 0x1a8   : > { %v1385_v9 = vpop.permute.xlu1 %1384 }
 0x1a9   : > { %v1702_v50 = vsel %vm1692_vm11, %v1669_v17, %v1385_v9  ;;  %1203 = vrot.lane.b32.xlu0 %v3914_v51, %s2645_s7  ;;  %v4693_v9 = vld [vmem:[#allocation25_spill] sm:$0xff] }
 0x1aa   : > { %1105 = vrot.lane.b32.xlu1 %v3300_v40, %s2644_s28  ;;  %2501 = vmatmul.mubr.msk.f32.gmra.mrb[8].mxu0 %vm1730_vm12, %v1702_v50  ;;  %v1506_v40 = vsel %vm1494_vm5, %v1473_v34, %v3554_v23 }
 0x1ab   : > { %v889_v28 = vpop.permute.xlu0 %888  ;;  %v1539_v27 = vsel %vm1527_vm6, %v1506_v40, %v3678_v2 }
 0x1ac   : > { %v1184_v31 = vpop.permute.xlu1 %1183 }
 0x1ad   : > { %1205 = vrot.lane.b32.xlu0 %v3921_v4, %s2645_s7  ;;  %v1637_v3 = vsel %vm1626_vm10, %v1604_v20, %v1184_v31 }
 0x1ae   : > { %1107 = vrot.lane.b32.xlu1 %v3333_v63, %s2644_s28  ;;  %v1572_v63 = vsel %vm1560_vm7, %v1539_v27, %v987_v14 }
 0x1af   : > { %v1288_v24 = vpop.permute.xlu0 %1287  ;;  %v1605_v60 = vsel %vm1593_vm8, %v1572_v63, %v1088_v36 }
 0x1b0   : > { %v1286_v48 = vpop.permute.xlu1 %1285  ;;  %v1638_v21 = vsel %vm1626_vm10, %v1605_v60, %v1186_v32  ;;  %v4692_v32 = vld [vmem:[#allocation30_spill] sm:$0xff]  ;;  %v2605_v60 = vld [vmem:[#allocation2 + $0xb0] sm:$0xff] }
 0x1b1   : > { %908 = vrot.lane.b32.xlu0 %v3921_v4, %s2642_s26  ;;  %v1671_v10 = vsel %vm1659_vm9, %v1638_v21, %v1288_v24  ;;  %v1670_v57 = vsel %vm1659_vm9, %v1637_v3, %v1286_v48  ;;  %v4697_v3 = vld [vmem:[#allocation41_spill] sm:$0xff] }
 0x1b2   : > { %906 = vrot.lane.b32.xlu1 %v3914_v51, %s2642_s26 }
 0x1b3   : > { %v991_v23 = vpop.permute.xlu0 %990 }
 0x1b4   : > { %v989_v2 = vpop.permute.xlu1 %988 }
 0x1b5   : > { %1307 = vrot.lane.b32.xlu0 %v4686_v18, %s2647_s20 }
 0x1b6   : > { %1305 = vrot.lane.b32.xlu1 %v4687_v1, %s2647_s20 }
 0x1b7   : > { %v1389_v12 = vpop.permute.xlu0 %1388 }
 0x1b8   : > { %v1704_v30 = vsel %vm1692_vm11, %v1671_v10, %v1389_v12  ;;  %v1387_v8 = vpop.permute.xlu1 %1386  ;;  %v4698_v12 = vld [vmem:[#allocation60_spill] sm:$0xff] }
 0x1b9   : > { %v1703_v56 = vsel %vm1692_vm11, %v1670_v57, %v1387_v8  ;;  %1010 = vrot.lane.b32.xlu0 %v4686_v18, %s2643_s27  ;;  %v4696_v18 = vld [vmem:[#allocation44_spill] sm:$0xff]  ;;  %v4699_v8 = vld [vmem:[#allocation6_spill] sm:$0xff] }
 0x1ba   : > { %1008 = vrot.lane.b32.xlu1 %v4687_v1, %s2643_s27  ;;  %2503 = vmatprep.mubr.msk.f32.mxu0 %vm1730_vm12, %v1703_v56  ;;  %v1477_v20 = vsel %vm248_vm0, %v2605_v60, %v4696_v18  ;;  %v2606_v1 = vld [vmem:[#allocation2 + $0xa8] sm:$0xff] }
 0x1bb   : > { %2504 = vmatmul.mubr.msk.f32.gmra.mrb[10].mxu0 %vm1730_vm12, %v1704_v30  ;;  %v1188_v15 = vpop.permute.xlu0 %1187  ;;  %v1476_v10 = vsel %vm248_vm0, %v2606_v1, %v4697_v3  ;;  %v1510_v57 = vsel %vm1494_vm5, %v1477_v20, %v4698_v12 }
 0x1bc   : > { %v1090_v35 = vpop.permute.xlu1 %1089  ;;  %v1509_v56 = vsel %vm1494_vm5, %v1476_v10, %v4699_v8 }
 0x1bd   : > { %1408 = vrot.lane.b32.xlu0 %v3348_v61, %s2646_s14 }
 0x1be   : > { %1406 = vrot.lane.b32.xlu1 %v3313_v52, %s2646_s14 }
 0x1bf   : > { %v1190_v46 = vpop.permute.xlu0 %1189 }
 0x1c0   : > { %v1092_v53 = vpop.permute.xlu1 %1091 }
 0x1c1   : > { %1207 = vrot.lane.b32.xlu0 %v3967_v44, %s2645_s7 }
 0x1c2   : > { %1109 = vrot.lane.b32.xlu1 %v3313_v52, %s2644_s28  ;;  %v4689_v52 = vld [vmem:[#allocation59_spill] sm:$0xff] }
 0x1c3   : > { %v893_v55 = vpop.permute.xlu0 %892  ;;  %v1508_v0 = vsel %vm1494_vm5, %v1475_v42, %v4689_v52 }
 0x1c4   : > { %v891_v22 = vpop.permute.xlu1 %890  ;;  %v1541_v16 = vsel %vm1527_vm6, %v1508_v0, %v889_v28 }
 0x1c5   : > { %1209 = vrot.lane.b32.xlu0 %v3973_v26, %s2645_s7  ;;  %v1574_v37 = vsel %vm1560_vm7, %v1541_v16, %v991_v23  ;;  %v4018_v23 = vld [vmem:[#allocation2 + $0x150] sm:$0xff] }
 0x1c6   : > { %1111 = vrot.lane.b32.xlu1 %v3348_v61, %s2644_s28  ;;  %v4691_v61 = vld [vmem:[#allocation8_spill] sm:$0xff]  ;;  %v1607_v36 = vsel %vm1593_vm8, %v1574_v37, %v1092_v53  ;;  %v4702_v37 = vld [vmem:[#allocation38_spill] sm:$0xff] }
 0x1c7   : > { %v1292_v6 = vpop.permute.xlu0 %1291  ;;  %v1540_v54 = vsel %vm1527_vm6, %v1507_v25, %v4691_v61  ;;  %v1640_v17 = vsel %vm1626_vm10, %v1607_v36, %v1190_v46 }
 0x1c8   : > { %v1290_v49 = vpop.permute.xlu1 %1289  ;;  %v1573_v39 = vsel %vm1560_vm7, %v1540_v54, %v989_v2  ;;  %v1673_v50 = vsel %vm1659_vm9, %v1640_v17, %v1292_v6  ;;  %v4078_v17 = vld [vmem:[#allocation2 + $0x170] sm:$0xff] }
 0x1c9   : > { %912 = vrot.lane.b32.xlu0 %v3973_v26, %s2642_s26  ;;  %v1606_v29 = vsel %vm1593_vm8, %v1573_v39, %v1090_v35  ;;  %v1542_v35 = vsel %vm1527_vm6, %v1509_v56, %v891_v22  ;;  %v4701_v22 = vld [vmem:[#allocation27_spill] sm:$0xff] }
 0x1ca   : > { %910 = vrot.lane.b32.xlu1 %v3967_v44, %s2642_s26  ;;  %v1639_v28 = vsel %vm1626_vm10, %v1606_v29, %v1188_v15  ;;  %v1543_v15 = vsel %vm1527_vm6, %v1510_v57, %v893_v55  ;;  %v4700_v55 = vld [vmem:[#allocation31_spill] sm:$0xff]  ;;  %v4068_v29 = vld [vmem:[#allocation2 + $0x168] sm:$0xff] }
 0x1cb   : > { %v995_v14 = vpop.permute.xlu0 %994  ;;  %v1672_v19 = vsel %vm1659_vm9, %v1639_v28, %v1290_v49  ;;  %v4703_v39 = vld [vmem:[#allocation35_spill] sm:$0xff] }
 0x1cc   : > { %v993_v5 = vpop.permute.xlu1 %992  ;;  %v1576_v46 = vsel %vm1560_vm7, %v1543_v15, %v995_v14 }
 0x1cd   : > { %1311 = vrot.lane.b32.xlu0 %v4692_v32, %s2647_s20  ;;  %v1575_v53 = vsel %vm1560_vm7, %v1542_v35, %v993_v5 }
 0x1ce   : > { %1309 = vrot.lane.b32.xlu1 %v4693_v9, %s2647_s20 }
 0x1cf   : > { %v1393_v31 = vpop.permute.xlu0 %1392 }
 0x1d0   : > { %v1706_v34 = vsel %vm1692_vm11, %v1673_v50, %v1393_v31  ;;  %v1391_v24 = vpop.permute.xlu1 %1390  ;;  %v4704_v50 = vld [vmem:[#allocation46_spill] sm:$0xff] }
 0x1d1   : > { %v1705_v40 = vsel %vm1692_vm11, %v1672_v19, %v1391_v24  ;;  %1014 = vrot.lane.b32.xlu0 %v4692_v32, %s2643_s27  ;;  %v2610_v19 = vld [vmem:[#allocation2 + $0xc0] sm:$0xff] }
 0x1d2   : > { %1012 = vrot.lane.b32.xlu1 %v4693_v9, %s2643_s27  ;;  %2506 = vmatprep.mubr.msk.f32.mxu0 %vm1730_vm12, %v1705_v40  ;;  %v2609_v9 = vld [vmem:[#allocation2 + $0xc8] sm:$0xff]  ;;  %v4706_v40 = vld [vmem:[#allocation61_spill] sm:$0xff] }
 0x1d3   : > { %2507 = vmatmul.mubr.msk.f32.gmra.mrb[12].mxu0 %vm1730_vm12, %v1706_v34  ;;  %v1192_v48 = vpop.permute.xlu0 %1191  ;;  %v1479_v28 = vsel %vm248_vm0, %v2609_v9, %v4704_v50  ;;  %v4705_v34 = vld [vmem:[#allocation42_spill] sm:$0xff] }
 0x1d4   : > { %v1094_v27 = vpop.permute.xlu1 %1093  ;;  %v1478_v24 = vsel %vm248_vm0, %v2610_v19, %v4705_v34 }
 0x1d5   : > { %1412 = vrot.lane.b32.xlu0 %v4694_v45, %s2646_s14  ;;  %v1608_v6 = vsel %vm1593_vm8, %v1575_v53, %v1094_v27 }
 0x1d6   : > { %1410 = vrot.lane.b32.xlu1 %v4695_v13, %s2646_s14  ;;  %v1641_v52 = vsel %vm1626_vm10, %v1608_v6, %v1192_v48  ;;  %v1512_v48 = vsel %vm1494_vm5, %v1479_v28, %v4706_v40  ;;  %v452_v6 = vld [vmem:[#allocation2 + $0x180] sm:$0xff] }
 0x1d7   : > { %v1194_v63 = vpop.permute.xlu0 %1193  ;;  %v4715_v28 = vld [vmem:[#allocation33_spill] sm:$0xff] }
 0x1d8   : > { %v1096_v38 = vpop.permute.xlu1 %1095 }
 0x1d9   : > { %1211 = vrot.lane.b32.xlu0 %v4018_v23, %s2645_s7  ;;  %v1609_v41 = vsel %vm1593_vm8, %v1576_v46, %v1096_v38 }
 0x1da   : > { %1113 = vrot.lane.b32.xlu1 %v4695_v13, %s2644_s28  ;;  %v1642_v33 = vsel %vm1626_vm10, %v1609_v41, %v1194_v63  ;;  %v4710_v41 = vld [vmem:[#allocation39_spill] sm:$0xff] }
 0x1db   : > { %v897_v47 = vpop.permute.xlu0 %896 }
 0x1dc   : > { %v895_v2 = vpop.permute.xlu1 %894  ;;  %v1545_v63 = vsel %vm1527_vm6, %v1512_v48, %v897_v47  ;;  %v4708_v47 = vld [vmem:[#allocation32_spill] sm:$0xff] }
 0x1dd   : > { %1213 = vrot.lane.b32.xlu0 %v4024_v11, %s2645_s7 }
 0x1de   : > { %1115 = vrot.lane.b32.xlu1 %v4694_v45, %s2644_s28  ;;  %v4707_v45 = vld [vmem:[#allocation4_spill] sm:$0xff] }
 0x1df   : > { %v1296_v21 = vpop.permute.xlu0 %1295  ;;  %v1511_v13 = vsel %vm1494_vm5, %v1478_v24, %v4707_v45 }
 0x1e0   : > { %v1294_v30 = vpop.permute.xlu1 %1293  ;;  %v1675_v43 = vsel %vm1659_vm9, %v1642_v33, %v1296_v21  ;;  %v1544_v38 = vsel %vm1527_vm6, %v1511_v13, %v895_v2  ;;  %v4709_v2 = vld [vmem:[#allocation29_spill] sm:$0xff]  ;;  %v453_v33 = vld [vmem:[#allocation2 + $0x188] sm:$0xff] }
 0x1e1   : > { %916 = vrot.lane.b32.xlu0 %v4024_v11, %s2642_s26  ;;  %v1674_v49 = vsel %vm1659_vm9, %v1641_v52, %v1294_v30 }
 0x1e2   : > { %914 = vrot.lane.b32.xlu1 %v4018_v23, %s2642_s26 }
 0x1e3   : > { %v999_v42 = vpop.permute.xlu0 %998 }
 0x1e4   : > { %v997_v62 = vpop.permute.xlu1 %996  ;;  %v1578_v60 = vsel %vm1560_vm7, %v1545_v63, %v999_v42  ;;  %v4711_v42 = vld [vmem:[#allocation36_spill] sm:$0xff] }
 0x1e5   : > { %1315 = vrot.lane.b32.xlu0 %v4700_v55, %s2647_s20  ;;  %v1577_v18 = vsel %vm1560_vm7, %v1544_v38, %v997_v62  ;;  %v1061_v38 = vrot.slane %v453_v33, 2 }
 0x1e6   : > { %1313 = vrot.lane.b32.xlu1 %v4701_v22, %s2647_s20 }
 0x1e7   : > { %v1397_v0 = vpop.permute.xlu0 %1396 }
 0x1e8   : > { %v1708_v58 = vsel %vm1692_vm11, %v1675_v43, %v1397_v0  ;;  %v1395_v25 = vpop.permute.xlu1 %1394  ;;  %v454_v43 = vld [vmem:[#allocation2 + $0x190] sm:$0x3]  ;;  %v960_v0 = vrot.slane %v453_v33, 1 }
 0x1e9   : > { %v1707_v16 = vsel %vm1692_vm11, %v1674_v49, %v1395_v25  ;;  %1018 = vrot.lane.b32.xlu0 %v4700_v55, %s2643_s27  ;;  %v962_v49 = vrot.slane %v454_v43, 1  ;;  %v4712_v25 = vld [vmem:[#allocation48_spill] sm:$0xff] }
 0x1ea   : > { %1016 = vrot.lane.b32.xlu1 %v4701_v22, %s2643_s27  ;;  %2509 = vmatprep.mubr.msk.f32.mxu0 %vm1730_vm12, %v1707_v16 }
 0x1eb   : > { %2510 = vmatmul.mubr.msk.f32.gmra.mrb[14].mxu0 %vm1730_vm12, %v1708_v58  ;;  %v1196_v61 = vpop.permute.xlu0 %1195  ;;  %v2611_v58 = vld [vmem:[#allocation2 + $0xe0] sm:$0xff]  ;;  %v963_v40 = vsel %vm506_vm2, %v960_v0, %v962_v49  ;;  %v2613_v49 = vld [vmem:[#allocation2 + $0xf8] sm:$0xff] }
 0x1ec   : > { %v1098_v54 = vpop.permute.xlu1 %1097  ;;  %v1481_v16 = vsel %vm248_vm0, %v2611_v58, %v4712_v25  ;;  %v4716_v58 = vld [vmem:[#allocation50_spill] sm:$0xff] }
 0x1ed   : > { %1416 = vrot.lane.b32.xlu0 %v4702_v37, %s2646_s14  ;;  %v1610_v1 = vsel %vm1593_vm8, %v1577_v18, %v1098_v54  ;;  %v1060_v18 = vrot.slane %v452_v6, 2  ;;  %v1483_v25 = vsel %vm248_vm0, %v2613_v49, %v4716_v58  ;;  %v4722_v58 = vld [vmem:[#allocation62_spill] sm:$0xff] }
 0x1ee   : > { %1414 = vrot.lane.b32.xlu1 %v4703_v39, %s2646_s14  ;;  %v1643_v57 = vsel %vm1626_vm10, %v1610_v1, %v1196_v61  ;;  %v959_v61 = vrot.slane %v452_v6, 1 }
 0x1ef   : > { %v1198_v36 = vpop.permute.xlu0 %1197 }
 0x1f0   : > { %v1100_v14 = vpop.permute.xlu1 %1099  ;;  %v961_v13 = vsel %vm506_vm2, %v959_v61, %v960_v0 }
 0x1f1   : > { %1215 = vrot.lane.b32.xlu0 %v4068_v29, %s2645_s7  ;;  %v1611_v20 = vsel %vm1593_vm8, %v1578_v60, %v1100_v14  ;;  %v4714_v14 = vld [vmem:[#allocation63_spill] sm:$0xff]  ;;  %v1063_v60 = vrot.slane %v454_v43, 2  ;;  %v457_v43 = vld [vmem:[#allocation2 + $0x1a8] sm:$0x3] }
 0x1f2   : > { %1117 = vrot.lane.b32.xlu1 %v4703_v39, %s2644_s28  ;;  %v1644_v10 = vsel %vm1626_vm10, %v1611_v20, %v1198_v36  ;;  %v4713_v39 = vld [vmem:[#allocation43_spill] sm:$0xff]  ;;  %v1514_v9 = vsel %vm1494_vm5, %v1481_v16, %v4714_v14  ;;  %v1263_v61 = vrot.slane %v457_v43, 1 }
 0x1f3   : > { %v4074_v5 = vpop.permute.xlu0 %900 }
 0x1f4   : > { %v4076_v32 = vpop.permute.xlu1 %898  ;;  %v1547_v19 = vsel %vm1527_vm6, %v1514_v9, %v4074_v5 }
 0x1f5   : > { %1217 = vrot.lane.b32.xlu0 %v4078_v17, %s2645_s7 }
 0x1f6   : > { %1119 = vrot.lane.b32.xlu1 %v4702_v37, %s2644_s28  ;;  %v2612_v37 = vld [vmem:[#allocation2 + $0xd8] sm:$0xff] }
 0x1f7   : > { %v1300_v31 = vpop.permute.xlu0 %1299  ;;  %v1480_v36 = vsel %vm248_vm0, %v2612_v37, %v4713_v39  ;;  %v4717_v37 = vld [vmem:[#allocation45_spill] sm:$0xff] }
 0x1f8   : > { %v1298_v27 = vpop.permute.xlu1 %1297  ;;  %v1677_v12 = vsel %vm1659_vm9, %v1644_v10, %v1300_v31  ;;  %v1513_v31 = vsel %vm1494_vm5, %v1480_v36, %v4715_v28  ;;  %v4718_v36 = vld [vmem:[#allocation65_spill] sm:$0xff] }
 0x1f9   : > { %920 = vrot.lane.b32.xlu0 %v4078_v17, %s2642_s26  ;;  %v1676_v8 = vsel %vm1659_vm9, %v1643_v57, %v1298_v27  ;;  %v1546_v34 = vsel %vm1527_vm6, %v1513_v31, %v4076_v32  ;;  %v1516_v14 = vsel %vm1494_vm5, %v1483_v25, %v4718_v36 }
 0x1fa   : > { %918 = vrot.lane.b32.xlu1 %v4068_v29, %s2642_s26 }
 0x1fb   : > { %v1003_v21 = vpop.permute.xlu0 %1002 }
 0x1fc   : > { %v1001_v3 = vpop.permute.xlu1 %1000  ;;  %v1580_v24 = vsel %vm1560_vm7, %v1547_v19, %v1003_v21 }
 0x1fd   : > { %1319 = vrot.lane.b32.xlu0 %v4708_v47, %s2647_s20  ;;  %v1579_v48 = vsel %vm1560_vm7, %v1546_v34, %v1001_v3 }
 0x1fe   : > { %1317 = vrot.lane.b32.xlu1 %v4709_v2, %s2647_s20 }
 0x1ff   : > { %v1401_v30 = vpop.permute.xlu0 %1400 }
 0x200   : > { %v1710_v56 = vsel %vm1692_vm11, %v1677_v12, %v1401_v30  ;;  %v1399_v15 = vpop.permute.xlu1 %1398  ;;  %v1064_v12 = vsel %vm683_vm3, %v1061_v38, %v1063_v60  ;;  %v1062_v30 = vsel %vm683_vm3, %v1060_v18, %v1061_v38 }
 0x201   : > { %1022 = vrot.lane.b32.xlu0 %v4708_v47, %s2643_s27  ;;  %v1709_v35 = vsel %vm1692_vm11, %v1676_v8, %v1399_v15  ;;  %v455_v8 = vld [vmem:[#allocation2 + $0x198] sm:$0xff] }
 0x202   : > { %1020 = vrot.lane.b32.xlu1 %v4709_v2, %s2643_s27  ;;  %2512 = vmatprep.mubr.msk.f32.mxu1 %vm1730_vm12, %v1709_v35  ;;  %v1260_v35 = vrot.slane %v455_v8, 1 }
 0x203   : > { %2513 = vmatmul.mubr.msk.f32.vlgmr.msra.gmra.mrb[0].mxu1 %vm1730_vm12, %v1710_v56  ;;  %v1200_v46 = vpop.permute.xlu0 %1199  ;;  %v456_v56 = vld [vmem:[#allocation2 + $0x1a0] sm:$0xff] }
 0x204   : > { %v1102_v53 = vpop.permute.xlu1 %1101 }
 0x205   : > { %1420 = vrot.lane.b32.xlu0 %v4710_v41, %s2646_s14  ;;  %v1612_v5 = vsel %vm1593_vm8, %v1579_v48, %v1102_v53 }
 0x206   : > { %1418 = vrot.lane.b32.xlu1 %v4711_v42, %s2646_s14  ;;  %v1645_v21 = vsel %vm1626_vm10, %v1612_v5, %v1200_v46  ;;  %v1261_v46 = vrot.slane %v456_v56, 1 }
 0x207   : > { %v1202_v62 = vpop.permute.xlu0 %1201 }
 0x208   : > { %v1104_v55 = vpop.permute.xlu1 %1103 }
 0x209   : > { %1219 = vrot.lane.b32.xlu0 %v452_v6, %s2645_s7  ;;  %v1613_v27 = vsel %vm1593_vm8, %v1580_v24, %v1104_v55  ;;  %v1364_v24 = vrot.slane %v457_v43, 2  ;;  %v4721_v43 = vld [vmem:[#allocation52_spill] sm:$0xff] }
 0x20a   : > { %1121 = vrot.lane.b32.xlu1 %v4711_v42, %s2644_s28  ;;  %v1646_v32 = vsel %vm1626_vm10, %v1613_v27, %v1202_v62  ;;  %v1361_v42 = vrot.slane %v455_v8, 2  ;;  %v1362_v62 = vrot.slane %v456_v56, 2 }
 0x20b   : > { %v4125_v22 = vpop.permute.xlu0 %904 }
 0x20c   : > { %v4127_v52 = vpop.permute.xlu1 %902  ;;  %v1363_v0 = vsel %vm683_vm3, %v1361_v42, %v1362_v62  ;;  %v1549_v31 = vsel %vm1527_vm6, %v1516_v14, %v4125_v22  ;;  %v1264_v22 = vsel %vm506_vm2, %v1261_v46, %v1263_v61  ;;  %v1365_v60 = vsel %vm683_vm3, %v1362_v62, %v1364_v24 }
 0x20d   : > { %1221 = vrot.lane.b32.xlu0 %v453_v33, %s2645_s7 }
 0x20e   : > { %1123 = vrot.lane.b32.xlu1 %v4710_v41, %s2644_s28 }
 0x20f   : > { %v1304_v54 = vpop.permute.xlu0 %1303 }
 0x210   : > { %v1302_v50 = vpop.permute.xlu1 %1301  ;;  %v1679_v20 = vsel %vm1659_vm9, %v1646_v32, %v1304_v54  ;;  %v2614_v54 = vld [vmem:[#allocation2 + $0xf0] sm:$0xff] }
 0x211   : > { %924 = vrot.lane.b32.xlu0 %v453_v33, %s2642_s26  ;;  %v1678_v3 = vsel %vm1659_vm9, %v1645_v21, %v1302_v50  ;;  %v1482_v39 = vsel %vm248_vm0, %v2614_v54, %v4717_v37  ;;  %v4719_v50 = vld [vmem:[#allocation9_spill] sm:$0xff] }
 0x212   : > { %922 = vrot.lane.b32.xlu1 %v452_v6, %s2642_s26  ;;  %v1262_v6 = vsel %vm506_vm2, %v1260_v35, %v1261_v46  ;;  %v1515_v28 = vsel %vm1494_vm5, %v1482_v39, %v4719_v50 }
 0x213   : > { %v1007_v45 = vpop.permute.xlu0 %1006  ;;  %v1548_v19 = vsel %vm1527_vm6, %v1515_v28, %v4127_v52 }
 0x214   : > { %v1005_v63 = vpop.permute.xlu1 %1004  ;;  %v1582_v34 = vsel %vm1560_vm7, %v1549_v31, %v1007_v45 }
 0x215   : > { %1323 = vrot.lane.b32.xlu0 %v963_v40, %s2647_s20 }
 0x216   : > { %1321 = vrot.lane.b32.xlu1 %v961_v13, %s2647_s20 }
 0x217   : > { %v1405_v1 = vpop.permute.xlu0 %1404 }
 0x218   : > { %v1712_v47 = vsel %vm1692_vm11, %v1679_v20, %v1405_v1  ;;  %v1403_v10 = vpop.permute.xlu1 %1402 }
 0x219   : > { %v1711_v2 = vsel %vm1692_vm11, %v1678_v3, %v1403_v10  ;;  %1026 = vrot.lane.b32.xlu0 %v963_v40, %s2643_s27  ;;  %v1581_v40 = vsel %vm1560_vm7, %v1548_v19, %v1005_v63 }
 0x21a   : > { %1024 = vrot.lane.b32.xlu1 %v961_v13, %s2643_s27  ;;  %2515 = vmatprep.mubr.msk.f32.mxu1 %vm1730_vm12, %v1711_v2 }
 0x21b   : > { %2516 = vmatmul.mubr.msk.f32.gmra.mrb[2].mxu1 %vm1730_vm12, %v1712_v47  ;;  %v1204_v57 = vpop.permute.xlu0 %1203 }
 0x21c   : > { %v1106_v15 = vpop.permute.xlu1 %1105 }
 0x21d   : > { %1424 = vrot.lane.b32.xlu0 %v1064_v12, %s2646_s14  ;;  %v1614_v52 = vsel %vm1593_vm8, %v1581_v40, %v1106_v15 }
 0x21e   : > { %1422 = vrot.lane.b32.xlu1 %v1062_v30, %s2646_s14  ;;  %v1647_v20 = vsel %vm1626_vm10, %v1614_v52, %v1204_v57 }
 0x21f   : > { %v1206_v53 = vpop.permute.xlu0 %1205 }
 0x220   : > { %v1108_v41 = vpop.permute.xlu1 %1107 }
 0x221   : > { %1223 = vrot.lane.b32.xlu0 %v455_v8, %s2645_s7  ;;  %v1615_v48 = vsel %vm1593_vm8, %v1582_v34, %v1108_v41 }
 0x222   : > { %1125 = vrot.lane.b32.xlu1 %v1062_v30, %s2644_s28  ;;  %v1648_v5 = vsel %vm1626_vm10, %v1615_v48, %v1206_v53 }
 0x223   : > { %v4172_v55 = vpop.permute.xlu0 %908 }
 0x224   : > { %v4174_v33 = vpop.permute.xlu1 %906 }
 0x225   : > { %1325 = vrot.lane.b32.xlu0 %v1262_v6, %s2647_s20  ;;  %v4720_v6 = vld [vmem:[#allocation47_spill] sm:$0xff] }
 0x226   : > { %1127 = vrot.lane.b32.xlu1 %v1064_v12, %s2644_s28  ;;  %v1484_v62 = vsel %vm248_vm0, %v3858_v7, %v4720_v6  ;;  %v4726_v6 = vld [vmem:[#allocation68_spill] sm:$0xff]  ;;  %s4429_s28 = scalar_lea.vmem %s4508_s3, %s2403_s25 }
 0x227   : > { %v1308_v16 = vpop.permute.xlu0 %1307  ;;  %v1517_v25 = vsel %vm1494_vm5, %v1484_v62, %v4722_v58 }
 0x228   : > { %v1306_v9 = vpop.permute.xlu1 %1305  ;;  %v1681_v18 = vsel %vm1659_vm9, %v1648_v5, %v1308_v16  ;;  %v4723_v16 = vld [vmem:[#allocation66_spill] sm:$0xff]  ;;  %v1550_v39 = vsel %vm1527_vm6, %v1517_v25, %v4174_v33 }
 0x229   : > { %1426 = vrot.lane.b32.xlu0 %v1363_v0, %s2646_s14  ;;  %v1680_v47 = vsel %vm1659_vm9, %v1647_v20, %v1306_v9  ;;  %v1485_v0 = vsel %vm248_vm0, %v3868_v59, %v4721_v43 }
 0x22a   : > { %1225 = vrot.lane.b32.xlu1 %v456_v56, %s2645_s7  ;;  %v1518_v61 = vsel %vm1494_vm5, %v1485_v0, %v4723_v16 }
 0x22b   : > { %v1011_v27 = vpop.permute.xlu0 %1010  ;;  %v1551_v37 = vsel %vm1527_vm6, %v1518_v61, %v4172_v55 }
 0x22c   : > { %v1009_v45 = vpop.permute.xlu1 %1008  ;;  %v1584_v7 = vsel %vm1560_vm7, %v1551_v37, %v1011_v27 }
 0x22d   : > { %v2490_v13 = vpop.f32.mrb[0].mxu0  ;;  %v1583_v14 = vsel %vm1560_vm7, %v1550_v39, %v1009_v45 }
 0x22e   : > { %2057 = vst.msk [vmem:[%s4199_s24 + $0x8] sm:$0xff] %vm248_vm0, %v2490_v13  ;;  %v2090_v63 = vsel %vm248_vm0, %v2490_v13, 0.0  ;;  %v2162_v38 = vmul.f32 %v2490_v13, %v2490_v13  ;;  %v1897_v32 = vpop.f32.mrb[1].mxu0  ;;  %1327 = vrot.lane.b32.xlu1 %v1264_v22, %s2647_s20 }
 0x22f   : > { %2056 = vst.msk [vmem:[%s4199_s24] sm:$0xff] %vm248_vm0, %v1897_v32  ;;  %v2089_v21 = vsel %vm248_vm0, %v1897_v32, 0.0  ;;  %v2161_v1 = vmul.f32 %v1897_v32, %v1897_v32  ;;  %v1409_v3 = vpop.permute.xlu0 %1408 }
 0x230   : > { %v2194_v10 = vsel %vm248_vm0, %v2162_v38, 0.0  ;;  %v2091_v2 = vadd.f32 %v2090_v63, %v2089_v21  ;;  %v1714_v12 = vsel %vm1692_vm11, %v1681_v18, %v1409_v3  ;;  %v1407_v30 = vpop.permute.xlu1 %1406 }
 0x231   : > { %v2193_v8 = vsel %vm248_vm0, %v2161_v1, 0.0  ;;  %v1713_v56 = vsel %vm1692_vm11, %v1680_v47, %v1407_v30  ;;  %v4724_v30 = vld [vmem:[#allocation54_spill] sm:$0xff] }
 0x232   : > { %v2195_v15 = vadd.f32 %v2194_v10, %v2193_v8  ;;  %1428 = vrot.lane.b32.xlu1 %v1365_v60, %s2646_s14  ;;  %2518 = vmatprep.mubr.msk.f32.mxu1 %vm1730_vm12, %v1713_v56  ;;  %v1487_v8 = vsel %vm248_vm0, %v3921_v4, %v4724_v30  ;;  %v4729_v30 = vld [vmem:[#allocation51_spill] sm:$0xff] }
 0x233   : > { %2519 = vmatmul.mubr.msk.f32.gmra.mrb[4].mxu1 %vm1730_vm12, %v1714_v12  ;;  %v1208_v57 = vpop.permute.xlu0 %1207  ;;  %v1520_v62 = vsel %vm1494_vm5, %v1487_v8, %v4726_v6  ;;  %v1488_v8 = vsel %vm248_vm0, %v3967_v44, %v4729_v30 }
 0x234   : > { %v1110_v35 = vpop.permute.xlu1 %1109 }
 0x235   : > { %v1616_v19 = vsel %vm1593_vm8, %v1583_v14, %v1110_v35 }
 0x236   : > { %v1649_v45 = vsel %vm1626_vm10, %v1616_v19, %v1208_v57 }
 0x237   : > { %v1210_v46 = vpop.permute.xlu0 %1209 }
 0x238   : > { %v1112_v53 = vpop.permute.xlu1 %1111 }
 0x239   : > { %v1617_v9 = vsel %vm1593_vm8, %v1584_v7, %v1112_v53 }
 0x23a   : > { %v1650_v48 = vsel %vm1626_vm10, %v1617_v9, %v1210_v46  ;;  %v4725_v46 = vld [vmem:[#allocation49_spill] sm:$0xff] }
 0x23b   : > { %v913_v41 = vpop.permute.xlu0 %912  ;;  %v1486_v53 = vsel %vm248_vm0, %v3914_v51, %v4725_v46  ;;  %v4731_v46 = vld [vmem:[#allocation5_spill] sm:$0xff] }
 0x23c   : > { %v4222_v42 = vpop.permute.xlu1 %910  ;;  %v1553_v4 = vsel %vm1527_vm6, %v1520_v62, %v913_v41 }
 0x23f   : > { %v1312_v49 = vpop.permute.xlu0 %1311 }
 0x240   : > { %v1310_v54 = vpop.permute.xlu1 %1309  ;;  %v1683_v52 = vsel %vm1659_vm9, %v1650_v48, %v1312_v49  ;;  %v4727_v49 = vld [vmem:[#allocation64_spill] sm:$0xff] }
 0x241   : > { %v2493_v36 = vpop.f32.mrb[2].mxu0  ;;  %v1682_v63 = vsel %vm1659_vm9, %v1649_v45, %v1310_v54  ;;  %v1519_v58 = vsel %vm1494_vm5, %v1486_v53, %v4727_v49  ;;  %v1521_v53 = vsel %vm1494_vm5, %v1488_v8, %v4731_v46 }
 0x242   : > { %2059 = vst.msk [vmem:[%s4199_s24 + $0x18] sm:$0xff] %vm248_vm0, %v2493_v36  ;;  %v1907_v59 = vpop.f32.mrb[3].mxu0  ;;  %v2164_v50 = vmul.f32 %v2493_v36, %v2493_v36  ;;  %v2094_v24 = vsel %vm248_vm0, %v2493_v36, 0.0  ;;  %v1552_v61 = vsel %vm1527_vm6, %v1519_v58, %v4222_v42 }
 0x243   : > { %2058 = vst.msk [vmem:[%s4199_s24 + $0x10] sm:$0xff] %vm248_vm0, %v1907_v59  ;;  %v2092_v28 = vsel %vm248_vm0, %v1907_v59, 0.0  ;;  %v2163_v31 = vmul.f32 %v1907_v59, %v1907_v59  ;;  %v1015_v55 = vpop.permute.xlu0 %1014 }
 0x244   : > { %v2093_v33 = vadd.f32 %v2092_v28, %v2091_v2  ;;  %v1013_v34 = vpop.permute.xlu1 %1012  ;;  %v2198_v13 = vsel %vm248_vm0, %v2164_v50, 0.0  ;;  %v1586_v54 = vsel %vm1560_vm7, %v1553_v4, %v1015_v55 }
 0x245   : > { %v2196_v40 = vsel %vm248_vm0, %v2163_v31, 0.0  ;;  %v1585_v39 = vsel %vm1560_vm7, %v1552_v61, %v1013_v34 }
 0x246   : > { %v2197_v27 = vadd.f32 %v2196_v40, %v2195_v15  ;;  %v2095_v22 = vadd.f32 %v2094_v24, %v2093_v33 }
 0x247   : > { %v1413_v5 = vpop.permute.xlu0 %1412 }
 0x248   : > { %v1716_v38 = vsel %vm1692_vm11, %v1683_v52, %v1413_v5  ;;  %v1411_v32 = vpop.permute.xlu1 %1410  ;;  %v2199_v60 = vadd.f32 %v2198_v13, %v2197_v27 }
 0x249   : > { %v1715_v18 = vsel %vm1692_vm11, %v1682_v63, %v1411_v32 }
 0x24a   : > { %2521 = vmatprep.mubr.msk.f32.mxu1 %vm1730_vm12, %v1715_v18 }
 0x24b   : > { %2522 = vmatmul.mubr.msk.f32.gmra.mrb[6].mxu1 %vm1730_vm12, %v1716_v38  ;;  %v1212_v20 = vpop.permute.xlu0 %1211 }
 0x24c   : > { %v1114_v21 = vpop.permute.xlu1 %1113 }
 0x24d   : > { %v1618_v41 = vsel %vm1593_vm8, %v1585_v39, %v1114_v21 }
 0x24e   : > { %v1651_v28 = vsel %vm1626_vm10, %v1618_v41, %v1212_v20 }
 0x24f   : > { %v1214_v1 = vpop.permute.xlu0 %1213 }
 0x250   : > { %v1116_v3 = vpop.permute.xlu1 %1115 }
 0x251   : > { %v1619_v36 = vsel %vm1593_vm8, %v1586_v54, %v1116_v3 }
 0x252   : > { %v1652_v50 = vsel %vm1626_vm10, %v1619_v36, %v1214_v1  ;;  %v4728_v1 = vld [vmem:[#allocation56_spill] sm:$0xff] }
 0x253   : > { %v4258_v47 = vpop.permute.xlu0 %916  ;;  %v1489_v3 = vsel %vm248_vm0, %v3973_v26, %v4728_v1 }
 0x254   : > { %v4260_v10 = vpop.permute.xlu1 %914 }
 0x255   : > { %v2496_v2 = vpop.f32.mrb[4].mxu0  ;;  %v1554_v26 = vsel %vm1527_vm6, %v1521_v53, %v4260_v10 }
 0x256   : > { %2061 = vst.msk [vmem:[%s4199_s24 + $0x28] sm:$0xff] %vm248_vm0, %v2496_v2  ;;  %v1917_v12 = vpop.f32.mrb[5].mxu0  ;;  %v2166_v56 = vmul.f32 %v2496_v2, %v2496_v2  ;;  %v2098_v25 = vsel %vm248_vm0, %v2496_v2, 0.0 }
 0x257   : > { %2060 = vst.msk [vmem:[%s4199_s24 + $0x20] sm:$0xff] %vm248_vm0, %v1917_v12  ;;  %v2096_v15 = vsel %vm248_vm0, %v1917_v12, 0.0  ;;  %v2165_v57 = vmul.f32 %v1917_v12, %v1917_v12  ;;  %v1316_v35 = vpop.permute.xlu0 %1315 }
 0x258   : > { %v2097_v43 = vadd.f32 %v2096_v15, %v2095_v22  ;;  %v1314_v0 = vpop.permute.xlu1 %1313  ;;  %v2202_v7 = vsel %vm248_vm0, %v2166_v56, 0.0  ;;  %v1685_v42 = vsel %vm1659_vm9, %v1652_v50, %v1316_v35  ;;  %v4730_v56 = vld [vmem:[#allocation69_spill] sm:$0xff] }
 0x259   : > { %v2200_v16 = vsel %vm248_vm0, %v2165_v57, 0.0  ;;  %v1684_v55 = vsel %vm1659_vm9, %v1651_v28, %v1314_v0  ;;  %v1522_v15 = vsel %vm1494_vm5, %v1489_v3, %v4730_v56 }
 0x25a   : > { %v2201_v51 = vadd.f32 %v2200_v16, %v2199_v60  ;;  %v2099_v37 = vadd.f32 %v2098_v25, %v2097_v43  ;;  %v1555_v6 = vsel %vm1527_vm6, %v1522_v15, %v4258_v47 }
 0x25b   : > { %v1019_v14 = vpop.permute.xlu0 %1018 }
 0x25c   : > { %v1017_v59 = vpop.permute.xlu1 %1016  ;;  %v2203_v9 = vadd.f32 %v2202_v7, %v2201_v51  ;;  %v1588_v62 = vsel %vm1560_vm7, %v1555_v6, %v1019_v14 }
 0x25d   : > { %v1587_v43 = vsel %vm1560_vm7, %v1554_v26, %v1017_v59 }
 0x25f   : > { %v1417_v31 = vpop.permute.xlu0 %1416 }
 0x260   : > { %v1718_v19 = vsel %vm1692_vm11, %v1685_v42, %v1417_v31  ;;  %v1415_v33 = vpop.permute.xlu1 %1414 }
 0x261   : > { %v1717_v34 = vsel %vm1692_vm11, %v1684_v55, %v1415_v33 }
 0x262   : > { %2524 = vmatprep.mubr.msk.f32.mxu1 %vm1730_vm12, %v1717_v34 }
 0x263   : > { %2525 = vmatmul.mubr.msk.f32.gmra.mrb[8].mxu1 %vm1730_vm12, %v1718_v19  ;;  %v1216_v24 = vpop.permute.xlu0 %1215 }
 0x264   : > { %v1118_v40 = vpop.permute.xlu1 %1117 }
 0x265   : > { %v1620_v49 = vsel %vm1593_vm8, %v1587_v43, %v1118_v40 }
 0x266   : > { %v1653_v47 = vsel %vm1626_vm10, %v1620_v49, %v1216_v24  ;;  %v4736_v49 = vld [vmem:[#allocation55_spill] sm:$0xff] }
 0x267   : > { %v1218_v48 = vpop.permute.xlu0 %1217 }
 0x268   : > { %v1120_v27 = vpop.permute.xlu1 %1119 }
 0x269   : > { %v2499_v22 = vpop.f32.mrb[6].mxu0  ;;  %v1621_v44 = vsel %vm1593_vm8, %v1588_v62, %v1120_v27 }
 0x26a   : > { %2063 = vst.msk [vmem:[%s4199_s24 + $0x38] sm:$0xff] %vm248_vm0, %v2499_v22  ;;  %v1927_v52 = vpop.f32.mrb[7].mxu0  ;;  %v2168_v45 = vmul.f32 %v2499_v22, %v2499_v22  ;;  %v2102_v60 = vsel %vm248_vm0, %v2499_v22, 0.0  ;;  %v1654_v4 = vsel %vm1626_vm10, %v1621_v44, %v1218_v48  ;;  %v4732_v48 = vld [vmem:[#allocation53_spill] sm:$0xff] }
 0x26b   : > { %2062 = vst.msk [vmem:[%s4199_s24 + $0x30] sm:$0xff] %vm248_vm0, %v1927_v52  ;;  %v2100_v13 = vsel %vm248_vm0, %v1927_v52, 0.0  ;;  %v2167_v5 = vmul.f32 %v1927_v52, %v1927_v52  ;;  %v921_v63 = vpop.permute.xlu0 %920  ;;  %v1490_v27 = vsel %vm248_vm0, %v4018_v23, %v4732_v48  ;;  %v4733_v22 = vld [vmem:[#allocation57_spill] sm:$0xff] }
 0x26c   : > { %v2101_v38 = vadd.f32 %v2100_v13, %v2099_v37  ;;  %v919_v32 = vpop.permute.xlu1 %918  ;;  %v2206_v2 = vsel %vm248_vm0, %v2168_v45, 0.0  ;;  %v1491_v52 = vsel %vm248_vm0, %v4024_v11, %v4733_v22  ;;  %v4734_v13 = vld [vmem:[#allocation67_spill] sm:$0xff] }
 0x26d   : > { %v2204_v18 = vsel %vm248_vm0, %v2167_v5, 0.0  ;;  %v1523_v5 = vsel %vm1494_vm5, %v1490_v27, %v4734_v13 }
 0x26e   : > { %v2205_v20 = vadd.f32 %v2204_v18, %v2203_v9  ;;  %v2103_v21 = vadd.f32 %v2102_v60, %v2101_v38  ;;  %v4735_v38 = vld [vmem:[#allocation70_spill] sm:$0xff] }
 0x26f   : > { %v1320_v12 = vpop.permute.xlu0 %1319  ;;  %v1524_v60 = vsel %vm1494_vm5, %v1491_v52, %v4735_v38 }
 0x270   : > { %v1318_v57 = vpop.permute.xlu1 %1317  ;;  %v2207_v35 = vadd.f32 %v2206_v2, %v2205_v20  ;;  %v1687_v25 = vsel %vm1659_vm9, %v1654_v4, %v1320_v12  ;;  %v1557_v20 = vsel %vm1527_vm6, %v1524_v60, %v921_v63 }
 0x271   : > { %v1686_v10 = vsel %vm1659_vm9, %v1653_v47, %v1318_v57 }
 0x273   : > { %v1023_v0 = vpop.permute.xlu0 %1022 }
 0x274   : > { %v1021_v58 = vpop.permute.xlu1 %1020  ;;  %v1590_v23 = vsel %vm1560_vm7, %v1557_v20, %v1023_v0 }
 0x277   : > { %v1421_v16 = vpop.permute.xlu0 %1420 }
 0x278   : > { %v1720_v61 = vsel %vm1692_vm11, %v1687_v25, %v1421_v16  ;;  %v1419_v54 = vpop.permute.xlu1 %1418  ;;  %v4737_v16 = vld [vmem:[#allocation12_spill] sm:$0xff] }
 0x279   : > { %v1719_v51 = vsel %vm1692_vm11, %v1686_v10, %v1419_v54 }
 0x27a   : > { %2527 = vmatprep.mubr.msk.f32.mxu1 %vm1730_vm12, %v1719_v51 }
 0x27b   : > { %2528 = vmatmul.mubr.msk.f32.gmra.mrb[10].mxu1 %vm1730_vm12, %v1720_v61  ;;  %v1220_v37 = vpop.permute.xlu0 %1219 }
 0x27c   : > { %v1122_v39 = vpop.permute.xlu1 %1121 }
 0x27d   : > { %v2502_v36 = vpop.f32.mrb[8].mxu0 }
 0x27e   : > { %2065 = vst.msk [vmem:[%s4199_s24 + $0x48] sm:$0xff] %vm248_vm0, %v2502_v36  ;;  %v1937_v7 = vpop.f32.mrb[9].mxu0  ;;  %v2170_v14 = vmul.f32 %v2502_v36, %v2502_v36  ;;  %v2106_v28 = vsel %vm248_vm0, %v2502_v36, 0.0 }
 0x27f   : > { %2064 = vst.msk [vmem:[%s4199_s24 + $0x40] sm:$0xff] %vm248_vm0, %v1937_v7  ;;  %v2104_v41 = vsel %vm248_vm0, %v1937_v7, 0.0  ;;  %v2169_v59 = vmul.f32 %v1937_v7, %v1937_v7  ;;  %v1222_v9 = vpop.permute.xlu0 %1221 }
 0x280   : > { %v2105_v50 = vadd.f32 %v2104_v41, %v2103_v21  ;;  %v1124_v42 = vpop.permute.xlu1 %1123  ;;  %v2210_v33 = vsel %vm248_vm0, %v2170_v14, 0.0  ;;  %v1556_v21 = vsel %vm1527_vm6, %v1523_v5, %v919_v32 }
 0x281   : > { %v2208_v31 = vsel %vm248_vm0, %v2169_v59, 0.0  ;;  %v1589_v1 = vsel %vm1560_vm7, %v1556_v21, %v1021_v58  ;;  %v1623_v3 = vsel %vm1593_vm8, %v1590_v23, %v1124_v42  ;;  %v1492_v58 = vsel %vm248_vm0, %v4068_v29, %v4736_v49  ;;  %v4738_v42 = vld [vmem:[#allocation58_spill] sm:$0xff] }
 0x282   : > { %v2209_v55 = vadd.f32 %v2208_v31, %v2207_v35  ;;  %v2107_v19 = vadd.f32 %v2106_v28, %v2105_v50  ;;  %v1622_v11 = vsel %vm1593_vm8, %v1589_v1, %v1122_v39  ;;  %v1656_v30 = vsel %vm1626_vm10, %v1623_v3, %v1222_v9  ;;  %v4739_v31 = vld [vmem:[#allocation71_spill] sm:$0xff] }
 0x283   : > { %v925_v34 = vpop.permute.xlu0 %924  ;;  %v1655_v8 = vsel %vm1626_vm10, %v1622_v11, %v1220_v37  ;;  %v1525_v10 = vsel %vm1494_vm5, %v1492_v58, %v4737_v16  ;;  %v1493_v28 = vsel %vm248_vm0, %v4078_v17, %v4738_v42 }
 0x284   : > { %v923_v24 = vpop.permute.xlu1 %922  ;;  %v2211_v40 = vadd.f32 %v2210_v33, %v2209_v55  ;;  %v1526_v55 = vsel %vm1494_vm5, %v1493_v28, %v4739_v31 }
 0x285   : > { %v1558_v51 = vsel %vm1527_vm6, %v1525_v10, %v923_v24 }
 0x287   : > { %v1324_v45 = vpop.permute.xlu0 %1323 }
 0x288   : > { %v1322_v18 = vpop.permute.xlu1 %1321  ;;  %v1689_v63 = vsel %vm1659_vm9, %v1656_v30, %v1324_v45 }
 0x289   : > { %v1688_v32 = vsel %vm1659_vm9, %v1655_v8, %v1322_v18 }
 0x28b   : > { %v1027_v2 = vpop.permute.xlu0 %1026 }
 0x28c   : > { %v1025_v12 = vpop.permute.xlu1 %1024 }
 0x28d   : > { %v1591_v39 = vsel %vm1560_vm7, %v1558_v51, %v1025_v12 }
 0x28e   : > { %v2505_v56 = vpop.f32.mrb[10].mxu0 }
 0x28f   : > { %2067 = vst.msk [vmem:[%s4199_s24 + $0x58] sm:$0xff] %vm248_vm0, %v2505_v56  ;;  %v1947_v15 = vpop.f32.mrb[11].mxu0  ;;  %v1425_v57 = vpop.permute.xlu0 %1424  ;;  %v2172_v35 = vmul.f32 %v2505_v56, %v2505_v56  ;;  %v2110_v44 = vsel %vm248_vm0, %v2505_v56, 0.0 }
 0x290   : > { %2066 = vst.msk [vmem:[%s4199_s24 + $0x50] sm:$0xff] %vm248_vm0, %v1947_v15  ;;  %v2108_v46 = vsel %vm248_vm0, %v1947_v15, 0.0  ;;  %v2171_v53 = vmul.f32 %v1947_v15, %v1947_v15  ;;  %v1722_v6 = vsel %vm1692_vm11, %v1689_v63, %v1425_v57  ;;  %v1423_v26 = vpop.permute.xlu1 %1422 }
 0x291   : > { %v2109_v62 = vadd.f32 %v2108_v46, %v2107_v19  ;;  %v1721_v43 = vsel %vm1692_vm11, %v1688_v32, %v1423_v26  ;;  %v2214_v61 = vsel %vm248_vm0, %v2172_v35, 0.0  ;;  %v1559_v19 = vsel %vm1527_vm6, %v1526_v55, %v925_v34 }
 0x292   : > { %v2212_v0 = vsel %vm248_vm0, %v2171_v53, 0.0  ;;  %2530 = vmatprep.mubr.msk.f32.mxu1 %vm1730_vm12, %v1721_v43  ;;  %v1592_v24 = vsel %vm1560_vm7, %v1559_v19, %v1027_v2 }
 0x293   : > { %v2213_v4 = vadd.f32 %v2212_v0, %v2211_v40  ;;  %2531 = vmatmul.mubr.msk.f32.gmra.mrb[12].mxu1 %vm1730_vm12, %v1722_v6  ;;  %v1224_v25 = vpop.permute.xlu0 %1223  ;;  %v2111_v47 = vadd.f32 %v2110_v44, %v2109_v62 }
 0x294   : > { %v1126_v54 = vpop.permute.xlu1 %1125 }
 0x295   : > { %v2215_v37 = vadd.f32 %v2214_v61, %v2213_v4  ;;  %v1624_v36 = vsel %vm1593_vm8, %v1591_v39, %v1126_v54 }
 0x296   : > { %v1657_v14 = vsel %vm1626_vm10, %v1624_v36, %v1224_v25 }
 0x297   : > { %v1326_v7 = vpop.permute.xlu0 %1325 }
 0x298   : > { %v1128_v29 = vpop.permute.xlu1 %1127  ;;  %v1690_v41 = vsel %vm1659_vm9, %v1657_v14, %v1326_v7 }
 0x299   : > { %v1625_v40 = vsel %vm1593_vm8, %v1592_v24, %v1128_v29 }
 0x29b   : > { %v1427_v59 = vpop.permute.xlu0 %1426 }
 0x29c   : > { %v1723_v9 = vsel %vm1692_vm11, %v1690_v41, %v1427_v59  ;;  %v1226_v50 = vpop.permute.xlu1 %1225  ;;  %v4740_v41 = vmov 0.0  }
 0x29d   : > { %2533 = vmatprep.mubr.msk.f32.mxu1 %vm1730_vm12, %v1723_v9  ;;  %v1658_v48 = vsel %vm1626_vm10, %v1625_v40, %v1226_v50  ;;  %249 = vst.msk [vmem:[%s4429_s28] sm:$0xff] %vm248_vm0, %v4740_v41  ;;  %250 = vst.msk [vmem:[%s4434_s5] sm:$0xff] %vm248_vm0, %v4740_v41 }
 0x2a0   : > { %v1328_v33 = vpop.permute.xlu1 %1327 }
 0x2a1   : > { %v1691_v27 = vsel %vm1659_vm9, %v1658_v48, %v1328_v33 }
 0x2a4   : > { %v1429_v22 = vpop.permute.xlu1 %1428 }
 0x2a5   : > { %v1724_v52 = vsel %vm1692_vm11, %v1691_v27, %v1429_v22 }
 0x2a6   : > { %v2508_v45 = vpop.f32.mrb[12].mxu0  ;;  %2534 = vmatmul.mubr.msk.f32.gmra.mrb[14].mxu1 %vm1730_vm12, %v1724_v52 }
 0x2a7   : > { %2069 = vst.msk [vmem:[%s4199_s24 + $0x68] sm:$0xff] %vm248_vm0, %v2508_v45  ;;  %v1957_v17 = vpop.f32.mrb[13].mxu0  ;;  %v2174_v34 = vmul.f32 %v2508_v45, %v2508_v45  ;;  %v2114_v60 = vsel %vm248_vm0, %v2508_v45, 0.0 }
 0x2a8   : > { %2068 = vst.msk [vmem:[%s4199_s24 + $0x60] sm:$0xff] %vm248_vm0, %v1957_v17  ;;  %v2112_v13 = vsel %vm248_vm0, %v1957_v17, 0.0  ;;  %v2173_v5 = vmul.f32 %v1957_v17, %v1957_v17 }
 0x2a9   : > { %v2113_v38 = vadd.f32 %v2112_v13, %v2111_v47  ;;  %v2218_v23 = vsel %vm248_vm0, %v2174_v34, 0.0 }
 0x2aa   : > { %v2216_v18 = vsel %vm248_vm0, %v2173_v5, 0.0 }
 0x2ab   : > { %v2217_v20 = vadd.f32 %v2216_v18, %v2215_v37  ;;  %v2115_v21 = vadd.f32 %v2114_v60, %v2113_v38 }
 0x2ad   : > { %v2219_v1 = vadd.f32 %v2218_v23, %v2217_v20 }
 0x2be   : > { %v2511_v11 = vpop.f32.mrb[14].mxu0 }
 0x2bf   : > { %2071 = vst.msk [vmem:[%s4199_s24 + $0x78] sm:$0xff] %vm248_vm0, %v2511_v11  ;;  %v1967_v3 = vpop.f32.mrb[15].mxu0  ;;  %v2176_v2 = vmul.f32 %v2511_v11, %v2511_v11  ;;  %v2118_v56 = vsel %vm248_vm0, %v2511_v11, 0.0 }
 0x2c0   : > { %2070 = vst.msk [vmem:[%s4199_s24 + $0x70] sm:$0xff] %vm248_vm0, %v1967_v3  ;;  %v2116_v12 = vsel %vm248_vm0, %v1967_v3, 0.0  ;;  %v2175_v30 = vmul.f32 %v1967_v3, %v1967_v3 }
 0x2c1   : > { %v2117_v8 = vadd.f32 %v2116_v12, %v2115_v21  ;;  %v2222_v57 = vsel %vm248_vm0, %v2176_v2, 0.0 }
 0x2c2   : > { %v2220_v63 = vsel %vm248_vm0, %v2175_v30, 0.0 }
 0x2c3   : > { %v2119_v32 = vadd.f32 %v2118_v56, %v2117_v8  ;;  %v2221_v15 = vadd.f32 %v2220_v63, %v2219_v1 }
 0x2c5   : > { %v2223_v35 = vadd.f32 %v2222_v57, %v2221_v15 }
 0x2d6   : > { %v2514_v46 = vpop.f32.mrb[0].mxu1 }
 0x2d7   : > { %2073 = vst.msk [vmem:[%s4199_s24 + $0x88] sm:$0xff] %vm248_vm0, %v2514_v46  ;;  %v1977_v53 = vpop.f32.mrb[1].mxu1  ;;  %v2178_v6 = vmul.f32 %v2514_v46, %v2514_v46  ;;  %v2122_v44 = vsel %vm248_vm0, %v2514_v46, 0.0 }
 0x2d8   : > { %2072 = vst.msk [vmem:[%s4199_s24 + $0x80] sm:$0xff] %vm248_vm0, %v1977_v53  ;;  %v2120_v26 = vsel %vm248_vm0, %v1977_v53, 0.0  ;;  %v2177_v62 = vmul.f32 %v1977_v53, %v1977_v53 }
 0x2d9   : > { %v2121_v43 = vadd.f32 %v2120_v26, %v2119_v32  ;;  %v2226_v4 = vsel %vm248_vm0, %v2178_v6, 0.0 }
 0x2da   : > { %v2224_v0 = vsel %vm248_vm0, %v2177_v62, 0.0 }
 0x2db   : > { %v2225_v49 = vadd.f32 %v2224_v0, %v2223_v35  ;;  %v2123_v58 = vadd.f32 %v2122_v44, %v2121_v43 }
 0x2dd   : > { %v2227_v25 = vadd.f32 %v2226_v4, %v2225_v49 }
 0x2ee   : > { %v2517_v47 = vpop.f32.mrb[2].mxu1 }
 0x2ef   : > { %2075 = vst.msk [vmem:[%s4199_s24 + $0x98] sm:$0xff] %vm248_vm0, %v2517_v47  ;;  %v1987_v16 = vpop.f32.mrb[3].mxu1  ;;  %v2180_v10 = vmul.f32 %v2517_v47, %v2517_v47  ;;  %v2126_v37 = vsel %vm248_vm0, %v2517_v47, 0.0 }
 0x2f0   : > { %2074 = vst.msk [vmem:[%s4199_s24 + $0x90] sm:$0xff] %vm248_vm0, %v1987_v16  ;;  %v2124_v61 = vsel %vm248_vm0, %v1987_v16, 0.0  ;;  %v2179_v54 = vmul.f32 %v1987_v16, %v1987_v16 }
 0x2f1   : > { %v2125_v51 = vadd.f32 %v2124_v61, %v2123_v58  ;;  %v2230_v29 = vsel %vm248_vm0, %v2180_v10, 0.0 }
 0x2f2   : > { %v2228_v39 = vsel %vm248_vm0, %v2179_v54, 0.0 }
 0x2f3   : > { %v2229_v36 = vadd.f32 %v2228_v39, %v2227_v25  ;;  %v2127_v7 = vadd.f32 %v2126_v37, %v2125_v51 }
 0x2f5   : > { %v2231_v14 = vadd.f32 %v2230_v29, %v2229_v36 }
 0x306   : > { %v2520_v59 = vpop.f32.mrb[4].mxu1 }
 0x307   : > { %2077 = vst.msk [vmem:[%s4199_s24 + $0xa8] sm:$0xff] %vm248_vm0, %v2520_v59  ;;  %v1997_v9 = vpop.f32.mrb[5].mxu1  ;;  %v2182_v50 = vmul.f32 %v2520_v59, %v2520_v59  ;;  %v2130_v55 = vsel %vm248_vm0, %v2520_v59, 0.0 }
 0x308   : > { %2076 = vst.msk [vmem:[%s4199_s24 + $0xa0] sm:$0xff] %vm248_vm0, %v1997_v9  ;;  %v2128_v42 = vsel %vm248_vm0, %v1997_v9, 0.0  ;;  %v2181_v28 = vmul.f32 %v1997_v9, %v1997_v9 }
 0x309   : > { %v2129_v31 = vadd.f32 %v2128_v42, %v2127_v7  ;;  %v2234_v40 = vsel %vm248_vm0, %v2182_v50, 0.0 }
 0x30a   : > { %v2232_v19 = vsel %vm248_vm0, %v2181_v28, 0.0 }
 0x30b   : > { %v2233_v33 = vadd.f32 %v2232_v19, %v2231_v14  ;;  %v2131_v24 = vadd.f32 %v2130_v55, %v2129_v31 }
 0x30d   : > { %v2235_v48 = vadd.f32 %v2234_v40, %v2233_v33 }
 0x31e   : > { %v2523_v27 = vpop.f32.mrb[6].mxu1 }
 0x31f   : > { %2079 = vst.msk [vmem:[%s4199_s24 + $0xb8] sm:$0xff] %vm248_vm0, %v2523_v27  ;;  %v2007_v22 = vpop.f32.mrb[7].mxu1  ;;  %v2184_v52 = vmul.f32 %v2523_v27, %v2523_v27  ;;  %v2134_v13 = vsel %vm248_vm0, %v2523_v27, 0.0 }
 0x320   : > { %2078 = vst.msk [vmem:[%s4199_s24 + $0xb0] sm:$0xff] %vm248_vm0, %v2007_v22  ;;  %v2132_v45 = vsel %vm248_vm0, %v2007_v22, 0.0  ;;  %v2183_v17 = vmul.f32 %v2007_v22, %v2007_v22 }
 0x321   : > { %v2133_v34 = vadd.f32 %v2132_v45, %v2131_v24  ;;  %v2238_v18 = vsel %vm248_vm0, %v2184_v52, 0.0 }
 0x322   : > { %v2236_v5 = vsel %vm248_vm0, %v2183_v17, 0.0 }
 0x323   : > { %v2237_v38 = vadd.f32 %v2236_v5, %v2235_v48  ;;  %v2135_v60 = vadd.f32 %v2134_v13, %v2133_v34  ;;  %v2088_v34 = vld [vmem:[%s4429_s28] sm:$0xff] }
 0x325   : > { %v2239_v20 = vadd.f32 %v2238_v18, %v2237_v38  ;;  %v2160_v38 = vld [vmem:[%s4434_s5] sm:$0xff] }
 0x336   : > { %v2526_v21 = vpop.f32.mrb[8].mxu1 }
 0x337   : > { %2081 = vst.msk [vmem:[%s4199_s24 + $0xc8] sm:$0xff] %vm248_vm0, %v2526_v21  ;;  %v2017_v23 = vpop.f32.mrb[9].mxu1  ;;  %v2186_v1 = vmul.f32 %v2526_v21, %v2526_v21  ;;  %v2138_v12 = vsel %vm248_vm0, %v2526_v21, 0.0 }
 0x338   : > { %2080 = vst.msk [vmem:[%s4199_s24 + $0xc0] sm:$0xff] %vm248_vm0, %v2017_v23  ;;  %v2136_v11 = vsel %vm248_vm0, %v2017_v23, 0.0  ;;  %v2185_v3 = vmul.f32 %v2017_v23, %v2017_v23 }
 0x339   : > { %v2137_v2 = vadd.f32 %v2136_v11, %v2135_v60  ;;  %v2242_v63 = vsel %vm248_vm0, %v2186_v1, 0.0 }
 0x33a   : > { %v2240_v30 = vsel %vm248_vm0, %v2185_v3, 0.0 }
 0x33b   : > { %v2241_v8 = vadd.f32 %v2240_v30, %v2239_v20  ;;  %v2139_v56 = vadd.f32 %v2138_v12, %v2137_v2 }
 0x33d   : > { %v2243_v32 = vadd.f32 %v2242_v63, %v2241_v8 }
 0x34e   : > { %v2529_v15 = vpop.f32.mrb[10].mxu1 }
 0x34f   : > { %2083 = vst.msk [vmem:[%s4199_s24 + $0xd8] sm:$0xff] %vm248_vm0, %v2529_v15  ;;  %v2027_v57 = vpop.f32.mrb[11].mxu1  ;;  %v2188_v35 = vmul.f32 %v2529_v15, %v2529_v15  ;;  %v2142_v26 = vsel %vm248_vm0, %v2529_v15, 0.0 }
 0x350   : > { %2082 = vst.msk [vmem:[%s4199_s24 + $0xd0] sm:$0xff] %vm248_vm0, %v2027_v57  ;;  %v2140_v46 = vsel %vm248_vm0, %v2027_v57, 0.0  ;;  %v2187_v53 = vmul.f32 %v2027_v57, %v2027_v57 }
 0x351   : > { %v2141_v6 = vadd.f32 %v2140_v46, %v2139_v56  ;;  %v2246_v0 = vsel %vm248_vm0, %v2188_v35, 0.0 }
 0x352   : > { %v2244_v62 = vsel %vm248_vm0, %v2187_v53, 0.0 }
 0x353   : > { %v2245_v43 = vadd.f32 %v2244_v62, %v2243_v32  ;;  %v2143_v44 = vadd.f32 %v2142_v26, %v2141_v6 }
 0x355   : > { %v2247_v49 = vadd.f32 %v2246_v0, %v2245_v43 }
 0x366   : > { %v2532_v58 = vpop.f32.mrb[12].mxu1 }
 0x367   : > { %2085 = vst.msk [vmem:[%s4199_s24 + $0xe8] sm:$0xff] %vm248_vm0, %v2532_v58  ;;  %v2037_v4 = vpop.f32.mrb[13].mxu1  ;;  %v2190_v25 = vmul.f32 %v2532_v58, %v2532_v58  ;;  %v2146_v61 = vsel %vm248_vm0, %v2532_v58, 0.0 }
 0x368   : > { %2084 = vst.msk [vmem:[%s4199_s24 + $0xe0] sm:$0xff] %vm248_vm0, %v2037_v4  ;;  %v2144_v47 = vsel %vm248_vm0, %v2037_v4, 0.0  ;;  %v2189_v16 = vmul.f32 %v2037_v4, %v2037_v4 }
 0x369   : > { %v2145_v10 = vadd.f32 %v2144_v47, %v2143_v44  ;;  %v2250_v39 = vsel %vm248_vm0, %v2190_v25, 0.0 }
 0x36a   : > { %v2248_v54 = vsel %vm248_vm0, %v2189_v16, 0.0 }
 0x36b   : > { %v2249_v51 = vadd.f32 %v2248_v54, %v2247_v49  ;;  %v2147_v37 = vadd.f32 %v2146_v61, %v2145_v10 }
 0x36d   : > { %v2251_v36 = vadd.f32 %v2250_v39, %v2249_v51 }
 0x379   : > { %v2535_v7 = vpop.f32.mrb[14].mxu1 }
 0x37a   : > { %2087 = vst.msk [vmem:[%s4199_s24 + $0xf8] sm:$0xff] %vm248_vm0, %v2535_v7  ;;  %v2047_v29 = vpop.f32.mrb[15].mxu1  ;;  %v2192_v14 = vmul.f32 %v2535_v7, %v2535_v7  ;;  %v2150_v50 = vsel %vm248_vm0, %v2535_v7, 0.0 }
 0x37b   : > { %2086 = vst.msk [vmem:[%s4199_s24 + $0xf0] sm:$0xff] %vm248_vm0, %v2047_v29  ;;  %v2148_v41 = vsel %vm248_vm0, %v2047_v29, 0.0  ;;  %v2191_v59 = vmul.f32 %v2047_v29, %v2047_v29 }
 0x37c   : > { %v2149_v9 = vadd.f32 %v2148_v41, %v2147_v37  ;;  %v2254_v55 = vsel %vm248_vm0, %v2192_v14, 0.0 }
 0x37d   : > { %v2252_v42 = vsel %vm248_vm0, %v2191_v59, 0.0 }
 0x37e   : > { %v2151_v28 = vadd.f32 %v2150_v50, %v2149_v9  ;;  %v2253_v31 = vadd.f32 %v2252_v42, %v2251_v36 }
 0x380   : > { %v2152_v19 = vrot.slane %v2151_v28, 4  ;;  %v2255_v33 = vadd.f32 %v2254_v55, %v2253_v31 }
 0x382   : > { %v2153_v24 = vadd.f32 %v2152_v19, %v2151_v28  ;;  %v2256_v40 = vrot.slane %v2255_v33, 4 }
 0x384   : > { %v2154_v48 = vrot.slane %v2153_v24, 2  ;;  %v2257_v27 = vadd.f32 %v2256_v40, %v2255_v33 }
 0x386   : > { %v2155_v22 = vadd.f32 %v2154_v48, %v2153_v24  ;;  %v2258_v52 = vrot.slane %v2257_v27, 2 }
 0x388   : > { %v2156_v45 = vrot.slane %v2155_v22, 1  ;;  %v2259_v17 = vadd.f32 %v2258_v52, %v2257_v27 }
 0x38a   : > { %v2157_v13 = vadd.f32 %v2156_v45, %v2155_v22  ;;  %v2260_v5 = vrot.slane %v2259_v17, 1 }
 0x38c   : > { %v2158_v60 = vadd.f32 %v2157_v13, %v2088_v34  ;;  %v2261_v18 = vadd.f32 %v2260_v5, %v2259_v17 }
 0x38e   : > { %2159 = vst.msk [vmem:[%s4429_s28] sm:$0xff] %vm248_vm0, %v2158_v60  ;;  %v2262_v20 = vadd.f32 %v2261_v18, %v2160_v38 }
 0x390   : > { %2263 = vst.msk [vmem:[%s4434_s5] sm:$0xff] %vm248_vm0, %v2262_v20 }
 0x391 PF: > { %s15_s17 = sadd.s32 1, %s2637_s17   ;;  %s4741_s15 = smov %s2633_s16 }
 0x392   : > { %p12_p6 = scmp.ge.s32.totalorder %s15_s17, 4   ;;  %s4742_s16 = smov %s4744_s18 }
 0x394   :  { %14 = sbr.rel (!%p12_p6) target bundleno = 2 (0x2), region = 87 }

// kernel: resnet_basicblock_forward.4
= control target key start
LH: loop header
LB: loop body
LE: loop exit
PB: predicated region body
PF: predicated region fallthrough
CT: control target
= control target key end

     0   :  { %s2820_s21 = smov 0   ;;  %s2822_s22 = smov 0   ;;  %s4755_s0 = inlined_call_operand.vmem [shape: f32[512,4], index: 0, kind: input, shape index: {}]   ;;  %s4756_s1 = inlined_call_operand.vmem [shape: f32[1,4], index: 1, kind: input, shape index: {}]   ;;  %s4757_s2 = inlined_call_operand.vmem [shape: f32[1,4], index: 2, kind: input, shape index: {}]   ;;  %s4758_s3 = inlined_call_operand.vmem [shape: f32[36,4], index: 3, kind: input, shape index: {}]   ;;  %s4759_s4 = inlined_call_operand.vmem [shape: f32[512,4], index: 4, kind: output, shape index: {0}]   ;;  %s4760_s5 = inlined_call_operand.vmem [shape: f32[2,8,4], index: 5, kind: output, shape index: {1}]   ;;  %s4761_s6 = inlined_call_operand.vmem [shape: f32[2,8,4], index: 6, kind: output, shape index: {2}]  }
   0x1   :  { %s2824_s23 = smov 0  }
   0x2 LB: > { %s29_s24 = sadd.s32 1, %s2770_s22  ;;  %p2532_p0 = scmp.ge.s32.totalorder %s2774_s23, 1  ;;  %s2774_s23 = sphi %s2824_s23, %s17_s23   ;;  %s2770_s22 = sphi %s2822_s22, %s4996_s22   ;;  %s2766_s21 = sphi %s2820_s21, %s4995_s21  }
   0x3   : > { %p31_p1 = scmp.ge.s32.totalorder %s29_s24, 2  ;;  %p236_p2 = scmp.lt.s32.totalorder %s2774_s23, 3 }
   0x5   : > { %s4998_s24 = smov (%p31_p1, %s29_s24), 0  ;;  %p237_p3 = pnand %p2532_p0, %p236_p2 }
   0x7   : > { %240 = sbr.rel (%p237_p3) target bundleno = 913 (0x391), region = 36 }
   0xe   : > { %vm304_vm0 = vcmask 31744   ;;  %vm309_vm1 = vcmask 25600   ;;  %s2533_s25 = sshll.u32 %s2766_s21, 5  ;;  %v4762_v0 = vmov 0.0   ;;  %v2959_v1 = vld [vmem:[%s4756_s1] ss:$0 sm:$0xff] }
   0xf   : > { %307 = vst.msk [vmem:[#allocation2] sm:$0xff] %vm304_vm0, %v4762_v0  ;;  %308 = vst.msk [vmem:[#allocation2 + $0x8] sm:$0xff] %vm304_vm0, %v4762_v0  ;;  %p278_p4 = scmp.lt.s32.totalorder %s2533_s25, 63  ;;  %v2971_v2 = vld [vmem:[%s4757_s2] ss:$0 sm:$0xff]  ;;  %vm640_vm2 = vcmask 1046528  }
  0x10   : > { %311 = vst.msk [vmem:[#allocation2 + $0x18] sm:$0xff] %vm304_vm0, %v4762_v0  ;;  %312 = vst.msk [vmem:[#allocation2 + $0x20] sm:$0xff] %vm304_vm0, %v4762_v0  ;;  %s2777_s10 = smov 4   ;;  %vm817_vm3 = vcmask 1045504   ;;  %s2778_s11 = smov 8   ;;  %vm1961_vm4 = vcmask 1043456  }
  0x11   : > { %314 = vst.msk [vmem:[#allocation2 + $0x30] sm:$0xff] %vm304_vm0, %v4762_v0  ;;  %315 = vst.msk [vmem:[#allocation2 + $0x38] sm:$0xff] %vm304_vm0, %v4762_v0  ;;  %s5000_s25 = smov (!%p278_p4, %s2533_s25), 63  ;;  %s2779_s12 = smov 12   ;;  %vm1628_vm5 = vcmask 64512   ;;  %vm1661_vm6 = vcmask 97280  }
  0x12   : > { %317 = vst.msk [vmem:[#allocation2 + $0x48] sm:$0xff] %vm304_vm0, %v4762_v0  ;;  %318 = vst.msk [vmem:[#allocation2 + $0x50] sm:$0xff] %vm304_vm0, %v4762_v0  ;;  %s2534_s26 = sshll.u32 %s5000_s25, 3  ;;  %s2780_s13 = smov 16   ;;  %vm1694_vm7 = vcmask 130048   ;;  %vm1727_vm8 = vcmask 162816  }
  0x13   : > { %320 = vst.msk [vmem:[#allocation2 + $0x60] sm:$0xff] %vm304_vm0, %v4762_v0  ;;  %321 = vst.msk [vmem:[#allocation2 + $0x68] sm:$0xff] %vm304_vm0, %v4762_v0  ;;  %s2966_s7 = scalar_lea.vmem %s4755_s0, %s2534_s26  ;;  %s2781_s14 = smov 20   ;;  %vm1793_vm9 = vcmask 228352   ;;  %vm1760_vm10 = vcmask 195584   ;;  %vm1826_vm11 = vcmask 261120  }
  0x14   : > { %323 = vst.msk [vmem:[#allocation2 + $0x78] sm:$0xff] %vm304_vm0, %v4762_v0  ;;  %324 = vst.msk [vmem:[#allocation2 + $0x80] sm:$0xff] %vm304_vm0, %v4762_v0  ;;  %v364_v3 = vld [vmem:[%s2966_s7 + $0x10] sm:$0xff]  ;;  %v365_v4 = vld [vmem:[%s2966_s7 + $0x18] sm:$0xff]  ;;  %s2782_s19 = smov 24   ;;  %s2783_s9 = smov 32  }
  0x15   : > { %326 = vst.msk [vmem:[#allocation2 + $0x90] sm:$0xff] %vm304_vm0, %v4762_v0  ;;  %327 = vst.msk [vmem:[#allocation2 + $0x98] sm:$0xff] %vm304_vm0, %v4762_v0  ;;  %v362_v5 = vld [vmem:[%s2966_s7] sm:$0xff]  ;;  %v403_v9 = vmul.f32 %v2959_v1, %v364_v3  ;;  %v404_v10 = vmul.f32 %v2959_v1, %v365_v4  ;;  %v363_v15 = vld [vmem:[%s2966_s7 + $0x8] sm:$0xff]  ;;  %vm1864_vm12 = vcmask 293888   ;;  %p292_p5 = scmp.lt.s32.totalorder %s2766_s21, 1 }
  0x16   : > { %329 = vst.msk [vmem:[#allocation2 + $0xa8] sm:$0xff] %vm304_vm0, %v4762_v0  ;;  %330 = vst.msk [vmem:[#allocation2 + $0xb0] sm:$0xff] %vm304_vm0, %v4762_v0  ;;  %v2976_v6 = vld [vmem:[#allocation2] sm:$0xff]  ;;  %v2978_v7 = vld [vmem:[#allocation2 + $0x8] sm:$0xff]  ;;  %v401_v11 = vmul.f32 %v2959_v1, %v362_v5  ;;  %v402_v20 = vmul.f32 %v2959_v1, %v363_v15 }
  0x17   : > { %332 = vst.msk [vmem:[#allocation2 + $0xc0] sm:$0xff] %vm304_vm0, %v4762_v0  ;;  %333 = vst.msk [vmem:[#allocation2 + $0xc8] sm:$0xff] %vm304_vm0, %v4762_v0  ;;  %v641_v12 = vrot.slane %v2976_v6, 1  ;;  %v642_v13 = vrot.slane %v2978_v7, 1  ;;  %v366_v16 = vld [vmem:[%s2966_s7 + $0x20] sm:$0xff]  ;;  %v367_v17 = vld [vmem:[%s2966_s7 + $0x28] sm:$0xff]  ;;  %v442_v18 = vadd.f32 %v2971_v2, %v403_v9  ;;  %v443_v19 = vadd.f32 %v2971_v2, %v404_v10 }
  0x18   : > { %335 = vst.msk [vmem:[#allocation2 + $0xd8] sm:$0xff] %vm304_vm0, %v4762_v0  ;;  %336 = vst.msk [vmem:[#allocation2 + $0xe0] sm:$0xff] %vm304_vm0, %v4762_v0  ;;  %v440_v21 = vadd.f32 %v2971_v2, %v401_v11  ;;  %v368_v22 = vld [vmem:[%s2966_s7 + $0x30] sm:$0xff]  ;;  %v369_v23 = vld [vmem:[%s2966_s7 + $0x38] sm:$0xff]  ;;  %v405_v26 = vmul.f32 %v2959_v1, %v366_v16  ;;  %v406_v27 = vmul.f32 %v2959_v1, %v367_v17  ;;  %s5002_s21 = smov (!%p292_p5, %s2766_s21), 1 }
  0x19   : > { %338 = vst.msk [vmem:[#allocation2 + $0xf0] sm:$0xff] %vm304_vm0, %v4762_v0  ;;  %339 = vst.msk [vmem:[#allocation2 + $0xf8] sm:$0xff] %vm304_vm0, %v4762_v0  ;;  %v643_v24 = vsel %vm640_vm2, %v641_v12, %v642_v13  ;;  %v370_v28 = vld [vmem:[%s2966_s7 + $0x40] sm:$0xff]  ;;  %v371_v29 = vld [vmem:[%s2966_s7 + $0x48] sm:$0xff]  ;;  %v474_v31 = vmax.f32 %v442_v18, 0.0  ;;  %v475_v32 = vmax.f32 %v443_v19, 0.0  ;;  %v441_v33 = vadd.f32 %v2971_v2, %v402_v20 }
  0x1a   : > { %341 = vst.msk [vmem:[#allocation2 + $0x108] sm:$0xff] %vm304_vm0, %v4762_v0  ;;  %342 = vst.msk [vmem:[#allocation2 + $0x110] sm:$0xff] %vm304_vm0, %v4762_v0  ;;  %v372_v30 = vld [vmem:[%s2966_s7 + $0x50] sm:$0xff]  ;;  %721 = vrot.lane.b32.xlu0 %v643_v24, %s2777_s10  ;;  %v472_v34 = vmax.f32 %v440_v21, 0.0  ;;  %v444_v35 = vadd.f32 %v2971_v2, %v405_v26  ;;  %v445_v36 = vadd.f32 %v2971_v2, %v406_v27  ;;  %v373_v39 = vld [vmem:[%s2966_s7 + $0x58] sm:$0xff]  ;;  %s2537_s25 = sshll.u32 %s5002_s21, 3 }
  0x1b   : > { %344 = vst.msk [vmem:[#allocation2 + $0x120] sm:$0xff] %vm304_vm0, %v4762_v0  ;;  %345 = vst.msk [vmem:[#allocation2 + $0x128] sm:$0xff] %vm304_vm0, %v4762_v0  ;;  %v407_v37 = vmul.f32 %v2959_v1, %v368_v22  ;;  %v408_v38 = vmul.f32 %v2959_v1, %v369_v23  ;;  %v473_v40 = vmax.f32 %v441_v33, 0.0  ;;  %v409_v41 = vmul.f32 %v2959_v1, %v370_v28  ;;  %v374_v44 = vld [vmem:[%s2966_s7 + $0x60] sm:$0xff]  ;;  %v375_v45 = vld [vmem:[%s2966_s7 + $0x68] sm:$0xff]  ;;  %s4679_s18 = scalar_lea.vmem %s4760_s5, %s2537_s25  ;;  %s4684_s27 = scalar_lea.vmem %s4761_s6, %s2537_s25 }
  0x1c   : > { %347 = vst.msk [vmem:[#allocation2 + $0x138] sm:$0xff] %vm304_vm0, %v4762_v0  ;;  %348 = vst.msk [vmem:[#allocation2 + $0x140] sm:$0xff] %vm304_vm0, %v4762_v0  ;;  %v410_v42 = vmul.f32 %v2959_v1, %v371_v29  ;;  %v411_v43 = vmul.f32 %v2959_v1, %v372_v30  ;;  %v476_v46 = vmax.f32 %v444_v35, 0.0  ;;  %v477_v47 = vmax.f32 %v445_v36, 0.0  ;;  %v376_v54 = vld [vmem:[%s2966_s7 + $0x70] sm:$0xff]  ;;  %v377_v55 = vld [vmem:[%s2966_s7 + $0x78] sm:$0xff] }
  0x1d   : > { %350 = vst.msk [vmem:[#allocation2 + $0x150] sm:$0xff] %vm304_vm0, %v4762_v0  ;;  %351 = vst.msk [vmem:[#allocation2 + $0x158] sm:$0xff] %vm304_vm0, %v4762_v0  ;;  %v446_v48 = vadd.f32 %v2971_v2, %v407_v37  ;;  %v447_v49 = vadd.f32 %v2971_v2, %v408_v38  ;;  %v448_v50 = vadd.f32 %v2971_v2, %v409_v41  ;;  %v378_v60 = vld [vmem:[%s2966_s7 + $0x80] sm:$0xff]  ;;  %v379_v61 = vld [vmem:[%s2966_s7 + $0x88] sm:$0xff] }
  0x1e   : > { %353 = vst.msk [vmem:[#allocation2 + $0x168] sm:$0xff] %vm304_vm0, %v4762_v0  ;;  %354 = vst.msk [vmem:[#allocation2 + $0x170] sm:$0xff] %vm304_vm0, %v4762_v0  ;;  %v449_v51 = vadd.f32 %v2971_v2, %v410_v42  ;;  %v412_v52 = vmul.f32 %v2959_v1, %v373_v39  ;;  %v450_v53 = vadd.f32 %v2971_v2, %v411_v43  ;;  %v380_v26 = vld [vmem:[%s2966_s7 + $0x90] sm:$0xff]  ;;  %v381_v27 = vld [vmem:[%s2966_s7 + $0x98] sm:$0xff] }
  0x1f   : > { %356 = vst.msk [vmem:[#allocation2 + $0x180] sm:$0xff] %vm304_vm0, %v4762_v0  ;;  %357 = vst.msk [vmem:[#allocation2 + $0x188] sm:$0xff] %vm304_vm0, %v4762_v0  ;;  %v478_v56 = vmax.f32 %v446_v48, 0.0  ;;  %v479_v57 = vmax.f32 %v447_v49, 0.0  ;;  %v413_v58 = vmul.f32 %v2959_v1, %v374_v44  ;;  %v414_v59 = vmul.f32 %v2959_v1, %v375_v45 }
  0x20   : > { %359 = vst.msk [vmem:[#allocation2 + $0x198] sm:$0xff] %vm304_vm0, %v4762_v0  ;;  %360 = vst.msk [vmem:[#allocation2 + $0x1a0] sm:$0xff] %vm304_vm0, %v4762_v0  ;;  %v480_v62 = vmax.f32 %v448_v50, 0.0  ;;  %v481_v63 = vmax.f32 %v449_v51, 0.0  ;;  %v451_v3 = vadd.f32 %v2971_v2, %v412_v52  ;;  %v482_v4 = vmax.f32 %v450_v53, 0.0 }
  0x21   : > { %310 = vst.msk [vmem:[#allocation2 + $0x10] sm:$0x3] %vm309_vm1, %v4762_v0  ;;  %313 = vst.msk [vmem:[#allocation2 + $0x28] sm:$0x3] %vm309_vm1, %v4762_v0  ;;  %v452_v5 = vadd.f32 %v2971_v2, %v413_v58  ;;  %v453_v9 = vadd.f32 %v2971_v2, %v414_v59  ;;  %v415_v10 = vmul.f32 %v2959_v1, %v376_v54 }
  0x22   : > { %316 = vst.msk [vmem:[#allocation2 + $0x40] sm:$0x3] %vm309_vm1, %v4762_v0  ;;  %319 = vst.msk [vmem:[#allocation2 + $0x58] sm:$0x3] %vm309_vm1, %v4762_v0  ;;  %v416_v11 = vmul.f32 %v2959_v1, %v377_v55  ;;  %v483_v12 = vmax.f32 %v451_v3, 0.0  ;;  %v419_v41 = vmul.f32 %v2959_v1, %v380_v26  ;;  %v420_v42 = vmul.f32 %v2959_v1, %v381_v27  ;;  %v384_v3 = vld [vmem:[%s2966_s7 + $0xb0] sm:$0xff] }
  0x23   : > { %322 = vst.msk [vmem:[#allocation2 + $0x70] sm:$0x3] %vm309_vm1, %v4762_v0  ;;  %325 = vst.msk [vmem:[#allocation2 + $0x88] sm:$0x3] %vm309_vm1, %v4762_v0  ;;  %v484_v18 = vmax.f32 %v452_v5, 0.0  ;;  %v485_v19 = vmax.f32 %v453_v9, 0.0  ;;  %v454_v20 = vadd.f32 %v2971_v2, %v415_v10  ;;  %v423_v27 = vmul.f32 %v2959_v1, %v384_v3 }
  0x24   : > { %328 = vst.msk [vmem:[#allocation2 + $0xa0] sm:$0x3] %vm309_vm1, %v4762_v0  ;;  %331 = vst.msk [vmem:[#allocation2 + $0xb8] sm:$0x3] %vm309_vm1, %v4762_v0  ;;  %v455_v21 = vadd.f32 %v2971_v2, %v416_v11  ;;  %v458_v58 = vadd.f32 %v2971_v2, %v419_v41  ;;  %v459_v59 = vadd.f32 %v2971_v2, %v420_v42  ;;  %v385_v5 = vld [vmem:[%s2966_s7 + $0xb8] sm:$0xff]  ;;  %v386_v9 = vld [vmem:[%s2966_s7 + $0xc0] sm:$0xff] }
  0x25   : > { %334 = vst.msk [vmem:[#allocation2 + $0xd0] sm:$0x3] %vm309_vm1, %v4762_v0  ;;  %337 = vst.msk [vmem:[#allocation2 + $0xe8] sm:$0x3] %vm309_vm1, %v4762_v0  ;;  %v486_v30 = vmax.f32 %v454_v20, 0.0  ;;  %v390_v3 = vld [vmem:[%s2966_s7 + $0xe0] sm:$0xff] }
  0x26   : > { %340 = vst.msk [vmem:[#allocation2 + $0x100] sm:$0x3] %vm309_vm1, %v4762_v0  ;;  %343 = vst.msk [vmem:[#allocation2 + $0x118] sm:$0x3] %vm309_vm1, %v4762_v0 }
  0x27   : > { %346 = vst.msk [vmem:[#allocation2 + $0x130] sm:$0x3] %vm309_vm1, %v4762_v0  ;;  %349 = vst.msk [vmem:[#allocation2 + $0x148] sm:$0x3] %vm309_vm1, %v4762_v0 }
  0x28   : > { %352 = vst.msk [vmem:[#allocation2 + $0x160] sm:$0x3] %vm309_vm1, %v4762_v0  ;;  %355 = vst.msk [vmem:[#allocation2 + $0x178] sm:$0x3] %vm309_vm1, %v4762_v0  ;;  %v2980_v8 = vld [vmem:[#allocation2 + $0x10] sm:$0x3] }
  0x29   : > { %358 = vst.msk [vmem:[#allocation2 + $0x190] sm:$0x3] %vm309_vm1, %v4762_v0  ;;  %361 = vst.msk [vmem:[#allocation2 + $0x1a8] sm:$0x3] %vm309_vm1, %v4762_v0  ;;  %v644_v14 = vrot.slane %v2980_v8, 1 }
  0x2a   : > { %508 = vst.msk [vmem:[#allocation2 + $0x31] sm:$0xff] %vm304_vm0, %v474_v31  ;;  %509 = vst.msk [vmem:[#allocation2 + $0x39] sm:$0xff] %vm304_vm0, %v475_v32  ;;  %v487_v31 = vmax.f32 %v455_v21, 0.0 }
  0x2b   : > { %v645_v25 = vsel %vm640_vm2, %v642_v13, %v644_v14  ;;  %506 = vst.msk [vmem:[#allocation2 + $0x19] sm:$0xff] %vm304_vm0, %v472_v34  ;;  %507 = vst.msk [vmem:[#allocation2 + $0x21] sm:$0xff] %vm304_vm0, %v473_v40  ;;  %v417_v13 = vmul.f32 %v2959_v1, %v378_v60  ;;  %v418_v14 = vmul.f32 %v2959_v1, %v379_v61  ;;  %v382_v60 = vld [vmem:[%s2966_s7 + $0xa0] sm:$0xff] }
  0x2c   : > { %723 = vrot.lane.b32.xlu0 %v645_v25, %s2777_s10  ;;  %510 = vst.msk [vmem:[#allocation2 + $0x49] sm:$0xff] %vm304_vm0, %v476_v46  ;;  %511 = vst.msk [vmem:[#allocation2 + $0x51] sm:$0xff] %vm304_vm0, %v477_v47 }
  0x2d   : > { %512 = vst.msk [vmem:[#allocation2 + $0x61] sm:$0xff] %vm304_vm0, %v478_v56  ;;  %513 = vst.msk [vmem:[#allocation2 + $0x69] sm:$0xff] %vm304_vm0, %v479_v57  ;;  %v456_v25 = vadd.f32 %v2971_v2, %v417_v13  ;;  %v457_v32 = vadd.f32 %v2971_v2, %v418_v14  ;;  %v490_v13 = vmax.f32 %v458_v58, 0.0  ;;  %v491_v14 = vmax.f32 %v459_v59, 0.0 }
  0x2e   : > { %514 = vst.msk [vmem:[#allocation2 + $0x79] sm:$0xff] %vm304_vm0, %v480_v62  ;;  %515 = vst.msk [vmem:[#allocation2 + $0x81] sm:$0xff] %vm304_vm0, %v481_v63  ;;  %v383_v63 = vld [vmem:[%s2966_s7 + $0xa8] sm:$0xff] }
  0x2f   : > { %516 = vst.msk [vmem:[#allocation2 + $0x91] sm:$0xff] %vm304_vm0, %v482_v4  ;;  %517 = vst.msk [vmem:[#allocation2 + $0x99] sm:$0xff] %vm304_vm0, %v483_v12  ;;  %v488_v46 = vmax.f32 %v456_v25, 0.0  ;;  %v489_v47 = vmax.f32 %v457_v32, 0.0  ;;  %v421_v25 = vmul.f32 %v2959_v1, %v382_v60  ;;  %v422_v26 = vmul.f32 %v2959_v1, %v383_v63 }
  0x30   : > { %518 = vst.msk [vmem:[#allocation2 + $0xa9] sm:$0xff] %vm304_vm0, %v484_v18  ;;  %519 = vst.msk [vmem:[#allocation2 + $0xb1] sm:$0xff] %vm304_vm0, %v485_v19  ;;  %v387_v18 = vld [vmem:[%s2966_s7 + $0xc8] sm:$0xff]  ;;  %v425_v32 = vmul.f32 %v2959_v1, %v386_v9 }
  0x31   : > { %v3047_v15 = vld [vmem:[#allocation2 + $0x30] sm:$0xff]  ;;  %v3049_v16 = vld [vmem:[#allocation2 + $0x38] sm:$0xff]  ;;  %v3082_v40 = vld [vmem:[#allocation2 + $0x40] sm:$0x3]  ;;  %520 = vst.msk [vmem:[#allocation2 + $0xc1] sm:$0xff] %vm304_vm0, %v486_v30  ;;  %v460_v42 = vadd.f32 %v2971_v2, %v421_v25 }
  0x32   : > { %v3051_v17 = vld [vmem:[#allocation2 + $0x18] sm:$0xff]  ;;  %v651_v22 = vrot.slane %v3047_v15, 1  ;;  %v652_v23 = vrot.slane %v3049_v16, 1  ;;  %v3062_v28 = vld [vmem:[#allocation2 + $0x20] sm:$0xff]  ;;  %v3064_v29 = vld [vmem:[#allocation2 + $0x28] sm:$0x3]  ;;  %v464_v60 = vadd.f32 %v2971_v2, %v425_v32 }
  0x33   : > { %v646_v24 = vrot.slane %v3051_v17, 1  ;;  %v647_v34 = vrot.slane %v3062_v28, 1  ;;  %v3073_v35 = vld [vmem:[#allocation2 + $0x48] sm:$0xff]  ;;  %v3075_v36 = vld [vmem:[#allocation2 + $0x50] sm:$0xff]  ;;  %v649_v37 = vrot.slane %v3064_v29, 1  ;;  %521 = vst.msk [vmem:[#allocation2 + $0xc9] sm:$0xff] %vm304_vm0, %v487_v31  ;;  %v424_v31 = vmul.f32 %v2959_v1, %v385_v5 }
  0x34   : > { %v3070_v33 = vsel %vm640_vm2, %v651_v22, %v652_v23  ;;  %v656_v38 = vrot.slane %v3073_v35, 1  ;;  %v657_v39 = vrot.slane %v3075_v36, 1  ;;  %v3091_v44 = vld [vmem:[#allocation2 + $0x60] sm:$0xff]  ;;  %v3093_v45 = vld [vmem:[#allocation2 + $0x68] sm:$0xff]  ;;  %v654_v54 = vrot.slane %v3082_v40, 1  ;;  %522 = vst.msk [vmem:[#allocation2 + $0xd9] sm:$0xff] %vm304_vm0, %v488_v46 }
  0x35   : > { %729 = vrot.lane.b32.xlu0 %v3070_v33, %s2777_s10  ;;  %v3089_v43 = vsel %vm640_vm2, %v646_v24, %v647_v34  ;;  %v661_v49 = vrot.slane %v3091_v44, 1  ;;  %v662_v50 = vrot.slane %v3093_v45, 1  ;;  %v3102_v51 = vld [vmem:[#allocation2 + $0x78] sm:$0xff]  ;;  %v3104_v52 = vld [vmem:[#allocation2 + $0x80] sm:$0xff]  ;;  %v3107_v53 = vsel %vm640_vm2, %v647_v34, %v649_v37  ;;  %523 = vst.msk [vmem:[#allocation2 + $0xe1] sm:$0xff] %vm304_vm0, %v489_v47  ;;  %524 = vst.msk [vmem:[#allocation2 + $0xf1] sm:$0xff] %vm304_vm0, %v490_v13 }
  0x36   : > { %725 = vrot.lane.b32.xlu1 %v3089_v43, %s2777_s10  ;;  %v3098_v48 = vsel %vm640_vm2, %v656_v38, %v657_v39  ;;  %v666_v55 = vrot.slane %v3102_v51, 1  ;;  %v667_v56 = vrot.slane %v3104_v52, 1  ;;  %v3116_v57 = vld [vmem:[#allocation2 + $0x58] sm:$0x3]  ;;  %v3126_v62 = vld [vmem:[#allocation2 + $0x90] sm:$0xff]  ;;  %v3137_v10 = vsel %vm640_vm2, %v652_v23, %v654_v54  ;;  %525 = vst.msk [vmem:[#allocation2 + $0xf9] sm:$0xff] %vm304_vm0, %v491_v14 }
  0x37   : > { %4838 = vst [vmem:[#allocation3_spill] sm:$0xff] %v3098_v48  ;;  %v3124_v61 = vsel %vm640_vm2, %v661_v49, %v662_v50  ;;  %v3132_v4 = vld [vmem:[#allocation2 + $0x98] sm:$0xff]  ;;  %v659_v11 = vrot.slane %v3116_v57, 1  ;;  %v3140_v12 = vld [vmem:[#allocation2 + $0x70] sm:$0x3]  ;;  %v671_v20 = vrot.slane %v3126_v62, 1  ;;  %v426_v34 = vmul.f32 %v2959_v1, %v387_v18 }
  0x38   : > { %4839 = vst [vmem:[#allocation4_spill] sm:$0xff] %v3124_v61  ;;  %v3148_v19 = vsel %vm640_vm2, %v666_v55, %v667_v56  ;;  %v3151_v21 = vld [vmem:[#allocation2 + $0xa8] sm:$0xff]  ;;  %v672_v23 = vrot.slane %v3132_v4, 1  ;;  %v3156_v24 = vld [vmem:[#allocation2 + $0xb0] sm:$0xff]  ;;  %v664_v30 = vrot.slane %v3140_v12, 1  ;;  %v461_v47 = vadd.f32 %v2971_v2, %v422_v26  ;;  %v389_v55 = vld [vmem:[%s2966_s7 + $0xd8] sm:$0xff] }
  0x39   : > { %733 = vrot.lane.b32.xlu0 %v3098_v48, %s2777_s10  ;;  %4840 = vst [vmem:[#allocation5_spill] sm:$0xff] %v3148_v19  ;;  %v3153_v22 = vld [vmem:[#allocation2 + $0x88] sm:$0x3]  ;;  %4841 = vst [vmem:[#allocation6_spill] sm:$0xff] %v3156_v24  ;;  %v3170_v37 = vsel %vm640_vm2, %v657_v39, %v659_v11  ;;  %v676_v38 = vrot.slane %v3151_v21, 1  ;;  %v677_v46 = vrot.slane %v3156_v24, 1  ;;  %v462_v49 = vadd.f32 %v2971_v2, %v423_v27 }
  0x3a   : > { %727 = vrot.lane.b32.xlu1 %v3107_v53, %s2777_s10  ;;  %4842 = vst [vmem:[#allocation7_spill] sm:$0xff] %v3170_v37  ;;  %v669_v41 = vrot.slane %v3153_v22, 1  ;;  %v463_v54 = vadd.f32 %v2971_v2, %v424_v31  ;;  %v388_v39 = vld [vmem:[%s2966_s7 + $0xd0] sm:$0xff]  ;;  %v3186_v58 = vsel %vm640_vm2, %v671_v20, %v672_v23  ;;  %v492_v59 = vmax.f32 %v460_v42, 0.0  ;;  %v391_v5 = vld [vmem:[%s2966_s7 + $0xe8] sm:$0xff]  ;;  %v3199_v11 = vld [vmem:[#allocation2 + $0xc0] sm:$0xff] }
  0x3b   : > { %4843 = vst [vmem:[#allocation8_spill] sm:$0xff] %v3186_v58  ;;  %v465_v63 = vadd.f32 %v2971_v2, %v426_v34  ;;  %v3197_v9 = vsel %vm640_vm2, %v662_v50, %v664_v30  ;;  %v3201_v13 = vld [vmem:[#allocation2 + $0xc8] sm:$0xff]  ;;  %v493_v14 = vmax.f32 %v461_v47, 0.0  ;;  %v494_v18 = vmax.f32 %v462_v49, 0.0  ;;  %v3208_v50 = vld [vmem:[#allocation2 + $0xa0] sm:$0x3] }
  0x3c   : > { %4844 = vst [vmem:[#allocation9_spill] sm:$0xff] %v3197_v9  ;;  %4845 = vst [vmem:[#allocation10_spill] sm:$0xff] %v3201_v13  ;;  %v495_v20 = vmax.f32 %v463_v54, 0.0  ;;  %v496_v25 = vmax.f32 %v464_v60, 0.0  ;;  %v427_v27 = vmul.f32 %v2959_v1, %v388_v39  ;;  %v428_v31 = vmul.f32 %v2959_v1, %v389_v55  ;;  %v3227_v54 = vld [vmem:[#allocation2 + $0xd8] sm:$0xff] }
  0x3d   : > { %737 = vrot.lane.b32.xlu0 %v3124_v61, %s2777_s10  ;;  %526 = vst.msk [vmem:[#allocation2 + $0x109] sm:$0xff] %vm304_vm0, %v492_v59  ;;  %v497_v26 = vmax.f32 %v465_v63, 0.0  ;;  %527 = vst.msk [vmem:[#allocation2 + $0x111] sm:$0xff] %vm304_vm0, %v493_v14  ;;  %v429_v30 = vmul.f32 %v2959_v1, %v390_v3  ;;  %v430_v32 = vmul.f32 %v2959_v1, %v391_v5  ;;  %v681_v42 = vrot.slane %v3199_v11, 1  ;;  %v3229_v1 = vld [vmem:[#allocation2 + $0xe0] sm:$0xff] }
  0x3e   : > { %731 = vrot.lane.b32.xlu1 %v3137_v10, %s2777_s10  ;;  %528 = vst.msk [vmem:[#allocation2 + $0x121] sm:$0xff] %vm304_vm0, %v494_v18  ;;  %529 = vst.msk [vmem:[#allocation2 + $0x129] sm:$0xff] %vm304_vm0, %v495_v20  ;;  %v3218_v34 = vsel %vm640_vm2, %v676_v38, %v677_v46  ;;  %v682_v47 = vrot.slane %v3201_v13, 1  ;;  %v466_v49 = vadd.f32 %v2971_v2, %v427_v27  ;;  %v674_v60 = vrot.slane %v3208_v50, 1  ;;  %v3242_v3 = vld [vmem:[#allocation2 + $0xb8] sm:$0x3] }
  0x3f   : > { %4846 = vst [vmem:[#allocation11_spill] sm:$0xff] %v3218_v34  ;;  %530 = vst.msk [vmem:[#allocation2 + $0x139] sm:$0xff] %vm304_vm0, %v496_v25  ;;  %v467_v38 = vadd.f32 %v2971_v2, %v428_v31  ;;  %v468_v39 = vadd.f32 %v2971_v2, %v429_v30  ;;  %v469_v55 = vadd.f32 %v2971_v2, %v430_v32  ;;  %v686_v2 = vrot.slane %v3227_v54, 1  ;;  %v3267_v31 = vld [vmem:[#allocation2 + $0xd0] sm:$0x3] }
  0x40   : > { %531 = vst.msk [vmem:[#allocation2 + $0x141] sm:$0xff] %vm304_vm0, %v497_v26  ;;  %4847 = vst [vmem:[#allocation12_spill] sm:$0xff] %v3229_v1  ;;  %v3237_v59 = vsel %vm640_vm2, %v667_v56, %v669_v41  ;;  %v498_v63 = vmax.f32 %v466_v49, 0.0  ;;  %v3245_v20 = vsel %vm640_vm2, %v681_v42, %v682_v47  ;;  %v687_v25 = vrot.slane %v3229_v1, 1  ;;  %v3252_v56 = vld [vmem:[#allocation2 + $0xf0] sm:$0xff]  ;;  %v3254_v41 = vld [vmem:[#allocation2 + $0xf8] sm:$0xff] }
  0x41   : > { %741 = vrot.lane.b32.xlu0 %v3148_v19, %s2777_s10  ;;  %4848 = vst [vmem:[#allocation13_spill] sm:$0xff] %v3237_v59  ;;  %v499_v5 = vmax.f32 %v467_v38, 0.0  ;;  %v500_v14 = vmax.f32 %v468_v39, 0.0  ;;  %v501_v18 = vmax.f32 %v469_v55, 0.0  ;;  %4849 = vst [vmem:[#allocation14_spill] sm:$0xff] %v3245_v20  ;;  %v3262_v26 = vsel %vm640_vm2, %v672_v23, %v674_v60 }
  0x42   : > { %735 = vrot.lane.b32.xlu1 %v3170_v37, %s2777_s10  ;;  %532 = vst.msk [vmem:[#allocation2 + $0x151] sm:$0xff] %vm304_vm0, %v498_v63  ;;  %4850 = vst [vmem:[#allocation15_spill] sm:$0xff] %v3254_v41  ;;  %v679_v27 = vrot.slane %v3242_v3, 1  ;;  %v3270_v30 = vsel %vm640_vm2, %v686_v2, %v687_v25  ;;  %v691_v32 = vrot.slane %v3252_v56, 1  ;;  %v692_v42 = vrot.slane %v3254_v41, 1 }
  0x43   : > { %533 = vst.msk [vmem:[#allocation2 + $0x159] sm:$0xff] %vm304_vm0, %v499_v5  ;;  %534 = vst.msk [vmem:[#allocation2 + $0x169] sm:$0xff] %vm304_vm0, %v500_v14  ;;  %v684_v39 = vrot.slane %v3267_v31, 1  ;;  %v3288_v55 = vld [vmem:[#allocation2 + $0xe8] sm:$0x3]  ;;  %v818_v37 = vrot.slane %v2976_v6, 2 }
  0x44   : > { %535 = vst.msk [vmem:[#allocation2 + $0x171] sm:$0xff] %vm304_vm0, %v501_v18  ;;  %4851 = vst [vmem:[#allocation16_spill] sm:$0xff] %v3262_v26  ;;  %v3276_v49 = vld [vmem:[#allocation2 + $0x108] sm:$0xff]  ;;  %v3278_v23 = vld [vmem:[#allocation2 + $0x110] sm:$0xff]  ;;  %v3283_v38 = vsel %vm640_vm2, %v677_v46, %v679_v27  ;;  %v3291_v60 = vsel %vm640_vm2, %v691_v32, %v692_v42  ;;  %v689_v2 = vrot.slane %v3288_v55, 1  ;;  %v819_v48 = vrot.slane %v2978_v7, 2 }
  0x45   : > { %745 = vrot.lane.b32.xlu0 %v3186_v58, %s2777_s10  ;;  %4852 = vst [vmem:[#allocation17_spill] sm:$0xff] %v3270_v30  ;;  %4853 = vst [vmem:[#allocation18_spill] sm:$0xff] %v3283_v38  ;;  %v696_v63 = vrot.slane %v3276_v49, 1  ;;  %v697_v5 = vrot.slane %v3278_v23, 1  ;;  %v3297_v14 = vld [vmem:[#allocation2 + $0x120] sm:$0xff]  ;;  %v3299_v46 = vld [vmem:[#allocation2 + $0x128] sm:$0xff]  ;;  %v3302_v18 = vsel %vm640_vm2, %v682_v47, %v684_v39 }
  0x46   : > { %739 = vrot.lane.b32.xlu1 %v3197_v9, %s2777_s10  ;;  %4854 = vst [vmem:[#allocation19_spill] sm:$0xff] %v3291_v60  ;;  %4855 = vst [vmem:[#allocation20_spill] sm:$0xff] %v3302_v18  ;;  %v3307_v27 = vld [vmem:[#allocation2 + $0x100] sm:$0x3]  ;;  %v701_v0 = vrot.slane %v3297_v14, 1  ;;  %v3321_v39 = vsel %vm640_vm2, %v687_v25, %v689_v2  ;;  %v823_v6 = vrot.slane %v3051_v17, 2 }
  0x47   : > { %v3310_v32 = vsel %vm640_vm2, %v696_v63, %v697_v5  ;;  %v3318_v47 = vld [vmem:[#allocation2 + $0x140] sm:$0xff]  ;;  %4857 = vst [vmem:[#allocation22_spill] sm:$0xff] %v3321_v39  ;;  %v3326_v63 = vld [vmem:[#allocation2 + $0x118] sm:$0x3]  ;;  %v824_v7 = vrot.slane %v3062_v28, 2 }
  0x48   : > { %4856 = vst [vmem:[#allocation21_spill] sm:$0xff] %v3310_v32 }
  0x49   : > { %749 = vrot.lane.b32.xlu0 %v3218_v34, %s2777_s10 }
  0x4a   : > { %743 = vrot.lane.b32.xlu1 %v3237_v59, %s2777_s10  ;;  %v3337_v25 = vld [vmem:[#allocation2 + $0x158] sm:$0xff]  ;;  %v3354_v19 = vld [vmem:[#allocation2 + $0x168] sm:$0xff] }
  0x4b   : > { %v716_v61 = vrot.slane %v3354_v19, 1 }
  0x4d   : > { %753 = vrot.lane.b32.xlu0 %v3245_v20, %s2777_s10  ;;  %v3316_v20 = vld [vmem:[#allocation2 + $0x138] sm:$0xff] }
  0x4e   : > { %747 = vrot.lane.b32.xlu1 %v3262_v26, %s2777_s10  ;;  %v3335_v26 = vld [vmem:[#allocation2 + $0x150] sm:$0xff] }
  0x4f   : > { %v711_v59 = vrot.slane %v3335_v26, 1 }
  0x51   : > { %757 = vrot.lane.b32.xlu0 %v3270_v30, %s2777_s10  ;;  %v702_v30 = vrot.slane %v3299_v46, 1 }
  0x52   : > { %751 = vrot.lane.b32.xlu1 %v3283_v38, %s2777_s10  ;;  %v706_v38 = vrot.slane %v3316_v20, 1 }
  0x53   : > { %v3329_v34 = vsel %vm640_vm2, %v701_v0, %v702_v30  ;;  %v3345_v0 = vld [vmem:[#allocation2 + $0x130] sm:$0x3] }
  0x54   : > { %4858 = vst [vmem:[#allocation23_spill] sm:$0xff] %v3329_v34 }
  0x55   : > { %761 = vrot.lane.b32.xlu0 %v3291_v60, %s2777_s10  ;;  %v694_v60 = vrot.slane %v3307_v27, 1 }
  0x56   : > { %755 = vrot.lane.b32.xlu1 %v3302_v18, %s2777_s10  ;;  %v707_v18 = vrot.slane %v3318_v47, 1 }
  0x57   : > { %v3340_v2 = vsel %vm640_vm2, %v692_v42, %v694_v60  ;;  %v3356_v42 = vld [vmem:[#allocation2 + $0x170] sm:$0xff] }
  0x58   : > { %4859 = vst [vmem:[#allocation24_spill] sm:$0xff] %v3340_v2  ;;  %v3348_v58 = vsel %vm640_vm2, %v706_v38, %v707_v18  ;;  %v3364_v38 = vld [vmem:[#allocation2 + $0x148] sm:$0x3] }
  0x59   : > { %765 = vrot.lane.b32.xlu0 %v3310_v32, %s2777_s10  ;;  %v699_v32 = vrot.slane %v3326_v63, 1  ;;  %4860 = vst [vmem:[#allocation25_spill] sm:$0xff] %v3348_v58 }
  0x5a   : > { %759 = vrot.lane.b32.xlu1 %v3321_v39, %s2777_s10  ;;  %v712_v39 = vrot.slane %v3337_v25, 1 }
  0x5b   : > { %v3359_v60 = vsel %vm640_vm2, %v697_v5, %v699_v32  ;;  %v709_v32 = vrot.slane %v3364_v38, 1 }
  0x5c   : > { %4861 = vst [vmem:[#allocation26_spill] sm:$0xff] %v3359_v60  ;;  %v3367_v9 = vsel %vm640_vm2, %v711_v59, %v712_v39 }
  0x5d   : > { %769 = vrot.lane.b32.xlu0 %v3329_v34, %s2777_s10  ;;  %v704_v34 = vrot.slane %v3345_v0, 1  ;;  %4862 = vst [vmem:[#allocation27_spill] sm:$0xff] %v3367_v9 }
  0x5e   : > { %763 = vrot.lane.b32.xlu1 %v3340_v2, %s2777_s10  ;;  %v717_v2 = vrot.slane %v3356_v42, 1 }
  0x5f   : > { %v3374_v5 = vsel %vm640_vm2, %v702_v30, %v704_v34  ;;  %v3389_v34 = vsel %vm640_vm2, %v707_v18, %v709_v32  ;;  %v3407_v32 = vsel %vm817_vm3, %v823_v6, %v824_v7  ;;  %v834_v6 = vrot.slane %v3075_v36, 2 }
  0x60   : > { %4863 = vst [vmem:[#allocation28_spill] sm:$0xff] %v3374_v5  ;;  %v3382_v59 = vsel %vm640_vm2, %v716_v61, %v717_v2  ;;  %4865 = vst [vmem:[#allocation30_spill] sm:$0xff] %v3389_v34  ;;  %v820_v61 = vsel %vm817_vm3, %v818_v37, %v819_v48  ;;  %v828_v37 = vrot.slane %v3047_v15, 2 }
  0x61   : > { %773 = vrot.lane.b32.xlu0 %v3348_v58, %s2777_s10  ;;  %v3379_v58 = vld [vmem:[#allocation2 + $0x160] sm:$0x3]  ;;  %4864 = vst [vmem:[#allocation29_spill] sm:$0xff] %v3382_v59 }
  0x62   : > { %767 = vrot.lane.b32.xlu1 %v3359_v60, %s2777_s10  ;;  %v714_v30 = vrot.slane %v3379_v58, 1 }
  0x65   : > { %777 = vrot.lane.b32.xlu0 %v3367_v9, %s2777_s10  ;;  %v3394_v9 = vld [vmem:[#allocation2 + $0x178] sm:$0x3] }
  0x66   : > { %771 = vrot.lane.b32.xlu1 %v3374_v5, %s2777_s10  ;;  %v3402_v5 = vsel %vm640_vm2, %v712_v39, %v714_v30  ;;  %v719_v18 = vrot.slane %v3394_v9, 1  ;;  %v821_v39 = vrot.slane %v2980_v8, 2 }
  0x67   : > { %4866 = vst [vmem:[#allocation31_spill] sm:$0xff] %v3402_v5 }
  0x69   : > { %781 = vrot.lane.b32.xlu0 %v3382_v59, %s2777_s10  ;;  %v829_v59 = vrot.slane %v3049_v16, 2 }
  0x6a   : > { %775 = vrot.lane.b32.xlu1 %v3389_v34, %s2777_s10  ;;  %v3414_v34 = vsel %vm640_vm2, %v717_v2, %v719_v18  ;;  %v826_v2 = vrot.slane %v3064_v29, 2  ;;  %v838_v18 = vrot.slane %v3091_v44, 2 }
  0x6b   : > { %4867 = vst [vmem:[#allocation32_spill] sm:$0xff] %v3414_v34  ;;  %v3420_v30 = vsel %vm817_vm3, %v828_v37, %v829_v59  ;;  %v839_v37 = vrot.slane %v3093_v45, 2 }
  0x6c   : > { %v3437_v60 = vsel %vm817_vm3, %v824_v7, %v826_v2  ;;  %v836_v7 = vrot.slane %v3116_v57, 2  ;;  %v849_v2 = vrot.slane %v3132_v4, 2 }
  0x6d   : > { %898 = vrot.lane.b32.xlu0 %v820_v61, %s2778_s11  ;;  %v833_v61 = vrot.slane %v3073_v35, 2  ;;  %v3443_v29 = vsel %vm817_vm3, %v838_v18, %v839_v37 }
  0x6e   : > { %779 = vrot.lane.b32.xlu1 %v3402_v5, %s2777_s10  ;;  %v822_v5 = vsel %vm817_vm3, %v819_v48, %v821_v39  ;;  %4868 = vst [vmem:[#allocation33_spill] sm:$0xff] %v3443_v29  ;;  %v843_v48 = vrot.slane %v3102_v51, 2  ;;  %v844_v39 = vrot.slane %v3104_v52, 2  ;;  %v3463_v18 = vsel %vm817_vm3, %v834_v6, %v836_v7 }
  0x6f   : > { %v3431_v8 = vsel %vm817_vm3, %v833_v61, %v834_v6  ;;  %v848_v61 = vrot.slane %v3126_v62, 2  ;;  %v846_v6 = vrot.slane %v3153_v22, 2  ;;  %v858_v7 = vrot.slane %v3199_v11, 2 }
  0x71   : > { %902 = vrot.lane.b32.xlu0 %v3407_v32, %s2778_s11  ;;  %v3469_v57 = vsel %vm817_vm3, %v848_v61, %v849_v2  ;;  %v859_v61 = vrot.slane %v3201_v13, 2 }
  0x72   : > { %783 = vrot.lane.b32.xlu1 %v3414_v34, %s2777_s10  ;;  %v831_v34 = vrot.slane %v3082_v40, 2  ;;  %v3456_v40 = vsel %vm817_vm3, %v843_v48, %v844_v39  ;;  %v854_v48 = vrot.slane %v3156_v24, 2  ;;  %v3489_v24 = vsel %vm817_vm3, %v844_v39, %v846_v6  ;;  %s2784_s10 = smov 28  }
  0x73   : > { %v3495_v22 = vsel %vm817_vm3, %v858_v7, %v859_v61  ;;  %v856_v39 = vrot.slane %v3242_v3, 2  ;;  %v868_v6 = vrot.slane %v3252_v56, 2  ;;  %v869_v7 = vrot.slane %v3254_v41, 2 }
  0x75   : > { %906 = vrot.lane.b32.xlu0 %v3420_v30, %s2778_s11  ;;  %v3521_v3 = vsel %vm817_vm3, %v868_v6, %v869_v7  ;;  %v883_v6 = vrot.slane %v3316_v20, 2  ;;  %v888_v20 = vrot.slane %v3335_v26, 2  ;;  %v893_v26 = vrot.slane %v3354_v19, 2 }
  0x76   : > { %900 = vrot.lane.b32.xlu1 %v822_v5, %s2778_s11  ;;  %v3450_v5 = vsel %vm817_vm3, %v829_v59, %v831_v34  ;;  %v841_v59 = vrot.slane %v3140_v12, 2  ;;  %v853_v34 = vrot.slane %v3151_v21, 2 }
  0x78   : > { %v3482_v12 = vsel %vm817_vm3, %v853_v34, %v854_v48  ;;  %v864_v34 = vrot.slane %v3229_v1, 2  ;;  %v3515_v1 = vsel %vm817_vm3, %v854_v48, %v856_v39  ;;  %v866_v48 = vrot.slane %v3288_v55, 2 }
  0x79   : > { %910 = vrot.lane.b32.xlu0 %v3431_v8, %s2778_s11  ;;  %v878_v39 = vrot.slane %v3297_v14, 2  ;;  %v884_v14 = vrot.slane %v3318_v47, 2  ;;  %v889_v47 = vrot.slane %v3337_v25, 2  ;;  %v894_v25 = vrot.slane %v3356_v42, 2 }
  0x7a   : > { %904 = vrot.lane.b32.xlu1 %v3437_v60, %s2778_s11 }
  0x7d   : > { %914 = vrot.lane.b32.xlu0 %v3443_v29, %s2778_s11  ;;  %v3476_v29 = vsel %vm817_vm3, %v839_v37, %v841_v59  ;;  %v851_v37 = vrot.slane %v3208_v50, 2  ;;  %v863_v59 = vrot.slane %v3227_v54, 2 }
  0x7e   : > { %908 = vrot.lane.b32.xlu1 %v3450_v5, %s2778_s11 }
  0x7f   : > { %v3502_v13 = vsel %vm817_vm3, %v849_v2, %v851_v37  ;;  %v3508_v50 = vsel %vm817_vm3, %v863_v59, %v864_v34  ;;  %v861_v2 = vrot.slane %v3267_v31, 2  ;;  %v873_v37 = vrot.slane %v3276_v49, 2 }
  0x80   : > { %v874_v59 = vrot.slane %v3278_v23, 2  ;;  %v879_v49 = vrot.slane %v3299_v46, 2  ;;  %v3541_v23 = vsel %vm817_vm3, %v864_v34, %v866_v48  ;;  %v3577_v48 = vsel %vm817_vm3, %v888_v20, %v889_v47 }
  0x81   : > { %918 = vrot.lane.b32.xlu0 %v3456_v40, %s2778_s11  ;;  %v3528_v41 = vsel %vm817_vm3, %v859_v61, %v861_v2  ;;  %v871_v61 = vrot.slane %v3307_v27, 2  ;;  %v876_v27 = vrot.slane %v3326_v63, 2  ;;  %v3562_v2 = vsel %vm817_vm3, %v883_v6, %v884_v14  ;;  %4870 = vst [vmem:[#allocation35_spill] sm:$0xff] %v3577_v48 }
  0x82   : > { %912 = vrot.lane.b32.xlu1 %v3463_v18, %s2778_s11  ;;  %v3534_v31 = vsel %vm817_vm3, %v873_v37, %v874_v59  ;;  %v3547_v55 = vsel %vm817_vm3, %v878_v39, %v879_v49  ;;  %4869 = vst [vmem:[#allocation34_spill] sm:$0xff] %v3562_v2  ;;  %v3590_v39 = vsel %vm817_vm3, %v893_v26, %v894_v25 }
  0x83   : > { %v3556_v34 = vsel %vm817_vm3, %v869_v7, %v871_v61  ;;  %v3569_v37 = vsel %vm817_vm3, %v874_v59, %v876_v27  ;;  %v881_v7 = vrot.slane %v3345_v0, 2  ;;  %v886_v0 = vrot.slane %v3364_v38, 2  ;;  %4871 = vst [vmem:[#allocation36_spill] sm:$0xff] %v3590_v39 }
  0x84   : > { %v891_v61 = vrot.slane %v3379_v58, 2  ;;  %v896_v27 = vrot.slane %v3394_v9, 2 }
  0x85   : > { %922 = vrot.lane.b32.xlu0 %v3469_v57, %s2778_s11  ;;  %v3584_v59 = vsel %vm817_vm3, %v879_v49, %v881_v7  ;;  %v3597_v42 = vsel %vm817_vm3, %v884_v14, %v886_v0 }
  0x86   : > { %916 = vrot.lane.b32.xlu1 %v3476_v29, %s2778_s11  ;;  %4872 = vst [vmem:[#allocation37_spill] sm:$0xff] %v3597_v42  ;;  %v3609_v6 = vsel %vm817_vm3, %v889_v47, %v891_v61  ;;  %v3621_v14 = vsel %vm817_vm3, %v894_v25, %v896_v27 }
  0x87   : > { %4873 = vst [vmem:[#allocation38_spill] sm:$0xff] %v3609_v6  ;;  %4874 = vst [vmem:[#allocation39_spill] sm:$0xff] %v3621_v14 }
  0x89   : > { %926 = vrot.lane.b32.xlu0 %v3482_v12, %s2778_s11 }
  0x8a   : > { %920 = vrot.lane.b32.xlu1 %v3489_v24, %s2778_s11 }
  0x8c   : > { %v3553_v46 = vpop.permute.xlu0 %721 }
  0x8d   : > { %930 = vrot.lane.b32.xlu0 %v3495_v22, %s2778_s11 }
  0x8e   : > { %924 = vrot.lane.b32.xlu1 %v3502_v13, %s2778_s11 }
  0x91   : > { %934 = vrot.lane.b32.xlu0 %v3508_v50, %s2778_s11 }
  0x92   : > { %928 = vrot.lane.b32.xlu1 %v3515_v1, %s2778_s11 }
  0x95   : > { %938 = vrot.lane.b32.xlu0 %v3521_v3, %s2778_s11 }
  0x96   : > { %932 = vrot.lane.b32.xlu1 %v3528_v41, %s2778_s11 }
  0x99   : > { %942 = vrot.lane.b32.xlu0 %v3534_v31, %s2778_s11 }
  0x9a   : > { %936 = vrot.lane.b32.xlu1 %v3541_v23, %s2778_s11 }
  0x9d   : > { %946 = vrot.lane.b32.xlu0 %v3547_v55, %s2778_s11 }
  0x9e   : > { %940 = vrot.lane.b32.xlu1 %v3556_v34, %s2778_s11  ;;  %v3574_v63 = vpop.permute.xlu0 %723 }
  0xa1   : > { %950 = vrot.lane.b32.xlu0 %v3562_v2, %s2778_s11 }
  0xa2   : > { %944 = vrot.lane.b32.xlu1 %v3569_v37, %s2778_s11 }
  0xa5   : > { %954 = vrot.lane.b32.xlu0 %v3577_v48, %s2778_s11 }
  0xa6   : > { %948 = vrot.lane.b32.xlu1 %v3584_v59, %s2778_s11 }
  0xa7   : > { %v3594_v19 = vpop.permute.xlu0 %729 }
  0xa8   : > { %v3600_v49 = vpop.permute.xlu1 %725 }
  0xa9   : > { %958 = vrot.lane.b32.xlu0 %v3590_v39, %s2778_s11 }
  0xaa   : > { %952 = vrot.lane.b32.xlu1 %v3597_v42, %s2778_s11 }
  0xab   : > { %v3606_v38 = vpop.permute.xlu0 %733 }
  0xac   : > { %v3612_v20 = vpop.permute.xlu1 %727 }
  0xad   : > { %996 = vrot.lane.b32.xlu0 %v3051_v17, %s2779_s12 }
  0xae   : > { %956 = vrot.lane.b32.xlu1 %v3609_v6, %s2778_s11 }
  0xaf   : > { %v3618_v58 = vpop.permute.xlu0 %737 }
  0xb0   : > { %v3623_v7 = vpop.permute.xlu1 %731 }
  0xb1   : > { %1000 = vrot.lane.b32.xlu0 %v3047_v15, %s2779_s12 }
  0xb2   : > { %960 = vrot.lane.b32.xlu1 %v3621_v14, %s2778_s11 }
  0xb3   : > { %v3629_v9 = vpop.permute.xlu0 %741 }
  0xb4   : > { %v3631_v47 = vpop.permute.xlu1 %735 }
  0xb5   : > { %1004 = vrot.lane.b32.xlu0 %v3073_v35, %s2779_s12 }
  0xb6   : > { %998 = vrot.lane.b32.xlu1 %v3062_v28, %s2779_s12 }
  0xb7   : > { %v3637_v17 = vpop.permute.xlu0 %745 }
  0xb8   : > { %4875 = vst [vmem:[#allocation40_spill] sm:$0xff] %v3637_v17  ;;  %v3639_v26 = vpop.permute.xlu1 %739 }
  0xb9   : > { %1008 = vrot.lane.b32.xlu0 %v3091_v44, %s2779_s12 }
  0xba   : > { %1002 = vrot.lane.b32.xlu1 %v3049_v16, %s2779_s12 }
  0xbb   : > { %v3645_v25 = vpop.permute.xlu0 %749 }
  0xbc   : > { %4876 = vst [vmem:[#allocation41_spill] sm:$0xff] %v3645_v25  ;;  %v3647_v0 = vpop.permute.xlu1 %743  ;;  %v4926_v25 = vld [vmem:[#allocation18_spill] sm:$0xff] }
  0xbd   : > { %1012 = vrot.lane.b32.xlu0 %v3102_v51, %s2779_s12 }
  0xbe   : > { %1006 = vrot.lane.b32.xlu1 %v3075_v36, %s2779_s12 }
  0xbf   : > { %v3653_v28 = vpop.permute.xlu0 %753 }
  0xc0   : > { %4877 = vst [vmem:[#allocation42_spill] sm:$0xff] %v3653_v28  ;;  %v3655_v61 = vpop.permute.xlu1 %747 }
  0xc1   : > { %4878 = vst [vmem:[#allocation43_spill] sm:$0xff] %v3655_v61  ;;  %1016 = vrot.lane.b32.xlu0 %v3126_v62, %s2779_s12 }
  0xc2   : > { %1010 = vrot.lane.b32.xlu1 %v3093_v45, %s2779_s12 }
  0xc3   : > { %v3661_v27 = vpop.permute.xlu0 %757 }
  0xc4   : > { %4879 = vst [vmem:[#allocation44_spill] sm:$0xff] %v3661_v27  ;;  %v3663_v39 = vpop.permute.xlu1 %751 }
  0xc5   : > { %4880 = vst [vmem:[#allocation45_spill] sm:$0xff] %v3663_v39  ;;  %1020 = vrot.lane.b32.xlu0 %v3151_v21, %s2779_s12  ;;  %v4927_v39 = vld [vmem:[#allocation11_spill] sm:$0xff] }
  0xc6   : > { %1014 = vrot.lane.b32.xlu1 %v3104_v52, %s2779_s12 }
  0xc7   : > { %v3669_v14 = vpop.permute.xlu0 %761 }
  0xc8   : > { %4881 = vst [vmem:[#allocation46_spill] sm:$0xff] %v3669_v14  ;;  %v3671_v28 = vpop.permute.xlu1 %755  ;;  %v1859_v14 = vld [vmem:[%s4758_s3] sm:$0xff] }
  0xc9   : > { %4882 = vst [vmem:[#allocation47_spill] sm:$0xff] %v3671_v28  ;;  %1100 = vrot.lane.b32.xlu0 %v3107_v53, %s2780_s13  ;;  %v1860_v28 = vld [vmem:[%s4758_s3 + $0x8] sm:$0xff] }
  0xca   : > { %1018 = vrot.lane.b32.xlu1 %v3132_v4, %s2779_s12 }
  0xcb   : > { %v3677_v27 = vpop.permute.xlu0 %765 }
  0xcc   : > { %4883 = vst [vmem:[#allocation48_spill] sm:$0xff] %v3677_v27  ;;  %v3679_v48 = vpop.permute.xlu1 %759  ;;  %v2671_v27 = vpack.c.bf16 %v1860_v28, %v1859_v14 }
  0xcd   : > { %4884 = vst [vmem:[#allocation49_spill] sm:$0xff] %v3679_v48  ;;  %1201 = vrot.lane.b32.xlu0 %v3437_v60, %s2781_s14  ;;  %v1861_v60 = vld [vmem:[%s4758_s3 + $0x10] sm:$0xff]  ;;  %v1862_v48 = vld [vmem:[%s4758_s3 + $0x18] sm:$0xff] }
  0xce   : > { %1098 = vrot.lane.b32.xlu1 %v3089_v43, %s2780_s13  ;;  %2672 = vmatprep.subr.bf16.mxu0 %v2671_v27  ;;  %v2675_v14 = vpack.c.bf16 %v1862_v48, %v1861_v60 }
  0xcf   : > { %v3691_v53 = vpop.permute.xlu0 %769  ;;  %2674 = vmatpush3.bf16.msra.mxu0 %v2671_v27  ;;  %2679 = vmatprep.subr.bf16.mxu1 %v2671_v27 }
  0xd0   : > { %4885 = vst [vmem:[#allocation50_spill] sm:$0xff] %v3691_v53  ;;  %v3693_v6 = vpop.permute.xlu1 %763  ;;  %2682 = vmatpush3.bf16.msra.mxu1 %v2671_v27  ;;  %2676 = vmatprep.subr.bf16.mxu0 %v2675_v14 }
  0xd1   : > { %4886 = vst [vmem:[#allocation51_spill] sm:$0xff] %v3693_v6  ;;  %1299 = vrot.lane.b32.xlu0 %v3049_v16, %s2782_s19  ;;  %2680 = vmatprep.subr.bf16.mxu1 %v2675_v14  ;;  %v4902_v6 = vld [vmem:[#allocation33_spill] sm:$0xff] }
  0xd2   : > { %1199 = vrot.lane.b32.xlu1 %v3407_v32, %s2781_s14  ;;  %v1863_v32 = vld [vmem:[%s4758_s3 + $0x20] sm:$0xf] }
  0xd3   : > { %v3705_v43 = vpop.permute.xlu0 %773  ;;  %2678 = vmatpush3.bf16.msra.mxu0 %v2675_v14 }
  0xd4   : > { %4887 = vst [vmem:[#allocation52_spill] sm:$0xff] %v3705_v43  ;;  %v3707_v28 = vpop.permute.xlu1 %767  ;;  %2683 = vmatpush3.bf16.msra.mxu1 %v2675_v14  ;;  %2621 = vmatprep.subr.msk.mxu0 %vm1961_vm4, %v1863_v32 }
  0xd5   : > { %4888 = vst [vmem:[#allocation53_spill] sm:$0xff] %v3707_v28  ;;  %1102 = vrot.lane.b32.xlu0 %v3070_v33, %s2780_s13  ;;  %2681 = vmatprep.subr.msk.mxu1 %vm1961_vm4, %v1863_v32 }
  0xd6   : > { %1297 = vrot.lane.b32.xlu1 %v3047_v15, %s2782_s19 }
  0xd7   : > { %v3713_v16 = vpop.permute.xlu0 %777  ;;  %2622 = vmatpush3.msk.msra.mxu0 %vm1961_vm4, %v1863_v32 }
  0xd8   : > { %4889 = vst [vmem:[#allocation54_spill] sm:$0xff] %v3713_v16  ;;  %v3718_v48 = vpop.permute.xlu1 %771  ;;  %2684 = vmatpush3.msk.msra.mxu1 %vm1961_vm4, %v1863_v32 }
  0xd9   : > { %4890 = vst [vmem:[#allocation55_spill] sm:$0xff] %v3718_v48  ;;  %1500 = vrot.lane.b32.xlu0 %v3420_v30, %s2783_s9  ;;  %v4899_v48 = vld [vmem:[#allocation4_spill] sm:$0xff] }
  0xda   : > { %1399 = vrot.lane.b32.xlu1 %v3070_v33, %s2784_s10 }
  0xdb   : > { %v3724_v15 = vpop.permute.xlu0 %781 }
  0xdc   : > { %4891 = vst [vmem:[#allocation56_spill] sm:$0xff] %v3724_v15  ;;  %v3726_v27 = vpop.permute.xlu1 %775 }
  0xdd   : > { %4892 = vst [vmem:[#allocation57_spill] sm:$0xff] %v3726_v27  ;;  %1203 = vrot.lane.b32.xlu0 %v3420_v30, %s2781_s14 }
  0xde   : > { %1401 = vrot.lane.b32.xlu1 %v3137_v10, %s2784_s10 }
  0xdf   : > { %v3732_v60 = vpop.permute.xlu0 %898 }
  0xe0   : > { %v3734_v14 = vpop.permute.xlu1 %779 }
  0xe1   : > { %4893 = vst [vmem:[#allocation58_spill] sm:$0xff] %v3734_v14  ;;  %1205 = vrot.lane.b32.xlu0 %v3450_v5, %s2781_s14  ;;  %v4895_v14 = vld [vmem:[#allocation3_spill] sm:$0xff] }
  0xe2   : > { %1104 = vrot.lane.b32.xlu1 %v3137_v10, %s2780_s13 }
  0xe3   : > { %v3740_v33 = vpop.permute.xlu0 %902 }
  0xe4   : > { %v3742_v32 = vpop.permute.xlu1 %783 }
  0xe5   : > { %4894 = vst [vmem:[#allocation59_spill] sm:$0xff] %v3742_v32  ;;  %1303 = vrot.lane.b32.xlu0 %v3075_v36, %s2782_s19  ;;  %v4896_v32 = vld [vmem:[#allocation7_spill] sm:$0xff] }
  0xe6   : > { %1502 = vrot.lane.b32.xlu1 %v3450_v5, %s2783_s9 }
  0xe7   : > { %v3748_v30 = vpop.permute.xlu0 %906 }
  0xe8   : > { %v3750_v15 = vpop.permute.xlu1 %900 }
  0xe9   : > { %1106 = vrot.lane.b32.xlu0 %v4895_v14, %s2780_s13 }
  0xea   : > { %1301 = vrot.lane.b32.xlu1 %v3073_v35, %s2782_s19 }
  0xeb   : > { %v3756_v10 = vpop.permute.xlu0 %910 }
  0xec   : > { %v3758_v16 = vpop.permute.xlu1 %904 }
  0xed   : > { %1504 = vrot.lane.b32.xlu0 %v3431_v8, %s2783_s9 }
  0xee   : > { %1403 = vrot.lane.b32.xlu1 %v4895_v14, %s2784_s10 }
  0xef   : > { %v3764_v36 = vpop.permute.xlu0 %914 }
  0xf0   : > { %v3766_v5 = vpop.permute.xlu1 %908 }
  0xf1   : > { %1207 = vrot.lane.b32.xlu0 %v3431_v8, %s2781_s14 }
  0xf2   : > { %1405 = vrot.lane.b32.xlu1 %v4896_v32, %s2784_s10 }
  0xf3   : > { %v3772_v35 = vpop.permute.xlu0 %918 }
  0xf4   : > { %v3774_v43 = vpop.permute.xlu1 %912 }
  0xf5   : > { %1209 = vrot.lane.b32.xlu0 %v3463_v18, %s2781_s14 }
  0xf6   : > { %1108 = vrot.lane.b32.xlu1 %v4896_v32, %s2780_s13 }
  0xf7   : > { %v3780_v14 = vpop.permute.xlu0 %922 }
  0xf8   : > { %4897 = vst [vmem:[#allocation3_spill] sm:$0xff] %v3780_v14  ;;  %v3782_v27 = vpop.permute.xlu1 %916 }
  0xf9   : > { %1307 = vrot.lane.b32.xlu0 %v3093_v45, %s2782_s19 }
  0xfa   : > { %1506 = vrot.lane.b32.xlu1 %v3463_v18, %s2783_s9 }
  0xfb   : > { %v3788_v8 = vpop.permute.xlu0 %926 }
  0xfc   : > { %4898 = vst [vmem:[#allocation7_spill] sm:$0xff] %v3788_v8  ;;  %v3790_v53 = vpop.permute.xlu1 %920  ;;  %v4905_v8 = vld [vmem:[#allocation9_spill] sm:$0xff] }
  0xfd   : > { %1110 = vrot.lane.b32.xlu0 %v4899_v48, %s2780_s13 }
  0xfe   : > { %1305 = vrot.lane.b32.xlu1 %v3091_v44, %s2782_s19 }
  0xff   : > { %v3796_v32 = vpop.permute.xlu0 %930 }
 0x100   : > { %4900 = vst [vmem:[#allocation4_spill] sm:$0xff] %v3796_v32  ;;  %v3798_v28 = vpop.permute.xlu1 %924 }
 0x101   : > { %4901 = vst [vmem:[#allocation60_spill] sm:$0xff] %v3798_v28  ;;  %1508 = vrot.lane.b32.xlu0 %v4902_v6, %s2783_s9 }
 0x102   : > { %1407 = vrot.lane.b32.xlu1 %v4899_v48, %s2784_s10 }
 0x103   : > { %v3804_v45 = vpop.permute.xlu0 %934 }
 0x104   : > { %4903 = vst [vmem:[#allocation33_spill] sm:$0xff] %v3804_v45  ;;  %v3806_v18 = vpop.permute.xlu1 %928 }
 0x105   : > { %4904 = vst [vmem:[#allocation61_spill] sm:$0xff] %v3806_v18  ;;  %1211 = vrot.lane.b32.xlu0 %v4902_v6, %s2781_s14 }
 0x106   : > { %1409 = vrot.lane.b32.xlu1 %v4905_v8, %s2784_s10 }
 0x107   : > { %v3812_v44 = vpop.permute.xlu0 %938 }
 0x108   : > { %4906 = vst [vmem:[#allocation9_spill] sm:$0xff] %v3812_v44  ;;  %v3814_v32 = vpop.permute.xlu1 %932 }
 0x109   : > { %4907 = vst [vmem:[#allocation62_spill] sm:$0xff] %v3814_v32  ;;  %1213 = vrot.lane.b32.xlu0 %v3476_v29, %s2781_s14  ;;  %v4912_v32 = vld [vmem:[#allocation5_spill] sm:$0xff] }
 0x10a   : > { %1112 = vrot.lane.b32.xlu1 %v4905_v8, %s2780_s13 }
 0x10b   : > { %v3820_v48 = vpop.permute.xlu0 %942 }
 0x10c   : > { %4908 = vst [vmem:[#allocation63_spill] sm:$0xff] %v3820_v48  ;;  %v3822_v45 = vpop.permute.xlu1 %936 }
 0x10d   : > { %4909 = vst [vmem:[#allocation64_spill] sm:$0xff] %v3822_v45  ;;  %1311 = vrot.lane.b32.xlu0 %v3104_v52, %s2782_s19 }
 0x10e   : > { %1510 = vrot.lane.b32.xlu1 %v3476_v29, %s2783_s9 }
 0x10f   : > { %v3828_v6 = vpop.permute.xlu0 %946 }
 0x110   : > { %4910 = vst [vmem:[#allocation65_spill] sm:$0xff] %v3828_v6  ;;  %v3830_v44 = vpop.permute.xlu1 %940  ;;  %v4917_v6 = vld [vmem:[#allocation13_spill] sm:$0xff] }
 0x111   : > { %4911 = vst [vmem:[#allocation66_spill] sm:$0xff] %v3830_v44  ;;  %1114 = vrot.lane.b32.xlu0 %v4912_v32, %s2780_s13  ;;  %v4924_v44 = vld [vmem:[#allocation6_spill] sm:$0xff] }
 0x112   : > { %1309 = vrot.lane.b32.xlu1 %v3102_v51, %s2782_s19 }
 0x113   : > { %v3836_v8 = vpop.permute.xlu0 %950 }
 0x114   : > { %4913 = vst [vmem:[#allocation5_spill] sm:$0xff] %v3836_v8  ;;  %v3838_v48 = vpop.permute.xlu1 %944 }
 0x115   : > { %4914 = vst [vmem:[#allocation67_spill] sm:$0xff] %v3838_v48  ;;  %1512 = vrot.lane.b32.xlu0 %v3456_v40, %s2783_s9 }
 0x116   : > { %1411 = vrot.lane.b32.xlu1 %v4912_v32, %s2784_s10 }
 0x117   : > { %v3844_v52 = vpop.permute.xlu0 %954 }
 0x118   : > { %4915 = vst [vmem:[#allocation68_spill] sm:$0xff] %v3844_v52  ;;  %v3846_v29 = vpop.permute.xlu1 %948 }
 0x119   : > { %4916 = vst [vmem:[#allocation69_spill] sm:$0xff] %v3846_v29  ;;  %1215 = vrot.lane.b32.xlu0 %v3456_v40, %s2781_s14 }
 0x11a   : > { %1413 = vrot.lane.b32.xlu1 %v4917_v6, %s2784_s10 }
 0x11b   : > { %v3852_v51 = vpop.permute.xlu0 %958 }
 0x11c   : > { %4918 = vst [vmem:[#allocation13_spill] sm:$0xff] %v3852_v51  ;;  %v3854_v8 = vpop.permute.xlu1 %952 }
 0x11d   : > { %4919 = vst [vmem:[#allocation70_spill] sm:$0xff] %v3854_v8  ;;  %1217 = vrot.lane.b32.xlu0 %v3489_v24, %s2781_s14  ;;  %v4922_v8 = vld [vmem:[#allocation8_spill] sm:$0xff] }
 0x11e   : > { %1116 = vrot.lane.b32.xlu1 %v4917_v6, %s2780_s13 }
 0x11f   : > { %v997_v32 = vpop.permute.xlu0 %996 }
 0x120   : > { %v3860_v52 = vpop.permute.xlu1 %956 }
 0x121   : > { %4920 = vst [vmem:[#allocation71_spill] sm:$0xff] %v3860_v52  ;;  %1315 = vrot.lane.b32.xlu0 %v3132_v4, %s2782_s19 }
 0x122   : > { %1514 = vrot.lane.b32.xlu1 %v3489_v24, %s2783_s9 }
 0x123   : > { %v3866_v40 = vpop.permute.xlu0 %1000 }
 0x124   : > { %v3868_v51 = vpop.permute.xlu1 %960 }
 0x125   : > { %4921 = vst [vmem:[#allocation72_spill] sm:$0xff] %v3868_v51  ;;  %1118 = vrot.lane.b32.xlu0 %v4922_v8, %s2780_s13  ;;  %v4923_v51 = vld [vmem:[#allocation16_spill] sm:$0xff] }
 0x126   : > { %1313 = vrot.lane.b32.xlu1 %v3126_v62, %s2782_s19 }
 0x127   : > { %v3874_v6 = vpop.permute.xlu0 %1004 }
 0x128   : > { %v3876_v29 = vpop.permute.xlu1 %998 }
 0x129   : > { %1516 = vrot.lane.b32.xlu0 %v3469_v57, %s2783_s9 }
 0x12a   : > { %1415 = vrot.lane.b32.xlu1 %v4922_v8, %s2784_s10 }
 0x12b   : > { %v3882_v4 = vpop.permute.xlu0 %1008 }
 0x12c   : > { %v3884_v24 = vpop.permute.xlu1 %1002 }
 0x12d   : > { %1219 = vrot.lane.b32.xlu0 %v3469_v57, %s2781_s14 }
 0x12e   : > { %1417 = vrot.lane.b32.xlu1 %v4923_v51, %s2784_s10 }
 0x12f   : > { %v3890_v62 = vpop.permute.xlu0 %1012 }
 0x130   : > { %v3892_v52 = vpop.permute.xlu1 %1006 }
 0x131   : > { %1221 = vrot.lane.b32.xlu0 %v3502_v13, %s2781_s14 }
 0x132   : > { %1120 = vrot.lane.b32.xlu1 %v4923_v51, %s2780_s13 }
 0x133   : > { %v3898_v8 = vpop.permute.xlu0 %1016 }
 0x134   : > { %v3900_v48 = vpop.permute.xlu1 %1010 }
 0x135   : > { %1319 = vrot.lane.b32.xlu0 %v4924_v44, %s2782_s19 }
 0x136   : > { %1518 = vrot.lane.b32.xlu1 %v3502_v13, %s2783_s9 }
 0x137   : > { %v3906_v57 = vpop.permute.xlu0 %1020 }
 0x138   : > { %4925 = vst [vmem:[#allocation8_spill] sm:$0xff] %v3906_v57  ;;  %v3908_v45 = vpop.permute.xlu1 %1014  ;;  %v2718_v57 = vld [vmem:[#allocation2] sm:$0xff] }
 0x139   : > { %1022 = vrot.lane.b32.xlu0 %v4924_v44, %s2779_s12  ;;  %v1596_v14 = vsel %vm304_vm0, %v2718_v57, %v3553_v46  ;;  %v4928_v57 = vld [vmem:[#allocation10_spill] sm:$0xff] }
 0x13a   : > { %1317 = vrot.lane.b32.xlu1 %v3151_v21, %s2782_s19 }
 0x13b   : > { %v1101_v51 = vpop.permute.xlu0 %1100 }
 0x13c   : > { %v3914_v18 = vpop.permute.xlu1 %1018 }
 0x13d   : > { %1421 = vrot.lane.b32.xlu0 %v4926_v25, %s2784_s10 }
 0x13e   : > { %1419 = vrot.lane.b32.xlu1 %v4927_v39, %s2784_s10 }
 0x13f   : > { %v1202_v13 = vpop.permute.xlu0 %1201 }
 0x140   : > { %v1099_v2 = vpop.permute.xlu1 %1098 }
 0x141   : > { %1124 = vrot.lane.b32.xlu0 %v4926_v25, %s2780_s13  ;;  %v1629_v25 = vsel %vm1628_vm5, %v1596_v14, %v3732_v60 }
 0x142   : > { %1122 = vrot.lane.b32.xlu1 %v4927_v39, %s2780_s13  ;;  %v1662_v39 = vsel %vm1661_vm6, %v1629_v25, %v997_v32 }
 0x143   : > { %v1300_v44 = vpop.permute.xlu0 %1299  ;;  %v1695_v17 = vsel %vm1694_vm7, %v1662_v39, %v1099_v2 }
 0x144   : > { %v1200_v42 = vpop.permute.xlu1 %1199 }
 0x145   : > { %1522 = vrot.lane.b32.xlu0 %v3515_v1, %s2783_s9  ;;  %v1728_v46 = vsel %vm1727_vm8, %v1695_v17, %v1200_v42  ;;  %v2719_v42 = vld [vmem:[#allocation2 + $0x8] sm:$0xff] }
 0x146   : > { %1520 = vrot.lane.b32.xlu1 %v3482_v12, %s2783_s9  ;;  %v1597_v17 = vsel %vm304_vm0, %v2719_v42, %v3574_v63  ;;  %v4930_v63 = vld [vmem:[#allocation14_spill] sm:$0xff] }
 0x147   : > { %v1103_v21 = vpop.permute.xlu0 %1102 }
 0x148   : > { %v1298_v28 = vpop.permute.xlu1 %1297 }
 0x149   : > { %1321 = vrot.lane.b32.xlu0 %v3199_v11, %s2782_s19  ;;  %v1761_v60 = vsel %vm1760_vm10, %v1728_v46, %v1298_v28  ;;  %v4929_v46 = vld [vmem:[#allocation20_spill] sm:$0xff] }
 0x14a   : > { %1223 = vrot.lane.b32.xlu1 %v3482_v12, %s2781_s14 }
 0x14b   : > { %v1501_v61 = vpop.permute.xlu0 %1500 }
 0x14c   : > { %v1400_v14 = vpop.permute.xlu1 %1399 }
 0x14d   : > { %1323 = vrot.lane.b32.xlu0 %v4928_v57, %s2782_s19  ;;  %v1794_v32 = vsel %vm1793_vm9, %v1761_v60, %v1400_v14 }
 0x14e   : > { %1225 = vrot.lane.b32.xlu1 %v3515_v1, %s2781_s14  ;;  %v1827_v12 = vsel %vm1826_vm11, %v1794_v32, %v1501_v61  ;;  %v1630_v1 = vsel %vm1628_vm5, %v1597_v17, %v3750_v15 }
 0x14f   : > { %v1204_v2 = vpop.permute.xlu0 %1203  ;;  %2623 = vmatprep.mubr.msk.f32.mxu0 %vm1864_vm12, %v1827_v12  ;;  %v1663_v61 = vsel %vm1661_vm6, %v1630_v1, %v3876_v29 }
 0x150   : > { %v1402_v25 = vpop.permute.xlu1 %1401  ;;  %v1696_v60 = vsel %vm1694_vm7, %v1663_v61, %v1101_v51 }
 0x151   : > { %1026 = vrot.lane.b32.xlu0 %v4928_v57, %s2779_s12  ;;  %v1729_v14 = vsel %vm1727_vm8, %v1696_v60, %v1202_v13  ;;  %v2720_v13 = vld [vmem:[#allocation2 + $0x18] sm:$0xff]  ;;  %v2721_v60 = vld [vmem:[#allocation2 + $0x20] sm:$0xff] }
 0x152   : > { %1024 = vrot.lane.b32.xlu1 %v3199_v11, %s2779_s12  ;;  %v1762_v11 = vsel %vm1760_vm10, %v1729_v14, %v1300_v44  ;;  %v1598_v12 = vsel %vm304_vm0, %v2720_v13, %v3600_v49 }
 0x153   : > { %v1206_v28 = vpop.permute.xlu0 %1205  ;;  %v1795_v32 = vsel %vm1793_vm9, %v1762_v11, %v1402_v25  ;;  %v1631_v44 = vsel %vm1628_vm5, %v1598_v12, %v3740_v33 }
 0x154   : > { %v1105_v39 = vpop.permute.xlu1 %1104  ;;  %v1664_v42 = vsel %vm1661_vm6, %v1631_v44, %v3866_v40  ;;  %v4933_v44 = vld [vmem:[#allocation17_spill] sm:$0xff] }
 0x155   : > { %1425 = vrot.lane.b32.xlu0 %v4929_v46, %s2784_s10  ;;  %v1697_v17 = vsel %vm1694_vm7, %v1664_v42, %v1103_v21 }
 0x156   : > { %1423 = vrot.lane.b32.xlu1 %v4930_v63, %s2784_s10  ;;  %v1730_v61 = vsel %vm1727_vm8, %v1697_v17, %v1204_v2  ;;  %v1599_v2 = vsel %vm304_vm0, %v2721_v60, %v3612_v20 }
 0x157   : > { %v1304_v57 = vpop.permute.xlu0 %1303  ;;  %v1632_v11 = vsel %vm1628_vm5, %v1599_v2, %v3758_v16 }
 0x158   : > { %v1503_v15 = vpop.permute.xlu1 %1502 }
 0x159   : > { %1128 = vrot.lane.b32.xlu0 %v4929_v46, %s2780_s13  ;;  %v1828_v29 = vsel %vm1826_vm11, %v1795_v32, %v1503_v15  ;;  %v1665_v32 = vsel %vm1661_vm6, %v1632_v11, %v3884_v24  ;;  %v392_v11 = vld [vmem:[%s2966_s7 + $0xf0] sm:$0xff] }
 0x15a   : > { %1126 = vrot.lane.b32.xlu1 %v4930_v63, %s2780_s13  ;;  %2624 = vmatmul.mubr.msk.f32.vlgmr.msra.gmra.mrb[0].mxu0 %vm1864_vm12, %v1828_v29  ;;  %v4931_v63 = vld [vmem:[#allocation12_spill] sm:$0xff]  ;;  %v1698_v15 = vsel %vm1694_vm7, %v1665_v32, %v1105_v39 }
 0x15b   : > { %v1107_v51 = vpop.permute.xlu0 %1106  ;;  %v1731_v20 = vsel %vm1727_vm8, %v1698_v15, %v1206_v28  ;;  %v2724_v15 = vld [vmem:[%s4756_s1] ss:$0 sm:$0xff] }
 0x15c   : > { %v1302_v25 = vpop.permute.xlu1 %1301  ;;  %v1764_v16 = vsel %vm1760_vm10, %v1731_v20, %v1304_v57 }
 0x15d   : > { %1526 = vrot.lane.b32.xlu0 %v3528_v41, %s2783_s9  ;;  %v1763_v49 = vsel %vm1760_vm10, %v1730_v61, %v1302_v25  ;;  %v2722_v25 = vld [vmem:[#allocation2 + $0x30] sm:$0xff] }
 0x15e   : > { %1524 = vrot.lane.b32.xlu1 %v3495_v22, %s2783_s9 }
 0x15f   : > { %v1505_v1 = vpop.permute.xlu0 %1504 }
 0x160   : > { %v1404_v46 = vpop.permute.xlu1 %1403 }
 0x161   : > { %1325 = vrot.lane.b32.xlu0 %v3227_v54, %s2782_s19  ;;  %v1796_v33 = vsel %vm1793_vm9, %v1763_v49, %v1404_v46 }
 0x162   : > { %1227 = vrot.lane.b32.xlu1 %v3495_v22, %s2781_s14  ;;  %v1829_v40 = vsel %vm1826_vm11, %v1796_v33, %v1505_v1  ;;  %v2723_v33 = vld [vmem:[#allocation2 + $0x38] sm:$0xff] }
 0x163   : > { %v1208_v21 = vpop.permute.xlu0 %1207  ;;  %2626 = vmatprep.mubr.msk.f32.mxu0 %vm1864_vm12, %v1829_v40  ;;  %v1601_v40 = vsel %vm304_vm0, %v2723_v33, %v3623_v7  ;;  %v4934_v7 = vld [vmem:[#allocation15_spill] sm:$0xff] }
 0x164   : > { %v1406_v14 = vpop.permute.xlu1 %1405  ;;  %v1634_v60 = vsel %vm1628_vm5, %v1601_v40, %v3766_v5  ;;  %v431_v5 = vmul.f32 %v2724_v15, %v392_v11  ;;  %v4100_v11 = vld [vmem:[#allocation2 + $0x108] sm:$0xff] }
 0x165   : > { %1327 = vrot.lane.b32.xlu0 %v4931_v63, %s2782_s19  ;;  %v1797_v24 = vsel %vm1793_vm9, %v1764_v16, %v1406_v14  ;;  %v1667_v2 = vsel %vm1661_vm6, %v1634_v60, %v3892_v52 }
 0x166   : > { %1229 = vrot.lane.b32.xlu1 %v3528_v41, %s2781_s14  ;;  %v4932_v41 = vld [vmem:[#allocation22_spill] sm:$0xff] }
 0x167   : > { %v1210_v22 = vpop.permute.xlu0 %1209 }
 0x168   : > { %v1109_v29 = vpop.permute.xlu1 %1108 }
 0x169   : > { %1030 = vrot.lane.b32.xlu0 %v4931_v63, %s2779_s12  ;;  %v1700_v63 = vsel %vm1694_vm7, %v1667_v2, %v1109_v29 }
 0x16a   : > { %1028 = vrot.lane.b32.xlu1 %v3227_v54, %s2779_s12  ;;  %v1600_v54 = vsel %vm304_vm0, %v2722_v25, %v3594_v19  ;;  %v1733_v20 = vsel %vm1727_vm8, %v1700_v63, %v1210_v22  ;;  %v2726_v25 = vld [vmem:[#allocation2 + $0x48] sm:$0xff] }
 0x16b   : > { %v1308_v13 = vpop.permute.xlu0 %1307  ;;  %v1633_v57 = vsel %vm1628_vm5, %v1600_v54, %v3748_v30  ;;  %v1602_v54 = vsel %vm304_vm0, %v2726_v25, %v3606_v38 }
 0x16c   : > { %v1507_v12 = vpop.permute.xlu1 %1506  ;;  %v1666_v17 = vsel %vm1661_vm6, %v1633_v57, %v3874_v6  ;;  %v1766_v16 = vsel %vm1760_vm10, %v1733_v20, %v1308_v13  ;;  %v1635_v57 = vsel %vm1628_vm5, %v1602_v54, %v3756_v10 }
 0x16d   : > { %1429 = vrot.lane.b32.xlu0 %v4932_v41, %s2784_s10  ;;  %v1830_v39 = vsel %vm1826_vm11, %v1797_v24, %v1507_v12  ;;  %v1699_v1 = vsel %vm1694_vm7, %v1666_v17, %v1107_v51  ;;  %v393_v24 = vld [vmem:[%s2966_s7 + $0xf8] sm:$0xff] }
 0x16e   : > { %1427 = vrot.lane.b32.xlu1 %v4933_v44, %s2784_s10  ;;  %2627 = vmatmul.mubr.msk.f32.gmra.mrb[2].mxu0 %vm1864_vm12, %v1830_v39  ;;  %v1732_v49 = vsel %vm1727_vm8, %v1699_v1, %v1208_v21  ;;  %v432_v22 = vmul.f32 %v2724_v15, %v393_v24  ;;  %v4935_v17 = vld [vmem:[#allocation24_spill] sm:$0xff] }
 0x16f   : > { %v1111_v28 = vpop.permute.xlu0 %1110 }
 0x170   : > { %v1306_v42 = vpop.permute.xlu1 %1305 }
 0x171   : > { %1132 = vrot.lane.b32.xlu0 %v4932_v41, %s2780_s13  ;;  %v1765_v19 = vsel %vm1760_vm10, %v1732_v49, %v1306_v42  ;;  %v4936_v49 = vld [vmem:[#allocation19_spill] sm:$0xff] }
 0x172   : > { %1130 = vrot.lane.b32.xlu1 %v4933_v44, %s2780_s13 }
 0x173   : > { %v1509_v61 = vpop.permute.xlu0 %1508 }
 0x174   : > { %v1408_v46 = vpop.permute.xlu1 %1407 }
 0x175   : > { %1530 = vrot.lane.b32.xlu0 %v3541_v23, %s2783_s9  ;;  %v1798_v30 = vsel %vm1793_vm9, %v1765_v19, %v1408_v46 }
 0x176   : > { %1528 = vrot.lane.b32.xlu1 %v3508_v50, %s2783_s9  ;;  %v1831_v6 = vsel %vm1826_vm11, %v1798_v30, %v1509_v61 }
 0x177   : > { %v1212_v51 = vpop.permute.xlu0 %1211  ;;  %2629 = vmatprep.mubr.msk.f32.mxu0 %vm1864_vm12, %v1831_v6  ;;  %v2727_v6 = vld [vmem:[#allocation2 + $0x50] sm:$0xff] }
 0x178   : > { %v1410_v21 = vpop.permute.xlu1 %1409 }
 0x179   : > { %1329 = vrot.lane.b32.xlu0 %v3252_v56, %s2782_s19  ;;  %v1799_v12 = vsel %vm1793_vm9, %v1766_v16, %v1410_v21 }
 0x17a   : > { %1231 = vrot.lane.b32.xlu1 %v3508_v50, %s2781_s14  ;;  %v2725_v50 = vld [vmem:[%s4757_s2] ss:$0 sm:$0xff] }
 0x17b   : > { %v1214_v14 = vpop.permute.xlu0 %1213  ;;  %v470_v29 = vadd.f32 %v2725_v50, %v431_v5  ;;  %v471_v13 = vadd.f32 %v2725_v50, %v432_v22  ;;  %v4109_v5 = vld [vmem:[#allocation2 + $0x110] sm:$0xff] }
 0x17c   : > { %v1113_v32 = vpop.permute.xlu1 %1112 }
 0x17d   : > { %1331 = vrot.lane.b32.xlu0 %v4934_v7, %s2782_s19  ;;  %v502_v39 = vmax.f32 %v470_v29, 0.0  ;;  %v503_v1 = vmax.f32 %v471_v13, 0.0 }
 0x17e   : > { %1233 = vrot.lane.b32.xlu1 %v3541_v23, %s2781_s14 }
 0x17f   : > { %v1312_v52 = vpop.permute.xlu0 %1311  ;;  %536 = vst.msk [vmem:[#allocation2 + $0x181] sm:$0xff] %vm304_vm0, %v502_v39  ;;  %537 = vst.msk [vmem:[#allocation2 + $0x189] sm:$0xff] %vm304_vm0, %v503_v1  ;;  %v4938_v39 = vld [vmem:[#allocation21_spill] sm:$0xff] }
 0x180   : > { %v1511_v41 = vpop.permute.xlu1 %1510 }
 0x181   : > { %1034 = vrot.lane.b32.xlu0 %v4934_v7, %s2779_s12  ;;  %v1832_v44 = vsel %vm1826_vm11, %v1799_v12, %v1511_v41 }
 0x182   : > { %1032 = vrot.lane.b32.xlu1 %v3252_v56, %s2779_s12  ;;  %2630 = vmatmul.mubr.msk.f32.gmra.mrb[4].mxu0 %vm1864_vm12, %v1832_v44  ;;  %v1668_v56 = vsel %vm1661_vm6, %v1635_v57, %v3882_v4  ;;  %v2731_v44 = vld [vmem:[#allocation2 + $0x68] sm:$0xff] }
 0x183   : > { %v1115_v23 = vpop.permute.xlu0 %1114  ;;  %v1701_v61 = vsel %vm1694_vm7, %v1668_v56, %v1111_v28 }
 0x184   : > { %v1310_v42 = vpop.permute.xlu1 %1309  ;;  %v1734_v38 = vsel %vm1727_vm8, %v1701_v61, %v1212_v51  ;;  %v1603_v51 = vsel %vm304_vm0, %v2727_v6, %v3631_v47  ;;  %v4157_v61 = vld [vmem:[#allocation2 + $0x120] sm:$0xff] }
 0x185   : > { %1433 = vrot.lane.b32.xlu0 %v4935_v17, %s2784_s10  ;;  %v1767_v10 = vsel %vm1760_vm10, %v1734_v38, %v1310_v42  ;;  %v1636_v40 = vsel %vm1628_vm5, %v1603_v51, %v3774_v43  ;;  %v2735_v51 = vld [vmem:[#allocation2 + $0x78] sm:$0xff] }
 0x186   : > { %1431 = vrot.lane.b32.xlu1 %v4936_v49, %s2784_s10  ;;  %v1669_v21 = vsel %vm1661_vm6, %v1636_v40, %v3900_v48 }
 0x187   : > { %v1513_v19 = vpop.permute.xlu0 %1512  ;;  %v1702_v2 = vsel %vm1694_vm7, %v1669_v21, %v1113_v32 }
 0x188   : > { %v1412_v46 = vpop.permute.xlu1 %1411  ;;  %v1735_v47 = vsel %vm1727_vm8, %v1702_v2, %v1214_v14 }
 0x189   : > { %1136 = vrot.lane.b32.xlu0 %v4935_v17, %s2780_s13  ;;  %v1800_v30 = vsel %vm1793_vm9, %v1767_v10, %v1412_v46  ;;  %v1768_v48 = vsel %vm1760_vm10, %v1735_v47, %v1312_v52  ;;  %v4165_v10 = vld [vmem:[#allocation2 + $0x128] sm:$0xff]  ;;  %v4940_v47 = vld [vmem:[#allocation23_spill] sm:$0xff] }
 0x18a   : > { %1134 = vrot.lane.b32.xlu1 %v4936_v49, %s2780_s13  ;;  %v1833_v4 = vsel %vm1826_vm11, %v1800_v30, %v1513_v19  ;;  %v2734_v30 = vld [vmem:[#allocation2 + $0x80] sm:$0xff] }
 0x18b   : > { %v1216_v28 = vpop.permute.xlu0 %1215  ;;  %2632 = vmatprep.mubr.msk.f32.mxu0 %vm1864_vm12, %v1833_v4  ;;  %v1607_v4 = vsel %vm304_vm0, %v2734_v30, %v3647_v0 }
 0x18c   : > { %v1414_v33 = vpop.permute.xlu1 %1413 }
 0x18d   : > { %1534 = vrot.lane.b32.xlu0 %v3556_v34, %s2783_s9  ;;  %v1801_v7 = vsel %vm1793_vm9, %v1768_v48, %v1414_v33  ;;  %v1606_v33 = vsel %vm304_vm0, %v2735_v51, %v3629_v9 }
 0x18e   : > { %1532 = vrot.lane.b32.xlu1 %v3521_v3, %s2783_s9 }
 0x18f   : > { %v1218_v60 = vpop.permute.xlu0 %1217 }
 0x190   : > { %v1117_v63 = vpop.permute.xlu1 %1116 }
 0x191   : > { %1333 = vrot.lane.b32.xlu0 %v4100_v11, %s2782_s19 }
 0x192   : > { %1235 = vrot.lane.b32.xlu1 %v3521_v3, %s2781_s14  ;;  %v2730_v3 = vld [vmem:[#allocation2 + $0x60] sm:$0xff] }
 0x193   : > { %v1316_v43 = vpop.permute.xlu0 %1315  ;;  %v1604_v20 = vsel %vm304_vm0, %v2730_v3, %v3618_v58 }
 0x194   : > { %v1515_v15 = vpop.permute.xlu1 %1514  ;;  %v1637_v52 = vsel %vm1628_vm5, %v1604_v20, %v3764_v36  ;;  %v4937_v36 = vld [vmem:[#allocation26_spill] sm:$0xff] }
 0x195   : > { %1335 = vrot.lane.b32.xlu0 %v4109_v5, %s2782_s19  ;;  %v1834_v32 = vsel %vm1826_vm11, %v1801_v7, %v1515_v15  ;;  %v1670_v29 = vsel %vm1661_vm6, %v1637_v52, %v3890_v62 }
 0x196   : > { %1237 = vrot.lane.b32.xlu1 %v3556_v34, %s2781_s14  ;;  %2633 = vmatmul.mubr.msk.f32.gmra.mrb[6].mxu0 %vm1864_vm12, %v1834_v32  ;;  %v1703_v34 = vsel %vm1694_vm7, %v1670_v29, %v1115_v23  ;;  %v1605_v23 = vsel %vm304_vm0, %v2731_v44, %v3639_v26 }
 0x197   : > { %v4117_v14 = vpop.permute.xlu0 %1118  ;;  %v1736_v24 = vsel %vm1727_vm8, %v1703_v34, %v1216_v28  ;;  %v1638_v25 = vsel %vm1628_vm5, %v1605_v23, %v3782_v27  ;;  %v4944_v23 = vld [vmem:[#allocation3_spill] sm:$0xff] }
 0x198   : > { %v1314_v50 = vpop.permute.xlu1 %1313  ;;  %v1671_v54 = vsel %vm1661_vm6, %v1638_v25, %v3908_v45  ;;  %v4945_v25 = vld [vmem:[#allocation8_spill] sm:$0xff] }
 0x199   : > { %1038 = vrot.lane.b32.xlu0 %v4109_v5, %s2779_s12  ;;  %v1769_v58 = vsel %vm1760_vm10, %v1736_v24, %v1314_v50  ;;  %v1704_v42 = vsel %vm1694_vm7, %v1671_v54, %v1117_v63  ;;  %v4212_v50 = vld [vmem:[#allocation2 + $0x138] sm:$0xff] }
 0x19a   : > { %1036 = vrot.lane.b32.xlu1 %v4100_v11, %s2779_s12  ;;  %v1737_v26 = vsel %vm1727_vm8, %v1704_v42, %v1218_v60  ;;  %v4939_v60 = vld [vmem:[#allocation28_spill] sm:$0xff] }
 0x19b   : > { %v1517_v16 = vpop.permute.xlu0 %1516  ;;  %v1770_v27 = vsel %vm1760_vm10, %v1737_v26, %v1316_v43 }
 0x19c   : > { %v1416_v12 = vpop.permute.xlu1 %1415 }
 0x19d   : > { %1437 = vrot.lane.b32.xlu0 %v4937_v36, %s2784_s10  ;;  %v1802_v41 = vsel %vm1793_vm9, %v1769_v58, %v1416_v12  ;;  %v2738_v58 = vld [vmem:[#allocation2 + $0x98] sm:$0xff]  ;;  %v4941_v12 = vld [vmem:[#allocation43_spill] sm:$0xff] }
 0x19e   : > { %1435 = vrot.lane.b32.xlu1 %v4938_v39, %s2784_s10  ;;  %v1835_v62 = vsel %vm1826_vm11, %v1802_v41, %v1517_v16  ;;  %v4218_v16 = vld [vmem:[#allocation2 + $0x140] sm:$0xff]  ;;  %v2739_v41 = vld [vmem:[#allocation2 + $0x90] sm:$0xff] }
 0x19f   : > { %v1220_v22 = vpop.permute.xlu0 %1219  ;;  %2635 = vmatprep.mubr.msk.f32.mxu0 %vm1864_vm12, %v1835_v62 }
 0x1a0   : > { %v1418_v13 = vpop.permute.xlu1 %1417 }
 0x1a1   : > { %1140 = vrot.lane.b32.xlu0 %v4937_v36, %s2780_s13  ;;  %v1803_v45 = vsel %vm1793_vm9, %v1770_v27, %v1418_v13  ;;  %v1609_v36 = vsel %vm304_vm0, %v2738_v58, %v4941_v12 }
 0x1a2   : > { %1138 = vrot.lane.b32.xlu1 %v4938_v39, %s2780_s13  ;;  %v4942_v39 = vld [vmem:[#allocation40_spill] sm:$0xff] }
 0x1a3   : > { %v1222_v57 = vpop.permute.xlu0 %1221  ;;  %v1608_v62 = vsel %vm304_vm0, %v2739_v41, %v4942_v39  ;;  %v4954_v39 = vld [vmem:[#allocation31_spill] sm:$0xff] }
 0x1a4   : > { %v1121_v17 = vpop.permute.xlu1 %1120  ;;  %v1641_v13 = vsel %vm1628_vm5, %v1608_v62, %v4944_v23 }
 0x1a5   : > { %1538 = vrot.lane.b32.xlu0 %v3569_v37, %s2783_s9  ;;  %v1674_v54 = vsel %vm1661_vm6, %v1641_v13, %v4945_v25 }
 0x1a6   : > { %1536 = vrot.lane.b32.xlu1 %v3534_v31, %s2783_s9 }
 0x1a7   : > { %v1320_v1 = vpop.permute.xlu0 %1319 }
 0x1a8   : > { %v1519_v56 = vpop.permute.xlu1 %1518 }
 0x1a9   : > { %1337 = vrot.lane.b32.xlu0 %v4157_v61, %s2782_s19  ;;  %v1836_v49 = vsel %vm1826_vm11, %v1803_v45, %v1519_v56  ;;  %v4946_v45 = vld [vmem:[#allocation30_spill] sm:$0xff] }
 0x1aa   : > { %1239 = vrot.lane.b32.xlu1 %v3534_v31, %s2781_s14  ;;  %2636 = vmatmul.mubr.msk.f32.gmra.mrb[8].mxu0 %vm1864_vm12, %v1836_v49  ;;  %v1640_v31 = vsel %vm1628_vm5, %v1607_v4, %v3790_v53  ;;  %v1639_v53 = vsel %vm1628_vm5, %v1606_v33, %v3772_v35  ;;  %v4947_v49 = vld [vmem:[#allocation25_spill] sm:$0xff] }
 0x1ab   : > { %v1023_v19 = vpop.permute.xlu0 %1022  ;;  %v1673_v6 = vsel %vm1661_vm6, %v1640_v31, %v3914_v18  ;;  %v1672_v40 = vsel %vm1661_vm6, %v1639_v53, %v3898_v8  ;;  %v4948_v33 = vld [vmem:[#allocation37_spill] sm:$0xff] }
 0x1ac   : > { %v1318_v38 = vpop.permute.xlu1 %1317  ;;  %v1705_v18 = vsel %vm1694_vm7, %v1672_v40, %v4117_v14  ;;  %v4263_v40 = vld [vmem:[#allocation2 + $0x150] sm:$0xff] }
 0x1ad   : > { %1339 = vrot.lane.b32.xlu0 %v4165_v10, %s2782_s19  ;;  %v1738_v2 = vsel %vm1727_vm8, %v1705_v18, %v1220_v22  ;;  %v4269_v18 = vld [vmem:[#allocation2 + $0x158] sm:$0xff] }
 0x1ae   : > { %1241 = vrot.lane.b32.xlu1 %v3569_v37, %s2781_s14  ;;  %v1706_v37 = vsel %vm1694_vm7, %v1673_v6, %v1121_v17  ;;  %v1771_v43 = vsel %vm1760_vm10, %v1738_v2, %v1318_v38  ;;  %v2742_v2 = vld [vmem:[#allocation2 + $0xb0] sm:$0xff] }
 0x1af   : > { %v1422_v46 = vpop.permute.xlu0 %1421  ;;  %v1739_v9 = vsel %vm1727_vm8, %v1706_v37, %v1222_v57  ;;  %v4949_v37 = vld [vmem:[#allocation34_spill] sm:$0xff] }
 0x1b0   : > { %v1420_v28 = vpop.permute.xlu1 %1419  ;;  %v1772_v63 = vsel %vm1760_vm10, %v1739_v9, %v1320_v1 }
 0x1b1   : > { %1042 = vrot.lane.b32.xlu0 %v4165_v10, %s2779_s12  ;;  %v1805_v8 = vsel %vm1793_vm9, %v1772_v63, %v1422_v46  ;;  %v1804_v48 = vsel %vm1793_vm9, %v1771_v43, %v1420_v28  ;;  %v4950_v63 = vld [vmem:[#allocation45_spill] sm:$0xff] }
 0x1b2   : > { %1040 = vrot.lane.b32.xlu1 %v4157_v61, %s2779_s12  ;;  %v4951_v43 = vld [vmem:[#allocation41_spill] sm:$0xff] }
 0x1b3   : > { %v1125_v0 = vpop.permute.xlu0 %1124 }
 0x1b4   : > { %v1123_v21 = vpop.permute.xlu1 %1122 }
 0x1b5   : > { %1441 = vrot.lane.b32.xlu0 %v4939_v60, %s2784_s10  ;;  %v1707_v17 = vsel %vm1694_vm7, %v1674_v54, %v1123_v21 }
 0x1b6   : > { %1439 = vrot.lane.b32.xlu1 %v4940_v47, %s2784_s10 }
 0x1b7   : > { %v1523_v35 = vpop.permute.xlu0 %1522 }
 0x1b8   : > { %v1838_v7 = vsel %vm1826_vm11, %v1805_v8, %v1523_v35  ;;  %v1521_v15 = vpop.permute.xlu1 %1520  ;;  %v2743_v35 = vld [vmem:[#allocation2 + $0xa8] sm:$0xff] }
 0x1b9   : > { %1144 = vrot.lane.b32.xlu0 %v4939_v60, %s2780_s13  ;;  %v1837_v32 = vsel %vm1826_vm11, %v1804_v48, %v1521_v15  ;;  %v1610_v8 = vsel %vm304_vm0, %v2743_v35, %v4951_v43  ;;  %v4952_v48 = vld [vmem:[#allocation61_spill] sm:$0xff] }
 0x1ba   : > { %1142 = vrot.lane.b32.xlu1 %v4940_v47, %s2780_s13  ;;  %2638 = vmatprep.mubr.msk.f32.mxu0 %vm1864_vm12, %v1837_v32  ;;  %v1611_v47 = vsel %vm304_vm0, %v2742_v2, %v4950_v63  ;;  %v4953_v32 = vld [vmem:[#allocation7_spill] sm:$0xff] }
 0x1bb   : > { %v1322_v14 = vpop.permute.xlu0 %1321  ;;  %2639 = vmatmul.mubr.msk.f32.gmra.mrb[10].mxu0 %vm1864_vm12, %v1838_v7  ;;  %v1644_v7 = vsel %vm1628_vm5, %v1611_v47, %v4952_v48 }
 0x1bc   : > { %v1224_v3 = vpop.permute.xlu1 %1223 }
 0x1bd   : > { %1542 = vrot.lane.b32.xlu0 %v3584_v59, %s2783_s9  ;;  %v1740_v1 = vsel %vm1727_vm8, %v1707_v17, %v1224_v3 }
 0x1be   : > { %1540 = vrot.lane.b32.xlu1 %v3547_v55, %s2783_s9  ;;  %v1773_v46 = vsel %vm1760_vm10, %v1740_v1, %v1322_v14  ;;  %v1643_v14 = vsel %vm1628_vm5, %v1610_v8, %v4953_v32  ;;  %v4313_v1 = vld [vmem:[#allocation2 + $0x168] sm:$0xff]  ;;  %v4962_v8 = vld [vmem:[#allocation32_spill] sm:$0xff] }
 0x1bf   : > { %v1324_v20 = vpop.permute.xlu0 %1323 }
 0x1c0   : > { %v1226_v52 = vpop.permute.xlu1 %1225 }
 0x1c1   : > { %1341 = vrot.lane.b32.xlu0 %v4212_v50, %s2782_s19 }
 0x1c2   : > { %1243 = vrot.lane.b32.xlu1 %v3547_v55, %s2781_s14  ;;  %v4943_v55 = vld [vmem:[#allocation60_spill] sm:$0xff] }
 0x1c3   : > { %v1027_v29 = vpop.permute.xlu0 %1026  ;;  %v1642_v22 = vsel %vm1628_vm5, %v1609_v36, %v4943_v55 }
 0x1c4   : > { %v1025_v34 = vpop.permute.xlu1 %1024  ;;  %v1677_v3 = vsel %vm1661_vm6, %v1644_v7, %v1027_v29 }
 0x1c5   : > { %1343 = vrot.lane.b32.xlu0 %v4218_v16, %s2782_s19 }
 0x1c6   : > { %1245 = vrot.lane.b32.xlu1 %v3584_v59, %s2781_s14  ;;  %v1675_v59 = vsel %vm1661_vm6, %v1642_v22, %v1023_v19 }
 0x1c7   : > { %v1426_v24 = vpop.permute.xlu0 %1425  ;;  %v1708_v57 = vsel %vm1694_vm7, %v1675_v59, %v1125_v0 }
 0x1c8   : > { %v1424_v44 = vpop.permute.xlu1 %1423  ;;  %v1741_v26 = vsel %vm1727_vm8, %v1708_v57, %v1226_v52  ;;  %v4956_v57 = vld [vmem:[#allocation38_spill] sm:$0xff] }
 0x1c9   : > { %1046 = vrot.lane.b32.xlu0 %v4218_v16, %s2779_s12  ;;  %v1774_v56 = vsel %vm1760_vm10, %v1741_v26, %v1324_v20  ;;  %v1806_v30 = vsel %vm1793_vm9, %v1773_v46, %v1424_v44  ;;  %v1676_v20 = vsel %vm1661_vm6, %v1643_v14, %v1025_v34  ;;  %v4955_v34 = vld [vmem:[#allocation27_spill] sm:$0xff] }
 0x1ca   : > { %1044 = vrot.lane.b32.xlu1 %v4212_v50, %s2779_s12  ;;  %v1807_v38 = vsel %vm1793_vm9, %v1774_v56, %v1426_v24  ;;  %v4323_v56 = vld [vmem:[#allocation2 + $0x170] sm:$0xff] }
 0x1cb   : > { %v1129_v42 = vpop.permute.xlu0 %1128 }
 0x1cc   : > { %v1127_v27 = vpop.permute.xlu1 %1126  ;;  %v1710_v52 = vsel %vm1694_vm7, %v1677_v3, %v1129_v42  ;;  %v4957_v42 = vld [vmem:[#allocation35_spill] sm:$0xff] }
 0x1cd   : > { %1445 = vrot.lane.b32.xlu0 %v4946_v45, %s2784_s10  ;;  %v1709_v58 = vsel %vm1694_vm7, %v1676_v20, %v1127_v27 }
 0x1ce   : > { %1443 = vrot.lane.b32.xlu1 %v4947_v49, %s2784_s10 }
 0x1cf   : > { %v1527_v19 = vpop.permute.xlu0 %1526 }
 0x1d0   : > { %v1840_v4 = vsel %vm1826_vm11, %v1807_v38, %v1527_v19  ;;  %v1525_v31 = vpop.permute.xlu1 %1524  ;;  %v2746_v19 = vld [vmem:[#allocation2 + $0xc8] sm:$0xff]  ;;  %v4958_v38 = vld [vmem:[#allocation47_spill] sm:$0xff] }
 0x1d1   : > { %1148 = vrot.lane.b32.xlu0 %v4946_v45, %s2780_s13  ;;  %v1839_v28 = vsel %vm1826_vm11, %v1806_v30, %v1525_v31  ;;  %v1613_v46 = vsel %vm304_vm0, %v2746_v19, %v4958_v38  ;;  %v2747_v30 = vld [vmem:[#allocation2 + $0xc0] sm:$0xff] }
 0x1d2   : > { %1146 = vrot.lane.b32.xlu1 %v4947_v49, %s2780_s13  ;;  %2641 = vmatprep.mubr.msk.f32.mxu0 %vm1864_vm12, %v1839_v28  ;;  %v4960_v28 = vld [vmem:[#allocation62_spill] sm:$0xff]  ;;  %v4969_v38 = vld [vmem:[#allocation33_spill] sm:$0xff] }
 0x1d3   : > { %v1326_v6 = vpop.permute.xlu0 %1325  ;;  %2642 = vmatmul.mubr.msk.f32.gmra.mrb[12].mxu0 %vm1864_vm12, %v1840_v4  ;;  %v4959_v4 = vld [vmem:[#allocation42_spill] sm:$0xff] }
 0x1d4   : > { %v1228_v51 = vpop.permute.xlu1 %1227  ;;  %v1612_v31 = vsel %vm304_vm0, %v2747_v30, %v4959_v4 }
 0x1d5   : > { %1546 = vrot.lane.b32.xlu0 %v4948_v33, %s2783_s9  ;;  %v1742_v36 = vsel %vm1727_vm8, %v1709_v58, %v1228_v51  ;;  %v4964_v58 = vld [vmem:[#allocation39_spill] sm:$0xff] }
 0x1d6   : > { %1544 = vrot.lane.b32.xlu1 %v4949_v37, %s2783_s9  ;;  %v1775_v22 = vsel %vm1760_vm10, %v1742_v36, %v1326_v6  ;;  %v1646_v6 = vsel %vm1628_vm5, %v1613_v46, %v4960_v28  ;;  %v4965_v36 = vld [vmem:[#allocation36_spill] sm:$0xff] }
 0x1d7   : > { %v1328_v0 = vpop.permute.xlu0 %1327 }
 0x1d8   : > { %v1230_v53 = vpop.permute.xlu1 %1229 }
 0x1d9   : > { %1345 = vrot.lane.b32.xlu0 %v4263_v40, %s2782_s19  ;;  %v1743_v12 = vsel %vm1727_vm8, %v1710_v52, %v1230_v53 }
 0x1da   : > { %1247 = vrot.lane.b32.xlu1 %v4949_v37, %s2781_s14  ;;  %v1776_v29 = vsel %vm1760_vm10, %v1743_v12, %v1328_v0  ;;  %v586_v12 = vld [vmem:[#allocation2 + $0x180] sm:$0xff] }
 0x1db   : > { %v1031_v21 = vpop.permute.xlu0 %1030 }
 0x1dc   : > { %v1029_v60 = vpop.permute.xlu1 %1028  ;;  %v1679_v0 = vsel %vm1661_vm6, %v1646_v6, %v1031_v21 }
 0x1dd   : > { %1347 = vrot.lane.b32.xlu0 %v4269_v18, %s2782_s19 }
 0x1de   : > { %1249 = vrot.lane.b32.xlu1 %v4948_v33, %s2781_s14  ;;  %v4961_v33 = vld [vmem:[#allocation4_spill] sm:$0xff] }
 0x1df   : > { %v1430_v9 = vpop.permute.xlu0 %1429  ;;  %v1645_v37 = vsel %vm1628_vm5, %v1612_v31, %v4961_v33 }
 0x1e0   : > { %v1428_v15 = vpop.permute.xlu1 %1427  ;;  %v1809_v55 = vsel %vm1793_vm9, %v1776_v29, %v1430_v9  ;;  %v1678_v53 = vsel %vm1661_vm6, %v1645_v37, %v1029_v60  ;;  %v4963_v60 = vld [vmem:[#allocation29_spill] sm:$0xff]  ;;  %v587_v29 = vld [vmem:[#allocation2 + $0x188] sm:$0xff] }
 0x1e1   : > { %1050 = vrot.lane.b32.xlu0 %v4269_v18, %s2779_s12  ;;  %v1808_v44 = vsel %vm1793_vm9, %v1775_v22, %v1428_v15  ;;  %v1094_v22 = vrot.slane %v587_v29, 1 }
 0x1e2   : > { %1048 = vrot.lane.b32.xlu1 %v4263_v40, %s2779_s12 }
 0x1e3   : > { %v1133_v24 = vpop.permute.xlu0 %1132 }
 0x1e4   : > { %v1131_v41 = vpop.permute.xlu1 %1130  ;;  %v1712_v9 = vsel %vm1694_vm7, %v1679_v0, %v1133_v24 }
 0x1e5   : > { %1449 = vrot.lane.b32.xlu0 %v4954_v39, %s2784_s10  ;;  %v1711_v63 = vsel %vm1694_vm7, %v1678_v53, %v1131_v41 }
 0x1e6   : > { %1447 = vrot.lane.b32.xlu1 %v4955_v34, %s2784_s10 }
 0x1e7   : > { %v1531_v62 = vpop.permute.xlu0 %1530 }
 0x1e8   : > { %v1842_v23 = vsel %vm1826_vm11, %v1809_v55, %v1531_v62  ;;  %v1529_v13 = vpop.permute.xlu1 %1528  ;;  %v588_v62 = vld [vmem:[#allocation2 + $0x190] sm:$0x3] }
 0x1e9   : > { %1152 = vrot.lane.b32.xlu0 %v4954_v39, %s2780_s13  ;;  %v1841_v59 = vsel %vm1826_vm11, %v1808_v44, %v1529_v13  ;;  %v1096_v44 = vrot.slane %v588_v62, 1  ;;  %v2748_v13 = vld [vmem:[#allocation2 + $0xe0] sm:$0xff] }
 0x1ea   : > { %1150 = vrot.lane.b32.xlu1 %v4955_v34, %s2780_s13  ;;  %2644 = vmatprep.mubr.msk.f32.mxu0 %vm1864_vm12, %v1841_v59  ;;  %v4966_v59 = vld [vmem:[#allocation49_spill] sm:$0xff] }
 0x1eb   : > { %v1330_v25 = vpop.permute.xlu0 %1329  ;;  %2645 = vmatmul.mubr.msk.f32.gmra.mrb[14].mxu0 %vm1864_vm12, %v1842_v23  ;;  %v1097_v4 = vsel %vm640_vm2, %v1094_v22, %v1096_v44 }
 0x1ec   : > { %v1232_v54 = vpop.permute.xlu1 %1231 }
 0x1ed   : > { %1550 = vrot.lane.b32.xlu0 %v4956_v57, %s2783_s9  ;;  %v1744_v35 = vsel %vm1727_vm8, %v1711_v63, %v1232_v54  ;;  %v1093_v54 = vrot.slane %v586_v12, 1  ;;  %v1194_v63 = vrot.slane %v586_v12, 2 }
 0x1ee   : > { %1548 = vrot.lane.b32.xlu1 %v4957_v42, %s2783_s9  ;;  %v1777_v15 = vsel %vm1760_vm10, %v1744_v35, %v1330_v25  ;;  %v1615_v25 = vsel %vm304_vm0, %v2748_v13, %v4966_v59  ;;  %v4970_v13 = vld [vmem:[#allocation51_spill] sm:$0xff] }
 0x1ef   : > { %v1332_v17 = vpop.permute.xlu0 %1331  ;;  %v1095_v37 = vsel %vm640_vm2, %v1093_v54, %v1094_v22  ;;  %v2751_v54 = vld [vmem:[#allocation2 + $0xf0] sm:$0xff] }
 0x1f0   : > { %v1234_v26 = vpop.permute.xlu1 %1233 }
 0x1f1   : > { %1349 = vrot.lane.b32.xlu0 %v4313_v1, %s2782_s19  ;;  %v1745_v47 = vsel %vm1727_vm8, %v1712_v9, %v1234_v26  ;;  %v4968_v26 = vld [vmem:[#allocation64_spill] sm:$0xff]  ;;  %v1197_v9 = vrot.slane %v588_v62, 2  ;;  %v591_v62 = vld [vmem:[#allocation2 + $0x1a8] sm:$0x3] }
 0x1f2   : > { %1251 = vrot.lane.b32.xlu1 %v4957_v42, %s2781_s14  ;;  %v1778_v21 = vsel %vm1760_vm10, %v1745_v47, %v1332_v17  ;;  %v4967_v42 = vld [vmem:[#allocation44_spill] sm:$0xff] }
 0x1f3   : > { %v4319_v27 = vpop.permute.xlu0 %1034 }
 0x1f4   : > { %v4321_v45 = vpop.permute.xlu1 %1032 }
 0x1f5   : > { %1351 = vrot.lane.b32.xlu0 %v4323_v56, %s2782_s19 }
 0x1f6   : > { %1253 = vrot.lane.b32.xlu1 %v4956_v57, %s2781_s14  ;;  %v2749_v57 = vld [vmem:[#allocation2 + $0xd8] sm:$0xff] }
 0x1f7   : > { %v1434_v49 = vpop.permute.xlu0 %1433  ;;  %v1614_v17 = vsel %vm304_vm0, %v2749_v57, %v4967_v42  ;;  %v4971_v57 = vld [vmem:[#allocation46_spill] sm:$0xff] }
 0x1f8   : > { %v1432_v51 = vpop.permute.xlu1 %1431  ;;  %v1811_v7 = vsel %vm1793_vm9, %v1778_v21, %v1434_v49  ;;  %v1648_v49 = vsel %vm1628_vm5, %v1615_v25, %v4968_v26  ;;  %v1647_v46 = vsel %vm1628_vm5, %v1614_v17, %v4969_v38  ;;  %v1397_v25 = vrot.slane %v591_v62, 1  ;;  %v4972_v17 = vld [vmem:[#allocation66_spill] sm:$0xff] }
 0x1f9   : > { %1054 = vrot.lane.b32.xlu0 %v4323_v56, %s2779_s12  ;;  %v1810_v32 = vsel %vm1793_vm9, %v1777_v15, %v1432_v51  ;;  %v1681_v30 = vsel %vm1661_vm6, %v1648_v49, %v4319_v27  ;;  %v1680_v31 = vsel %vm1661_vm6, %v1647_v46, %v4321_v45  ;;  %v1195_v27 = vrot.slane %v587_v29, 2  ;;  %v589_v15 = vld [vmem:[#allocation2 + $0x198] sm:$0xff] }
 0x1fa   : > { %1052 = vrot.lane.b32.xlu1 %v4313_v1, %s2779_s12  ;;  %v1616_v42 = vsel %vm304_vm0, %v2751_v54, %v4971_v57 }
 0x1fb   : > { %v1137_v2 = vpop.permute.xlu0 %1136 }
 0x1fc   : > { %v1135_v43 = vpop.permute.xlu1 %1134  ;;  %v1714_v28 = vsel %vm1694_vm7, %v1681_v30, %v1137_v2 }
 0x1fd   : > { %1453 = vrot.lane.b32.xlu0 %v4962_v8, %s2784_s10  ;;  %v1713_v51 = vsel %vm1694_vm7, %v1680_v31, %v1135_v43 }
 0x1fe   : > { %1451 = vrot.lane.b32.xlu1 %v4963_v60, %s2784_s10 }
 0x1ff   : > { %v1535_v48 = vpop.permute.xlu0 %1534 }
 0x200   : > { %v1844_v14 = vsel %vm1826_vm11, %v1811_v7, %v1535_v48  ;;  %v1533_v3 = vpop.permute.xlu1 %1532  ;;  %v1198_v48 = vsel %vm817_vm3, %v1195_v27, %v1197_v9 }
 0x201   : > { %1156 = vrot.lane.b32.xlu0 %v4962_v8, %s2780_s13  ;;  %v1843_v20 = vsel %vm1826_vm11, %v1810_v32, %v1533_v3  ;;  %v590_v32 = vld [vmem:[#allocation2 + $0x1a0] sm:$0xff] }
 0x202   : > { %1154 = vrot.lane.b32.xlu1 %v4963_v60, %s2780_s13  ;;  %2647 = vmatprep.mubr.msk.f32.mxu1 %vm1864_vm12, %v1843_v20  ;;  %v1394_v20 = vrot.slane %v589_v15, 1 }
 0x203   : > { %v1334_v52 = vpop.permute.xlu0 %1333  ;;  %2648 = vmatmul.mubr.msk.f32.vlgmr.msra.gmra.mrb[0].mxu1 %vm1864_vm12, %v1844_v14  ;;  %v1196_v14 = vsel %vm817_vm3, %v1194_v63, %v1195_v27 }
 0x204   : > { %v1236_v24 = vpop.permute.xlu1 %1235 }
 0x205   : > { %1554 = vrot.lane.b32.xlu0 %v4964_v58, %s2783_s9  ;;  %v1746_v0 = vsel %vm1727_vm8, %v1713_v51, %v1236_v24 }
 0x206   : > { %1552 = vrot.lane.b32.xlu1 %v4965_v36, %s2783_s9  ;;  %v1779_v35 = vsel %vm1760_vm10, %v1746_v0, %v1334_v52  ;;  %v1395_v52 = vrot.slane %v590_v32, 1 }
 0x207   : > { %v1336_v41 = vpop.permute.xlu0 %1335 }
 0x208   : > { %v1238_v39 = vpop.permute.xlu1 %1237 }
 0x209   : > { %1353 = vrot.lane.b32.xlu0 %v586_v12, %s2782_s19  ;;  %v1747_v33 = vsel %vm1727_vm8, %v1714_v28, %v1238_v39  ;;  %v1498_v28 = vrot.slane %v591_v62, 2 }
 0x20a   : > { %1255 = vrot.lane.b32.xlu1 %v4965_v36, %s2781_s14  ;;  %v1780_v45 = vsel %vm1760_vm10, %v1747_v33, %v1336_v41  ;;  %v1396_v36 = vsel %vm640_vm2, %v1394_v20, %v1395_v52  ;;  %v1496_v41 = vrot.slane %v590_v32, 2 }
 0x20b   : > { %v4370_v34 = vpop.permute.xlu0 %1038 }
 0x20c   : > { %v4372_v55 = vpop.permute.xlu1 %1036 }
 0x20d   : > { %1355 = vrot.lane.b32.xlu0 %v587_v29, %s2782_s19 }
 0x20e   : > { %1257 = vrot.lane.b32.xlu1 %v4964_v58, %s2781_s14 }
 0x20f   : > { %v1438_v23 = vpop.permute.xlu0 %1437 }
 0x210   : > { %v1436_v19 = vpop.permute.xlu1 %1435  ;;  %v1813_v47 = vsel %vm1793_vm9, %v1780_v45, %v1438_v23  ;;  %v2750_v23 = vld [vmem:[#allocation2 + $0xf8] sm:$0xff] }
 0x211   : > { %1058 = vrot.lane.b32.xlu0 %v587_v29, %s2779_s12  ;;  %v1812_v43 = vsel %vm1793_vm9, %v1779_v35, %v1436_v19  ;;  %v1617_v59 = vsel %vm304_vm0, %v2750_v23, %v4970_v13  ;;  %v4973_v19 = vld [vmem:[#allocation9_spill] sm:$0xff]  ;;  %v4976_v23 = vld [vmem:[#allocation63_spill] sm:$0xff] }
 0x212   : > { %1056 = vrot.lane.b32.xlu1 %v586_v12, %s2779_s12  ;;  %v1495_v12 = vrot.slane %v589_v15, 2  ;;  %v1650_v26 = vsel %vm1628_vm5, %v1617_v59, %v4972_v17  ;;  %v1649_v38 = vsel %vm1628_vm5, %v1616_v42, %v4973_v19  ;;  %v4977_v59 = vld [vmem:[#allocation67_spill] sm:$0xff] }
 0x213   : > { %v1141_v6 = vpop.permute.xlu0 %1140  ;;  %v1683_v46 = vsel %vm1661_vm6, %v1650_v26, %v4370_v34  ;;  %v1682_v30 = vsel %vm1661_vm6, %v1649_v38, %v4372_v55  ;;  %v1398_v34 = vsel %vm640_vm2, %v1395_v52, %v1397_v25 }
 0x214   : > { %v1139_v53 = vpop.permute.xlu1 %1138  ;;  %v1497_v22 = vsel %vm817_vm3, %v1495_v12, %v1496_v41 }
 0x215   : > { %1457 = vrot.lane.b32.xlu0 %v1097_v4, %s2784_s10  ;;  %v1715_v51 = vsel %vm1694_vm7, %v1682_v30, %v1139_v53 }
 0x216   : > { %1455 = vrot.lane.b32.xlu1 %v1095_v37, %s2784_s10 }
 0x217   : > { %v1539_v2 = vpop.permute.xlu0 %1538 }
 0x218   : > { %v1846_v8 = vsel %vm1826_vm11, %v1813_v47, %v1539_v2  ;;  %v1537_v21 = vpop.permute.xlu1 %1536  ;;  %v1499_v2 = vsel %vm817_vm3, %v1496_v41, %v1498_v28  ;;  %v4974_v41 = vld [vmem:[#allocation48_spill] sm:$0xff] }
 0x219   : > { %1160 = vrot.lane.b32.xlu0 %v1097_v4, %s2780_s13  ;;  %v1845_v60 = vsel %vm1826_vm11, %v1812_v43, %v1537_v21  ;;  %v1716_v4 = vsel %vm1694_vm7, %v1683_v46, %v1141_v6  ;;  %v1618_v62 = vsel %vm304_vm0, %v4100_v11, %v4974_v41 }
 0x21a   : > { %1158 = vrot.lane.b32.xlu1 %v1095_v37, %s2780_s13  ;;  %2650 = vmatprep.mubr.msk.f32.mxu1 %vm1864_vm12, %v1845_v60  ;;  %s4445_s13 = scalar_lea.vmem %s4759_s4, %s2534_s26  ;;  %v1651_v13 = vsel %vm1628_vm5, %v1618_v62, %v4976_v23 }
 0x21b   : > { %v1338_v7 = vpop.permute.xlu0 %1337  ;;  %2651 = vmatmul.mubr.msk.f32.gmra.mrb[2].mxu1 %vm1864_vm12, %v1846_v8 }
 0x21c   : > { %v1240_v3 = vpop.permute.xlu1 %1239 }
 0x21d   : > { %1558 = vrot.lane.b32.xlu0 %v1198_v48, %s2783_s9  ;;  %v1748_v55 = vsel %vm1727_vm8, %v1715_v51, %v1240_v3 }
 0x21e   : > { %1556 = vrot.lane.b32.xlu1 %v1196_v14, %s2783_s9  ;;  %v1781_v47 = vsel %vm1760_vm10, %v1748_v55, %v1338_v7 }
 0x21f   : > { %v1340_v24 = vpop.permute.xlu0 %1339 }
 0x220   : > { %v1242_v58 = vpop.permute.xlu1 %1241 }
 0x221   : > { %1357 = vrot.lane.b32.xlu0 %v589_v15, %s2782_s19  ;;  %v1749_v33 = vsel %vm1727_vm8, %v1716_v4, %v1242_v58 }
 0x222   : > { %1259 = vrot.lane.b32.xlu1 %v1196_v14, %s2781_s14  ;;  %v1782_v0 = vsel %vm1760_vm10, %v1749_v33, %v1340_v24 }
 0x223   : > { %v4416_v39 = vpop.permute.xlu0 %1042 }
 0x224   : > { %v4418_v29 = vpop.permute.xlu1 %1040 }
 0x225   : > { %1459 = vrot.lane.b32.xlu0 %v1396_v36, %s2784_s10  ;;  %v1684_v42 = vsel %vm1661_vm6, %v1651_v13, %v4418_v29 }
 0x226   : > { %1261 = vrot.lane.b32.xlu1 %v1198_v48, %s2781_s14 }
 0x227   : > { %v1442_v44 = vpop.permute.xlu0 %1441 }
 0x228   : > { %v1440_v49 = vpop.permute.xlu1 %1439  ;;  %v1815_v63 = vsel %vm1793_vm9, %v1782_v0, %v1442_v44 }
 0x229   : > { %1560 = vrot.lane.b32.xlu0 %v1497_v22, %s2783_s9  ;;  %v1814_v8 = vsel %vm1793_vm9, %v1781_v47, %v1440_v49  ;;  %v4975_v22 = vld [vmem:[#allocation53_spill] sm:$0xff] }
 0x22a   : > { %1359 = vrot.lane.b32.xlu1 %v590_v32, %s2782_s19  ;;  %v1619_v44 = vsel %vm304_vm0, %v4109_v5, %v4975_v22 }
 0x22b   : > { %v1145_v31 = vpop.permute.xlu0 %1144  ;;  %v1652_v25 = vsel %vm1628_vm5, %v1619_v44, %v4977_v59  ;;  %v4981_v44 = vld [vmem:[#allocation65_spill] sm:$0xff] }
 0x22c   : > { %v1143_v6 = vpop.permute.xlu1 %1142  ;;  %v1685_v57 = vsel %vm1661_vm6, %v1652_v25, %v4416_v39 }
 0x22d   : > { %v2625_v37 = vpop.f32.mrb[0].mxu0  ;;  %v1718_v11 = vsel %vm1694_vm7, %v1685_v57, %v1145_v31  ;;  %v1717_v26 = vsel %vm1694_vm7, %v1684_v42, %v1143_v6 }
 0x22e   : > { %2191 = vst.msk [vmem:[%s4445_s13 + $0x8] sm:$0xff] %vm304_vm0, %v2625_v37  ;;  %v2224_v53 = vsel %vm304_vm0, %v2625_v37, 0.0  ;;  %v2296_v27 = vmul.f32 %v2625_v37, %v2625_v37  ;;  %v2031_v9 = vpop.f32.mrb[1].mxu0  ;;  %1461 = vrot.lane.b32.xlu1 %v1398_v34, %s2784_s10 }
 0x22f   : > { %v1543_v45 = vpop.permute.xlu0 %1542  ;;  %2190 = vst.msk [vmem:[%s4445_s13] sm:$0xff] %vm304_vm0, %v2031_v9  ;;  %v2223_v35 = vsel %vm304_vm0, %v2031_v9, 0.0  ;;  %v2295_v43 = vmul.f32 %v2031_v9, %v2031_v9 }
 0x230   : > { %v2328_v21 = vsel %vm304_vm0, %v2296_v27, 0.0  ;;  %v2225_v60 = vadd.f32 %v2224_v53, %v2223_v35  ;;  %v1848_v48 = vsel %vm1826_vm11, %v1815_v63, %v1543_v45  ;;  %v1541_v15 = vpop.permute.xlu1 %1540 }
 0x231   : > { %v2327_v32 = vsel %vm304_vm0, %v2295_v43, 0.0  ;;  %v1847_v14 = vsel %vm1826_vm11, %v1814_v8, %v1541_v15 }
 0x232   : > { %v2329_v3 = vadd.f32 %v2328_v21, %v2327_v32  ;;  %1562 = vrot.lane.b32.xlu1 %v1499_v2, %s2783_s9  ;;  %2653 = vmatprep.mubr.msk.f32.mxu1 %vm1864_vm12, %v1847_v14  ;;  %v4978_v32 = vld [vmem:[#allocation55_spill] sm:$0xff] }
 0x233   : > { %v1342_v7 = vpop.permute.xlu0 %1341  ;;  %2654 = vmatmul.mubr.msk.f32.gmra.mrb[4].mxu1 %vm1864_vm12, %v1848_v48  ;;  %v1621_v14 = vsel %vm304_vm0, %v4165_v10, %v4978_v32 }
 0x234   : > { %v1244_v20 = vpop.permute.xlu1 %1243 }
 0x235   : > { %v1750_v30 = vsel %vm1727_vm8, %v1717_v26, %v1244_v20 }
 0x236   : > { %v1783_v37 = vsel %vm1760_vm10, %v1750_v30, %v1342_v7 }
 0x237   : > { %v1344_v52 = vpop.permute.xlu0 %1343 }
 0x238   : > { %v1246_v24 = vpop.permute.xlu1 %1245 }
 0x239   : > { %v1751_v19 = vsel %vm1727_vm8, %v1718_v11, %v1246_v24 }
 0x23a   : > { %v1784_v51 = vsel %vm1760_vm10, %v1751_v19, %v1344_v52  ;;  %v4979_v52 = vld [vmem:[#allocation50_spill] sm:$0xff] }
 0x23b   : > { %v1047_v58 = vpop.permute.xlu0 %1046  ;;  %v1620_v24 = vsel %vm304_vm0, %v4157_v61, %v4979_v52  ;;  %v4985_v52 = vld [vmem:[#allocation5_spill] sm:$0xff] }
 0x23c   : > { %v4468_v12 = vpop.permute.xlu1 %1044  ;;  %v1653_v23 = vsel %vm1628_vm5, %v1620_v24, %v4981_v44 }
 0x23d   : > { %v1686_v25 = vsel %vm1661_vm6, %v1653_v23, %v4468_v12 }
 0x23f   : > { %v1446_v36 = vpop.permute.xlu0 %1445 }
 0x240   : > { %v1444_v54 = vpop.permute.xlu1 %1443  ;;  %v1817_v6 = vsel %vm1793_vm9, %v1784_v51, %v1446_v36  ;;  %v4980_v36 = vld [vmem:[#allocation69_spill] sm:$0xff] }
 0x241   : > { %v2628_v17 = vpop.f32.mrb[2].mxu0  ;;  %v1816_v53 = vsel %vm1793_vm9, %v1783_v37, %v1444_v54  ;;  %v1654_v41 = vsel %vm1628_vm5, %v1621_v14, %v4980_v36  ;;  %v4984_v14 = vld [vmem:[#allocation70_spill] sm:$0xff] }
 0x242   : > { %2193 = vst.msk [vmem:[%s4445_s13 + $0x18] sm:$0xff] %vm304_vm0, %v2628_v17  ;;  %v2041_v5 = vpop.f32.mrb[3].mxu0  ;;  %v2298_v38 = vmul.f32 %v2628_v17, %v2628_v17  ;;  %v2228_v31 = vsel %vm304_vm0, %v2628_v17, 0.0  ;;  %v1687_v10 = vsel %vm1661_vm6, %v1654_v41, %v1047_v58 }
 0x243   : > { %v1149_v49 = vpop.permute.xlu0 %1148  ;;  %2192 = vst.msk [vmem:[%s4445_s13 + $0x10] sm:$0xff] %vm304_vm0, %v2041_v5  ;;  %v2226_v46 = vsel %vm304_vm0, %v2041_v5, 0.0  ;;  %v2297_v39 = vmul.f32 %v2041_v5, %v2041_v5 }
 0x244   : > { %v2227_v29 = vadd.f32 %v2226_v46, %v2225_v60  ;;  %v1147_v4 = vpop.permute.xlu1 %1146  ;;  %v2332_v0 = vsel %vm304_vm0, %v2298_v38, 0.0  ;;  %v1720_v54 = vsel %vm1694_vm7, %v1687_v10, %v1149_v49 }
 0x245   : > { %v2330_v28 = vsel %vm304_vm0, %v2297_v39, 0.0  ;;  %v1719_v17 = vsel %vm1694_vm7, %v1686_v25, %v1147_v4 }
 0x246   : > { %v2331_v33 = vadd.f32 %v2330_v28, %v2329_v3  ;;  %v2229_v55 = vadd.f32 %v2228_v31, %v2227_v29 }
 0x247   : > { %v1547_v34 = vpop.permute.xlu0 %1546 }
 0x248   : > { %v1850_v27 = vsel %vm1826_vm11, %v1817_v6, %v1547_v34  ;;  %v1545_v9 = vpop.permute.xlu1 %1544  ;;  %v2333_v45 = vadd.f32 %v2332_v0, %v2331_v33 }
 0x249   : > { %v1849_v2 = vsel %vm1826_vm11, %v1816_v53, %v1545_v9 }
 0x24a   : > { %2656 = vmatprep.mubr.msk.f32.mxu1 %vm1864_vm12, %v1849_v2 }
 0x24b   : > { %v1346_v63 = vpop.permute.xlu0 %1345  ;;  %2657 = vmatmul.mubr.msk.f32.gmra.mrb[6].mxu1 %vm1864_vm12, %v1850_v27 }
 0x24c   : > { %v1248_v47 = vpop.permute.xlu1 %1247 }
 0x24d   : > { %v1752_v58 = vsel %vm1727_vm8, %v1719_v17, %v1248_v47 }
 0x24e   : > { %v1785_v49 = vsel %vm1760_vm10, %v1752_v58, %v1346_v63 }
 0x24f   : > { %v1348_v35 = vpop.permute.xlu0 %1347 }
 0x250   : > { %v1250_v43 = vpop.permute.xlu1 %1249 }
 0x251   : > { %v1753_v11 = vsel %vm1727_vm8, %v1720_v54, %v1250_v43  ;;  %v4982_v43 = vld [vmem:[#allocation57_spill] sm:$0xff] }
 0x252   : > { %v1786_v38 = vsel %vm1760_vm10, %v1753_v11, %v1348_v35 }
 0x253   : > { %v4504_v8 = vpop.permute.xlu0 %1050 }
 0x254   : > { %v4506_v21 = vpop.permute.xlu1 %1048 }
 0x255   : > { %v2631_v60 = vpop.f32.mrb[4].mxu0 }
 0x256   : > { %2195 = vst.msk [vmem:[%s4445_s13 + $0x28] sm:$0xff] %vm304_vm0, %v2631_v60  ;;  %v2051_v48 = vpop.f32.mrb[5].mxu0  ;;  %v2300_v3 = vmul.f32 %v2631_v60, %v2631_v60  ;;  %v2232_v13 = vsel %vm304_vm0, %v2631_v60, 0.0  ;;  %v1623_v60 = vsel %vm304_vm0, %v4218_v16, %v4982_v43 }
 0x257   : > { %v1450_v15 = vpop.permute.xlu0 %1449  ;;  %2194 = vst.msk [vmem:[%s4445_s13 + $0x20] sm:$0xff] %vm304_vm0, %v2051_v48  ;;  %v2230_v7 = vsel %vm304_vm0, %v2051_v48, 0.0  ;;  %v2299_v20 = vmul.f32 %v2051_v48, %v2051_v48 }
 0x258   : > { %v2231_v62 = vadd.f32 %v2230_v7, %v2229_v55  ;;  %v1448_v22 = vpop.permute.xlu1 %1447  ;;  %v2336_v26 = vsel %vm304_vm0, %v2300_v3, 0.0  ;;  %v1819_v12 = vsel %vm1793_vm9, %v1786_v38, %v1450_v15  ;;  %v4983_v15 = vld [vmem:[#allocation52_spill] sm:$0xff]  ;;  %v1656_v3 = vsel %vm1628_vm5, %v1623_v60, %v4984_v14 }
 0x259   : > { %v2334_v59 = vsel %vm304_vm0, %v2299_v20, 0.0  ;;  %v1818_v39 = vsel %vm1793_vm9, %v1785_v49, %v1448_v22  ;;  %v1622_v32 = vsel %vm304_vm0, %v4212_v50, %v4983_v15  ;;  %v1689_v36 = vsel %vm1661_vm6, %v1656_v3, %v4504_v8 }
 0x25a   : > { %v2335_v61 = vadd.f32 %v2334_v59, %v2333_v45  ;;  %v2233_v42 = vadd.f32 %v2232_v13, %v2231_v62  ;;  %v1655_v24 = vsel %vm1628_vm5, %v1622_v32, %v4985_v52 }
 0x25b   : > { %v1153_v57 = vpop.permute.xlu0 %1152  ;;  %v1688_v16 = vsel %vm1661_vm6, %v1655_v24, %v4506_v21 }
 0x25c   : > { %v1151_v5 = vpop.permute.xlu1 %1150  ;;  %v2337_v19 = vadd.f32 %v2336_v26, %v2335_v61  ;;  %v1722_v41 = vsel %vm1694_vm7, %v1689_v36, %v1153_v57 }
 0x25d   : > { %v1721_v22 = vsel %vm1694_vm7, %v1688_v16, %v1151_v5 }
 0x25f   : > { %v1551_v46 = vpop.permute.xlu0 %1550 }
 0x260   : > { %v1852_v30 = vsel %vm1826_vm11, %v1819_v12, %v1551_v46  ;;  %v1549_v29 = vpop.permute.xlu1 %1548 }
 0x261   : > { %v1851_v4 = vsel %vm1826_vm11, %v1818_v39, %v1549_v29 }
 0x262   : > { %2659 = vmatprep.mubr.msk.f32.mxu1 %vm1864_vm12, %v1851_v4 }
 0x263   : > { %v1350_v31 = vpop.permute.xlu0 %1349  ;;  %2660 = vmatmul.mubr.msk.f32.gmra.mrb[8].mxu1 %vm1864_vm12, %v1852_v30 }
 0x264   : > { %v1252_v28 = vpop.permute.xlu1 %1251 }
 0x265   : > { %v1754_v44 = vsel %vm1727_vm8, %v1721_v22, %v1252_v28  ;;  %v4990_v22 = vld [vmem:[#allocation56_spill] sm:$0xff] }
 0x266   : > { %v1787_v59 = vsel %vm1760_vm10, %v1754_v44, %v1350_v31 }
 0x267   : > { %v1352_v51 = vpop.permute.xlu0 %1351 }
 0x268   : > { %v1254_v33 = vpop.permute.xlu1 %1253 }
 0x269   : > { %v2634_v34 = vpop.f32.mrb[6].mxu0  ;;  %v1755_v50 = vsel %vm1727_vm8, %v1722_v41, %v1254_v33  ;;  %v4986_v33 = vld [vmem:[#allocation54_spill] sm:$0xff] }
 0x26a   : > { %2197 = vst.msk [vmem:[%s4445_s13 + $0x38] sm:$0xff] %vm304_vm0, %v2634_v34  ;;  %v2061_v55 = vpop.f32.mrb[7].mxu0  ;;  %v2302_v37 = vmul.f32 %v2634_v34, %v2634_v34  ;;  %v2236_v45 = vsel %vm304_vm0, %v2634_v34, 0.0  ;;  %v1788_v10 = vsel %vm1760_vm10, %v1755_v50, %v1352_v51  ;;  %v1624_v34 = vsel %vm304_vm0, %v4263_v40, %v4986_v33 }
 0x26b   : > { %v4543_v6 = vpop.permute.xlu0 %1054  ;;  %2196 = vst.msk [vmem:[%s4445_s13 + $0x30] sm:$0xff] %vm304_vm0, %v2061_v55  ;;  %v2234_v0 = vsel %vm304_vm0, %v2061_v55, 0.0  ;;  %v2301_v53 = vmul.f32 %v2061_v55, %v2061_v55  ;;  %v4987_v55 = vld [vmem:[#allocation58_spill] sm:$0xff]  ;;  %v1626_v50 = vsel %vm304_vm0, %v4313_v1, %v4990_v22 }
 0x26c   : > { %v2235_v27 = vadd.f32 %v2234_v0, %v2233_v42  ;;  %v1053_v9 = vpop.permute.xlu1 %1052  ;;  %v2340_v48 = vsel %vm304_vm0, %v2302_v37, 0.0  ;;  %v1625_v37 = vsel %vm304_vm0, %v4269_v18, %v4987_v55  ;;  %v4988_v0 = vld [vmem:[#allocation68_spill] sm:$0xff] }
 0x26d   : > { %v2338_v2 = vsel %vm304_vm0, %v2301_v53, 0.0  ;;  %v1657_v53 = vsel %vm1628_vm5, %v1624_v34, %v4988_v0 }
 0x26e   : > { %v2339_v63 = vadd.f32 %v2338_v2, %v2337_v19  ;;  %v2237_v35 = vadd.f32 %v2236_v45, %v2235_v27  ;;  %v4989_v27 = vld [vmem:[#allocation71_spill] sm:$0xff] }
 0x26f   : > { %v1454_v47 = vpop.permute.xlu0 %1453  ;;  %v1658_v45 = vsel %vm1628_vm5, %v1625_v37, %v4989_v27 }
 0x270   : > { %v1452_v7 = vpop.permute.xlu1 %1451  ;;  %v2341_v20 = vadd.f32 %v2340_v48, %v2339_v63  ;;  %v1821_v8 = vsel %vm1793_vm9, %v1788_v10, %v1454_v47  ;;  %v1691_v63 = vsel %vm1661_vm6, %v1658_v45, %v4543_v6  ;;  %v1690_v47 = vsel %vm1661_vm6, %v1657_v53, %v1053_v9 }
 0x271   : > { %v1820_v21 = vsel %vm1793_vm9, %v1787_v59, %v1452_v7 }
 0x273   : > { %v1157_v62 = vpop.permute.xlu0 %1156 }
 0x274   : > { %v1155_v23 = vpop.permute.xlu1 %1154  ;;  %v1724_v40 = vsel %vm1694_vm7, %v1691_v63, %v1157_v62 }
 0x277   : > { %v1555_v13 = vpop.permute.xlu0 %1554 }
 0x278   : > { %v1854_v25 = vsel %vm1826_vm11, %v1821_v8, %v1555_v13  ;;  %v1553_v54 = vpop.permute.xlu1 %1552  ;;  %v4991_v13 = vld [vmem:[#allocation13_spill] sm:$0xff] }
 0x279   : > { %v1853_v61 = vsel %vm1826_vm11, %v1820_v21, %v1553_v54  ;;  %v1659_v8 = vsel %vm1628_vm5, %v1626_v50, %v4991_v13 }
 0x27a   : > { %2662 = vmatprep.mubr.msk.f32.mxu1 %vm1864_vm12, %v1853_v61 }
 0x27b   : > { %v1354_v57 = vpop.permute.xlu0 %1353  ;;  %2663 = vmatmul.mubr.msk.f32.gmra.mrb[10].mxu1 %vm1864_vm12, %v1854_v25 }
 0x27c   : > { %v1256_v42 = vpop.permute.xlu1 %1255 }
 0x27d   : > { %v2637_v17 = vpop.f32.mrb[8].mxu0 }
 0x27e   : > { %2199 = vst.msk [vmem:[%s4445_s13 + $0x48] sm:$0xff] %vm304_vm0, %v2637_v17  ;;  %v2071_v11 = vpop.f32.mrb[9].mxu0  ;;  %v2304_v58 = vmul.f32 %v2637_v17, %v2637_v17  ;;  %v2240_v12 = vsel %vm304_vm0, %v2637_v17, 0.0 }
 0x27f   : > { %v1356_v26 = vpop.permute.xlu0 %1355  ;;  %2198 = vst.msk [vmem:[%s4445_s13 + $0x40] sm:$0xff] %vm304_vm0, %v2071_v11  ;;  %v2238_v5 = vsel %vm304_vm0, %v2071_v11, 0.0  ;;  %v2303_v19 = vmul.f32 %v2071_v11, %v2071_v11 }
 0x280   : > { %v2239_v38 = vadd.f32 %v2238_v5, %v2237_v35  ;;  %v1258_v46 = vpop.permute.xlu1 %1257  ;;  %v2344_v4 = vsel %vm304_vm0, %v2304_v58, 0.0  ;;  %v1723_v35 = vsel %vm1694_vm7, %v1690_v47, %v1155_v23 }
 0x281   : > { %v2342_v49 = vsel %vm304_vm0, %v2303_v19, 0.0  ;;  %v1756_v18 = vsel %vm1727_vm8, %v1723_v35, %v1256_v42  ;;  %v1757_v60 = vsel %vm1727_vm8, %v1724_v40, %v1258_v46  ;;  %v4992_v46 = vld [vmem:[#allocation59_spill] sm:$0xff] }
 0x282   : > { %v2343_v39 = vadd.f32 %v2342_v49, %v2341_v20  ;;  %v2241_v29 = vadd.f32 %v2240_v12, %v2239_v38  ;;  %v1790_v15 = vsel %vm1760_vm10, %v1757_v60, %v1356_v26  ;;  %v1789_v32 = vsel %vm1760_vm10, %v1756_v18, %v1354_v57  ;;  %v4993_v49 = vld [vmem:[#allocation72_spill] sm:$0xff] }
 0x283   : > { %v1059_v30 = vpop.permute.xlu0 %1058  ;;  %v1627_v12 = vsel %vm304_vm0, %v4323_v56, %v4992_v46 }
 0x284   : > { %v1057_v31 = vpop.permute.xlu1 %1056  ;;  %v2345_v28 = vadd.f32 %v2344_v4, %v2343_v39  ;;  %v1660_v39 = vsel %vm1628_vm5, %v1627_v12, %v4993_v49 }
 0x285   : > { %v1692_v25 = vsel %vm1661_vm6, %v1659_v8, %v1057_v31 }
 0x287   : > { %v1458_v51 = vpop.permute.xlu0 %1457 }
 0x288   : > { %v1456_v2 = vpop.permute.xlu1 %1455  ;;  %v1823_v6 = vsel %vm1793_vm9, %v1790_v15, %v1458_v51 }
 0x289   : > { %v1822_v9 = vsel %vm1793_vm9, %v1789_v32, %v1456_v2 }
 0x28b   : > { %v1161_v43 = vpop.permute.xlu0 %1160 }
 0x28c   : > { %v1159_v48 = vpop.permute.xlu1 %1158 }
 0x28d   : > { %v1725_v1 = vsel %vm1694_vm7, %v1692_v25, %v1159_v48 }
 0x28e   : > { %v2640_v14 = vpop.f32.mrb[10].mxu0 }
 0x28f   : > { %v1559_v3 = vpop.permute.xlu0 %1558  ;;  %2201 = vst.msk [vmem:[%s4445_s13 + $0x58] sm:$0xff] %vm304_vm0, %v2640_v14  ;;  %v2081_v7 = vpop.f32.mrb[11].mxu0  ;;  %v2306_v20 = vmul.f32 %v2640_v14, %v2640_v14  ;;  %v2244_v44 = vsel %vm304_vm0, %v2640_v14, 0.0 }
 0x290   : > { %2200 = vst.msk [vmem:[%s4445_s13 + $0x50] sm:$0xff] %vm304_vm0, %v2081_v7  ;;  %v2242_v52 = vsel %vm304_vm0, %v2081_v7, 0.0  ;;  %v2305_v24 = vmul.f32 %v2081_v7, %v2081_v7  ;;  %v1856_v36 = vsel %vm1826_vm11, %v1823_v6, %v1559_v3  ;;  %v1557_v16 = vpop.permute.xlu1 %1556 }
 0x291   : > { %v2243_v41 = vadd.f32 %v2242_v52, %v2241_v29  ;;  %v1855_v62 = vsel %vm1826_vm11, %v1822_v9, %v1557_v16  ;;  %v2348_v54 = vsel %vm304_vm0, %v2306_v20, 0.0  ;;  %v1693_v29 = vsel %vm1661_vm6, %v1660_v39, %v1059_v30 }
 0x292   : > { %v2346_v23 = vsel %vm304_vm0, %v2305_v24, 0.0  ;;  %2665 = vmatprep.mubr.msk.f32.mxu1 %vm1864_vm12, %v1855_v62  ;;  %v1726_v31 = vsel %vm1694_vm7, %v1693_v29, %v1161_v43 }
 0x293   : > { %v1358_v10 = vpop.permute.xlu0 %1357  ;;  %v2347_v59 = vadd.f32 %v2346_v23, %v2345_v28  ;;  %2666 = vmatmul.mubr.msk.f32.gmra.mrb[12].mxu1 %vm1864_vm12, %v1856_v36  ;;  %v2245_v21 = vadd.f32 %v2244_v44, %v2243_v41 }
 0x294   : > { %v1260_v61 = vpop.permute.xlu1 %1259 }
 0x295   : > { %v2349_v57 = vadd.f32 %v2348_v54, %v2347_v59  ;;  %v1758_v42 = vsel %vm1727_vm8, %v1725_v1, %v1260_v61 }
 0x296   : > { %v1791_v26 = vsel %vm1760_vm10, %v1758_v42, %v1358_v10 }
 0x297   : > { %v1460_v17 = vpop.permute.xlu0 %1459 }
 0x298   : > { %v1262_v11 = vpop.permute.xlu1 %1261  ;;  %v1824_v58 = vsel %vm1793_vm9, %v1791_v26, %v1460_v17 }
 0x299   : > { %v1759_v28 = vsel %vm1727_vm8, %v1726_v31, %v1262_v11 }
 0x29b   : > { %v1561_v5 = vpop.permute.xlu0 %1560 }
 0x29c   : > { %v1857_v19 = vsel %vm1826_vm11, %v1824_v58, %v1561_v5  ;;  %v1360_v38 = vpop.permute.xlu1 %1359  ;;  %v4994_v58 = vmov 0.0  }
 0x29d   : > { %2668 = vmatprep.mubr.msk.f32.mxu1 %vm1864_vm12, %v1857_v19  ;;  %v1792_v51 = vsel %vm1760_vm10, %v1759_v28, %v1360_v38  ;;  %305 = vst.msk [vmem:[%s4679_s18] sm:$0xff] %vm304_vm0, %v4994_v58  ;;  %306 = vst.msk [vmem:[%s4684_s27] sm:$0xff] %vm304_vm0, %v4994_v58 }
 0x2a0   : > { %v1462_v4 = vpop.permute.xlu1 %1461 }
 0x2a1   : > { %v1825_v33 = vsel %vm1793_vm9, %v1792_v51, %v1462_v4 }
 0x2a4   : > { %v1563_v34 = vpop.permute.xlu1 %1562 }
 0x2a5   : > { %v1858_v55 = vsel %vm1826_vm11, %v1825_v33, %v1563_v34 }
 0x2a6   : > { %v2643_v37 = vpop.f32.mrb[12].mxu0  ;;  %2669 = vmatmul.mubr.msk.f32.gmra.mrb[14].mxu1 %vm1864_vm12, %v1858_v55 }
 0x2a7   : > { %2203 = vst.msk [vmem:[%s4445_s13 + $0x68] sm:$0xff] %vm304_vm0, %v2643_v37  ;;  %v2091_v56 = vpop.f32.mrb[13].mxu0  ;;  %v2308_v30 = vmul.f32 %v2643_v37, %v2643_v37  ;;  %v2248_v45 = vsel %vm304_vm0, %v2643_v37, 0.0 }
 0x2a8   : > { %2202 = vst.msk [vmem:[%s4445_s13 + $0x60] sm:$0xff] %vm304_vm0, %v2091_v56  ;;  %v2246_v0 = vsel %vm304_vm0, %v2091_v56, 0.0  ;;  %v2307_v53 = vmul.f32 %v2091_v56, %v2091_v56 }
 0x2a9   : > { %v2247_v27 = vadd.f32 %v2246_v0, %v2245_v21  ;;  %v2352_v40 = vsel %vm304_vm0, %v2308_v30, 0.0 }
 0x2aa   : > { %v2350_v2 = vsel %vm304_vm0, %v2307_v53, 0.0 }
 0x2ab   : > { %v2351_v63 = vadd.f32 %v2350_v2, %v2349_v57  ;;  %v2249_v47 = vadd.f32 %v2248_v45, %v2247_v27 }
 0x2ad   : > { %v2353_v35 = vadd.f32 %v2352_v40, %v2351_v63 }
 0x2be   : > { %v2646_v43 = vpop.f32.mrb[14].mxu0 }
 0x2bf   : > { %2205 = vst.msk [vmem:[%s4445_s13 + $0x78] sm:$0xff] %vm304_vm0, %v2646_v43  ;;  %v2101_v18 = vpop.f32.mrb[15].mxu0  ;;  %v2310_v60 = vmul.f32 %v2646_v43, %v2646_v43  ;;  %v2252_v14 = vsel %vm304_vm0, %v2646_v43, 0.0 }
 0x2c0   : > { %2204 = vst.msk [vmem:[%s4445_s13 + $0x70] sm:$0xff] %vm304_vm0, %v2101_v18  ;;  %v2250_v48 = vsel %vm304_vm0, %v2101_v18, 0.0  ;;  %v2309_v15 = vmul.f32 %v2101_v18, %v2101_v18 }
 0x2c1   : > { %v2251_v32 = vadd.f32 %v2250_v48, %v2249_v47  ;;  %v2356_v7 = vsel %vm304_vm0, %v2310_v60, 0.0 }
 0x2c2   : > { %v2354_v3 = vsel %vm304_vm0, %v2309_v15, 0.0 }
 0x2c3   : > { %v2253_v6 = vadd.f32 %v2252_v14, %v2251_v32  ;;  %v2355_v9 = vadd.f32 %v2354_v3, %v2353_v35 }
 0x2c5   : > { %v2357_v20 = vadd.f32 %v2356_v7, %v2355_v9 }
 0x2d6   : > { %v2649_v52 = vpop.f32.mrb[0].mxu1 }
 0x2d7   : > { %2207 = vst.msk [vmem:[%s4445_s13 + $0x88] sm:$0xff] %vm304_vm0, %v2649_v52  ;;  %v2111_v24 = vpop.f32.mrb[1].mxu1  ;;  %v2312_v36 = vmul.f32 %v2649_v52, %v2649_v52  ;;  %v2256_v22 = vsel %vm304_vm0, %v2649_v52, 0.0 }
 0x2d8   : > { %2206 = vst.msk [vmem:[%s4445_s13 + $0x80] sm:$0xff] %vm304_vm0, %v2111_v24  ;;  %v2254_v16 = vsel %vm304_vm0, %v2111_v24, 0.0  ;;  %v2311_v41 = vmul.f32 %v2111_v24, %v2111_v24 }
 0x2d9   : > { %v2255_v62 = vadd.f32 %v2254_v16, %v2253_v6  ;;  %v2360_v10 = vsel %vm304_vm0, %v2312_v36, 0.0 }
 0x2da   : > { %v2358_v50 = vsel %vm304_vm0, %v2311_v41, 0.0 }
 0x2db   : > { %v2359_v44 = vadd.f32 %v2358_v50, %v2357_v20  ;;  %v2257_v23 = vadd.f32 %v2256_v22, %v2255_v62 }
 0x2dd   : > { %v2361_v13 = vadd.f32 %v2360_v10, %v2359_v44 }
 0x2ee   : > { %v2652_v8 = vpop.f32.mrb[2].mxu1 }
 0x2ef   : > { %2209 = vst.msk [vmem:[%s4445_s13 + $0x98] sm:$0xff] %vm304_vm0, %v2652_v8  ;;  %v2121_v59 = vpop.f32.mrb[3].mxu1  ;;  %v2314_v21 = vmul.f32 %v2652_v8, %v2652_v8  ;;  %v2260_v1 = vsel %vm304_vm0, %v2652_v8, 0.0 }
 0x2f0   : > { %2208 = vst.msk [vmem:[%s4445_s13 + $0x90] sm:$0xff] %vm304_vm0, %v2121_v59  ;;  %v2258_v25 = vsel %vm304_vm0, %v2121_v59, 0.0  ;;  %v2313_v54 = vmul.f32 %v2121_v59, %v2121_v59 }
 0x2f1   : > { %v2259_v61 = vadd.f32 %v2258_v25, %v2257_v23  ;;  %v2364_v11 = vsel %vm304_vm0, %v2314_v21, 0.0 }
 0x2f2   : > { %v2362_v57 = vsel %vm304_vm0, %v2313_v54, 0.0 }
 0x2f3   : > { %v2363_v42 = vadd.f32 %v2362_v57, %v2361_v13  ;;  %v2261_v17 = vadd.f32 %v2260_v1, %v2259_v61 }
 0x2f5   : > { %v2365_v26 = vadd.f32 %v2364_v11, %v2363_v42 }
 0x306   : > { %v2655_v5 = vpop.f32.mrb[4].mxu1 }
 0x307   : > { %2211 = vst.msk [vmem:[%s4445_s13 + $0xa8] sm:$0xff] %vm304_vm0, %v2655_v5  ;;  %v2131_v19 = vpop.f32.mrb[5].mxu1  ;;  %v2316_v38 = vmul.f32 %v2655_v5, %v2655_v5  ;;  %v2264_v39 = vsel %vm304_vm0, %v2655_v5, 0.0 }
 0x308   : > { %2210 = vst.msk [vmem:[%s4445_s13 + $0xa0] sm:$0xff] %vm304_vm0, %v2131_v19  ;;  %v2262_v46 = vsel %vm304_vm0, %v2131_v19, 0.0  ;;  %v2315_v12 = vmul.f32 %v2131_v19, %v2131_v19 }
 0x309   : > { %v2263_v49 = vadd.f32 %v2262_v46, %v2261_v17  ;;  %v2368_v28 = vsel %vm304_vm0, %v2316_v38, 0.0 }
 0x30a   : > { %v2366_v29 = vsel %vm304_vm0, %v2315_v12, 0.0 }
 0x30b   : > { %v2367_v4 = vadd.f32 %v2366_v29, %v2365_v26  ;;  %v2265_v31 = vadd.f32 %v2264_v39, %v2263_v49 }
 0x30d   : > { %v2369_v51 = vadd.f32 %v2368_v28, %v2367_v4 }
 0x31e   : > { %v2658_v33 = vpop.f32.mrb[6].mxu1 }
 0x31f   : > { %2213 = vst.msk [vmem:[%s4445_s13 + $0xb8] sm:$0xff] %vm304_vm0, %v2658_v33  ;;  %v2141_v34 = vpop.f32.mrb[7].mxu1  ;;  %v2318_v55 = vmul.f32 %v2658_v33, %v2658_v33  ;;  %v2268_v0 = vsel %vm304_vm0, %v2658_v33, 0.0 }
 0x320   : > { %2212 = vst.msk [vmem:[%s4445_s13 + $0xb0] sm:$0xff] %vm304_vm0, %v2141_v34  ;;  %v2266_v37 = vsel %vm304_vm0, %v2141_v34, 0.0  ;;  %v2317_v56 = vmul.f32 %v2141_v34, %v2141_v34 }
 0x321   : > { %v2267_v30 = vadd.f32 %v2266_v37, %v2265_v31  ;;  %v2372_v2 = vsel %vm304_vm0, %v2318_v55, 0.0 }
 0x322   : > { %v2370_v53 = vsel %vm304_vm0, %v2317_v56, 0.0 }
 0x323   : > { %v2371_v27 = vadd.f32 %v2370_v53, %v2369_v51  ;;  %v2269_v45 = vadd.f32 %v2268_v0, %v2267_v30  ;;  %v2222_v30 = vld [vmem:[%s4679_s18] sm:$0xff] }
 0x325   : > { %v2373_v63 = vadd.f32 %v2372_v2, %v2371_v27  ;;  %v2294_v27 = vld [vmem:[%s4684_s27] sm:$0xff] }
 0x336   : > { %v2661_v47 = vpop.f32.mrb[8].mxu1 }
 0x337   : > { %2215 = vst.msk [vmem:[%s4445_s13 + $0xc8] sm:$0xff] %vm304_vm0, %v2661_v47  ;;  %v2151_v40 = vpop.f32.mrb[9].mxu1  ;;  %v2320_v35 = vmul.f32 %v2661_v47, %v2661_v47  ;;  %v2272_v48 = vsel %vm304_vm0, %v2661_v47, 0.0 }
 0x338   : > { %2214 = vst.msk [vmem:[%s4445_s13 + $0xc0] sm:$0xff] %vm304_vm0, %v2151_v40  ;;  %v2270_v43 = vsel %vm304_vm0, %v2151_v40, 0.0  ;;  %v2319_v18 = vmul.f32 %v2151_v40, %v2151_v40 }
 0x339   : > { %v2271_v60 = vadd.f32 %v2270_v43, %v2269_v45  ;;  %v2376_v3 = vsel %vm304_vm0, %v2320_v35, 0.0 }
 0x33a   : > { %v2374_v15 = vsel %vm304_vm0, %v2319_v18, 0.0 }
 0x33b   : > { %v2375_v32 = vadd.f32 %v2374_v15, %v2373_v63  ;;  %v2273_v14 = vadd.f32 %v2272_v48, %v2271_v60 }
 0x33d   : > { %v2377_v6 = vadd.f32 %v2376_v3, %v2375_v32 }
 0x34e   : > { %v2664_v9 = vpop.f32.mrb[10].mxu1 }
 0x34f   : > { %2217 = vst.msk [vmem:[%s4445_s13 + $0xd8] sm:$0xff] %vm304_vm0, %v2664_v9  ;;  %v2161_v7 = vpop.f32.mrb[11].mxu1  ;;  %v2322_v20 = vmul.f32 %v2664_v9, %v2664_v9  ;;  %v2276_v16 = vsel %vm304_vm0, %v2664_v9, 0.0 }
 0x350   : > { %2216 = vst.msk [vmem:[%s4445_s13 + $0xd0] sm:$0xff] %vm304_vm0, %v2161_v7  ;;  %v2274_v52 = vsel %vm304_vm0, %v2161_v7, 0.0  ;;  %v2321_v24 = vmul.f32 %v2161_v7, %v2161_v7 }
 0x351   : > { %v2275_v36 = vadd.f32 %v2274_v52, %v2273_v14  ;;  %v2380_v50 = vsel %vm304_vm0, %v2322_v20, 0.0 }
 0x352   : > { %v2378_v41 = vsel %vm304_vm0, %v2321_v24, 0.0 }
 0x353   : > { %v2379_v62 = vadd.f32 %v2378_v41, %v2377_v6  ;;  %v2277_v22 = vadd.f32 %v2276_v16, %v2275_v36 }
 0x355   : > { %v2381_v44 = vadd.f32 %v2380_v50, %v2379_v62 }
 0x366   : > { %v2667_v23 = vpop.f32.mrb[12].mxu1 }
 0x367   : > { %2219 = vst.msk [vmem:[%s4445_s13 + $0xe8] sm:$0xff] %vm304_vm0, %v2667_v23  ;;  %v2171_v10 = vpop.f32.mrb[13].mxu1  ;;  %v2324_v13 = vmul.f32 %v2667_v23, %v2667_v23  ;;  %v2280_v25 = vsel %vm304_vm0, %v2667_v23, 0.0 }
 0x368   : > { %2218 = vst.msk [vmem:[%s4445_s13 + $0xe0] sm:$0xff] %vm304_vm0, %v2171_v10  ;;  %v2278_v8 = vsel %vm304_vm0, %v2171_v10, 0.0  ;;  %v2323_v59 = vmul.f32 %v2171_v10, %v2171_v10 }
 0x369   : > { %v2279_v21 = vadd.f32 %v2278_v8, %v2277_v22  ;;  %v2384_v57 = vsel %vm304_vm0, %v2324_v13, 0.0 }
 0x36a   : > { %v2382_v54 = vsel %vm304_vm0, %v2323_v59, 0.0 }
 0x36b   : > { %v2383_v61 = vadd.f32 %v2382_v54, %v2381_v44  ;;  %v2281_v1 = vadd.f32 %v2280_v25, %v2279_v21 }
 0x36d   : > { %v2385_v42 = vadd.f32 %v2384_v57, %v2383_v61 }
 0x379   : > { %v2670_v17 = vpop.f32.mrb[14].mxu1 }
 0x37a   : > { %2221 = vst.msk [vmem:[%s4445_s13 + $0xf8] sm:$0xff] %vm304_vm0, %v2670_v17  ;;  %v2181_v11 = vpop.f32.mrb[15].mxu1  ;;  %v2326_v26 = vmul.f32 %v2670_v17, %v2670_v17  ;;  %v2284_v38 = vsel %vm304_vm0, %v2670_v17, 0.0 }
 0x37b   : > { %2220 = vst.msk [vmem:[%s4445_s13 + $0xf0] sm:$0xff] %vm304_vm0, %v2181_v11  ;;  %v2282_v58 = vsel %vm304_vm0, %v2181_v11, 0.0  ;;  %v2325_v5 = vmul.f32 %v2181_v11, %v2181_v11 }
 0x37c   : > { %v2283_v19 = vadd.f32 %v2282_v58, %v2281_v1  ;;  %v2388_v39 = vsel %vm304_vm0, %v2326_v26, 0.0 }
 0x37d   : > { %v2386_v46 = vsel %vm304_vm0, %v2325_v5, 0.0 }
 0x37e   : > { %v2285_v12 = vadd.f32 %v2284_v38, %v2283_v19  ;;  %v2387_v49 = vadd.f32 %v2386_v46, %v2385_v42 }
 0x380   : > { %v2286_v29 = vrot.slane %v2285_v12, 4  ;;  %v2389_v4 = vadd.f32 %v2388_v39, %v2387_v49 }
 0x382   : > { %v2287_v31 = vadd.f32 %v2286_v29, %v2285_v12  ;;  %v2390_v28 = vrot.slane %v2389_v4, 4 }
 0x384   : > { %v2288_v51 = vrot.slane %v2287_v31, 2  ;;  %v2391_v33 = vadd.f32 %v2390_v28, %v2389_v4 }
 0x386   : > { %v2289_v34 = vadd.f32 %v2288_v51, %v2287_v31  ;;  %v2392_v55 = vrot.slane %v2391_v33, 2 }
 0x388   : > { %v2290_v37 = vrot.slane %v2289_v34, 1  ;;  %v2393_v56 = vadd.f32 %v2392_v55, %v2391_v33 }
 0x38a   : > { %v2291_v0 = vadd.f32 %v2290_v37, %v2289_v34  ;;  %v2394_v53 = vrot.slane %v2393_v56, 1 }
 0x38c   : > { %v2292_v45 = vadd.f32 %v2291_v0, %v2222_v30  ;;  %v2395_v2 = vadd.f32 %v2394_v53, %v2393_v56 }
 0x38e   : > { %2293 = vst.msk [vmem:[%s4679_s18] sm:$0xff] %vm304_vm0, %v2292_v45  ;;  %v2396_v63 = vadd.f32 %v2395_v2, %v2294_v27 }
 0x390   : > { %2397 = vst.msk [vmem:[%s4684_s27] sm:$0xff] %vm304_vm0, %v2396_v63 }
 0x391 PF: > { %s17_s23 = sadd.s32 1, %s2774_s23   ;;  %s4995_s21 = smov %s2770_s22 }
 0x392   : > { %p14_p6 = scmp.ge.s32.totalorder %s17_s23, 4   ;;  %s4996_s22 = smov %s4998_s24 }
 0x394   :  { %16 = sbr.rel (!%p14_p6) target bundleno = 2 (0x2), region = 95 }

</bundles_post_ra>
